<compile_context>
chip_gen: v7x
topology: tpu7x:2x2x1
jax: 0.10.0
libtpu: 0.0.40
codegen_flags: <defaults>
</compile_context>

<pallas_src>
import functools

import numpy as np

import jax
import jax.numpy as jnp
from jax.experimental import pallas as pl
from jax.experimental.pallas import tpu as pltpu

LANES = 128  # TPU lane width; activations / weights are zero padded to this


def _round_up(x, m):
    return (x + m - 1) // m * m


# ----------------------------------------------------------------------------
# Pallas kernels
# ----------------------------------------------------------------------------
def _conv_relu_pool_kernel(x_ref, v_ref, b_ref, s_ref, o_ref, *, hin, nrows):
    """Fused Conv3d(k=2) + ReLU + MaxPool3d(2,2,2) for one batch element.

    Layouts (all zero padded):
      x_ref: (1, r_in, 128)     rows = d*Hin + h, lanes = w*Cin + c
      v_ref: (4, 128, 256)      bf16 weights, one (kd,kh) offset per leading idx;
                                output lanes [0:128) even-w parity, [128:256) odd
      b_ref: (1, 256)           f32 bias tiled per (parity, wp, cout) slot
      s_ref: (4, r_out, nrows)  f32 0/1 row-selection matrices, one per (dd,hh)
                                pool offset (D/H max-pool as an MXU row gather)
      o_ref: (1, r_out, 128)    rows = dp*Hp + hp, lanes = wp*Cout + c
    """
    acc = jnp.zeros((nrows, 2 * LANES), jnp.float32)
    for idx, (kd, kh) in enumerate(((0, 0), (0, 1), (1, 0), (1, 1))):
        xs = x_ref[0, pl.ds(kd * hin + kh, nrows), :]
        acc = acc + jnp.dot(xs.astype(jnp.bfloat16), v_ref[idx],
                            preferred_element_type=jnp.float32)
    acc = jnp.maximum(acc + b_ref[...], 0.0)              # bias + ReLU, f32 on VPU
    wmax = jnp.maximum(acc[:, :LANES], acc[:, LANES:])    # max-pool over W (lane halves)
    pooled = jnp.dot(s_ref[0], wmax, preferred_element_type=jnp.float32)
    for i in range(1, 4):
        pooled = jnp.maximum(
            pooled, jnp.dot(s_ref[i], wmax, preferred_element_type=jnp.float32))
    o_ref[0] = pooled


def _fc_kernel(x_ref, w1_ref, b1_ref, w2_ref, b2_ref, w3_ref, b3_ref, o_ref):
    """fc1 -> ReLU -> fc2 -> ReLU -> fc3 with intermediates held in VMEM.

    Eval mode: BatchNorm1d is pre-folded into fc1; Dropout == identity."""
    h = jnp.dot(x_ref[...].astype(jnp.bfloat16), w1_ref[...],
                preferred_element_type=jnp.float32)
    h = jnp.maximum(h + b1_ref[...], 0.0)
    h = jnp.dot(h.astype(jnp.bfloat16), w2_ref[...],
                preferred_element_type=jnp.float32)
    h = jnp.maximum(h + b2_ref[...], 0.0)
    o_ref[...] = (jnp.dot(h, w3_ref[...], preferred_element_type=jnp.float32)
                  + b3_ref[...])


_VMEM = pl.BlockSpec(memory_space=pltpu.MemorySpace.VMEM)


# ----------------------------------------------------------------------------
# Pallas wrappers
# ----------------------------------------------------------------------------
def conv_relu_pool_stage(x, stage):
    n = x.shape[0]
    g = stage["geom"]
    r_in, r_out, hin, nrows = g["r_in"], g["r_out"], g["hin"], g["nrows"]
    assert x.shape == (n, r_in, LANES), (x.shape, r_in)
    kernel = functools.partial(_conv_relu_pool_kernel, hin=hin, nrows=nrows)
    return pl.pallas_call(
        kernel,
        out_shape=jax.ShapeDtypeStruct((n, r_out, LANES), jnp.float32),
        grid=(n,),
        in_specs=[
            pl.BlockSpec((1, r_in, LANES), lambda i: (i, 0, 0)),       # activations
            pl.BlockSpec((4, LANES, 2 * LANES), lambda i: (0, 0, 0)),  # conv weights
            pl.BlockSpec((1, 2 * LANES), lambda i: (0, 0)),            # bias
            pl.BlockSpec((4, r_out, nrows), lambda i: (0, 0, 0)),      # pool selectors
        ],
        out_specs=pl.BlockSpec((1, r_out, LANES), lambda i: (i, 0, 0)),
        compiler_params=pltpu.CompilerParams(
            dimension_semantics=("parallel",)),   # v7x: both TCs split the batch
    )(x, stage["V"], stage["bias"], stage["S"])


def fc_stack(feats, fc):
    n, f_in = feats.shape
    h1 = fc["W1"].shape[1]
    h2 = fc["W2"].shape[1]
    n_out = fc["W3"].shape[1]
    flops = 2 * n * (f_in * h1 + h1 * h2 + h2 * n_out)
    bytes_accessed = (feats.size * 4 + fc["W1"].size * 2 + fc["W2"].size * 2
                      + fc["W3"].size * 4 + (h1 + h2 + n_out) * 4 + n * n_out * 4)
    return pl.pallas_call(
        _fc_kernel,
        out_shape=jax.ShapeDtypeStruct((n, n_out), jnp.float32),
        in_specs=[_VMEM] * 7,
        out_specs=_VMEM,
        cost_estimate=pl.CostEstimate(flops=flops, transcendentals=0,
                                      bytes_accessed=bytes_accessed),
    )(feats, fc["W1"], fc["b1"], fc["W2"], fc["b2"], fc["W3"], fc["b3"])


# ----------------------------------------------------------------------------
# Parameter packing (done once; folds BN, builds block weights / pool selectors)
# ----------------------------------------------------------------------------
def _pack_conv_stage(w_pt, b_pt, din, hin, win, bn=None, eps=1e-5):
    w = np.asarray(w_pt, np.float32)                    # (Cout, Cin, 2, 2, 2)
    b = np.asarray(b_pt, np.float32)
    cout, cin = w.shape[0], w.shape[1]
    do, ho, wo = din - 1, hin - 1, win - 1
    dp, hp, wp = do // 2, ho // 2, wo // 2
    if bn is not None:   # fold eval-mode BatchNorm3d into this conv
        scale = (np.asarray(bn["gamma"], np.float32)
                 / np.sqrt(np.asarray(bn["var"], np.float32) + eps))
        shift = np.asarray(bn["beta"], np.float32) - np.asarray(bn["mean"], np.float32) * scale
        b = b + np.einsum("oidhw,i->o", w, shift)
        w = w * scale[None, :, None, None, None]

    assert win * cin <= LANES and wp * cout <= LANES
    nrows = do * hin
    r_in = _round_up(din * hin + 1, 8)
    r_out = _round_up(dp * hp + 1, 8)

    V = np.zeros((4, LANES, 2 * LANES), np.float32)
    for idx, (kd, kh) in enumerate(((0, 0), (0, 1), (1, 0), (1, 1))):
        for parity in range(2):
            for wpi in range(wp):
                w_out = 2 * wpi + parity
                col = parity * LANES + wpi * cout
                for kw in range(2):
                    row = (w_out + kw) * cin
                    V[idx, row:row + cin, col:col + cout] = w[:, :, kd, kh, kw].T
    bias = np.zeros((1, 2 * LANES), np.float32)
    for parity in range(2):
        for wpi in range(wp):
            col = parity * LANES + wpi * cout
            bias[0, col:col + cout] = b
    S = np.zeros((4, r_out, nrows), np.float32)
    for idx, (dd, hh) in enumerate(((0, 0), (0, 1), (1, 0), (1, 1))):
        for dpi in range(dp):
            for hpi in range(hp):
                S[idx, dpi * hp + hpi, (2 * dpi + dd) * hin + (2 * hpi + hh)] = 1.0

    return {
        "V": jnp.asarray(V, jnp.bfloat16),
        "bias": jnp.asarray(bias),
        "S": jnp.asarray(S),
        "geom": {"r_in": r_in, "r_out": r_out, "hin": hin, "nrows": nrows,
                 "din": din, "win": win, "cin": cin, "cout": cout,
                 "dp": dp, "hp": hp, "wp": wp},
    }


def _pack_fc(raw, eps=1e-5):
    bn = raw["bn1d"]
    s = (np.asarray(bn["gamma"], np.float32)
         / np.sqrt(np.asarray(bn["var"], np.float32) + eps))
    t = np.asarray(bn["beta"], np.float32) - np.asarray(bn["mean"], np.float32) * s
    W1 = np.asarray(raw["fc1"]["w"], np.float32)        # (1000, n_feat)
    n_feat = W1.shape[1]
    assert n_feat <= LANES
    b1 = np.asarray(raw["fc1"]["b"], np.float32) + W1 @ t
    W1 = (W1 * s[None, :]).T                            # fold BN1d scale, pre-transpose
    W1p = np.zeros((LANES, W1.shape[1]), np.float32)    # zero rows absorb lane padding
    W1p[:n_feat, :] = W1
    W2 = np.asarray(raw["fc2"]["w"], np.float32).T
    W3 = np.asarray(raw["fc3"]["w"], np.float32).T
    return {
        "W1": jnp.asarray(W1p, jnp.bfloat16),
        "b1": jnp.asarray(b1[None, :]),
        "W2": jnp.asarray(W2, jnp.bfloat16),
        "b2": jnp.asarray(np.asarray(raw["fc2"]["b"], np.float32)[None, :]),
        "W3": jnp.asarray(W3),
        "b3": jnp.asarray(np.asarray(raw["fc3"]["b"], np.float32)[None, :]),
    }


def pack_params(raw, spatial):
    d1 = spatial
    st1 = _pack_conv_stage(raw["conv1"]["w"], raw["conv1"]["b"], d1, d1, d1,
                           bn=raw["bn3d"])
    d2 = (d1 - 1) // 2
    st2 = _pack_conv_stage(raw["conv2"]["w"], raw["conv2"]["b"], d2, d2, d2)
    d3 = (d2 - 1) // 2
    st3 = _pack_conv_stage(raw["conv3"]["w"], raw["conv3"]["b"], d3, d3, d3)
    g3 = st3["geom"]
    # TODO(synk): for inputs whose final pooled spatial size is > 1x1x1, the
    # PyTorch flatten permutation would have to be folded into fc1's weights.
    assert g3["dp"] == 1 and g3["hp"] == 1 and g3["wp"] == 1
    return {"s1": st1, "s2": st2, "s3": st3, "fc": _pack_fc(raw)}


# ----------------------------------------------------------------------------
# Full forward pass
# ----------------------------------------------------------------------------
def forward(packed, x_ncdhw):
    n, c, d, h, w = x_ncdhw.shape
    g1 = packed["s1"]["geom"]
    # layout plumbing: NCDHW -> (N, D*H rows, W*C lanes), zero pad to (r_in, 128)
    x = jnp.transpose(x_ncdhw, (0, 2, 3, 4, 1)).reshape(n, d * h, w * c)
    x = jnp.pad(x, ((0, 0), (0, g1["r_in"] - d * h), (0, LANES - w * c)))
    y = conv_relu_pool_stage(x, packed["s1"])
    y = conv_relu_pool_stage(y, packed["s2"])
    y = conv_relu_pool_stage(y, packed["s3"])
    feats = y[:, 0, :]     # final spatial is 1x1x1 -> features are the 3*C0 channels (+ zero pad)
    return fc_stack(feats, packed["fc"])


# ----------------------------------------------------------------------------
# Synthetic parameters (PyTorch layouts) and a plain-JAX reference for checking
# ----------------------------------------------------------------------------
def init_raw_params(key, c0, n_feat):
    ks = iter(jax.random.split(key, 32))

    def bn(c):
        return dict(
            gamma=1.0 + 0.1 * jax.random.normal(next(ks), (c,), jnp.float32),
            beta=0.1 * jax.random.normal(next(ks), (c,), jnp.float32),
            mean=0.05 * jax.random.normal(next(ks), (c,), jnp.float32),
            var=jnp.abs(1.0 + 0.1 * jax.random.normal(next(ks), (c,), jnp.float32)),
        )

    def conv(cin, cout):
        return dict(
            w=jax.random.normal(next(ks), (cout, cin, 2, 2, 2), jnp.float32)
            / np.sqrt(cin * 8),
            b=0.01 * jax.random.normal(next(ks), (cout,), jnp.float32),
        )

    def linear(fin, fout):
        return dict(
            w=jax.random.normal(next(ks), (fout, fin), jnp.float32) / np.sqrt(fin),
            b=0.01 * jax.random.normal(next(ks), (fout,), jnp.float32),
        )

    return {"bn3d": bn(c0), "conv1": conv(c0, c0), "conv2": conv(c0, 2 * c0),
            "conv3": conv(2 * c0, 3 * c0), "bn1d": bn(n_feat),
            "fc1": linear(n_feat, 1000), "fc2": linear(1000, 1000),
            "fc3": linear(1000, 2)}


def reference_forward(raw, x_ncdhw, eps=1e-5):
    f32 = jnp.float32

    def q(a):  # mimic bf16 weight storage used by the kernels
        return a.astype(jnp.bfloat16).astype(f32)

    def conv(x, w, b):
        n, d, h, wd, _ = x.shape
        out = jnp.zeros((n, d - 1, h - 1, wd - 1, w.shape[0]), f32) + b
        for kd in range(2):
            for kh in range(2):
                for kw in range(2):
                    patch = x[:, kd:kd + d - 1, kh:kh + h - 1, kw:kw + wd - 1, :]
                    out = out + jnp.einsum("ndhwc,oc->ndhwo", patch,
                                           q(w[:, :, kd, kh, kw]))
        return out

    def pool(x):
        n, d, h, w, c = x.shape
        dp, hp, wp = d // 2, h // 2, w // 2
        xr = x[:, :2 * dp, :2 * hp, :2 * wp, :].reshape(n, dp, 2, hp, 2, wp, 2, c)
        return xr.max(axis=(2, 4, 6))

    x = jnp.transpose(x_ncdhw, (0, 2, 3, 4, 1)).astype(f32)
    bn = raw["bn3d"]
    s = bn["gamma"] / jnp.sqrt(bn["var"] + eps)
    x = x * s + (bn["beta"] - bn["mean"] * s)
    for name in ("conv1", "conv2", "conv3"):
        x = pool(jax.nn.relu(conv(x, raw[name]["w"], raw[name]["b"])))
    n = x.shape[0]
    x = jnp.transpose(x, (0, 4, 1, 2, 3)).reshape(n, -1)   # PyTorch flatten order
    bn1 = raw["bn1d"]
    s1 = bn1["gamma"] / jnp.sqrt(bn1["var"] + eps)
    x = x * s1 + (bn1["beta"] - bn1["mean"] * s1)
    x = jax.nn.relu(x @ q(raw["fc1"]["w"]).T + raw["fc1"]["b"])
    x = jax.nn.relu(x @ q(raw["fc2"]["w"]).T + raw["fc2"]["b"])
    return x @ raw["fc3"]["w"].T + raw["fc3"]["b"]


if __name__ == "__main__":
    key = jax.random.PRNGKey(0)
    kx, kp = jax.random.split(key)

    N, C0, S = 2, 4, 16                      # input_shape = (4, 16, 16, 16)
    x = jax.random.uniform(kx, (N, C0, S, S, S), jnp.float32)   # NCDHW like PyTorch

    s_final = S
    for _ in range(3):
        s_final = (s_final - 1) // 2
    n_feat = 3 * C0 * s_final ** 3           # == 12 for these sizes

    raw = init_raw_params(kp, C0, n_feat)
    packed = pack_params(raw, S)

    fwd = jax.jit(lambda xx: forward(packed, xx))
    out = jax.block_until_ready(fwd(x))
    assert out.shape == (N, 2), out.shape
    assert bool(jnp.all(jnp.isfinite(out)))

    ref = reference_forward(raw, x)
    err = float(jnp.max(jnp.abs(out - ref.astype(jnp.float32))))
    assert err < 0.1, f"max abs err vs reference = {err}"
    print("KERNEL_OK")
</pallas_src>

<mosaic_0001>
module attributes {stable_mosaic.version = 11 : i64} {
  func.func @_conv_relu_pool_kernel(%arg0: i32, %arg1: memref<1x264x128xf32, #tpu.memory_space<vmem>>, %arg2: memref<4x128x256xbf16, #tpu.memory_space<vmem>>, %arg3: memref<1x256xf32, #tpu.memory_space<vmem>>, %arg4: memref<4x56x240xf32, #tpu.memory_space<vmem>>, %arg5: memref<1x56x128xf32, #tpu.memory_space<vmem>>) attributes {dimension_semantics = [#tpu.dimension_semantics<parallel>], iteration_bounds = array<i64: 2>, scalar_prefetch = 0 : i64, scratch_operands = 0 : i64, tpu.core_type = #tpu.core_type<tc>, window_params = [{transform_indices = @transform_0, window_bounds = array<i64: 1, 264, 128>}, {pipeline_mode = #tpu.pipeline_mode<synchronous>, transform_indices = @transform_1, window_bounds = array<i64: 4, 128, 256>}, {pipeline_mode = #tpu.pipeline_mode<synchronous>, transform_indices = @transform_2, window_bounds = array<i64: 1, 256>}, {pipeline_mode = #tpu.pipeline_mode<synchronous>, transform_indices = @transform_3, window_bounds = array<i64: 4, 56, 240>}, {transform_indices = @transform_4, window_bounds = array<i64: 1, 56, 128>}]} {
    %cst = arith.constant 0.000000e+00 : f32
    %0 = vector.broadcast %cst : f32 to vector<240x256xf32>
    %c0 = arith.constant 0 : index
    %c0_0 = arith.constant 0 : index
    %c0_1 = arith.constant 0 : index
    %1 = vector.load %arg1[%c0, %c0_0, %c0_1] : memref<1x264x128xf32, #tpu.memory_space<vmem>>, vector<1x240x128xf32>
    %2 = vector.shape_cast %1 : vector<1x240x128xf32> to vector<240x128xf32>
    %3 = arith.truncf %2 : vector<240x128xf32> to vector<240x128xbf16>
    %c0_2 = arith.constant 0 : index
    %c0_3 = arith.constant 0 : index
    %c0_4 = arith.constant 0 : index
    %4 = vector.load %arg2[%c0_2, %c0_3, %c0_4] : memref<4x128x256xbf16, #tpu.memory_space<vmem>>, vector<1x128x256xbf16>
    %5 = vector.shape_cast %4 : vector<1x128x256xbf16> to vector<128x256xbf16>
    %cst_5 = arith.constant dense<0.000000e+00> : vector<240x256xf32>
    %6 = tpu.matmul %3, %5, %cst_5 {dimension_numbers = #tpu.dot_dimension_numbers<[1], [0], [0], [1], [0, 0, 1, 1], [], []>} : vector<240x128xbf16>, vector<128x256xbf16>, vector<240x256xf32> -> vector<240x256xf32>
    %7 = arith.addf %0, %6 : vector<240x256xf32>
    %c0_6 = arith.constant 0 : index
    %c1 = arith.constant 1 : index
    %c0_7 = arith.constant 0 : index
    %8 = vector.load %arg1[%c0_6, %c1, %c0_7] : memref<1x264x128xf32, #tpu.memory_space<vmem>>, vector<1x240x128xf32>
    %9 = vector.shape_cast %8 : vector<1x240x128xf32> to vector<240x128xf32>
    %10 = arith.truncf %9 : vector<240x128xf32> to vector<240x128xbf16>
    %c1_8 = arith.constant 1 : index
    %c0_9 = arith.constant 0 : index
    %c0_10 = arith.constant 0 : index
    %11 = vector.load %arg2[%c1_8, %c0_9, %c0_10] : memref<4x128x256xbf16, #tpu.memory_space<vmem>>, vector<1x128x256xbf16>
    %12 = vector.shape_cast %11 : vector<1x128x256xbf16> to vector<128x256xbf16>
    %cst_11 = arith.constant dense<0.000000e+00> : vector<240x256xf32>
    %13 = tpu.matmul %10, %12, %cst_11 {dimension_numbers = #tpu.dot_dimension_numbers<[1], [0], [0], [1], [0, 0, 1, 1], [], []>} : vector<240x128xbf16>, vector<128x256xbf16>, vector<240x256xf32> -> vector<240x256xf32>
    %14 = arith.addf %7, %13 : vector<240x256xf32>
    %c0_12 = arith.constant 0 : index
    %c16 = arith.constant 16 : index
    %c0_13 = arith.constant 0 : index
    %15 = vector.load %arg1[%c0_12, %c16, %c0_13] : memref<1x264x128xf32, #tpu.memory_space<vmem>>, vector<1x240x128xf32>
    %16 = vector.shape_cast %15 : vector<1x240x128xf32> to vector<240x128xf32>
    %17 = arith.truncf %16 : vector<240x128xf32> to vector<240x128xbf16>
    %c2 = arith.constant 2 : index
    %c0_14 = arith.constant 0 : index
    %c0_15 = arith.constant 0 : index
    %18 = vector.load %arg2[%c2, %c0_14, %c0_15] : memref<4x128x256xbf16, #tpu.memory_space<vmem>>, vector<1x128x256xbf16>
    %19 = vector.shape_cast %18 : vector<1x128x256xbf16> to vector<128x256xbf16>
    %cst_16 = arith.constant dense<0.000000e+00> : vector<240x256xf32>
    %20 = tpu.matmul %17, %19, %cst_16 {dimension_numbers = #tpu.dot_dimension_numbers<[1], [0], [0], [1], [0, 0, 1, 1], [], []>} : vector<240x128xbf16>, vector<128x256xbf16>, vector<240x256xf32> -> vector<240x256xf32>
    %21 = arith.addf %14, %20 : vector<240x256xf32>
    %c0_17 = arith.constant 0 : index
    %c17 = arith.constant 17 : index
    %c0_18 = arith.constant 0 : index
    %22 = vector.load %arg1[%c0_17, %c17, %c0_18] : memref<1x264x128xf32, #tpu.memory_space<vmem>>, vector<1x240x128xf32>
    %23 = vector.shape_cast %22 : vector<1x240x128xf32> to vector<240x128xf32>
    %24 = arith.truncf %23 : vector<240x128xf32> to vector<240x128xbf16>
    %c3 = arith.constant 3 : index
    %c0_19 = arith.constant 0 : index
    %c0_20 = arith.constant 0 : index
    %25 = vector.load %arg2[%c3, %c0_19, %c0_20] : memref<4x128x256xbf16, #tpu.memory_space<vmem>>, vector<1x128x256xbf16>
    %26 = vector.shape_cast %25 : vector<1x128x256xbf16> to vector<128x256xbf16>
    %cst_21 = arith.constant dense<0.000000e+00> : vector<240x256xf32>
    %27 = tpu.matmul %24, %26, %cst_21 {dimension_numbers = #tpu.dot_dimension_numbers<[1], [0], [0], [1], [0, 0, 1, 1], [], []>} : vector<240x128xbf16>, vector<128x256xbf16>, vector<240x256xf32> -> vector<240x256xf32>
    %28 = arith.addf %21, %27 : vector<240x256xf32>
    %c0_22 = arith.constant 0 : index
    %c0_23 = arith.constant 0 : index
    %29 = vector.load %arg3[%c0_22, %c0_23] : memref<1x256xf32, #tpu.memory_space<vmem>>, vector<1x256xf32>
    %30 = vector.broadcast %29 : vector<1x256xf32> to vector<240x256xf32>
    %31 = arith.addf %28, %30 : vector<240x256xf32>
    %cst_24 = arith.constant 0.000000e+00 : f32
    %32 = vector.broadcast %cst_24 : f32 to vector<240x256xf32>
    %33 = arith.maximumf %31, %32 : vector<240x256xf32>
    %34 = vector.extract_strided_slice %33 {offsets = [0, 0], sizes = [240, 128], strides = [1, 1]} : vector<240x256xf32> to vector<240x128xf32>
    %35 = vector.extract_strided_slice %33 {offsets = [0, 128], sizes = [240, 128], strides = [1, 1]} : vector<240x256xf32> to vector<240x128xf32>
    %36 = arith.maximumf %34, %35 : vector<240x128xf32>
    %c0_25 = arith.constant 0 : index
    %c0_26 = arith.constant 0 : index
    %c0_27 = arith.constant 0 : index
    %37 = vector.load %arg4[%c0_25, %c0_26, %c0_27] : memref<4x56x240xf32, #tpu.memory_space<vmem>>, vector<1x56x240xf32>
    %38 = vector.shape_cast %37 : vector<1x56x240xf32> to vector<56x240xf32>
    %cst_28 = arith.constant dense<0.000000e+00> : vector<56x128xf32>
    %39 = tpu.matmul %38, %36, %cst_28 {dimension_numbers = #tpu.dot_dimension_numbers<[1], [0], [0], [1], [0, 0, 1, 1], [], []>} : vector<56x240xf32>, vector<240x128xf32>, vector<56x128xf32> -> vector<56x128xf32>
    %c1_29 = arith.constant 1 : index
    %c0_30 = arith.constant 0 : index
    %c0_31 = arith.constant 0 : index
    %40 = vector.load %arg4[%c1_29, %c0_30, %c0_31] : memref<4x56x240xf32, #tpu.memory_space<vmem>>, vector<1x56x240xf32>
    %41 = vector.shape_cast %40 : vector<1x56x240xf32> to vector<56x240xf32>
    %cst_32 = arith.constant dense<0.000000e+00> : vector<56x128xf32>
    %42 = tpu.matmul %41, %36, %cst_32 {dimension_numbers = #tpu.dot_dimension_numbers<[1], [0], [0], [1], [0, 0, 1, 1], [], []>} : vector<56x240xf32>, vector<240x128xf32>, vector<56x128xf32> -> vector<56x128xf32>
    %43 = arith.maximumf %39, %42 : vector<56x128xf32>
    %c2_33 = arith.constant 2 : index
    %c0_34 = arith.constant 0 : index
    %c0_35 = arith.constant 0 : index
    %44 = vector.load %arg4[%c2_33, %c0_34, %c0_35] : memref<4x56x240xf32, #tpu.memory_space<vmem>>, vector<1x56x240xf32>
    %45 = vector.shape_cast %44 : vector<1x56x240xf32> to vector<56x240xf32>
    %cst_36 = arith.constant dense<0.000000e+00> : vector<56x128xf32>
    %46 = tpu.matmul %45, %36, %cst_36 {dimension_numbers = #tpu.dot_dimension_numbers<[1], [0], [0], [1], [0, 0, 1, 1], [], []>} : vector<56x240xf32>, vector<240x128xf32>, vector<56x128xf32> -> vector<56x128xf32>
    %47 = arith.maximumf %43, %46 : vector<56x128xf32>
    %c3_37 = arith.constant 3 : index
    %c0_38 = arith.constant 0 : index
    %c0_39 = arith.constant 0 : index
    %48 = vector.load %arg4[%c3_37, %c0_38, %c0_39] : memref<4x56x240xf32, #tpu.memory_space<vmem>>, vector<1x56x240xf32>
    %49 = vector.shape_cast %48 : vector<1x56x240xf32> to vector<56x240xf32>
    %cst_40 = arith.constant dense<0.000000e+00> : vector<56x128xf32>
    %50 = tpu.matmul %49, %36, %cst_40 {dimension_numbers = #tpu.dot_dimension_numbers<[1], [0], [0], [1], [0, 0, 1, 1], [], []>} : vector<56x240xf32>, vector<240x128xf32>, vector<56x128xf32> -> vector<56x128xf32>
    %51 = arith.maximumf %47, %50 : vector<56x128xf32>
    %c0_41 = arith.constant 0 : index
    %c0_42 = arith.constant 0 : index
    %c0_43 = arith.constant 0 : index
    %52 = vector.load %arg5[%c0_41, %c0_42, %c0_43] : memref<1x56x128xf32, #tpu.memory_space<vmem>>, vector<1x56x128xf32>
    %53 = vector.shape_cast %52 : vector<1x56x128xf32> to vector<56x128xf32>
    %54 = vector.shape_cast %51 : vector<56x128xf32> to vector<1x56x128xf32>
    tpu.vector_store %arg5[%c0_41, %c0_42, %c0_43], %54 {strides = array<i32>} : memref<1x56x128xf32, #tpu.memory_space<vmem>>, vector<1x56x128xf32>,
    return
  }
  func.func @transform_0(%arg0: i32) -> (i32, i32, i32) {
    %c0_i32 = arith.constant 0 : i32
    %c0_i32_0 = arith.constant 0 : i32
    %c0_i32_1 = arith.constant 0 : i32
    return %arg0, %c0_i32, %c0_i32_0 : i32, i32, i32
  }
  func.func @transform_1(%arg0: i32) -> (i32, i32, i32) {
    %c0_i32 = arith.constant 0 : i32
    %c0_i32_0 = arith.constant 0 : i32
    %c0_i32_1 = arith.constant 0 : i32
    %c0_i32_2 = arith.constant 0 : i32
    return %c0_i32, %c0_i32_0, %c0_i32_1 : i32, i32, i32
  }
  func.func @transform_2(%arg0: i32) -> (i32, i32) {
    %c0_i32 = arith.constant 0 : i32
    %c0_i32_0 = arith.constant 0 : i32
    %c0_i32_1 = arith.constant 0 : i32
    return %c0_i32, %c0_i32_0 : i32, i32
  }
  func.func @transform_3(%arg0: i32) -> (i32, i32, i32) {
    %c0_i32 = arith.constant 0 : i32
    %c0_i32_0 = arith.constant 0 : i32
    %c0_i32_1 = arith.constant 0 : i32
    %c0_i32_2 = arith.constant 0 : i32
    return %c0_i32, %c0_i32_0, %c0_i32_1 : i32, i32, i32
  }
  func.func @transform_4(%arg0: i32) -> (i32, i32, i32) {
    %c0_i32 = arith.constant 0 : i32
    %c0_i32_0 = arith.constant 0 : i32
    %c0_i32_1 = arith.constant 0 : i32
    return %arg0, %c0_i32, %c0_i32_0 : i32, i32, i32
  }
}

module attributes {stable_mosaic.version = 11 : i64} {
  func.func @_conv_relu_pool_kernel(%arg0: i32, %arg1: memref<1x56x128xf32, #tpu.memory_space<vmem>>, %arg2: memref<4x128x256xbf16, #tpu.memory_space<vmem>>, %arg3: memref<1x256xf32, #tpu.memory_space<vmem>>, %arg4: memref<4x16x42xf32, #tpu.memory_space<vmem>>, %arg5: memref<1x16x128xf32, #tpu.memory_space<vmem>>) attributes {dimension_semantics = [#tpu.dimension_semantics<parallel>], iteration_bounds = array<i64: 2>, scalar_prefetch = 0 : i64, scratch_operands = 0 : i64, tpu.core_type = #tpu.core_type<tc>, window_params = [{transform_indices = @transform_0, window_bounds = array<i64: 1, 56, 128>}, {pipeline_mode = #tpu.pipeline_mode<synchronous>, transform_indices = @transform_1, window_bounds = array<i64: 4, 128, 256>}, {pipeline_mode = #tpu.pipeline_mode<synchronous>, transform_indices = @transform_2, window_bounds = array<i64: 1, 256>}, {pipeline_mode = #tpu.pipeline_mode<synchronous>, transform_indices = @transform_3, window_bounds = array<i64: 4, 16, 42>}, {transform_indices = @transform_4, window_bounds = array<i64: 1, 16, 128>}]} {
    %cst = arith.constant 0.000000e+00 : f32
    %0 = vector.broadcast %cst : f32 to vector<42x256xf32>
    %c0 = arith.constant 0 : index
    %c0_0 = arith.constant 0 : index
    %c0_1 = arith.constant 0 : index
    %1 = vector.load %arg1[%c0, %c0_0, %c0_1] : memref<1x56x128xf32, #tpu.memory_space<vmem>>, vector<1x42x128xf32>
    %2 = vector.shape_cast %1 : vector<1x42x128xf32> to vector<42x128xf32>
    %3 = arith.truncf %2 : vector<42x128xf32> to vector<42x128xbf16>
    %c0_2 = arith.constant 0 : index
    %c0_3 = arith.constant 0 : index
    %c0_4 = arith.constant 0 : index
    %4 = vector.load %arg2[%c0_2, %c0_3, %c0_4] : memref<4x128x256xbf16, #tpu.memory_space<vmem>>, vector<1x128x256xbf16>
    %5 = vector.shape_cast %4 : vector<1x128x256xbf16> to vector<128x256xbf16>
    %cst_5 = arith.constant dense<0.000000e+00> : vector<42x256xf32>
    %6 = tpu.matmul %3, %5, %cst_5 {dimension_numbers = #tpu.dot_dimension_numbers<[1], [0], [0], [1], [0, 0, 1, 1], [], []>} : vector<42x128xbf16>, vector<128x256xbf16>, vector<42x256xf32> -> vector<42x256xf32>
    %7 = arith.addf %0, %6 : vector<42x256xf32>
    %c0_6 = arith.constant 0 : index
    %c1 = arith.constant 1 : index
    %c0_7 = arith.constant 0 : index
    %8 = vector.load %arg1[%c0_6, %c1, %c0_7] : memref<1x56x128xf32, #tpu.memory_space<vmem>>, vector<1x42x128xf32>
    %9 = vector.shape_cast %8 : vector<1x42x128xf32> to vector<42x128xf32>
    %10 = arith.truncf %9 : vector<42x128xf32> to vector<42x128xbf16>
    %c1_8 = arith.constant 1 : index
    %c0_9 = arith.constant 0 : index
    %c0_10 = arith.constant 0 : index
    %11 = vector.load %arg2[%c1_8, %c0_9, %c0_10] : memref<4x128x256xbf16, #tpu.memory_space<vmem>>, vector<1x128x256xbf16>
    %12 = vector.shape_cast %11 : vector<1x128x256xbf16> to vector<128x256xbf16>
    %cst_11 = arith.constant dense<0.000000e+00> : vector<42x256xf32>
    %13 = tpu.matmul %10, %12, %cst_11 {dimension_numbers = #tpu.dot_dimension_numbers<[1], [0], [0], [1], [0, 0, 1, 1], [], []>} : vector<42x128xbf16>, vector<128x256xbf16>, vector<42x256xf32> -> vector<42x256xf32>
    %14 = arith.addf %7, %13 : vector<42x256xf32>
    %c0_12 = arith.constant 0 : index
    %c7 = arith.constant 7 : index
    %c0_13 = arith.constant 0 : index
    %15 = vector.load %arg1[%c0_12, %c7, %c0_13] : memref<1x56x128xf32, #tpu.memory_space<vmem>>, vector<1x42x128xf32>
    %16 = vector.shape_cast %15 : vector<1x42x128xf32> to vector<42x128xf32>
    %17 = arith.truncf %16 : vector<42x128xf32> to vector<42x128xbf16>
    %c2 = arith.constant 2 : index
    %c0_14 = arith.constant 0 : index
    %c0_15 = arith.constant 0 : index
    %18 = vector.load %arg2[%c2, %c0_14, %c0_15] : memref<4x128x256xbf16, #tpu.memory_space<vmem>>, vector<1x128x256xbf16>
    %19 = vector.shape_cast %18 : vector<1x128x256xbf16> to vector<128x256xbf16>
    %cst_16 = arith.constant dense<0.000000e+00> : vector<42x256xf32>
    %20 = tpu.matmul %17, %19, %cst_16 {dimension_numbers = #tpu.dot_dimension_numbers<[1], [0], [0], [1], [0, 0, 1, 1], [], []>} : vector<42x128xbf16>, vector<128x256xbf16>, vector<42x256xf32> -> vector<42x256xf32>
    %21 = arith.addf %14, %20 : vector<42x256xf32>
    %c0_17 = arith.constant 0 : index
    %c8 = arith.constant 8 : index
    %c0_18 = arith.constant 0 : index
    %22 = vector.load %arg1[%c0_17, %c8, %c0_18] : memref<1x56x128xf32, #tpu.memory_space<vmem>>, vector<1x42x128xf32>
    %23 = vector.shape_cast %22 : vector<1x42x128xf32> to vector<42x128xf32>
    %24 = arith.truncf %23 : vector<42x128xf32> to vector<42x128xbf16>
    %c3 = arith.constant 3 : index
    %c0_19 = arith.constant 0 : index
    %c0_20 = arith.constant 0 : index
    %25 = vector.load %arg2[%c3, %c0_19, %c0_20] : memref<4x128x256xbf16, #tpu.memory_space<vmem>>, vector<1x128x256xbf16>
    %26 = vector.shape_cast %25 : vector<1x128x256xbf16> to vector<128x256xbf16>
    %cst_21 = arith.constant dense<0.000000e+00> : vector<42x256xf32>
    %27 = tpu.matmul %24, %26, %cst_21 {dimension_numbers = #tpu.dot_dimension_numbers<[1], [0], [0], [1], [0, 0, 1, 1], [], []>} : vector<42x128xbf16>, vector<128x256xbf16>, vector<42x256xf32> -> vector<42x256xf32>
    %28 = arith.addf %21, %27 : vector<42x256xf32>
    %c0_22 = arith.constant 0 : index
    %c0_23 = arith.constant 0 : index
    %29 = vector.load %arg3[%c0_22, %c0_23] : memref<1x256xf32, #tpu.memory_space<vmem>>, vector<1x256xf32>
    %30 = vector.broadcast %29 : vector<1x256xf32> to vector<42x256xf32>
    %31 = arith.addf %28, %30 : vector<42x256xf32>
    %cst_24 = arith.constant 0.000000e+00 : f32
    %32 = vector.broadcast %cst_24 : f32 to vector<42x256xf32>
    %33 = arith.maximumf %31, %32 : vector<42x256xf32>
    %34 = vector.extract_strided_slice %33 {offsets = [0, 0], sizes = [42, 128], strides = [1, 1]} : vector<42x256xf32> to vector<42x128xf32>
    %35 = vector.extract_strided_slice %33 {offsets = [0, 128], sizes = [42, 128], strides = [1, 1]} : vector<42x256xf32> to vector<42x128xf32>
    %36 = arith.maximumf %34, %35 : vector<42x128xf32>
    %c0_25 = arith.constant 0 : index
    %c0_26 = arith.constant 0 : index
    %c0_27 = arith.constant 0 : index
    %37 = vector.load %arg4[%c0_25, %c0_26, %c0_27] : memref<4x16x42xf32, #tpu.memory_space<vmem>>, vector<1x16x42xf32>
    %38 = vector.shape_cast %37 : vector<1x16x42xf32> to vector<16x42xf32>
    %cst_28 = arith.constant dense<0.000000e+00> : vector<16x128xf32>
    %39 = tpu.matmul %38, %36, %cst_28 {dimension_numbers = #tpu.dot_dimension_numbers<[1], [0], [0], [1], [0, 0, 1, 1], [], []>} : vector<16x42xf32>, vector<42x128xf32>, vector<16x128xf32> -> vector<16x128xf32>
    %c1_29 = arith.constant 1 : index
    %c0_30 = arith.constant 0 : index
    %c0_31 = arith.constant 0 : index
    %40 = vector.load %arg4[%c1_29, %c0_30, %c0_31] : memref<4x16x42xf32, #tpu.memory_space<vmem>>, vector<1x16x42xf32>
    %41 = vector.shape_cast %40 : vector<1x16x42xf32> to vector<16x42xf32>
    %cst_32 = arith.constant dense<0.000000e+00> : vector<16x128xf32>
    %42 = tpu.matmul %41, %36, %cst_32 {dimension_numbers = #tpu.dot_dimension_numbers<[1], [0], [0], [1], [0, 0, 1, 1], [], []>} : vector<16x42xf32>, vector<42x128xf32>, vector<16x128xf32> -> vector<16x128xf32>
    %43 = arith.maximumf %39, %42 : vector<16x128xf32>
    %c2_33 = arith.constant 2 : index
    %c0_34 = arith.constant 0 : index
    %c0_35 = arith.constant 0 : index
    %44 = vector.load %arg4[%c2_33, %c0_34, %c0_35] : memref<4x16x42xf32, #tpu.memory_space<vmem>>, vector<1x16x42xf32>
    %45 = vector.shape_cast %44 : vector<1x16x42xf32> to vector<16x42xf32>
    %cst_36 = arith.constant dense<0.000000e+00> : vector<16x128xf32>
    %46 = tpu.matmul %45, %36, %cst_36 {dimension_numbers = #tpu.dot_dimension_numbers<[1], [0], [0], [1], [0, 0, 1, 1], [], []>} : vector<16x42xf32>, vector<42x128xf32>, vector<16x128xf32> -> vector<16x128xf32>
    %47 = arith.maximumf %43, %46 : vector<16x128xf32>
    %c3_37 = arith.constant 3 : index
    %c0_38 = arith.constant 0 : index
    %c0_39 = arith.constant 0 : index
    %48 = vector.load %arg4[%c3_37, %c0_38, %c0_39] : memref<4x16x42xf32, #tpu.memory_space<vmem>>, vector<1x16x42xf32>
    %49 = vector.shape_cast %48 : vector<1x16x42xf32> to vector<16x42xf32>
    %cst_40 = arith.constant dense<0.000000e+00> : vector<16x128xf32>
    %50 = tpu.matmul %49, %36, %cst_40 {dimension_numbers = #tpu.dot_dimension_numbers<[1], [0], [0], [1], [0, 0, 1, 1], [], []>} : vector<16x42xf32>, vector<42x128xf32>, vector<16x128xf32> -> vector<16x128xf32>
    %51 = arith.maximumf %47, %50 : vector<16x128xf32>
    %c0_41 = arith.constant 0 : index
    %c0_42 = arith.constant 0 : index
    %c0_43 = arith.constant 0 : index
    %52 = vector.load %arg5[%c0_41, %c0_42, %c0_43] : memref<1x16x128xf32, #tpu.memory_space<vmem>>, vector<1x16x128xf32>
    %53 = vector.shape_cast %52 : vector<1x16x128xf32> to vector<16x128xf32>
    %54 = vector.shape_cast %51 : vector<16x128xf32> to vector<1x16x128xf32>
    tpu.vector_store %arg5[%c0_41, %c0_42, %c0_43], %54 {strides = array<i32>} : memref<1x16x128xf32, #tpu.memory_space<vmem>>, vector<1x16x128xf32>,
    return
  }
  func.func @transform_0(%arg0: i32) -> (i32, i32, i32) {
    %c0_i32 = arith.constant 0 : i32
    %c0_i32_0 = arith.constant 0 : i32
    %c0_i32_1 = arith.constant 0 : i32
    return %arg0, %c0_i32, %c0_i32_0 : i32, i32, i32
  }
  func.func @transform_1(%arg0: i32) -> (i32, i32, i32) {
    %c0_i32 = arith.constant 0 : i32
    %c0_i32_0 = arith.constant 0 : i32
    %c0_i32_1 = arith.constant 0 : i32
    %c0_i32_2 = arith.constant 0 : i32
    return %c0_i32, %c0_i32_0, %c0_i32_1 : i32, i32, i32
  }
  func.func @transform_2(%arg0: i32) -> (i32, i32) {
    %c0_i32 = arith.constant 0 : i32
    %c0_i32_0 = arith.constant 0 : i32
    %c0_i32_1 = arith.constant 0 : i32
    return %c0_i32, %c0_i32_0 : i32, i32
  }
  func.func @transform_3(%arg0: i32) -> (i32, i32, i32) {
    %c0_i32 = arith.constant 0 : i32
    %c0_i32_0 = arith.constant 0 : i32
    %c0_i32_1 = arith.constant 0 : i32
    %c0_i32_2 = arith.constant 0 : i32
    return %c0_i32, %c0_i32_0, %c0_i32_1 : i32, i32, i32
  }
  func.func @transform_4(%arg0: i32) -> (i32, i32, i32) {
    %c0_i32 = arith.constant 0 : i32
    %c0_i32_0 = arith.constant 0 : i32
    %c0_i32_1 = arith.constant 0 : i32
    return %arg0, %c0_i32, %c0_i32_0 : i32, i32, i32
  }
}

module attributes {stable_mosaic.version = 11 : i64} {
  func.func @_conv_relu_pool_kernel(%arg0: i32, %arg1: memref<1x16x128xf32, #tpu.memory_space<vmem>>, %arg2: memref<4x128x256xbf16, #tpu.memory_space<vmem>>, %arg3: memref<1x256xf32, #tpu.memory_space<vmem>>, %arg4: memref<4x8x6xf32, #tpu.memory_space<vmem>>, %arg5: memref<1x8x128xf32, #tpu.memory_space<vmem>>) attributes {dimension_semantics = [#tpu.dimension_semantics<parallel>], iteration_bounds = array<i64: 2>, scalar_prefetch = 0 : i64, scratch_operands = 0 : i64, tpu.core_type = #tpu.core_type<tc>, window_params = [{transform_indices = @transform_0, window_bounds = array<i64: 1, 16, 128>}, {pipeline_mode = #tpu.pipeline_mode<synchronous>, transform_indices = @transform_1, window_bounds = array<i64: 4, 128, 256>}, {pipeline_mode = #tpu.pipeline_mode<synchronous>, transform_indices = @transform_2, window_bounds = array<i64: 1, 256>}, {pipeline_mode = #tpu.pipeline_mode<synchronous>, transform_indices = @transform_3, window_bounds = array<i64: 4, 8, 6>}, {transform_indices = @transform_4, window_bounds = array<i64: 1, 8, 128>}]} {
    %cst = arith.constant 0.000000e+00 : f32
    %0 = vector.broadcast %cst : f32 to vector<6x256xf32>
    %c0 = arith.constant 0 : index
    %c0_0 = arith.constant 0 : index
    %c0_1 = arith.constant 0 : index
    %1 = vector.load %arg1[%c0, %c0_0, %c0_1] : memref<1x16x128xf32, #tpu.memory_space<vmem>>, vector<1x6x128xf32>
    %2 = vector.shape_cast %1 : vector<1x6x128xf32> to vector<6x128xf32>
    %3 = arith.truncf %2 : vector<6x128xf32> to vector<6x128xbf16>
    %c0_2 = arith.constant 0 : index
    %c0_3 = arith.constant 0 : index
    %c0_4 = arith.constant 0 : index
    %4 = vector.load %arg2[%c0_2, %c0_3, %c0_4] : memref<4x128x256xbf16, #tpu.memory_space<vmem>>, vector<1x128x256xbf16>
    %5 = vector.shape_cast %4 : vector<1x128x256xbf16> to vector<128x256xbf16>
    %cst_5 = arith.constant dense<0.000000e+00> : vector<6x256xf32>
    %6 = tpu.matmul %3, %5, %cst_5 {dimension_numbers = #tpu.dot_dimension_numbers<[1], [0], [0], [1], [0, 0, 1, 1], [], []>} : vector<6x128xbf16>, vector<128x256xbf16>, vector<6x256xf32> -> vector<6x256xf32>
    %7 = arith.addf %0, %6 : vector<6x256xf32>
    %c0_6 = arith.constant 0 : index
    %c1 = arith.constant 1 : index
    %c0_7 = arith.constant 0 : index
    %8 = vector.load %arg1[%c0_6, %c1, %c0_7] : memref<1x16x128xf32, #tpu.memory_space<vmem>>, vector<1x6x128xf32>
    %9 = vector.shape_cast %8 : vector<1x6x128xf32> to vector<6x128xf32>
    %10 = arith.truncf %9 : vector<6x128xf32> to vector<6x128xbf16>
    %c1_8 = arith.constant 1 : index
    %c0_9 = arith.constant 0 : index
    %c0_10 = arith.constant 0 : index
    %11 = vector.load %arg2[%c1_8, %c0_9, %c0_10] : memref<4x128x256xbf16, #tpu.memory_space<vmem>>, vector<1x128x256xbf16>
    %12 = vector.shape_cast %11 : vector<1x128x256xbf16> to vector<128x256xbf16>
    %cst_11 = arith.constant dense<0.000000e+00> : vector<6x256xf32>
    %13 = tpu.matmul %10, %12, %cst_11 {dimension_numbers = #tpu.dot_dimension_numbers<[1], [0], [0], [1], [0, 0, 1, 1], [], []>} : vector<6x128xbf16>, vector<128x256xbf16>, vector<6x256xf32> -> vector<6x256xf32>
    %14 = arith.addf %7, %13 : vector<6x256xf32>
    %c0_12 = arith.constant 0 : index
    %c3 = arith.constant 3 : index
    %c0_13 = arith.constant 0 : index
    %15 = vector.load %arg1[%c0_12, %c3, %c0_13] : memref<1x16x128xf32, #tpu.memory_space<vmem>>, vector<1x6x128xf32>
    %16 = vector.shape_cast %15 : vector<1x6x128xf32> to vector<6x128xf32>
    %17 = arith.truncf %16 : vector<6x128xf32> to vector<6x128xbf16>
    %c2 = arith.constant 2 : index
    %c0_14 = arith.constant 0 : index
    %c0_15 = arith.constant 0 : index
    %18 = vector.load %arg2[%c2, %c0_14, %c0_15] : memref<4x128x256xbf16, #tpu.memory_space<vmem>>, vector<1x128x256xbf16>
    %19 = vector.shape_cast %18 : vector<1x128x256xbf16> to vector<128x256xbf16>
    %cst_16 = arith.constant dense<0.000000e+00> : vector<6x256xf32>
    %20 = tpu.matmul %17, %19, %cst_16 {dimension_numbers = #tpu.dot_dimension_numbers<[1], [0], [0], [1], [0, 0, 1, 1], [], []>} : vector<6x128xbf16>, vector<128x256xbf16>, vector<6x256xf32> -> vector<6x256xf32>
    %21 = arith.addf %14, %20 : vector<6x256xf32>
    %c0_17 = arith.constant 0 : index
    %c4 = arith.constant 4 : index
    %c0_18 = arith.constant 0 : index
    %22 = vector.load %arg1[%c0_17, %c4, %c0_18] : memref<1x16x128xf32, #tpu.memory_space<vmem>>, vector<1x6x128xf32>
    %23 = vector.shape_cast %22 : vector<1x6x128xf32> to vector<6x128xf32>
    %24 = arith.truncf %23 : vector<6x128xf32> to vector<6x128xbf16>
    %c3_19 = arith.constant 3 : index
    %c0_20 = arith.constant 0 : index
    %c0_21 = arith.constant 0 : index
    %25 = vector.load %arg2[%c3_19, %c0_20, %c0_21] : memref<4x128x256xbf16, #tpu.memory_space<vmem>>, vector<1x128x256xbf16>
    %26 = vector.shape_cast %25 : vector<1x128x256xbf16> to vector<128x256xbf16>
    %cst_22 = arith.constant dense<0.000000e+00> : vector<6x256xf32>
    %27 = tpu.matmul %24, %26, %cst_22 {dimension_numbers = #tpu.dot_dimension_numbers<[1], [0], [0], [1], [0, 0, 1, 1], [], []>} : vector<6x128xbf16>, vector<128x256xbf16>, vector<6x256xf32> -> vector<6x256xf32>
    %28 = arith.addf %21, %27 : vector<6x256xf32>
    %c0_23 = arith.constant 0 : index
    %c0_24 = arith.constant 0 : index
    %29 = vector.load %arg3[%c0_23, %c0_24] : memref<1x256xf32, #tpu.memory_space<vmem>>, vector<1x256xf32>
    %30 = vector.broadcast %29 : vector<1x256xf32> to vector<6x256xf32>
    %31 = arith.addf %28, %30 : vector<6x256xf32>
    %cst_25 = arith.constant 0.000000e+00 : f32
    %32 = vector.broadcast %cst_25 : f32 to vector<6x256xf32>
    %33 = arith.maximumf %31, %32 : vector<6x256xf32>
    %34 = vector.extract_strided_slice %33 {offsets = [0, 0], sizes = [6, 128], strides = [1, 1]} : vector<6x256xf32> to vector<6x128xf32>
    %35 = vector.extract_strided_slice %33 {offsets = [0, 128], sizes = [6, 128], strides = [1, 1]} : vector<6x256xf32> to vector<6x128xf32>
    %36 = arith.maximumf %34, %35 : vector<6x128xf32>
    %c0_26 = arith.constant 0 : index
    %c0_27 = arith.constant 0 : index
    %c0_28 = arith.constant 0 : index
    %37 = vector.load %arg4[%c0_26, %c0_27, %c0_28] : memref<4x8x6xf32, #tpu.memory_space<vmem>>, vector<1x8x6xf32>
    %38 = vector.shape_cast %37 : vector<1x8x6xf32> to vector<8x6xf32>
    %cst_29 = arith.constant dense<0.000000e+00> : vector<8x128xf32>
    %39 = tpu.matmul %38, %36, %cst_29 {dimension_numbers = #tpu.dot_dimension_numbers<[1], [0], [0], [1], [0, 0, 1, 1], [], []>} : vector<8x6xf32>, vector<6x128xf32>, vector<8x128xf32> -> vector<8x128xf32>
    %c1_30 = arith.constant 1 : index
    %c0_31 = arith.constant 0 : index
    %c0_32 = arith.constant 0 : index
    %40 = vector.load %arg4[%c1_30, %c0_31, %c0_32] : memref<4x8x6xf32, #tpu.memory_space<vmem>>, vector<1x8x6xf32>
    %41 = vector.shape_cast %40 : vector<1x8x6xf32> to vector<8x6xf32>
    %cst_33 = arith.constant dense<0.000000e+00> : vector<8x128xf32>
    %42 = tpu.matmul %41, %36, %cst_33 {dimension_numbers = #tpu.dot_dimension_numbers<[1], [0], [0], [1], [0, 0, 1, 1], [], []>} : vector<8x6xf32>, vector<6x128xf32>, vector<8x128xf32> -> vector<8x128xf32>
    %43 = arith.maximumf %39, %42 : vector<8x128xf32>
    %c2_34 = arith.constant 2 : index
    %c0_35 = arith.constant 0 : index
    %c0_36 = arith.constant 0 : index
    %44 = vector.load %arg4[%c2_34, %c0_35, %c0_36] : memref<4x8x6xf32, #tpu.memory_space<vmem>>, vector<1x8x6xf32>
    %45 = vector.shape_cast %44 : vector<1x8x6xf32> to vector<8x6xf32>
    %cst_37 = arith.constant dense<0.000000e+00> : vector<8x128xf32>
    %46 = tpu.matmul %45, %36, %cst_37 {dimension_numbers = #tpu.dot_dimension_numbers<[1], [0], [0], [1], [0, 0, 1, 1], [], []>} : vector<8x6xf32>, vector<6x128xf32>, vector<8x128xf32> -> vector<8x128xf32>
    %47 = arith.maximumf %43, %46 : vector<8x128xf32>
    %c3_38 = arith.constant 3 : index
    %c0_39 = arith.constant 0 : index
    %c0_40 = arith.constant 0 : index
    %48 = vector.load %arg4[%c3_38, %c0_39, %c0_40] : memref<4x8x6xf32, #tpu.memory_space<vmem>>, vector<1x8x6xf32>
    %49 = vector.shape_cast %48 : vector<1x8x6xf32> to vector<8x6xf32>
    %cst_41 = arith.constant dense<0.000000e+00> : vector<8x128xf32>
    %50 = tpu.matmul %49, %36, %cst_41 {dimension_numbers = #tpu.dot_dimension_numbers<[1], [0], [0], [1], [0, 0, 1, 1], [], []>} : vector<8x6xf32>, vector<6x128xf32>, vector<8x128xf32> -> vector<8x128xf32>
    %51 = arith.maximumf %47, %50 : vector<8x128xf32>
    %c0_42 = arith.constant 0 : index
    %c0_43 = arith.constant 0 : index
    %c0_44 = arith.constant 0 : index
    %52 = vector.load %arg5[%c0_42, %c0_43, %c0_44] : memref<1x8x128xf32, #tpu.memory_space<vmem>>, vector<1x8x128xf32>
    %53 = vector.shape_cast %52 : vector<1x8x128xf32> to vector<8x128xf32>
    %54 = vector.shape_cast %51 : vector<8x128xf32> to vector<1x8x128xf32>
    tpu.vector_store %arg5[%c0_42, %c0_43, %c0_44], %54 {strides = array<i32>} : memref<1x8x128xf32, #tpu.memory_space<vmem>>, vector<1x8x128xf32>,
    return
  }
  func.func @transform_0(%arg0: i32) -> (i32, i32, i32) {
    %c0_i32 = arith.constant 0 : i32
    %c0_i32_0 = arith.constant 0 : i32
    %c0_i32_1 = arith.constant 0 : i32
    return %arg0, %c0_i32, %c0_i32_0 : i32, i32, i32
  }
  func.func @transform_1(%arg0: i32) -> (i32, i32, i32) {
    %c0_i32 = arith.constant 0 : i32
    %c0_i32_0 = arith.constant 0 : i32
    %c0_i32_1 = arith.constant 0 : i32
    %c0_i32_2 = arith.constant 0 : i32
    return %c0_i32, %c0_i32_0, %c0_i32_1 : i32, i32, i32
  }
  func.func @transform_2(%arg0: i32) -> (i32, i32) {
    %c0_i32 = arith.constant 0 : i32
    %c0_i32_0 = arith.constant 0 : i32
    %c0_i32_1 = arith.constant 0 : i32
    return %c0_i32, %c0_i32_0 : i32, i32
  }
  func.func @transform_3(%arg0: i32) -> (i32, i32, i32) {
    %c0_i32 = arith.constant 0 : i32
    %c0_i32_0 = arith.constant 0 : i32
    %c0_i32_1 = arith.constant 0 : i32
    %c0_i32_2 = arith.constant 0 : i32
    return %c0_i32, %c0_i32_0, %c0_i32_1 : i32, i32, i32
  }
  func.func @transform_4(%arg0: i32) -> (i32, i32, i32) {
    %c0_i32 = arith.constant 0 : i32
    %c0_i32_0 = arith.constant 0 : i32
    %c0_i32_1 = arith.constant 0 : i32
    return %arg0, %c0_i32, %c0_i32_0 : i32, i32, i32
  }
}

module attributes {stable_mosaic.version = 11 : i64} {
  func.func @_fc_kernel(%arg0: memref<2x128xf32, #tpu.memory_space<vmem>>, %arg1: memref<128x1000xbf16, #tpu.memory_space<vmem>>, %arg2: memref<1x1000xf32, #tpu.memory_space<vmem>>, %arg3: memref<1000x1000xbf16, #tpu.memory_space<vmem>>, %arg4: memref<1x1000xf32, #tpu.memory_space<vmem>>, %arg5: memref<1000x2xf32, #tpu.memory_space<vmem>>, %arg6: memref<1x2xf32, #tpu.memory_space<vmem>>, %arg7: memref<2x2xf32, #tpu.memory_space<vmem>>) attributes {dimension_semantics = [], scalar_prefetch = 0 : i64, scratch_operands = 0 : i64, tpu.core_type = #tpu.core_type<tc>} {
    %c0 = arith.constant 0 : index
    %c0_0 = arith.constant 0 : index
    %0 = vector.load %arg0[%c0, %c0_0] : memref<2x128xf32, #tpu.memory_space<vmem>>, vector<2x128xf32>
    %1 = arith.truncf %0 : vector<2x128xf32> to vector<2x128xbf16>
    %c0_1 = arith.constant 0 : index
    %c0_2 = arith.constant 0 : index
    %2 = vector.load %arg1[%c0_1, %c0_2] : memref<128x1000xbf16, #tpu.memory_space<vmem>>, vector<128x1000xbf16>
    %cst = arith.constant dense<0.000000e+00> : vector<2x1000xf32>
    %3 = tpu.matmul %1, %2, %cst {dimension_numbers = #tpu.dot_dimension_numbers<[1], [0], [0], [1], [0, 0, 1, 1], [], []>} : vector<2x128xbf16>, vector<128x1000xbf16>, vector<2x1000xf32> -> vector<2x1000xf32>
    %c0_3 = arith.constant 0 : index
    %c0_4 = arith.constant 0 : index
    %4 = vector.load %arg2[%c0_3, %c0_4] : memref<1x1000xf32, #tpu.memory_space<vmem>>, vector<1x1000xf32>
    %5 = vector.broadcast %4 : vector<1x1000xf32> to vector<2x1000xf32>
    %6 = arith.addf %3, %5 : vector<2x1000xf32>
    %cst_5 = arith.constant 0.000000e+00 : f32
    %7 = vector.broadcast %cst_5 : f32 to vector<2x1000xf32>
    %8 = arith.maximumf %6, %7 : vector<2x1000xf32>
    %9 = arith.truncf %8 : vector<2x1000xf32> to vector<2x1000xbf16>
    %c0_6 = arith.constant 0 : index
    %c0_7 = arith.constant 0 : index
    %10 = vector.load %arg3[%c0_6, %c0_7] : memref<1000x1000xbf16, #tpu.memory_space<vmem>>, vector<1000x1000xbf16>
    %cst_8 = arith.constant dense<0.000000e+00> : vector<2x1000xf32>
    %11 = tpu.matmul %9, %10, %cst_8 {dimension_numbers = #tpu.dot_dimension_numbers<[1], [0], [0], [1], [0, 0, 1, 1], [], []>} : vector<2x1000xbf16>, vector<1000x1000xbf16>, vector<2x1000xf32> -> vector<2x1000xf32>
    %c0_9 = arith.constant 0 : index
    %c0_10 = arith.constant 0 : index
    %12 = vector.load %arg4[%c0_9, %c0_10] : memref<1x1000xf32, #tpu.memory_space<vmem>>, vector<1x1000xf32>
    %13 = vector.broadcast %12 : vector<1x1000xf32> to vector<2x1000xf32>
    %14 = arith.addf %11, %13 : vector<2x1000xf32>
    %cst_11 = arith.constant 0.000000e+00 : f32
    %15 = vector.broadcast %cst_11 : f32 to vector<2x1000xf32>
    %16 = arith.maximumf %14, %15 : vector<2x1000xf32>
    %c0_12 = arith.constant 0 : index
    %c0_13 = arith.constant 0 : index
    %17 = vector.load %arg5[%c0_12, %c0_13] : memref<1000x2xf32, #tpu.memory_space<vmem>>, vector<1000x2xf32>
    %cst_14 = arith.constant dense<0.000000e+00> : vector<2x2xf32>
    %18 = tpu.matmul %16, %17, %cst_14 {dimension_numbers = #tpu.dot_dimension_numbers<[1], [0], [0], [1], [0, 0, 1, 1], [], []>} : vector<2x1000xf32>, vector<1000x2xf32>, vector<2x2xf32> -> vector<2x2xf32>
    %c0_15 = arith.constant 0 : index
    %c0_16 = arith.constant 0 : index
    %19 = vector.load %arg6[%c0_15, %c0_16] : memref<1x2xf32, #tpu.memory_space<vmem>>, vector<1x2xf32>
    %20 = vector.broadcast %19 : vector<1x2xf32> to vector<2x2xf32>
    %21 = arith.addf %18, %20 : vector<2x2xf32>
    %c0_17 = arith.constant 0 : index
    %c0_18 = arith.constant 0 : index
    %22 = vector.load %arg7[%c0_17, %c0_18] : memref<2x2xf32, #tpu.memory_space<vmem>>, vector<2x2xf32>
    tpu.vector_store %arg7[%c0_17, %c0_18], %21 {strides = array<i32>} : memref<2x2xf32, #tpu.memory_space<vmem>>, vector<2x2xf32>,
    return
  }
}

</mosaic_0001>

<bundles_post_ra>
// kernel: _lambda_.5
= control target key start
LH: loop header
LB: loop body
LE: loop exit
PB: predicated region body
PF: predicated region fallthrough
CT: control target
= control target key end

     0   :  { %s1810_s15 = smov 0   ;;  %s2138_s0 = inlined_call_operand.vmem [shape: f32[2,56,128], index: 0, kind: input, shape index: {}]   ;;  %s2139_s1 = inlined_call_operand.vmem [shape: bf16[4,128,256], index: 1, kind: input, shape index: {}]   ;;  %s2140_s2 = inlined_call_operand.vmem [shape: f32[1,256], index: 2, kind: input, shape index: {}]   ;;  %s2141_s3 = inlined_call_operand.vmem [shape: f32[4,16,42], index: 3, kind: input, shape index: {}]   ;;  %s2142_s4 = inlined_call_operand.vmem [shape: f32[2,16,128], index: 4, kind: output, shape index: {}]  }
   0x1 LB: > { %s1343_s16 = sadd.s32 4294967295, %s1781_s15   ;;  %p1347_p0 = scmp.ge.s32.totalorder %s1781_s15, 1  ;;  %s1781_s15 = sphi %s1810_s15, %s14_s15  }
   0x2   : > { %p162_p1 = scmp.lt.s32.totalorder %s1781_s15, 3 }
   0x4   : > { %p163_p2 = pnand %p1347_p0, %p162_p1 }
   0x5   : > { %v1679_v0 = vld [vmem:[%s2139_s1 + $0x4] ss:$8 sps:$4 sm:$0xff] (!%p163_p2)   ;;  %v1681_v1 = vld [vmem:[%s2139_s1] ss:$8 sps:$4 sm:$0xff] (!%p163_p2)   ;;  %v1783_v2 = vmov (!%p163_p2), 0   ;;  %p188_p3 = scmp.lt.s32.totalorder (!%p163_p2), %s1343_s16, 1 }
   0x6   : > { %166 = sbr.rel (%p163_p2) target bundleno = 600 (0x258), region = 36  ;;  %505 = vmatprep.mubr.bf16.mxu0 (!%p163_p2), %v1783_v2  ;;  %362 = vmatprep.mubr.bf16.mxu1 (!%p163_p2), %v1783_v2  ;;  %v1682_v3 = vld [vmem:[%s2139_s1 + $0x14] ss:$8 sps:$4 sm:$0xff] (!%p163_p2)   ;;  %v1684_v4 = vld [vmem:[%s2139_s1 + $0x10] ss:$8 sps:$4 sm:$0xff] (!%p163_p2)   ;;  %vm942_vm0 = vcmask (!%p163_p2), 343040  }
   0x7   : > { %473 = vmatprep.subr.bf16.mxu0 (!%p163_p2), %v1679_v0  ;;  %v1685_v5 = vld [vmem:[%s2139_s1 + $0x24] ss:$8 sps:$4 sm:$0xff] (!%p163_p2)   ;;  %v1687_v6 = vld [vmem:[%s2139_s1 + $0x20] ss:$8 sps:$4 sm:$0xff] (!%p163_p2)   ;;  %v1688_v7 = vld [vmem:[%s2139_s1 + $0x34] ss:$8 sps:$4 sm:$0xff] (!%p163_p2)  }
   0x8   : > { %474 = vmatpush1.bf16.msra.mxu0 (!%p163_p2), %v1681_v1  ;;  %v1690_v8 = vld [vmem:[%s2139_s1 + $0x30] ss:$8 sps:$4 sm:$0xff] (!%p163_p2)   ;;  %v1691_v9 = vld [vmem:[%s2139_s1 + $0x44] ss:$8 sps:$4 sm:$0xff] (!%p163_p2)   ;;  %v1693_v10 = vld [vmem:[%s2139_s1 + $0x40] ss:$8 sps:$4 sm:$0xff] (!%p163_p2)  }
   0x9   : > { %475 = vmatprep.subr.bf16.mxu0 (!%p163_p2), %v1682_v3  ;;  %v1694_v11 = vld [vmem:[%s2139_s1 + $0x54] ss:$8 sps:$4 sm:$0xff] (!%p163_p2)   ;;  %v1696_v12 = vld [vmem:[%s2139_s1 + $0x50] ss:$8 sps:$4 sm:$0xff] (!%p163_p2)   ;;  %v1697_v13 = vld [vmem:[%s2139_s1 + $0x64] ss:$8 sps:$4 sm:$0xff] (!%p163_p2)  }
   0xa   : > { %v1699_v14 = vld [vmem:[%s2139_s1 + $0x60] ss:$8 sps:$4 sm:$0xff] (!%p163_p2)   ;;  %v1700_v15 = vld [vmem:[%s2139_s1 + $0x74] ss:$8 sps:$4 sm:$0xff] (!%p163_p2)   ;;  %v1727_v16 = vld [vmem:[%s2139_s1 + $0x84] ss:$8 sps:$4 sm:$0xff] (!%p163_p2)  }
   0xb   : > { %v1729_v17 = vld [vmem:[%s2139_s1 + $0x80] ss:$8 sps:$4 sm:$0xff] (!%p163_p2)   ;;  %v1702_v18 = vld [vmem:[%s2139_s1 + $0x70] ss:$8 sps:$4 sm:$0xff] (!%p163_p2)   ;;  %330 = vmatprep.subr.bf16.mxu1 (!%p163_p2), %v1727_v16  ;;  %v1733_v19 = vld [vmem:[%s2139_s1 + $0x94] ss:$8 sps:$4 sm:$0xff] (!%p163_p2)  }
   0xc   : > { %476 = vmatpush1.bf16.msra.mxu0 (!%p163_p2), %v1684_v4  ;;  %331 = vmatpush1.bf16.msra.mxu1 (!%p163_p2), %v1729_v17  ;;  %v1735_v22 = vld [vmem:[%s2139_s1 + $0x90] ss:$8 sps:$4 sm:$0xff] (!%p163_p2)   ;;  %v1705_v23 = vld [vmem:[%s2139_s1 + $0x104] ss:$8 sps:$4 sm:$0xff] (!%p163_p2)   ;;  %v1703_v26 = vld [vmem:[%s2139_s1 + $0x100] ss:$8 sps:$4 sm:$0xff] (!%p163_p2)  }
   0xd   : > { %477 = vmatprep.subr.bf16.mxu0 %v1685_v5  ;;  %s2146_s16 = smov (!%p188_p3, %s1343_s16), 1  ;;  %332 = vmatprep.subr.bf16.mxu1 %v1733_v19  ;;  %v1739_v25 = vld [vmem:[%s2139_s1 + $0xa4] ss:$8 sps:$4 sm:$0xff]   ;;  %v1708_v27 = vld [vmem:[%s2139_s1 + $0x114] ss:$8 sps:$4 sm:$0xff]   ;;  %vm949_vm1 = vcmask 1041408  }
   0xe   : > { %s1668_s19 = smul.u32 56, %s2146_s16  ;;  %v1741_v28 = vld [vmem:[%s2139_s1 + $0xa0] ss:$8 sps:$4 sm:$0xff]   ;;  %v1745_v29 = vld [vmem:[%s2139_s1 + $0xb4] ss:$8 sps:$4 sm:$0xff]   ;;  %vm1784_vm2 = vmmov 1  }
   0xf   : > { %v1706_v30 = vld [vmem:[%s2139_s1 + $0x110] ss:$8 sps:$4 sm:$0xff]   ;;  %v1711_v33 = vld [vmem:[%s2139_s1 + $0x124] ss:$8 sps:$4 sm:$0xff]   ;;  %v1709_v37 = vld [vmem:[%s2139_s1 + $0x120] ss:$8 sps:$4 sm:$0xff]  }
  0x10   : > { %478 = vmatpush1.bf16.msra.mxu0 %v1687_v6  ;;  %s1871_s26 = scalar_lea.vmem %s2138_s0, %s1668_s19  ;;  %333 = vmatpush1.bf16.msra.mxu1 %v1735_v22  ;;  %v1747_v34 = vld [vmem:[%s2139_s1 + $0xb0] ss:$8 sps:$4 sm:$0xff]   ;;  %v1751_v35 = vld [vmem:[%s2139_s1 + $0xc4] ss:$8 sps:$4 sm:$0xff]   ;;  %v1714_v38 = vld [vmem:[%s2139_s1 + $0x134] ss:$8 sps:$4 sm:$0xff]  }
  0x11   : > { %479 = vmatprep.subr.bf16.mxu0 %v1688_v7  ;;  %v199_v20 = vld [vmem:[%s1871_s26] sm:$0xff]  ;;  %v1887_v21 = vld [vmem:[%s1871_s26 + $0x8] sm:$0xff]  ;;  %334 = vmatprep.subr.bf16.mxu1 %v1739_v25  ;;  %v1916_v31 = vld [vmem:[%s1871_s26 + $0x10] sm:$0xff]  ;;  %s1483_s27 = sshll.u32 %s2146_s16, 4 }
  0x12   : > { %v205_v24 = vpack.c.bf16 %v1887_v21, %v199_v20  ;;  %v1919_v32 = vld [vmem:[%s1871_s26 + $0x18] sm:$0xff]  ;;  %v1753_v39 = vld [vmem:[%s2139_s1 + $0xc0] ss:$8 sps:$4 sm:$0xff]   ;;  %v1717_v42 = vld [vmem:[%s2139_s1 + $0x144] ss:$8 sps:$4 sm:$0xff]   ;;  %s197_s30 = scalar_lea.vmem %s2142_s4, %s1483_s27 }
  0x13   : > { %v206_v36 = vpack.c.bf16 %v1919_v32, %v1916_v31  ;;  %v1757_v40 = vld [vmem:[%s2139_s1 + $0xd4] ss:$8 sps:$4 sm:$0xff]   ;;  %v1712_v41 = vld [vmem:[%s2139_s1 + $0x130] ss:$8 sps:$4 sm:$0xff]   ;;  %v1952_v43 = vld [vmem:[%s1871_s26 + $0x20] sm:$0xff] }
  0x14   : > { %480 = vmatpush1.bf16.msra.mxu0 %v1690_v8  ;;  %335 = vmatpush1.bf16.msra.mxu1 %v1741_v28  ;;  %v204_v44 = vld [vmem:[%s1871_s26 + $0x28] sm:$0x3]  ;;  %v1759_v45 = vld [vmem:[%s2139_s1 + $0xd0] ss:$8 sps:$4 sm:$0xff]   ;;  %v1763_v46 = vld [vmem:[%s2139_s1 + $0xe4] ss:$8 sps:$4 sm:$0xff]  }
  0x15   : > { %481 = vmatprep.subr.bf16.mxu0 %v1691_v9  ;;  %336 = vmatprep.subr.bf16.mxu1 %v1745_v29  ;;  %v207_v47 = vpack.c.bf16 %v204_v44, %v1952_v43  ;;  %v1715_v48 = vld [vmem:[%s2139_s1 + $0x140] ss:$8 sps:$4 sm:$0xff]   ;;  %v1720_v49 = vld [vmem:[%s2139_s1 + $0x154] ss:$8 sps:$4 sm:$0xff]   ;;  %v1718_v52 = vld [vmem:[%s2139_s1 + $0x150] ss:$8 sps:$4 sm:$0xff]  }
  0x16   : > { %v1765_v50 = vld [vmem:[%s2139_s1 + $0xe0] ss:$8 sps:$4 sm:$0xff]   ;;  %v1769_v51 = vld [vmem:[%s2139_s1 + $0xf4] ss:$8 sps:$4 sm:$0xff]   ;;  %v1723_v53 = vld [vmem:[%s2139_s1 + $0x164] ss:$8 sps:$4 sm:$0xff]  }
  0x17   : > { %v1771_v54 = vld [vmem:[%s2139_s1 + $0xf0] ss:$8 sps:$4 sm:$0xff]   ;;  %v224_v55 = vld [vmem:[%s1871_s26 + $0x1] sm:$0xff]  ;;  %v1726_v59 = vld [vmem:[%s2139_s1 + $0x174] ss:$8 sps:$4 sm:$0xff]  }
  0x18   : > { %482 = vmatpush1.bf16.msra.mxu0 %v1693_v10  ;;  %337 = vmatpush1.bf16.msra.mxu1 %v1747_v34  ;;  %v225_v56 = vld [vmem:[%s1871_s26 + $0x9] sm:$0xff]  ;;  %v226_v0 = vld [vmem:[%s1871_s26 + $0x11] sm:$0xff]  ;;  %v227_v1 = vld [vmem:[%s1871_s26 + $0x19] sm:$0xff] }
  0x19   : > { %483 = vmatprep.subr.bf16.mxu0 %v1694_v11  ;;  %338 = vmatprep.subr.bf16.mxu1 %v1751_v35  ;;  %v1721_v57 = vld [vmem:[%s2139_s1 + $0x160] ss:$8 sps:$4 sm:$0xff]   ;;  %v230_v58 = vpack.c.bf16 %v225_v56, %v224_v55  ;;  %v1724_v60 = vld [vmem:[%s2139_s1 + $0x170] ss:$8 sps:$4 sm:$0xff]   ;;  %v1732_v63 = vld [vmem:[%s2139_s1 + $0x184] ss:$8 sps:$4 sm:$0xff]   ;;  %v231_v6 = vpack.c.bf16 %v227_v1, %v226_v0 }
  0x1a   : > { %v536_v61 = vld [vmem:[%s1871_s26 + $0x7] sm:$0xff]  ;;  %v537_v62 = vld [vmem:[%s1871_s26 + $0xf] sm:$0xff]  ;;  %v538_v8 = vld [vmem:[%s1871_s26 + $0x17] sm:$0xff] }
  0x1b   : > { %v542_v3 = vpack.c.bf16 %v537_v62, %v536_v61  ;;  %v1730_v4 = vld [vmem:[%s2139_s1 + $0x180] ss:$8 sps:$4 sm:$0xff]   ;;  %v1738_v5 = vld [vmem:[%s2139_s1 + $0x194] ss:$8 sps:$4 sm:$0xff]   ;;  %v1736_v7 = vld [vmem:[%s2139_s1 + $0x190] ss:$8 sps:$4 sm:$0xff]  }
  0x1c   : > { %484 = vmatpush1.bf16.msra.mxu0 %v1696_v12  ;;  %339 = vmatpush1.bf16.msra.mxu1 %v1753_v39  ;;  %v539_v9 = vld [vmem:[%s1871_s26 + $0x1f] sm:$0xff]  ;;  %v229_v12 = vld [vmem:[%s1871_s26 + $0x29] sm:$0x3]  ;;  %v1748_v17 = vld [vmem:[%s2139_s1 + $0x1b0] ss:$8 sps:$4 sm:$0xff]  }
  0x1d   : > { %485 = vmatprep.subr.bf16.mxu0 %v1697_v13  ;;  %340 = vmatprep.subr.bf16.mxu1 %v1757_v40  ;;  %v1744_v10 = vld [vmem:[%s2139_s1 + $0x1a4] ss:$8 sps:$4 sm:$0xff]   ;;  %v543_v13 = vpack.c.bf16 %v539_v9, %v538_v8  ;;  %v1760_v25 = vld [vmem:[%s2139_s1 + $0x1d0] ss:$8 sps:$4 sm:$0xff]   ;;  %v1774_v28 = vld [vmem:[%s2139_s1 + $0x1f4] ss:$8 sps:$4 sm:$0xff]  }
  0x1e   : > { %v228_v11 = vld [vmem:[%s1871_s26 + $0x21] sm:$0xff]  ;;  %v541_v19 = vld [vmem:[%s1871_s26 + $0x2f] sm:$0x3]  ;;  %vm2077_vm3 = vmpackc.low %vm949_vm1, %vm1784_vm2 }
  0x1f   : > { %v232_v16 = vpack.c.bf16 %v229_v12, %v228_v11  ;;  %v1756_v20 = vld [vmem:[%s2139_s1 + $0x1c4] ss:$8 sps:$4 sm:$0xff]   ;;  %v1772_v29 = vld [vmem:[%s2139_s1 + $0x1f0] ss:$8 sps:$4 sm:$0xff]  }
  0x20   : > { %486 = vmatpush1.bf16.msra.mxu0 %v1699_v14  ;;  %341 = vmatpush1.bf16.msra.mxu1 %v1759_v45  ;;  %v1742_v14 = vld [vmem:[%s2139_s1 + $0x1a0] ss:$8 sps:$4 sm:$0xff]   ;;  %v722_v35 = vld [vmem:[%s1871_s26 + $0x30] sm:$0x3] }
  0x21   : > { %487 = vmatprep.subr.bf16.mxu0 %v1700_v15  ;;  %342 = vmatprep.subr.bf16.mxu1 %v1763_v46  ;;  %v1750_v15 = vld [vmem:[%s2139_s1 + $0x1b4] ss:$8 sps:$4 sm:$0xff]   ;;  %v721_v34 = vld [vmem:[%s1871_s26 + $0x28] sm:$0xff]  ;;  %v900_v46 = vlaneseq }
  0x24   : > { %488 = vmatpush1.bf16.msra.mxu0 %v1702_v18  ;;  %343 = vmatpush1.bf16.msra.mxu1 %v1765_v50  ;;  %v540_v18 = vld [vmem:[%s1871_s26 + $0x27] sm:$0xff] }
  0x25   : > { %642 = vmatprep.subr.bf16.mxu0 %v1705_v23  ;;  %344 = vmatprep.subr.bf16.mxu1 %v1769_v51  ;;  %v544_v22 = vpack.c.bf16 %v541_v19, %v540_v18  ;;  %v1754_v23 = vld [vmem:[%s2139_s1 + $0x1c0] ss:$8 sps:$4 sm:$0xff]  }
  0x27   : > { %506 = vmatmul.mubr.bf16.vlgmr.msra.gmra.mrb[0].mxu0 %v205_v24  ;;  %v1762_v24 = vld [vmem:[%s2139_s1 + $0x1d4] ss:$8 sps:$4 sm:$0xff]  }
  0x28   : > { %643 = vmatpush1.bf16.msra.mxu0 %v1703_v26  ;;  %515 = vmatprep.mubr.bf16.mxu0 %v1783_v2  ;;  %v1768_v26 = vld [vmem:[%s2139_s1 + $0x1e4] ss:$8 sps:$4 sm:$0xff]  }
  0x29   : > { %644 = vmatprep.subr.bf16.mxu0 %v1708_v27  ;;  %345 = vmatpush1.bf16.msra.mxu1 %v1771_v54  ;;  %v1766_v27 = vld [vmem:[%s2139_s1 + $0x1e0] ss:$8 sps:$4 sm:$0xff]  }
  0x2c   : > { %645 = vmatpush1.bf16.msra.mxu0 %v1706_v30  ;;  %363 = vmatmul.mubr.bf16.vlgmr.msra.gmra.mrb[0].mxu1 %v230_v58  ;;  %v723_v30 = vpack.c.bf16 %v1916_v31, %v1887_v21 }
  0x2d   : > { %646 = vmatprep.subr.bf16.mxu0 %v1711_v33  ;;  %372 = vmatprep.mubr.bf16.mxu1 %v1783_v2  ;;  %v724_v33 = vpack.c.bf16 %v1952_v43, %v1919_v32 }
  0x2f   : > { %516 = vmatmul.mubr.bf16.gmra.mrb[4].mxu0 %v206_v36  ;;  %v725_v36 = vpack.c.bf16 %v722_v35, %v721_v34 }
  0x30   : > { %647 = vmatpush1.bf16.msra.mxu0 %v1709_v37  ;;  %525 = vmatprep.mubr.bf16.mxu0 %v1783_v2  ;;  %v940_v37 = vld [vmem:[%s2141_s3] sm:$0xff] }
  0x31   : > { %648 = vmatprep.subr.bf16.mxu0 %v1714_v38 }
  0x34   : > { %649 = vmatpush1.bf16.msra.mxu0 %v1712_v41  ;;  %373 = vmatmul.mubr.bf16.gmra.mrb[4].mxu1 %v231_v6 }
  0x35   : > { %650 = vmatprep.subr.bf16.mxu0 %v1717_v42  ;;  %382 = vmatprep.mubr.bf16.mxu1 %v1783_v2 }
  0x37   : > { %526 = vmatmul.mubr.bf16.gmra.mrb[8].mxu0 %v207_v47  ;;  %v901_v47 = vshrl.u32 %v900_v46, 7 }
  0x38   : > { %651 = vmatpush1.bf16.msra.mxu0 %v1715_v48  ;;  %674 = vmatprep.mubr.bf16.mxu0 %v1783_v2 }
  0x39   : > { %652 = vmatprep.subr.bf16.mxu0 %v1720_v49  ;;  %v902_v48 = vsub.s32 0, %v901_v47  ;;  %v898_v49 = vld [vmem:[%s2140_s2] sm:$0x3]  ;;  %v906_v50 = vsub.s32 1, %v901_v47 }
  0x3b   : > { %v903_v51 = vrot.slane %v898_v49, %v902_v48  ;;  %v1466_v48 = vld [vmem:[%s2141_s3 + $0x10] sm:$0xff] }
  0x3c   : > { %653 = vmatpush1.bf16.msra.mxu0 %v1718_v52  ;;  %383 = vmatmul.mubr.bf16.gmra.mrb[8].mxu1 %v232_v16 }
  0x3d   : > { %654 = vmatprep.subr.bf16.mxu0 %v1723_v53  ;;  %1528 = vmatprep.mubr.msk.f32.mxu1 %vm942_vm0, %v940_v37  ;;  %v907_v53 = vrot.slane %v898_v49, %v906_v50  ;;  %v1467_v49 = vld [vmem:[%s2141_s3 + $0x18] sm:$0xff]  ;;  %v1471_v50 = vld [vmem:[%s2141_s3 + $0x20] sm:$0xff] }
  0x40   : > { %655 = vmatpush1.bf16.msra.mxu0 %v1721_v57 }
  0x41   : > { %656 = vmatprep.subr.bf16.mxu0 %v1726_v59 }
  0x44   : > { %657 = vmatpush1.bf16.msra.mxu0 %v1724_v60 }
  0x45   : > { %823 = vmatprep.subr.bf16.mxu0 %v1732_v63 }
  0x47   : > { %675 = vmatmul.mubr.bf16.vlgmr.msra.gmra.mrb[0].mxu0 %v542_v3 }
  0x48   : > { %824 = vmatpush1.bf16.msra.mxu0 %v1730_v4  ;;  %684 = vmatprep.mubr.bf16.mxu0 %v1783_v2 }
  0x49   : > { %825 = vmatprep.subr.bf16.mxu0 %v1738_v5 }
  0x4c   : > { %826 = vmatpush1.bf16.msra.mxu0 %v1736_v7 }
  0x4d   : > { %827 = vmatprep.subr.bf16.mxu0 %v1744_v10 }
  0x4f   : > { %685 = vmatmul.mubr.bf16.gmra.mrb[4].mxu0 %v543_v13 }
  0x50   : > { %828 = vmatpush1.bf16.msra.mxu0 %v1742_v14  ;;  %694 = vmatprep.mubr.bf16.mxu0 %v1783_v2 }
  0x51   : > { %829 = vmatprep.subr.bf16.mxu0 %v1750_v15 }
  0x54   : > { %830 = vmatpush1.bf16.msra.mxu0 %v1748_v17 }
  0x55   : > { %831 = vmatprep.subr.bf16.mxu0 %v1756_v20 }
  0x57   : > { %695 = vmatmul.mubr.bf16.gmra.mrb[8].mxu0 %v544_v22 }
  0x58   : > { %832 = vmatpush1.bf16.msra.mxu0 %v1754_v23  ;;  %855 = vmatprep.mubr.bf16.mxu0 %v1783_v2 }
  0x59   : > { %833 = vmatprep.subr.bf16.mxu0 %v1762_v24 }
  0x5c   : > { %834 = vmatpush1.bf16.msra.mxu0 %v1760_v25 }
  0x5d   : > { %835 = vmatprep.subr.bf16.mxu0 %v1768_v26 }
  0x60   : > { %836 = vmatpush1.bf16.msra.mxu0 %v1766_v27 }
  0x61   : > { %837 = vmatprep.subr.bf16.mxu0 %v1774_v28 }
  0x64   : > { %838 = vmatpush1.bf16.msra.mxu0 %v1772_v29 }
  0x67   : > { %856 = vmatmul.mubr.bf16.vlgmr.msra.gmra.mrb[0].mxu0 %v723_v30 }
  0x68   : > { %865 = vmatprep.mubr.bf16.mxu0 %v1783_v2 }
  0x6f   : > { %866 = vmatmul.mubr.bf16.gmra.mrb[4].mxu0 %v724_v33 }
  0x70   : > { %875 = vmatprep.mubr.bf16.mxu0 %v1783_v2 }
  0x77   : > { %876 = vmatmul.mubr.bf16.gmra.mrb[8].mxu0 %v725_v36 }
  0xff   : > { %v364_v21 = vpop.f32.mrb[0].mxu1 }
 0x100   : > { %v366_v31 = vpop.f32.mrb[1].mxu1 }
 0x101   : > { %v368_v38 = vpop.f32.mrb[2].mxu1 }
 0x102   : > { %v370_v39 = vpop.f32.mrb[3].mxu1 }
 0x107   : > { %v374_v40 = vpop.f32.mrb[4].mxu1 }
 0x108   : > { %v376_v32 = vpop.f32.mrb[5].mxu1 }
 0x109   : > { %v378_v41 = vpop.f32.mrb[6].mxu1 }
 0x10a   : > { %v380_v42 = vpop.f32.mrb[7].mxu1 }
 0x10f   : > { %v384_v2 = vpop.f32.mrb[8].mxu1 }
 0x110   : > { %v386_v43 = vpop.f32.mrb[9].mxu1 }
 0x111   : > { %v388_v44 = vpop.f32.mrb[10].mxu1 }
 0x112   : > { %v390_v45 = vpop.f32.mrb[11].mxu1 }
 0x13a   : > { %v857_v52 = vpop.f32.mrb[0].mxu0 }
 0x13b   : > { %v1632_v54 = vadd.f32 %v857_v52, %v364_v21  ;;  %v859_v55 = vpop.f32.mrb[1].mxu0  ;;  %v1476_v52 = vld [vmem:[%s2141_s3 + $0x30] sm:$0xff] }
 0x13c   : > { %v1633_v56 = vadd.f32 %v859_v55, %v366_v31  ;;  %v861_v57 = vpop.f32.mrb[2].mxu0 }
 0x13d   : > { %v910_v58 = vadd.f32 %v1632_v54, %v903_v51  ;;  %v1634_v59 = vadd.f32 %v861_v57, %v368_v38  ;;  %v863_v60 = vpop.f32.mrb[3].mxu0 }
 0x13e   : > { %v911_v61 = vadd.f32 %v1633_v56, %v907_v53  ;;  %v1635_v62 = vadd.f32 %v863_v60, %v370_v39 }
 0x13f   : > { %v922_v63 = vmax.f32 %v910_v58, 0.0  ;;  %v912_v0 = vadd.f32 %v1634_v59, %v903_v51 }
 0x140   : > { %v923_v1 = vmax.f32 %v911_v61, 0.0  ;;  %v913_v3 = vadd.f32 %v1635_v62, %v907_v53 }
 0x141   : > { %v924_v4 = vmax.f32 %v912_v0, 0.0 }
 0x142   : > { %v934_v5 = vmax.f32 %v922_v63, %v923_v1  ;;  %v925_v6 = vmax.f32 %v913_v3, 0.0  ;;  %v867_v7 = vpop.f32.mrb[4].mxu0 }
 0x143   : > { %v1636_v8 = vadd.f32 %v867_v7, %v374_v40  ;;  %v869_v9 = vpop.f32.mrb[5].mxu0 }
 0x144   : > { %v935_v10 = vmax.f32 %v924_v4, %v925_v6  ;;  %v1637_v11 = vadd.f32 %v869_v9, %v376_v32  ;;  %v871_v12 = vpop.f32.mrb[6].mxu0 }
 0x145   : > { %v914_v13 = vadd.f32 %v1636_v8, %v903_v51  ;;  %v1638_v14 = vadd.f32 %v871_v12, %v378_v41  ;;  %v873_v15 = vpop.f32.mrb[7].mxu0 }
 0x146   : > { %v2073_v16 = vpack.c.bf16 %v935_v10, %v934_v5  ;;  %v915_v17 = vadd.f32 %v1637_v11, %v907_v53  ;;  %v1639_v18 = vadd.f32 %v873_v15, %v380_v42 }
 0x147   : > { %v926_v19 = vmax.f32 %v914_v13, 0.0  ;;  %v916_v20 = vadd.f32 %v1638_v14, %v903_v51 }
 0x148   : > { %v927_v22 = vmax.f32 %v915_v17, 0.0  ;;  %v917_v23 = vadd.f32 %v1639_v18, %v907_v53  ;;  %1577 = vmatprep.subr.bf16.mxu1 %v2073_v16 }
 0x149   : > { %v928_v24 = vmax.f32 %v916_v20, 0.0  ;;  %1579 = vmatpush3.bf16.msra.mxu1 %v2073_v16 }
 0x14a   : > { %v936_v25 = vmax.f32 %v926_v19, %v927_v22  ;;  %v929_v26 = vmax.f32 %v917_v23, 0.0  ;;  %v877_v27 = vpop.f32.mrb[8].mxu0 }
 0x14b   : > { %v1640_v28 = vadd.f32 %v877_v27, %v384_v2  ;;  %v879_v29 = vpop.f32.mrb[9].mxu0 }
 0x14c   : > { %v937_v30 = vmax.f32 %v928_v24, %v929_v26  ;;  %v1641_v33 = vadd.f32 %v879_v29, %v386_v43  ;;  %v881_v34 = vpop.f32.mrb[10].mxu0 }
 0x14d   : > { %v918_v35 = vadd.f32 %v1640_v28, %v903_v51  ;;  %v1642_v36 = vadd.f32 %v881_v34, %v388_v44  ;;  %v883_v37 = vpop.f32.mrb[11].mxu0 }
 0x14e   : > { %v1580_v21 = vpack.c.bf16 %v937_v30, %v936_v25  ;;  %v919_v31 = vadd.f32 %v1641_v33, %v907_v53  ;;  %v1643_v38 = vadd.f32 %v883_v37, %v390_v45  ;;  %v941_v45 = vld [vmem:[%s2141_s3 + $0x8] sm:$0xff] }
 0x14f   : > { %v930_v39 = vmax.f32 %v918_v35, 0.0  ;;  %v920_v40 = vadd.f32 %v1642_v36, %v903_v51  ;;  %v1472_v51 = vld [vmem:[%s2141_s3 + $0x28] sm:$0xff] }
 0x150   : > { %v931_v32 = vmax.f32 %v919_v31, 0.0  ;;  %v921_v41 = vadd.f32 %v1643_v38, %v907_v53  ;;  %1581 = vmatprep.subr.bf16.mxu1 %v1580_v21  ;;  %v1477_v53 = vld [vmem:[%s2141_s3 + $0x38] sm:$0xff] }
 0x151   : > { %v932_v42 = vmax.f32 %v920_v40, 0.0  ;;  %1583 = vmatpush3.bf16.msra.mxu1 %v1580_v21 }
 0x152   : > { %v938_v46 = vmax.f32 %v930_v39, %v931_v32  ;;  %v933_v47 = vmax.f32 %v921_v41, 0.0 }
 0x154   : > { %v939_v2 = vmax.f32 %v932_v42, %v933_v47 }
 0x156   : > { %v1584_v44 = vpack.c.bf16 %v939_v2, %v938_v46 }
 0x158   : > { %1586 = vmatprep.subr.msk.bf16.mxu1 %vm2077_vm3, %v1584_v44 }
 0x159   : > { %1589 = vmatpush3.bf16.msk.msra.mxu1 %vm2077_vm3, %v1584_v44 }
 0x15a   : > { %1591 = vmatprep.subr.bf16.mxu1 %v2073_v16 }
 0x15c   : > { %1529 = vmatmul.mubr.msk.f32.vlgmr.msra.gmra.mrb[12].mxu1 %vm942_vm0, %v941_v45 }
 0x15d   : > { %1593 = vmatpush3.bf16.msra.mxu1 %v2073_v16  ;;  %1543 = vmatprep.mubr.msk.f32.mxu1 %vm942_vm0, %v1466_v48 }
 0x15e   : > { %1595 = vmatprep.subr.bf16.mxu1 %v1580_v21 }
 0x161   : > { %1597 = vmatpush3.bf16.msra.mxu1 %v1580_v21 }
 0x162   : > { %1600 = vmatprep.subr.msk.bf16.mxu1 %vm2077_vm3, %v1584_v44 }
 0x165   : > { %1603 = vmatpush3.bf16.msk.msra.mxu1 %vm2077_vm3, %v1584_v44 }
 0x166   : > { %1605 = vmatprep.subr.bf16.mxu1 %v2073_v16 }
 0x168   : > { %1544 = vmatmul.mubr.msk.f32.vlgmr.msra.gmra.mrb[14].mxu1 %vm942_vm0, %v1467_v49 }
 0x169   : > { %1607 = vmatpush3.bf16.msra.mxu1 %v2073_v16  ;;  %1558 = vmatprep.mubr.msk.f32.mxu1 %vm942_vm0, %v1471_v50 }
 0x16a   : > { %1609 = vmatprep.subr.bf16.mxu1 %v1580_v21 }
 0x16d   : > { %1611 = vmatpush3.bf16.msra.mxu1 %v1580_v21 }
 0x16e   : > { %1614 = vmatprep.subr.msk.bf16.mxu1 %vm2077_vm3, %v1584_v44 }
 0x171   : > { %1617 = vmatpush3.bf16.msk.msra.mxu1 %vm2077_vm3, %v1584_v44 }
 0x172   : > { %1619 = vmatprep.subr.bf16.mxu1 %v2073_v16 }
 0x174   : > { %1559 = vmatmul.mubr.msk.f32.vlgmr.msra.gmra.mrb[16].mxu1 %vm942_vm0, %v1472_v51 }
 0x175   : > { %1621 = vmatpush3.bf16.msra.mxu1 %v2073_v16  ;;  %1573 = vmatprep.mubr.msk.f32.mxu1 %vm942_vm0, %v1476_v52 }
 0x176   : > { %1623 = vmatprep.subr.bf16.mxu1 %v1580_v21 }
 0x179   : > { %1625 = vmatpush3.bf16.msra.mxu1 %v1580_v21 }
 0x17a   : > { %1628 = vmatprep.subr.msk.bf16.mxu1 %vm2077_vm3, %v1584_v44 }
 0x17d   : > { %1631 = vmatpush3.bf16.msk.msra.mxu1 %vm2077_vm3, %v1584_v44 }
 0x180   : > { %1574 = vmatmul.mubr.msk.f32.vlgmr.msra.gmra.mrb[18].mxu1 %vm942_vm0, %v1477_v53 }
 0x22f   : > { %v1530_v54 = vpop.f32.mrb[12].mxu1 }
 0x230   : > { %v1019_v55 = vpop.f32.mrb[13].mxu1 }
 0x23b   : > { %v1545_v56 = vpop.f32.mrb[14].mxu1 }
 0x23c   : > { %v1113_v57 = vmax.f32 %v1530_v54, %v1545_v56  ;;  %v1103_v58 = vpop.f32.mrb[15].mxu1 }
 0x23d   : > { %v1112_v59 = vmax.f32 %v1019_v55, %v1103_v58 }
 0x247   : > { %v1560_v60 = vpop.f32.mrb[16].mxu1 }
 0x248   : > { %v1199_v61 = vmax.f32 %v1113_v57, %v1560_v60  ;;  %v1189_v62 = vpop.f32.mrb[17].mxu1 }
 0x249   : > { %v1198_v63 = vmax.f32 %v1112_v59, %v1189_v62 }
 0x253   : > { %v1575_v0 = vpop.f32.mrb[18].mxu1 }
 0x254   : > { %v1285_v1 = vmax.f32 %v1199_v61, %v1575_v0  ;;  %v1275_v3 = vpop.f32.mrb[19].mxu1 }
 0x255   : > { %v1284_v4 = vmax.f32 %v1198_v63, %v1275_v3 }
 0x256   : > { %1287 = vst [vmem:[%s197_s30 + $0x8] sm:$0xff] %v1285_v1 }
 0x257   : > { %1286 = vst [vmem:[%s197_s30] sm:$0xff] %v1284_v4 }
 0x258 PF: > { %s14_s15 = sadd.s32 1, %s1781_s15  }
 0x259   : > { %p11_p4 = scmp.ge.s32.totalorder %s14_s15, 4  }
 0x25b   :  { %13 = sbr.rel (!%p11_p4) target bundleno = 1 (0x1), region = 72 }

// kernel: _lambda_.4
= control target key start
LH: loop header
LB: loop body
LE: loop exit
PB: predicated region body
PF: predicated region fallthrough
CT: control target
= control target key end

     0   :  { %s3101_s15 = smov 0   ;;  %s4121_s0 = inlined_call_operand.vmem [shape: f32[2,264,128], index: 0, kind: input, shape index: {}]   ;;  %s4122_s1 = inlined_call_operand.vmem [shape: bf16[4,128,256], index: 1, kind: input, shape index: {}]   ;;  %s4123_s2 = inlined_call_operand.vmem [shape: f32[1,256], index: 2, kind: input, shape index: {}]   ;;  %s4124_s3 = inlined_call_operand.vmem [shape: f32[4,56,240], index: 3, kind: input, shape index: {}]   ;;  %s4125_s4 = inlined_call_operand.vmem [shape: f32[2,56,128], index: 4, kind: output, shape index: {}]  }
   0x1 LB: > { %s2407_s16 = sadd.s32 4294967295, %s3072_s15   ;;  %p2411_p0 = scmp.ge.s32.totalorder %s3072_s15, 1  ;;  %s3072_s15 = sphi %s3101_s15, %s14_s15  }
   0x2   : > { %p162_p1 = scmp.lt.s32.totalorder %s3072_s15, 3 }
   0x4   : > { %p163_p2 = pnand %p2411_p0, %p162_p1 }
   0x6   : > { %166 = sbr.rel (%p163_p2) target bundleno = 1046 (0x416), region = 36 }
   0xd   : > { %v2970_v0 = vld [vmem:[%s4122_s1 + $0x4] ss:$8 sps:$4 sm:$0xff]   ;;  %v2972_v1 = vld [vmem:[%s4122_s1] ss:$8 sps:$4 sm:$0xff]   ;;  %v3074_v2 = vmov 0   ;;  %p188_p3 = scmp.lt.s32.totalorder %s2407_s16, 1 }
   0xe   : > { %697 = vmatprep.mubr.bf16.mxu0 %v3074_v2  ;;  %434 = vmatprep.mubr.bf16.mxu1 %v3074_v2  ;;  %v2973_v3 = vld [vmem:[%s4122_s1 + $0x14] ss:$8 sps:$4 sm:$0xff]   ;;  %v2975_v4 = vld [vmem:[%s4122_s1 + $0x10] ss:$8 sps:$4 sm:$0xff]   ;;  %v2976_v5 = vld [vmem:[%s4122_s1 + $0x24] ss:$8 sps:$4 sm:$0xff]  }
   0xf   : > { %665 = vmatprep.subr.bf16.mxu0 %v2970_v0  ;;  %v2978_v6 = vld [vmem:[%s4122_s1 + $0x20] ss:$8 sps:$4 sm:$0xff]   ;;  %v2979_v7 = vld [vmem:[%s4122_s1 + $0x34] ss:$8 sps:$4 sm:$0xff]   ;;  %v2981_v8 = vld [vmem:[%s4122_s1 + $0x30] ss:$8 sps:$4 sm:$0xff]  }
  0x10   : > { %666 = vmatpush1.bf16.msra.mxu0 %v2972_v1  ;;  %v2982_v9 = vld [vmem:[%s4122_s1 + $0x44] ss:$8 sps:$4 sm:$0xff]   ;;  %v2984_v10 = vld [vmem:[%s4122_s1 + $0x40] ss:$8 sps:$4 sm:$0xff]   ;;  %v2985_v11 = vld [vmem:[%s4122_s1 + $0x54] ss:$8 sps:$4 sm:$0xff]  }
  0x11   : > { %667 = vmatprep.subr.bf16.mxu0 %v2973_v3  ;;  %s4158_s16 = smov (!%p188_p3, %s2407_s16), 1  ;;  %v2987_v12 = vld [vmem:[%s4122_s1 + $0x50] ss:$8 sps:$4 sm:$0xff]   ;;  %v2988_v13 = vld [vmem:[%s4122_s1 + $0x64] ss:$8 sps:$4 sm:$0xff]   ;;  %vm1794_vm0 = vcmask 916480  }
  0x12   : > { %s2958_s19 = smul.u32 264, %s4158_s16  ;;  %v2990_v14 = vld [vmem:[%s4122_s1 + $0x60] ss:$8 sps:$4 sm:$0xff]   ;;  %v2991_v15 = vld [vmem:[%s4122_s1 + $0x74] ss:$8 sps:$4 sm:$0xff]  }
  0x13   : > { %v2993_v16 = vld [vmem:[%s4122_s1 + $0x70] ss:$8 sps:$4 sm:$0xff]   ;;  %v2996_v19 = vld [vmem:[%s4122_s1 + $0x104] ss:$8 sps:$4 sm:$0xff]   ;;  %v2994_v21 = vld [vmem:[%s4122_s1 + $0x100] ss:$8 sps:$4 sm:$0xff]  }
  0x14   : > { %668 = vmatpush1.bf16.msra.mxu0 %v2975_v4  ;;  %s3162_s26 = scalar_lea.vmem %s4121_s0, %s2958_s19  ;;  %v2999_v22 = vld [vmem:[%s4122_s1 + $0x114] ss:$8 sps:$4 sm:$0xff]   ;;  %v2997_v25 = vld [vmem:[%s4122_s1 + $0x110] ss:$8 sps:$4 sm:$0xff]   ;;  %v3002_v26 = vld [vmem:[%s4122_s1 + $0x124] ss:$8 sps:$4 sm:$0xff]  }
  0x15   : > { %669 = vmatprep.subr.bf16.mxu0 %v2976_v5  ;;  %v199_v17 = vld [vmem:[%s3162_s26] sm:$0xff]  ;;  %v200_v18 = vld [vmem:[%s3162_s26 + $0x8] sm:$0xff]  ;;  %v201_v23 = vld [vmem:[%s3162_s26 + $0x10] sm:$0xff]  ;;  %s2959_s27 = smul.u32 56, %s4158_s16 }
  0x16   : > { %v229_v20 = vpack.c.bf16 %v200_v18, %v199_v17  ;;  %v202_v24 = vld [vmem:[%s3162_s26 + $0x18] sm:$0xff]  ;;  %v3000_v27 = vld [vmem:[%s4122_s1 + $0x120] ss:$8 sps:$4 sm:$0xff]   ;;  %v3008_v33 = vld [vmem:[%s4122_s1 + $0x144] ss:$8 sps:$4 sm:$0xff]  }
  0x17   : > { %v3190_v28 = vpack.c.bf16 %v202_v24, %v201_v23  ;;  %v3005_v29 = vld [vmem:[%s4122_s1 + $0x134] ss:$8 sps:$4 sm:$0xff]   ;;  %v203_v30 = vld [vmem:[%s3162_s26 + $0x20] sm:$0xff]  ;;  %v204_v31 = vld [vmem:[%s3162_s26 + $0x28] sm:$0xff]  ;;  %s197_s30 = scalar_lea.vmem %s4125_s4, %s2959_s27 }
  0x18   : > { %670 = vmatpush1.bf16.msra.mxu0 %v2978_v6  ;;  %v3003_v32 = vld [vmem:[%s4122_s1 + $0x130] ss:$8 sps:$4 sm:$0xff]   ;;  %v3205_v34 = vpack.c.bf16 %v204_v31, %v203_v30  ;;  %v3006_v35 = vld [vmem:[%s4122_s1 + $0x140] ss:$8 sps:$4 sm:$0xff]   ;;  %v3011_v36 = vld [vmem:[%s4122_s1 + $0x154] ss:$8 sps:$4 sm:$0xff]  }
  0x19   : > { %671 = vmatprep.subr.bf16.mxu0 %v2979_v7  ;;  %v205_v37 = vld [vmem:[%s3162_s26 + $0x30] sm:$0xff]  ;;  %v206_v38 = vld [vmem:[%s3162_s26 + $0x38] sm:$0xff]  ;;  %v3014_v40 = vld [vmem:[%s4122_s1 + $0x164] ss:$8 sps:$4 sm:$0xff]  }
  0x1a   : > { %v3009_v39 = vld [vmem:[%s4122_s1 + $0x150] ss:$8 sps:$4 sm:$0xff]   ;;  %v3223_v41 = vpack.c.bf16 %v206_v38, %v205_v37  ;;  %v3012_v42 = vld [vmem:[%s4122_s1 + $0x160] ss:$8 sps:$4 sm:$0xff]   ;;  %v3017_v43 = vld [vmem:[%s4122_s1 + $0x174] ss:$8 sps:$4 sm:$0xff]  }
  0x1b   : > { %v207_v44 = vld [vmem:[%s3162_s26 + $0x40] sm:$0xff]  ;;  %v208_v45 = vld [vmem:[%s3162_s26 + $0x48] sm:$0xff]  ;;  %v3015_v46 = vld [vmem:[%s4122_s1 + $0x170] ss:$8 sps:$4 sm:$0xff]  }
  0x1c   : > { %672 = vmatpush1.bf16.msra.mxu0 %v2981_v8  ;;  %v3020_v47 = vld [vmem:[%s4122_s1 + $0x184] ss:$8 sps:$4 sm:$0xff]   ;;  %v3241_v48 = vpack.c.bf16 %v208_v45, %v207_v44  ;;  %v209_v49 = vld [vmem:[%s3162_s26 + $0x50] sm:$0xff]  ;;  %v210_v50 = vld [vmem:[%s3162_s26 + $0x58] sm:$0xff] }
  0x1d   : > { %673 = vmatprep.subr.bf16.mxu0 %v2982_v9  ;;  %v3247_v51 = vpack.c.bf16 %v210_v50, %v209_v49  ;;  %v211_v52 = vld [vmem:[%s3162_s26 + $0x60] sm:$0xff]  ;;  %v212_v53 = vld [vmem:[%s3162_s26 + $0x68] sm:$0xff]  ;;  %v213_v55 = vld [vmem:[%s3162_s26 + $0x70] sm:$0xff] }
  0x1e   : > { %v3253_v54 = vpack.c.bf16 %v212_v53, %v211_v52  ;;  %v214_v56 = vld [vmem:[%s3162_s26 + $0x78] sm:$0xff]  ;;  %v215_v58 = vld [vmem:[%s3162_s26 + $0x80] sm:$0xff]  ;;  %v216_v59 = vld [vmem:[%s3162_s26 + $0x88] sm:$0xff] }
  0x1f   : > { %v3259_v57 = vpack.c.bf16 %v214_v56, %v213_v55  ;;  %v3265_v60 = vpack.c.bf16 %v216_v59, %v215_v58  ;;  %v217_v61 = vld [vmem:[%s3162_s26 + $0x90] sm:$0xff]  ;;  %v218_v62 = vld [vmem:[%s3162_s26 + $0x98] sm:$0xff]  ;;  %v3036_v0 = vld [vmem:[%s4122_s1 + $0x84] ss:$8 sps:$4 sm:$0xff]  }
  0x20   : > { %674 = vmatpush1.bf16.msra.mxu0 %v2984_v10  ;;  %v3271_v63 = vpack.c.bf16 %v218_v62, %v217_v61  ;;  %v3038_v1 = vld [vmem:[%s4122_s1 + $0x80] ss:$8 sps:$4 sm:$0xff]   ;;  %402 = vmatprep.subr.bf16.mxu1 %v3036_v0  ;;  %v3039_v6 = vld [vmem:[%s4122_s1 + $0x94] ss:$8 sps:$4 sm:$0xff]   ;;  %v3041_v7 = vld [vmem:[%s4122_s1 + $0x90] ss:$8 sps:$4 sm:$0xff]  }
  0x21   : > { %675 = vmatprep.subr.bf16.mxu0 %v2985_v11  ;;  %v219_v3 = vld [vmem:[%s3162_s26 + $0xa0] sm:$0xff]  ;;  %v220_v4 = vld [vmem:[%s3162_s26 + $0xa8] sm:$0xff]  ;;  %403 = vmatpush1.bf16.msra.mxu1 %v3038_v1  ;;  %v221_v9 = vld [vmem:[%s3162_s26 + $0xb0] sm:$0xff] }
  0x22   : > { %v3283_v5 = vpack.c.bf16 %v220_v4, %v219_v3  ;;  %v3042_v8 = vld [vmem:[%s4122_s1 + $0xa4] ss:$8 sps:$4 sm:$0xff]   ;;  %v222_v10 = vld [vmem:[%s3162_s26 + $0xb8] sm:$0xff]  ;;  %404 = vmatprep.subr.bf16.mxu1 %v3039_v6  ;;  %v3047_v11 = vld [vmem:[%s4122_s1 + $0xa0] ss:$8 sps:$4 sm:$0xff]  }
  0x23   : > { %v224_v17 = vld [vmem:[%s3162_s26 + $0xc8] sm:$0xff]  ;;  %v226_v23 = vld [vmem:[%s3162_s26 + $0xd8] sm:$0xff] }
  0x24   : > { %676 = vmatpush1.bf16.msra.mxu0 %v2987_v12  ;;  %v3301_v12 = vpack.c.bf16 %v222_v10, %v221_v9  ;;  %v3053_v18 = vld [vmem:[%s4122_s1 + $0xc0] ss:$8 sps:$4 sm:$0xff]   ;;  %v3060_v24 = vld [vmem:[%s4122_s1 + $0xe4] ss:$8 sps:$4 sm:$0xff]   ;;  %v1233_v37 = vld [vmem:[%s3162_s26 + $0x11] sm:$0xff] }
  0x25   : > { %677 = vmatprep.subr.bf16.mxu0 %v2988_v13  ;;  %405 = vmatpush1.bf16.msra.mxu1 %v3041_v7  ;;  %v3048_v13 = vld [vmem:[%s4122_s1 + $0xb4] ss:$8 sps:$4 sm:$0xff]   ;;  %v260_v30 = vld [vmem:[%s3162_s26 + $0x1] sm:$0xff]  ;;  %v261_v31 = vld [vmem:[%s3162_s26 + $0x9] sm:$0xff] }
  0x26   : > { %406 = vmatprep.subr.bf16.mxu1 %v3042_v8  ;;  %v1234_v38 = vld [vmem:[%s3162_s26 + $0x19] sm:$0xff]  ;;  %v1236_v44 = vld [vmem:[%s3162_s26 + $0x29] sm:$0xff]  ;;  %v1237_v50 = vld [vmem:[%s3162_s26 + $0x31] sm:$0xff] }
  0x27   : > { %v3021_v45 = vld [vmem:[%s4122_s1 + $0x190] ss:$8 sps:$4 sm:$0xff]   ;;  %v3029_v49 = vld [vmem:[%s4122_s1 + $0x1b4] ss:$8 sps:$4 sm:$0xff]   ;;  %v3032_v55 = vld [vmem:[%s4122_s1 + $0x1c4] ss:$8 sps:$4 sm:$0xff]  }
  0x28   : > { %678 = vmatpush1.bf16.msra.mxu0 %v2990_v14  ;;  %v3050_v14 = vld [vmem:[%s4122_s1 + $0xb0] ss:$8 sps:$4 sm:$0xff]   ;;  %v3035_v58 = vld [vmem:[%s4122_s1 + $0x1d4] ss:$8 sps:$4 sm:$0xff]   ;;  %v1239_v59 = vld [vmem:[%s3162_s26 + $0x41] sm:$0xff] }
  0x29   : > { %679 = vmatprep.subr.bf16.mxu0 %v2991_v15  ;;  %407 = vmatpush1.bf16.msra.mxu1 %v3047_v11  ;;  %v3051_v15 = vld [vmem:[%s4122_s1 + $0xc4] ss:$8 sps:$4 sm:$0xff]   ;;  %v1238_v52 = vld [vmem:[%s3162_s26 + $0x39] sm:$0xff]  ;;  %v1241_v4 = vld [vmem:[%s3162_s26 + $0x51] sm:$0xff] }
  0x2a   : > { %408 = vmatprep.subr.bf16.mxu1 %v3048_v13  ;;  %v3027_v53 = vld [vmem:[%s4122_s1 + $0x1b0] ss:$8 sps:$4 sm:$0xff]   ;;  %v3398_v56 = vpack.c.bf16 %v1238_v52, %v1237_v50  ;;  %v3046_v0 = vld [vmem:[%s4122_s1 + $0x1e4] ss:$8 sps:$4 sm:$0xff]   ;;  %v3059_v3 = vld [vmem:[%s4122_s1 + $0x1f4] ss:$8 sps:$4 sm:$0xff]  }
  0x2b   : > { %v1240_v61 = vld [vmem:[%s3162_s26 + $0x49] sm:$0xff]  ;;  %v1242_v6 = vld [vmem:[%s3162_s26 + $0x59] sm:$0xff]  ;;  %v1245_v11 = vld [vmem:[%s3162_s26 + $0x71] sm:$0xff] }
  0x2c   : > { %680 = vmatpush1.bf16.msra.mxu0 %v2993_v16  ;;  %v223_v16 = vld [vmem:[%s3162_s26 + $0xc0] sm:$0xff]  ;;  %v3033_v62 = vld [vmem:[%s4122_s1 + $0x1d0] ss:$8 sps:$4 sm:$0xff]   ;;  %v3418_v1 = vpack.c.bf16 %v1240_v61, %v1239_v59  ;;  %v3435_v8 = vpack.c.bf16 %v1242_v6, %v1241_v4 }
  0x2d   : > { %990 = vmatprep.subr.bf16.mxu0 %v2996_v19  ;;  %409 = vmatpush1.bf16.msra.mxu1 %v3050_v14  ;;  %v3319_v19 = vpack.c.bf16 %v224_v17, %v223_v16  ;;  %v3057_v7 = vld [vmem:[%s4122_s1 + $0x1f0] ss:$8 sps:$4 sm:$0xff]   ;;  %v1247_v14 = vld [vmem:[%s3162_s26 + $0x81] sm:$0xff] }
  0x2e   : > { %410 = vmatprep.subr.bf16.mxu1 %v3051_v15  ;;  %v1244_v9 = vld [vmem:[%s3162_s26 + $0x69] sm:$0xff]  ;;  %v1246_v13 = vld [vmem:[%s3162_s26 + $0x79] sm:$0xff]  ;;  %v1249_v16 = vld [vmem:[%s3162_s26 + $0x91] sm:$0xff] }
  0x2f   : > { %698 = vmatmul.mubr.bf16.vlgmr.msra.gmra.mrb[0].mxu0 %v229_v20  ;;  %v3054_v20 = vld [vmem:[%s4122_s1 + $0xd4] ss:$8 sps:$4 sm:$0xff]   ;;  %v1248_v15 = vld [vmem:[%s3162_s26 + $0x89] sm:$0xff] }
  0x30   : > { %991 = vmatpush1.bf16.msra.mxu0 %v2994_v21  ;;  %707 = vmatprep.mubr.bf16.mxu0 %v3074_v2  ;;  %v3056_v21 = vld [vmem:[%s4122_s1 + $0xd0] ss:$8 sps:$4 sm:$0xff]  }
  0x31   : > { %992 = vmatprep.subr.bf16.mxu0 %v2999_v22  ;;  %411 = vmatpush1.bf16.msra.mxu1 %v3053_v18  ;;  %v225_v22 = vld [vmem:[%s3162_s26 + $0xd0] sm:$0xff]  ;;  %v1250_v17 = vld [vmem:[%s3162_s26 + $0x99] sm:$0xff]  ;;  %v1251_v18 = vld [vmem:[%s3162_s26 + $0xa1] sm:$0xff] }
  0x32   : > { %412 = vmatprep.subr.bf16.mxu1 %v3054_v20  ;;  %v1252_v20 = vld [vmem:[%s3162_s26 + $0xa9] sm:$0xff]  ;;  %v1262_v50 = vld [vmem:[%s3162_s26 + $0xf9] sm:$0xff] }
  0x34   : > { %993 = vmatpush1.bf16.msra.mxu0 %v2997_v25  ;;  %v3062_v25 = vld [vmem:[%s4122_s1 + $0xe0] ss:$8 sps:$4 sm:$0xff]  }
  0x35   : > { %994 = vmatprep.subr.bf16.mxu0 %v3002_v26  ;;  %413 = vmatpush1.bf16.msra.mxu1 %v3056_v21  ;;  %v3337_v26 = vpack.c.bf16 %v226_v23, %v225_v22  ;;  %v1272_v21 = vpack.c.bf16 %v1252_v20, %v1251_v18  ;;  %v1254_v22 = vld [vmem:[%s3162_s26 + $0xb9] sm:$0xff] }
  0x36   : > { %414 = vmatprep.subr.bf16.mxu1 %v3060_v24  ;;  %v1256_v24 = vld [vmem:[%s3162_s26 + $0xc9] sm:$0xff] }
  0x37   : > { %708 = vmatmul.mubr.bf16.gmra.mrb[4].mxu0 %v3190_v28 }
  0x38   : > { %717 = vmatprep.mubr.bf16.mxu0 %v3074_v2  ;;  %995 = vmatpush1.bf16.msra.mxu0 %v3000_v27  ;;  %v3063_v27 = vld [vmem:[%s4122_s1 + $0xf4] ss:$8 sps:$4 sm:$0xff]  }
  0x39   : > { %996 = vmatprep.subr.bf16.mxu0 %v3005_v29  ;;  %415 = vmatpush1.bf16.msra.mxu1 %v3062_v25  ;;  %v3065_v29 = vld [vmem:[%s4122_s1 + $0xf0] ss:$8 sps:$4 sm:$0xff]  }
  0x3a   : > { %416 = vmatprep.subr.bf16.mxu1 %v3063_v27  ;;  %v1258_v27 = vld [vmem:[%s3162_s26 + $0xd9] sm:$0xff] }
  0x3c   : > { %997 = vmatpush1.bf16.msra.mxu0 %v3003_v32  ;;  %v227_v32 = vld [vmem:[%s3162_s26 + $0xe0] sm:$0xff] }
  0x3d   : > { %998 = vmatprep.subr.bf16.mxu0 %v3008_v33  ;;  %v228_v33 = vld [vmem:[%s3162_s26 + $0xe8] sm:$0xff]  ;;  %417 = vmatpush1.bf16.msra.mxu1 %v3065_v29 }
  0x3f   : > { %718 = vmatmul.mubr.bf16.gmra.mrb[8].mxu0 %v3205_v34 }
  0x40   : > { %727 = vmatprep.mubr.bf16.mxu0 %v3074_v2  ;;  %999 = vmatpush1.bf16.msra.mxu0 %v3006_v35  ;;  %v290_v35 = vpack.c.bf16 %v261_v31, %v260_v30  ;;  %v1260_v30 = vld [vmem:[%s3162_s26 + $0xe9] sm:$0xff] }
  0x41   : > { %1000 = vmatprep.subr.bf16.mxu0 %v3011_v36  ;;  %v3351_v36 = vpack.c.bf16 %v228_v33, %v227_v32  ;;  %v877_v32 = vld [vmem:[%s3162_s26 + $0xf8] sm:$0xff] }
  0x42   : > { %435 = vmatmul.mubr.bf16.vlgmr.msra.gmra.mrb[0].mxu1 %v290_v35 }
  0x43   : > { %444 = vmatprep.mubr.bf16.mxu1 %v3074_v2 }
  0x44   : > { %1001 = vmatpush1.bf16.msra.mxu0 %v3009_v39  ;;  %v3358_v39 = vpack.c.bf16 %v1234_v38, %v1233_v37 }
  0x45   : > { %1002 = vmatprep.subr.bf16.mxu0 %v3014_v40  ;;  %v3018_v40 = vld [vmem:[%s4122_s1 + $0x180] ss:$8 sps:$4 sm:$0xff]  }
  0x47   : > { %728 = vmatmul.mubr.bf16.gmra.mrb[12].mxu0 %v3223_v41 }
  0x48   : > { %737 = vmatprep.mubr.bf16.mxu0 %v3074_v2  ;;  %1003 = vmatpush1.bf16.msra.mxu0 %v3012_v42  ;;  %v3023_v42 = vld [vmem:[%s4122_s1 + $0x194] ss:$8 sps:$4 sm:$0xff]  }
  0x49   : > { %1004 = vmatprep.subr.bf16.mxu0 %v3017_v43  ;;  %v1235_v43 = vld [vmem:[%s3162_s26 + $0x21] sm:$0xff] }
  0x4a   : > { %445 = vmatmul.mubr.bf16.gmra.mrb[4].mxu1 %v3358_v39 }
  0x4b   : > { %454 = vmatprep.mubr.bf16.mxu1 %v3074_v2 }
  0x4c   : > { %1005 = vmatpush1.bf16.msra.mxu0 %v3015_v46  ;;  %v3026_v46 = vld [vmem:[%s4122_s1 + $0x1a4] ss:$8 sps:$4 sm:$0xff]  }
  0x4d   : > { %1375 = vmatprep.subr.bf16.mxu0 %v3020_v47  ;;  %v3378_v47 = vpack.c.bf16 %v1236_v44, %v1235_v43  ;;  %v4126_v44 = vmov 0.0|0.0  }
  0x4e   : > { %2598 = vmatprep.subr.bf16.mxu1 %v4126_v44  ;;  %v1618_v44 = vld [vmem:[%s4123_s2] sm:$0x3] }
  0x4f   : > { %738 = vmatmul.mubr.bf16.gmra.mrb[16].mxu0 %v3241_v48 }
  0x50   : > { %747 = vmatprep.mubr.bf16.mxu0 %v3074_v2 }
  0x52   : > { %455 = vmatmul.mubr.bf16.gmra.mrb[8].mxu1 %v3378_v47 }
  0x53   : > { %464 = vmatprep.mubr.bf16.mxu1 %v3074_v2 }
  0x57   : > { %748 = vmatmul.mubr.bf16.gmra.mrb[20].mxu0 %v3247_v51 }
  0x58   : > { %757 = vmatprep.mubr.bf16.mxu0 %v3074_v2 }
  0x5a   : > { %465 = vmatmul.mubr.bf16.gmra.mrb[12].mxu1 %v3398_v56 }
  0x5b   : > { %474 = vmatprep.mubr.bf16.mxu1 %v3074_v2 }
  0x5f   : > { %758 = vmatmul.mubr.bf16.gmra.mrb[24].mxu0 %v3253_v54 }
  0x60   : > { %767 = vmatprep.mubr.bf16.mxu0 %v3074_v2 }
  0x62   : > { %475 = vmatmul.mubr.bf16.gmra.mrb[16].mxu1 %v3418_v1 }
  0x63   : > { %484 = vmatprep.mubr.bf16.mxu1 %v3074_v2 }
  0x67   : > { %768 = vmatmul.mubr.bf16.gmra.mrb[28].mxu0 %v3259_v57 }
  0x68   : > { %777 = vmatprep.mubr.bf16.mxu0 %v3074_v2 }
  0x6a   : > { %485 = vmatmul.mubr.bf16.gmra.mrb[20].mxu1 %v3435_v8 }
  0x6b   : > { %494 = vmatprep.mubr.bf16.mxu1 %v3074_v2 }
  0x6f   : > { %778 = vmatmul.mubr.bf16.gmra.mrb[32].mxu0 %v3265_v60 }
  0x70   : > { %787 = vmatprep.mubr.bf16.mxu0 %v3074_v2 }
  0x77   : > { %788 = vmatmul.mubr.bf16.gmra.mrb[36].mxu0 %v3271_v63 }
  0x78   : > { %797 = vmatprep.mubr.bf16.mxu0 %v3074_v2 }
  0x7f   : > { %798 = vmatmul.mubr.bf16.gmra.mrb[40].mxu0 %v3283_v5 }
  0x80   : > { %807 = vmatprep.mubr.bf16.mxu0 %v3074_v2 }
  0x87   : > { %808 = vmatmul.mubr.bf16.gmra.mrb[44].mxu0 %v3301_v12 }
  0x88   : > { %817 = vmatprep.mubr.bf16.mxu0 %v3074_v2 }
  0x8f   : > { %818 = vmatmul.mubr.bf16.gmra.mrb[48].mxu0 %v3319_v19 }
  0x90   : > { %827 = vmatprep.mubr.bf16.mxu0 %v3074_v2 }
  0x97   : > { %828 = vmatmul.mubr.bf16.gmra.mrb[52].mxu0 %v3337_v26 }
  0x98   : > { %837 = vmatprep.mubr.bf16.mxu0 %v3074_v2 }
  0x9f   : > { %838 = vmatmul.mubr.bf16.gmra.mrb[56].mxu0 %v3351_v36 }
  0xa0   : > { %1022 = vmatprep.mubr.bf16.mxu0 %v3074_v2 }
  0xa7   : > { %1023 = vmatmul.mubr.bf16.vlgmr.msra.gmra.mrb[0].mxu0 %v3190_v28  ;;  %v3024_v28 = vld [vmem:[%s4122_s1 + $0x1a0] ss:$8 sps:$4 sm:$0xff]  }
  0xa8   : > { %1376 = vmatpush1.bf16.msra.mxu0 %v3018_v40  ;;  %1032 = vmatprep.mubr.bf16.mxu0 %v3074_v2 }
  0xa9   : > { %1377 = vmatprep.subr.bf16.mxu0 %v3023_v42 }
  0xac   : > { %1378 = vmatpush1.bf16.msra.mxu0 %v3021_v45 }
  0xad   : > { %1379 = vmatprep.subr.bf16.mxu0 %v3026_v46 }
  0xaf   : > { %1033 = vmatmul.mubr.bf16.gmra.mrb[4].mxu0 %v3205_v34  ;;  %v3030_v34 = vld [vmem:[%s4122_s1 + $0x1c0] ss:$8 sps:$4 sm:$0xff]  }
  0xb0   : > { %1042 = vmatprep.mubr.bf16.mxu0 %v3074_v2  ;;  %1380 = vmatpush1.bf16.msra.mxu0 %v3024_v28 }
  0xb1   : > { %1381 = vmatprep.subr.bf16.mxu0 %v3029_v49  ;;  %v1261_v49 = vld [vmem:[%s3162_s26 + $0xf1] sm:$0xff] }
  0xb4   : > { %1382 = vmatpush1.bf16.msra.mxu0 %v3027_v53 }
  0xb5   : > { %1383 = vmatprep.subr.bf16.mxu0 %v3032_v55 }
  0xb7   : > { %1043 = vmatmul.mubr.bf16.gmra.mrb[8].mxu0 %v3223_v41  ;;  %v3044_v41 = vld [vmem:[%s4122_s1 + $0x1e0] ss:$8 sps:$4 sm:$0xff]  }
  0xb8   : > { %1052 = vmatprep.mubr.bf16.mxu0 %v3074_v2  ;;  %1384 = vmatpush1.bf16.msra.mxu0 %v3030_v34 }
  0xb9   : > { %1385 = vmatprep.subr.bf16.mxu0 %v3035_v58 }
  0xbc   : > { %1386 = vmatpush1.bf16.msra.mxu0 %v3033_v62 }
  0xbd   : > { %1387 = vmatprep.subr.bf16.mxu0 %v3046_v0 }
  0xbf   : > { %1053 = vmatmul.mubr.bf16.gmra.mrb[12].mxu0 %v3241_v48  ;;  %v1243_v48 = vld [vmem:[%s3162_s26 + $0x61] sm:$0xff] }
  0xc0   : > { %1062 = vmatprep.mubr.bf16.mxu0 %v3074_v2  ;;  %1388 = vmatpush1.bf16.msra.mxu0 %v3044_v41  ;;  %v3443_v10 = vpack.c.bf16 %v1244_v9, %v1243_v48 }
  0xc1   : > { %1389 = vmatprep.subr.bf16.mxu0 %v3059_v3 }
  0xc2   : > { %495 = vmatmul.mubr.bf16.gmra.mrb[24].mxu1 %v3443_v10 }
  0xc3   : > { %504 = vmatprep.mubr.bf16.mxu1 %v3074_v2 }
  0xc4   : > { %1390 = vmatpush1.bf16.msra.mxu0 %v3057_v7 }
  0xc7   : > { %1063 = vmatmul.mubr.bf16.gmra.mrb[16].mxu0 %v3247_v51  ;;  %v3451_v51 = vpack.c.bf16 %v1246_v13, %v1245_v11 }
  0xc8   : > { %1072 = vmatprep.mubr.bf16.mxu0 %v3074_v2 }
  0xca   : > { %505 = vmatmul.mubr.bf16.gmra.mrb[28].mxu1 %v3451_v51 }
  0xcb   : > { %514 = vmatprep.mubr.bf16.mxu1 %v3074_v2 }
  0xcf   : > { %1073 = vmatmul.mubr.bf16.gmra.mrb[20].mxu0 %v3253_v54  ;;  %v3459_v54 = vpack.c.bf16 %v1248_v15, %v1247_v14 }
  0xd0   : > { %1082 = vmatprep.mubr.bf16.mxu0 %v3074_v2 }
  0xd2   : > { %515 = vmatmul.mubr.bf16.gmra.mrb[32].mxu1 %v3459_v54 }
  0xd3   : > { %524 = vmatprep.mubr.bf16.mxu1 %v3074_v2 }
  0xd7   : > { %1083 = vmatmul.mubr.bf16.gmra.mrb[24].mxu0 %v3259_v57  ;;  %v1271_v57 = vpack.c.bf16 %v1250_v17, %v1249_v16 }
  0xd8   : > { %1092 = vmatprep.mubr.bf16.mxu0 %v3074_v2 }
  0xda   : > { %525 = vmatmul.mubr.bf16.gmra.mrb[36].mxu1 %v1271_v57 }
  0xdb   : > { %534 = vmatprep.mubr.bf16.mxu1 %v3074_v2 }
  0xdf   : > { %1093 = vmatmul.mubr.bf16.gmra.mrb[28].mxu0 %v3265_v60  ;;  %v1253_v60 = vld [vmem:[%s3162_s26 + $0xb1] sm:$0xff] }
  0xe0   : > { %1102 = vmatprep.mubr.bf16.mxu0 %v3074_v2  ;;  %v1273_v23 = vpack.c.bf16 %v1254_v22, %v1253_v60 }
  0xe2   : > { %535 = vmatmul.mubr.bf16.gmra.mrb[40].mxu1 %v1272_v21 }
  0xe3   : > { %544 = vmatprep.mubr.bf16.mxu1 %v3074_v2 }
  0xe7   : > { %1103 = vmatmul.mubr.bf16.gmra.mrb[32].mxu0 %v3271_v63  ;;  %v1255_v63 = vld [vmem:[%s3162_s26 + $0xc1] sm:$0xff] }
  0xe8   : > { %1112 = vmatprep.mubr.bf16.mxu0 %v3074_v2  ;;  %v1274_v25 = vpack.c.bf16 %v1256_v24, %v1255_v63 }
  0xea   : > { %545 = vmatmul.mubr.bf16.gmra.mrb[44].mxu1 %v1273_v23 }
  0xeb   : > { %554 = vmatprep.mubr.bf16.mxu1 %v3074_v2 }
  0xef   : > { %1113 = vmatmul.mubr.bf16.gmra.mrb[36].mxu0 %v3283_v5  ;;  %v1257_v5 = vld [vmem:[%s3162_s26 + $0xd1] sm:$0xff] }
  0xf0   : > { %1122 = vmatprep.mubr.bf16.mxu0 %v3074_v2  ;;  %v1275_v29 = vpack.c.bf16 %v1258_v27, %v1257_v5 }
  0xf2   : > { %555 = vmatmul.mubr.bf16.gmra.mrb[48].mxu1 %v1274_v25 }
  0xf3   : > { %564 = vmatprep.mubr.bf16.mxu1 %v3074_v2 }
  0xf7   : > { %1123 = vmatmul.mubr.bf16.gmra.mrb[40].mxu0 %v3301_v12  ;;  %v1259_v12 = vld [vmem:[%s3162_s26 + $0xe1] sm:$0xff] }
  0xf8   : > { %1132 = vmatprep.mubr.bf16.mxu0 %v3074_v2  ;;  %v1276_v31 = vpack.c.bf16 %v1260_v30, %v1259_v12 }
  0xfa   : > { %565 = vmatmul.mubr.bf16.gmra.mrb[52].mxu1 %v1275_v29 }
  0xfb   : > { %574 = vmatprep.mubr.bf16.mxu1 %v3074_v2 }
  0xff   : > { %1133 = vmatmul.mubr.bf16.gmra.mrb[44].mxu0 %v3319_v19  ;;  %v876_v19 = vld [vmem:[%s3162_s26 + $0xf0] sm:$0xff] }
 0x100   : > { %1142 = vmatprep.mubr.bf16.mxu0 %v3074_v2  ;;  %v892_v33 = vpack.c.bf16 %v877_v32, %v876_v19 }
 0x102   : > { %575 = vmatmul.mubr.bf16.gmra.mrb[56].mxu1 %v1276_v31 }
 0x107   : > { %1143 = vmatmul.mubr.bf16.gmra.mrb[48].mxu0 %v3337_v26 }
 0x108   : > { %1152 = vmatprep.mubr.bf16.mxu0 %v3074_v2 }
 0x10f   : > { %1153 = vmatmul.mubr.bf16.gmra.mrb[52].mxu0 %v3351_v36 }
 0x110   : > { %1162 = vmatprep.mubr.bf16.mxu0 %v3074_v2 }
 0x115   : > { %v3515_v26 = vpop.f32.mrb[0].mxu1 }
 0x116   : > { %v3518_v35 = vpop.f32.mrb[1].mxu1 }
 0x117   : > { %1163 = vmatmul.mubr.bf16.gmra.mrb[56].mxu0 %v892_v33  ;;  %v3520_v36 = vpop.f32.mrb[2].mxu1 }
 0x118   : > { %1407 = vmatprep.mubr.bf16.mxu0 %v3074_v2  ;;  %v3522_v37 = vpop.f32.mrb[3].mxu1 }
 0x11d   : > { %v3524_v38 = vpop.f32.mrb[4].mxu1 }
 0x11f   : > { %1408 = vmatmul.mubr.bf16.vlgmr.msra.gmra.mrb[0].mxu0 %v3358_v39  ;;  %v3527_v39 = vpop.f32.mrb[5].mxu1 }
 0x120   : > { %1417 = vmatprep.mubr.bf16.mxu0 %v3074_v2  ;;  %v3529_v40 = vpop.f32.mrb[6].mxu1 }
 0x121   : > { %v3531_v42 = vpop.f32.mrb[7].mxu1 }
 0x125   : > { %v3533_v43 = vpop.f32.mrb[8].mxu1 }
 0x126   : > { %v3537_v45 = vpop.f32.mrb[9].mxu1 }
 0x127   : > { %1418 = vmatmul.mubr.bf16.gmra.mrb[4].mxu0 %v3378_v47  ;;  %v3539_v46 = vpop.f32.mrb[10].mxu1 }
 0x128   : > { %1427 = vmatprep.mubr.bf16.mxu0 %v3074_v2  ;;  %v3541_v47 = vpop.f32.mrb[11].mxu1 }
 0x12d   : > { %v3543_v28 = vpop.f32.mrb[12].mxu1 }
 0x12e   : > { %v3548_v52 = vpop.f32.mrb[13].mxu1 }
 0x12f   : > { %1428 = vmatmul.mubr.bf16.gmra.mrb[8].mxu0 %v3398_v56  ;;  %v3550_v53 = vpop.f32.mrb[14].mxu1  ;;  %v1277_v56 = vpack.c.bf16 %v1262_v50, %v1261_v49  ;;  %v1620_v49 = vlaneseq }
 0x130   : > { %1437 = vmatprep.mubr.bf16.mxu0 %v3074_v2  ;;  %v3552_v55 = vpop.f32.mrb[15].mxu1 }
 0x131   : > { %v1621_v50 = vshrl.u32 %v1620_v49, 7 }
 0x135   : > { %v3554_v34 = vpop.f32.mrb[16].mxu1 }
 0x136   : > { %v3556_v58 = vpop.f32.mrb[17].mxu1 }
 0x137   : > { %1438 = vmatmul.mubr.bf16.gmra.mrb[12].mxu0 %v3418_v1  ;;  %v3558_v59 = vpop.f32.mrb[18].mxu1 }
 0x138   : > { %1447 = vmatprep.mubr.bf16.mxu0 %v3074_v2  ;;  %v3560_v61 = vpop.f32.mrb[19].mxu1 }
 0x13d   : > { %v3562_v62 = vpop.f32.mrb[20].mxu1 }
 0x13f   : > { %1448 = vmatmul.mubr.bf16.gmra.mrb[16].mxu0 %v3435_v8 }
 0x140   : > { %1457 = vmatprep.mubr.bf16.mxu0 %v3074_v2 }
 0x147   : > { %1458 = vmatmul.mubr.bf16.gmra.mrb[20].mxu0 %v3443_v10 }
 0x148   : > { %1467 = vmatprep.mubr.bf16.mxu0 %v3074_v2 }
 0x14f   : > { %1468 = vmatmul.mubr.bf16.gmra.mrb[24].mxu0 %v3451_v51 }
 0x150   : > { %1477 = vmatprep.mubr.bf16.mxu0 %v3074_v2 }
 0x157   : > { %1478 = vmatmul.mubr.bf16.gmra.mrb[28].mxu0 %v3459_v54 }
 0x158   : > { %1487 = vmatprep.mubr.bf16.mxu0 %v3074_v2 }
 0x15f   : > { %1488 = vmatmul.mubr.bf16.gmra.mrb[32].mxu0 %v1271_v57 }
 0x160   : > { %1497 = vmatprep.mubr.bf16.mxu0 %v3074_v2 }
 0x167   : > { %1498 = vmatmul.mubr.bf16.gmra.mrb[36].mxu0 %v1272_v21 }
 0x168   : > { %1507 = vmatprep.mubr.bf16.mxu0 %v3074_v2 }
 0x16f   : > { %1508 = vmatmul.mubr.bf16.gmra.mrb[40].mxu0 %v1273_v23 }
 0x170   : > { %1517 = vmatprep.mubr.bf16.mxu0 %v3074_v2 }
 0x177   : > { %1518 = vmatmul.mubr.bf16.gmra.mrb[44].mxu0 %v1274_v25 }
 0x178   : > { %1527 = vmatprep.mubr.bf16.mxu0 %v3074_v2 }
 0x17f   : > { %1528 = vmatmul.mubr.bf16.gmra.mrb[48].mxu0 %v1275_v29 }
 0x180   : > { %1537 = vmatprep.mubr.bf16.mxu0 %v3074_v2 }
 0x187   : > { %1538 = vmatmul.mubr.bf16.gmra.mrb[52].mxu0 %v1276_v31 }
 0x188   : > { %1547 = vmatprep.mubr.bf16.mxu0 %v3074_v2  ;;  %v3564_v2 = vpop.f32.mrb[21].mxu1 }
 0x189   : > { %v3566_v0 = vpop.f32.mrb[22].mxu1 }
 0x18a   : > { %v3568_v1 = vpop.f32.mrb[23].mxu1 }
 0x18f   : > { %1548 = vmatmul.mubr.bf16.gmra.mrb[56].mxu0 %v1277_v56  ;;  %v1622_v56 = vsub.s32 0, %v1621_v50 }
 0x195   : > { %v3570_v41 = vpop.f32.mrb[24].mxu1 }
 0x196   : > { %v3572_v3 = vpop.f32.mrb[25].mxu1 }
 0x197   : > { %v3574_v4 = vpop.f32.mrb[26].mxu1 }
 0x198   : > { %v3576_v6 = vpop.f32.mrb[27].mxu1 }
 0x19d   : > { %v3578_v7 = vpop.f32.mrb[28].mxu1 }
 0x19e   : > { %v3580_v8 = vpop.f32.mrb[29].mxu1 }
 0x19f   : > { %v3582_v48 = vpop.f32.mrb[30].mxu1 }
 0x1a0   : > { %v3584_v9 = vpop.f32.mrb[31].mxu1 }
 0x1a5   : > { %v3586_v10 = vpop.f32.mrb[32].mxu1 }
 0x1a6   : > { %v3588_v11 = vpop.f32.mrb[33].mxu1 }
 0x1a7   : > { %v3590_v13 = vpop.f32.mrb[34].mxu1 }
 0x1a8   : > { %v3592_v51 = vpop.f32.mrb[35].mxu1 }
 0x1ad   : > { %v3594_v14 = vpop.f32.mrb[36].mxu1 }
 0x1ae   : > { %v3596_v15 = vpop.f32.mrb[37].mxu1 }
 0x1af   : > { %v3598_v54 = vpop.f32.mrb[38].mxu1 }
 0x1b0   : > { %v3600_v16 = vpop.f32.mrb[39].mxu1 }
 0x1b5   : > { %v3602_v17 = vpop.f32.mrb[40].mxu1 }
 0x1b6   : > { %v3604_v57 = vpop.f32.mrb[41].mxu1 }
 0x1b7   : > { %v3606_v18 = vpop.f32.mrb[42].mxu1 }
 0x1b8   : > { %v3608_v20 = vpop.f32.mrb[43].mxu1 }
 0x1bd   : > { %v3610_v21 = vpop.f32.mrb[44].mxu1 }
 0x1be   : > { %v3612_v60 = vpop.f32.mrb[45].mxu1 }
 0x1bf   : > { %v3614_v22 = vpop.f32.mrb[46].mxu1 }
 0x1c0   : > { %4128 = vst [vmem:[#allocation2_spill] sm:$0xff] %v3614_v22  ;;  %v3616_v23 = vpop.f32.mrb[47].mxu1 }
 0x1c1   : > { %4129 = vst [vmem:[#allocation3_spill] sm:$0xff] %v3616_v23 }
 0x1c5   : > { %v3618_v63 = vpop.f32.mrb[48].mxu1 }
 0x1c6   : > { %4130 = vst [vmem:[#allocation4_spill] sm:$0xff] %v3618_v63  ;;  %v3620_v24 = vpop.f32.mrb[49].mxu1 }
 0x1c7   : > { %4131 = vst [vmem:[#allocation5_spill] sm:$0xff] %v3620_v24  ;;  %v3622_v25 = vpop.f32.mrb[50].mxu1 }
 0x1c8   : > { %4132 = vst [vmem:[#allocation6_spill] sm:$0xff] %v3622_v25  ;;  %v3624_v5 = vpop.f32.mrb[51].mxu1 }
 0x1c9   : > { %4133 = vst [vmem:[#allocation7_spill] sm:$0xff] %v3624_v5 }
 0x1cd   : > { %v3626_v27 = vpop.f32.mrb[52].mxu1 }
 0x1ce   : > { %4134 = vst [vmem:[#allocation8_spill] sm:$0xff] %v3626_v27  ;;  %v3628_v29 = vpop.f32.mrb[53].mxu1 }
 0x1cf   : > { %4135 = vst [vmem:[#allocation9_spill] sm:$0xff] %v3628_v29  ;;  %v3630_v12 = vpop.f32.mrb[54].mxu1  ;;  %v1626_v29 = vsub.s32 1, %v1621_v50 }
 0x1d0   : > { %4136 = vst [vmem:[#allocation10_spill] sm:$0xff] %v3630_v12  ;;  %v3632_v30 = vpop.f32.mrb[55].mxu1 }
 0x1d1   : > { %4137 = vst [vmem:[#allocation11_spill] sm:$0xff] %v3632_v30  ;;  %v1781_v30 = vld [vmem:[%s4124_s3 + $0x8] sm:$0xff] }
 0x1d2   : > { %2526 = vmatprep.mubr.msk.f32.mxu1 %vm1794_vm0, %v1781_v30 }
 0x1d5   : > { %v3634_v31 = vpop.f32.mrb[56].mxu1 }
 0x1d6   : > { %4138 = vst [vmem:[#allocation12_spill] sm:$0xff] %v3634_v31  ;;  %v3636_v19 = vpop.f32.mrb[57].mxu1  ;;  %v3648_v31 = vrot.slane %v1618_v44, %v1622_v56 }
 0x1d7   : > { %4139 = vst [vmem:[#allocation13_spill] sm:$0xff] %v3636_v19  ;;  %v3638_v32 = vpop.f32.mrb[58].mxu1  ;;  %v3651_v19 = vrot.slane %v1618_v44, %v1626_v29 }
 0x1d8   : > { %4140 = vst [vmem:[#allocation14_spill] sm:$0xff] %v3638_v32  ;;  %v3640_v33 = vpop.f32.mrb[59].mxu1 }
 0x1d9   : > { %4141 = vst [vmem:[#allocation15_spill] sm:$0xff] %v3640_v33 }
 0x1f2   : > { %v1409_v32 = vpop.f32.mrb[0].mxu0 }
 0x1f3   : > { %v2778_v49 = vadd.f32 %v1409_v32, %v3515_v26  ;;  %v1411_v33 = vpop.f32.mrb[1].mxu0 }
 0x1f4   : > { %v2779_v12 = vadd.f32 %v1411_v33, %v3518_v35  ;;  %v1413_v27 = vpop.f32.mrb[2].mxu0 }
 0x1f5   : > { %v1630_v50 = vadd.f32 %v2778_v49, %v3648_v31  ;;  %v2780_v5 = vadd.f32 %v1413_v27, %v3520_v36  ;;  %v1415_v25 = vpop.f32.mrb[3].mxu0 }
 0x1f6   : > { %v1631_v24 = vadd.f32 %v2779_v12, %v3651_v19  ;;  %v2781_v56 = vadd.f32 %v1415_v25, %v3522_v37 }
 0x1f7   : > { %v1690_v63 = vmax.f32 %v1630_v50, 0.0  ;;  %v1632_v30 = vadd.f32 %v2780_v5, %v3648_v31 }
 0x1f8   : > { %v1691_v44 = vmax.f32 %v1631_v24, 0.0  ;;  %v1633_v29 = vadd.f32 %v2781_v56, %v3651_v19 }
 0x1f9   : > { %v1692_v26 = vmax.f32 %v1632_v30, 0.0  ;;  %v4142_v30 = vmov 0.0|0.0  }
 0x1fa   : > { %v1750_v32 = vmax.f32 %v1690_v63, %v1691_v44  ;;  %v1693_v23 = vmax.f32 %v1633_v29, 0.0  ;;  %v1419_v35 = vpop.f32.mrb[4].mxu0 }
 0x1fb   : > { %v2782_v33 = vadd.f32 %v1419_v35, %v3524_v38  ;;  %v1421_v49 = vpop.f32.mrb[5].mxu0 }
 0x1fc   : > { %v1751_v22 = vmax.f32 %v1692_v26, %v1693_v23  ;;  %v2783_v36 = vadd.f32 %v1421_v49, %v3527_v39  ;;  %v1423_v27 = vpop.f32.mrb[6].mxu0 }
 0x1fd   : > { %v1634_v12 = vadd.f32 %v2782_v33, %v3648_v31  ;;  %v2784_v37 = vadd.f32 %v1423_v27, %v3529_v40  ;;  %v1425_v25 = vpop.f32.mrb[7].mxu0 }
 0x1fe   : > { %v3665_v5 = vpack.c.bf16 %v1751_v22, %v1750_v32  ;;  %v1635_v24 = vadd.f32 %v2783_v36, %v3651_v19  ;;  %v2785_v63 = vadd.f32 %v1425_v25, %v3531_v42 }
 0x1ff   : > { %v1694_v50 = vmax.f32 %v1634_v12, 0.0  ;;  %v1636_v56 = vadd.f32 %v2784_v37, %v3648_v31 }
 0x200   : > { %v1695_v38 = vmax.f32 %v1635_v24, 0.0  ;;  %v1637_v23 = vadd.f32 %v2785_v63, %v3651_v19  ;;  %2600 = vmatpush1.bf16.msra.mxu1 %v3665_v5 }
 0x201   : > { %v1696_v39 = vmax.f32 %v1636_v56, 0.0  ;;  %2601 = vmatprep.subr.bf16.mxu1 %v4142_v30 }
 0x202   : > { %v1752_v44 = vmax.f32 %v1694_v50, %v1695_v38  ;;  %v1697_v40 = vmax.f32 %v1637_v23, 0.0  ;;  %v1429_v29 = vpop.f32.mrb[8].mxu0 }
 0x203   : > { %v2786_v22 = vadd.f32 %v1429_v29, %v3533_v43  ;;  %v1431_v26 = vpop.f32.mrb[9].mxu0 }
 0x204   : > { %v1753_v32 = vmax.f32 %v1696_v39, %v1697_v40  ;;  %v2787_v42 = vadd.f32 %v1431_v26, %v3537_v45  ;;  %v1433_v35 = vpop.f32.mrb[10].mxu0 }
 0x205   : > { %v1638_v33 = vadd.f32 %v2786_v22, %v3648_v31  ;;  %v2788_v49 = vadd.f32 %v1433_v35, %v3539_v46  ;;  %v1435_v36 = vpop.f32.mrb[11].mxu0 }
 0x206   : > { %v3677_v27 = vpack.c.bf16 %v1753_v32, %v1752_v44  ;;  %v1639_v12 = vadd.f32 %v2787_v42, %v3651_v19  ;;  %v2789_v37 = vadd.f32 %v1435_v36, %v3541_v47 }
 0x207   : > { %v1698_v25 = vmax.f32 %v1638_v33, 0.0  ;;  %v1640_v24 = vadd.f32 %v2788_v49, %v3648_v31 }
 0x208   : > { %v1699_v43 = vmax.f32 %v1639_v12, 0.0  ;;  %v1641_v63 = vadd.f32 %v2789_v37, %v3651_v19  ;;  %2603 = vmatpush1.bf16.msra.mxu1 %v3677_v27 }
 0x209   : > { %v1700_v45 = vmax.f32 %v1640_v24, 0.0  ;;  %2604 = vmatprep.subr.bf16.mxu1 %v4142_v30 }
 0x20a   : > { %v1754_v50 = vmax.f32 %v1698_v25, %v1699_v43  ;;  %v1701_v46 = vmax.f32 %v1641_v63, 0.0  ;;  %v1439_v56 = vpop.f32.mrb[12].mxu0 }
 0x20b   : > { %v2790_v38 = vadd.f32 %v1439_v56, %v3543_v28  ;;  %v1441_v23 = vpop.f32.mrb[13].mxu0 }
 0x20c   : > { %v1755_v39 = vmax.f32 %v1700_v45, %v1701_v46  ;;  %v2791_v47 = vadd.f32 %v1441_v23, %v3548_v52  ;;  %v1443_v44 = vpop.f32.mrb[14].mxu0 }
 0x20d   : > { %v1642_v40 = vadd.f32 %v2790_v38, %v3648_v31  ;;  %v2792_v29 = vadd.f32 %v1443_v44, %v3550_v53  ;;  %v1445_v22 = vpop.f32.mrb[15].mxu0 }
 0x20e   : > { %v3689_v26 = vpack.c.bf16 %v1755_v39, %v1754_v50  ;;  %v1643_v32 = vadd.f32 %v2791_v47, %v3651_v19  ;;  %v2793_v42 = vadd.f32 %v1445_v22, %v3552_v55 }
 0x20f   : > { %v1702_v35 = vmax.f32 %v1642_v40, 0.0  ;;  %v1644_v33 = vadd.f32 %v2792_v29, %v3648_v31 }
 0x210   : > { %v1703_v28 = vmax.f32 %v1643_v32, 0.0  ;;  %v1645_v49 = vadd.f32 %v2793_v42, %v3651_v19  ;;  %2606 = vmatpush1.bf16.msra.mxu1 %v3689_v26 }
 0x211   : > { %v1704_v52 = vmax.f32 %v1644_v33, 0.0  ;;  %2607 = vmatprep.subr.bf16.mxu1 %v4142_v30 }
 0x212   : > { %v1756_v36 = vmax.f32 %v1702_v35, %v1703_v28  ;;  %v1705_v53 = vmax.f32 %v1645_v49, 0.0  ;;  %v1449_v12 = vpop.f32.mrb[16].mxu0 }
 0x213   : > { %v2794_v37 = vadd.f32 %v1449_v12, %v3554_v34  ;;  %v1451_v25 = vpop.f32.mrb[17].mxu0 }
 0x214   : > { %v1757_v24 = vmax.f32 %v1704_v52, %v1705_v53  ;;  %v2795_v55 = vadd.f32 %v1451_v25, %v3556_v58  ;;  %v1453_v43 = vpop.f32.mrb[18].mxu0 }
 0x215   : > { %v1646_v63 = vadd.f32 %v2794_v37, %v3648_v31  ;;  %v2796_v45 = vadd.f32 %v1453_v43, %v3558_v59  ;;  %v1455_v50 = vpop.f32.mrb[19].mxu0 }
 0x216   : > { %v3701_v46 = vpack.c.bf16 %v1757_v24, %v1756_v36  ;;  %v1647_v56 = vadd.f32 %v2795_v55, %v3651_v19  ;;  %v2797_v38 = vadd.f32 %v1455_v50, %v3560_v61 }
 0x217   : > { %v1706_v23 = vmax.f32 %v1646_v63, 0.0  ;;  %v1648_v39 = vadd.f32 %v2796_v45, %v3648_v31 }
 0x218   : > { %v1707_v34 = vmax.f32 %v1647_v56, 0.0  ;;  %v1649_v47 = vadd.f32 %v2797_v38, %v3651_v19  ;;  %2609 = vmatpush1.bf16.msra.mxu1 %v3701_v46 }
 0x219   : > { %v1708_v58 = vmax.f32 %v1648_v39, 0.0  ;;  %2610 = vmatprep.subr.bf16.mxu1 %v4142_v30 }
 0x21a   : > { %v1758_v44 = vmax.f32 %v1706_v23, %v1707_v34  ;;  %v1709_v59 = vmax.f32 %v1649_v47, 0.0  ;;  %v1459_v40 = vpop.f32.mrb[20].mxu0 }
 0x21b   : > { %v2798_v29 = vadd.f32 %v1459_v40, %v3562_v62  ;;  %v1461_v22 = vpop.f32.mrb[21].mxu0 }
 0x21c   : > { %v1759_v32 = vmax.f32 %v1708_v58, %v1709_v59  ;;  %v2799_v61 = vadd.f32 %v1461_v22, %v3564_v2  ;;  %v1463_v42 = vpop.f32.mrb[22].mxu0 }
 0x21d   : > { %v1650_v35 = vadd.f32 %v2798_v29, %v3648_v31  ;;  %v2800_v33 = vadd.f32 %v1463_v42, %v3566_v0  ;;  %v1465_v28 = vpop.f32.mrb[23].mxu0 }
 0x21e   : > { %v3713_v49 = vpack.c.bf16 %v1759_v32, %v1758_v44  ;;  %v1651_v52 = vadd.f32 %v2799_v61, %v3651_v19  ;;  %v2801_v36 = vadd.f32 %v1465_v28, %v3568_v1 }
 0x21f   : > { %v1710_v53 = vmax.f32 %v1650_v35, 0.0  ;;  %v1652_v12 = vadd.f32 %v2800_v33, %v3648_v31 }
 0x220   : > { %v1711_v62 = vmax.f32 %v1651_v52, 0.0  ;;  %v1653_v37 = vadd.f32 %v2801_v36, %v3651_v19  ;;  %2612 = vmatpush1.bf16.msra.mxu1 %v3713_v49 }
 0x221   : > { %v1712_v2 = vmax.f32 %v1652_v12, 0.0  ;;  %2613 = vmatprep.subr.bf16.mxu1 %v4142_v30 }
 0x222   : > { %v1760_v25 = vmax.f32 %v1710_v53, %v1711_v62  ;;  %v1713_v0 = vmax.f32 %v1653_v37, 0.0  ;;  %v1469_v24 = vpop.f32.mrb[24].mxu0 }
 0x223   : > { %v2802_v55 = vadd.f32 %v1469_v24, %v3570_v41  ;;  %v1471_v43 = vpop.f32.mrb[25].mxu0 }
 0x224   : > { %v1761_v63 = vmax.f32 %v1712_v2, %v1713_v0  ;;  %v2803_v1 = vadd.f32 %v1471_v43, %v3572_v3  ;;  %v1473_v45 = vpop.f32.mrb[26].mxu0 }
 0x225   : > { %v1654_v50 = vadd.f32 %v2802_v55, %v3648_v31  ;;  %v2804_v56 = vadd.f32 %v1473_v45, %v3574_v4  ;;  %v1475_v38 = vpop.f32.mrb[27].mxu0 }
 0x226   : > { %v3725_v23 = vpack.c.bf16 %v1761_v63, %v1760_v25  ;;  %v1655_v39 = vadd.f32 %v2803_v1, %v3651_v19  ;;  %v2805_v34 = vadd.f32 %v1475_v38, %v3576_v6 }
 0x227   : > { %v1714_v47 = vmax.f32 %v1654_v50, 0.0  ;;  %v1656_v58 = vadd.f32 %v2804_v56, %v3648_v31 }
 0x228   : > { %v1715_v41 = vmax.f32 %v1655_v39, 0.0  ;;  %v1657_v44 = vadd.f32 %v2805_v34, %v3651_v19  ;;  %2615 = vmatpush1.bf16.msra.mxu1 %v3725_v23 }
 0x229   : > { %v1716_v3 = vmax.f32 %v1656_v58, 0.0  ;;  %2616 = vmatprep.subr.bf16.mxu1 %v4142_v30 }
 0x22a   : > { %v1762_v59 = vmax.f32 %v1714_v47, %v1715_v41  ;;  %v1717_v4 = vmax.f32 %v1657_v44, 0.0  ;;  %v1479_v40 = vpop.f32.mrb[28].mxu0 }
 0x22b   : > { %v2806_v29 = vadd.f32 %v1479_v40, %v3578_v7  ;;  %v1481_v22 = vpop.f32.mrb[29].mxu0 }
 0x22c   : > { %v1763_v32 = vmax.f32 %v1716_v3, %v1717_v4  ;;  %v2807_v6 = vadd.f32 %v1481_v22, %v3580_v8  ;;  %v1483_v61 = vpop.f32.mrb[30].mxu0 }
 0x22d   : > { %v1658_v42 = vadd.f32 %v2806_v29, %v3648_v31  ;;  %v2808_v35 = vadd.f32 %v1483_v61, %v3582_v48  ;;  %v1485_v33 = vpop.f32.mrb[31].mxu0 }
 0x22e   : > { %v3737_v28 = vpack.c.bf16 %v1763_v32, %v1762_v59  ;;  %v1659_v52 = vadd.f32 %v2807_v6, %v3651_v19  ;;  %v2809_v36 = vadd.f32 %v1485_v33, %v3584_v9 }
 0x22f   : > { %v1718_v53 = vmax.f32 %v1658_v42, 0.0  ;;  %v1660_v12 = vadd.f32 %v2808_v35, %v3648_v31 }
 0x230   : > { %v1719_v7 = vmax.f32 %v1659_v52, 0.0  ;;  %v1661_v62 = vadd.f32 %v2809_v36, %v3651_v19  ;;  %2618 = vmatpush1.bf16.msra.mxu1 %v3737_v28 }
 0x231   : > { %v1720_v8 = vmax.f32 %v1660_v12, 0.0  ;;  %2619 = vmatprep.subr.bf16.mxu1 %v4142_v30 }
 0x232   : > { %v1764_v37 = vmax.f32 %v1718_v53, %v1719_v7  ;;  %v1721_v48 = vmax.f32 %v1661_v62, 0.0  ;;  %v1489_v2 = vpop.f32.mrb[32].mxu0 }
 0x233   : > { %v2810_v25 = vadd.f32 %v1489_v2, %v3586_v10  ;;  %v1491_v0 = vpop.f32.mrb[33].mxu0 }
 0x234   : > { %v1765_v24 = vmax.f32 %v1720_v8, %v1721_v48  ;;  %v2811_v9 = vadd.f32 %v1491_v0, %v3588_v11  ;;  %v1493_v55 = vpop.f32.mrb[34].mxu0 }
 0x235   : > { %v1662_v43 = vadd.f32 %v2810_v25, %v3648_v31  ;;  %v2812_v63 = vadd.f32 %v1493_v55, %v3590_v13  ;;  %v1495_v1 = vpop.f32.mrb[35].mxu0 }
 0x236   : > { %v3749_v45 = vpack.c.bf16 %v1765_v24, %v1764_v37  ;;  %v1663_v50 = vadd.f32 %v2811_v9, %v3651_v19  ;;  %v2813_v56 = vadd.f32 %v1495_v1, %v3592_v51 }
 0x237   : > { %v1722_v38 = vmax.f32 %v1662_v43, 0.0  ;;  %v1664_v39 = vadd.f32 %v2812_v63, %v3648_v31 }
 0x238   : > { %v1723_v10 = vmax.f32 %v1663_v50, 0.0  ;;  %v1665_v34 = vadd.f32 %v2813_v56, %v3651_v19  ;;  %2621 = vmatpush1.bf16.msra.mxu1 %v3749_v45 }
 0x239   : > { %v1724_v11 = vmax.f32 %v1664_v39, 0.0  ;;  %2622 = vmatprep.subr.bf16.mxu1 %v4142_v30  ;;  %v4143_v39 = vld [vmem:[#allocation2_spill] sm:$0xff] }
 0x23a   : > { %v1766_v47 = vmax.f32 %v1722_v38, %v1723_v10  ;;  %v1725_v13 = vmax.f32 %v1665_v34, 0.0  ;;  %v1499_v58 = vpop.f32.mrb[36].mxu0 }
 0x23b   : > { %v2814_v41 = vadd.f32 %v1499_v58, %v3594_v14  ;;  %v1501_v44 = vpop.f32.mrb[37].mxu0 }
 0x23c   : > { %v1767_v3 = vmax.f32 %v1724_v11, %v1725_v13  ;;  %v2815_v51 = vadd.f32 %v1501_v44, %v3596_v15  ;;  %v1503_v59 = vpop.f32.mrb[38].mxu0  ;;  %v4144_v13 = vld [vmem:[#allocation3_spill] sm:$0xff] }
 0x23d   : > { %v1666_v4 = vadd.f32 %v2814_v41, %v3648_v31  ;;  %v2816_v40 = vadd.f32 %v1503_v59, %v3598_v54  ;;  %v1505_v29 = vpop.f32.mrb[39].mxu0 }
 0x23e   : > { %v3761_v22 = vpack.c.bf16 %v1767_v3, %v1766_v47  ;;  %v1667_v32 = vadd.f32 %v2815_v51, %v3651_v19  ;;  %v2817_v6 = vadd.f32 %v1505_v29, %v3600_v16 }
 0x23f   : > { %v1726_v61 = vmax.f32 %v1666_v4, 0.0  ;;  %v1668_v42 = vadd.f32 %v2816_v40, %v3648_v31  ;;  %v4145_v40 = vld [vmem:[#allocation4_spill] sm:$0xff] }
 0x240   : > { %v1727_v14 = vmax.f32 %v1667_v32, 0.0  ;;  %v1669_v35 = vadd.f32 %v2817_v6, %v3651_v19  ;;  %2624 = vmatpush1.bf16.msra.mxu1 %v3761_v22 }
 0x241   : > { %v1728_v15 = vmax.f32 %v1668_v42, 0.0  ;;  %2625 = vmatprep.subr.bf16.mxu1 %v4142_v30 }
 0x242   : > { %v1768_v33 = vmax.f32 %v1726_v61, %v1727_v14  ;;  %v1729_v54 = vmax.f32 %v1669_v35, 0.0  ;;  %v1509_v52 = vpop.f32.mrb[40].mxu0  ;;  %v4146_v61 = vld [vmem:[#allocation5_spill] sm:$0xff] }
 0x243   : > { %v2818_v36 = vadd.f32 %v1509_v52, %v3602_v17  ;;  %v1511_v53 = vpop.f32.mrb[41].mxu0 }
 0x244   : > { %v1769_v12 = vmax.f32 %v1728_v15, %v1729_v54  ;;  %v2819_v16 = vadd.f32 %v1511_v53, %v3604_v57  ;;  %v1513_v7 = vpop.f32.mrb[42].mxu0  ;;  %v4147_v15 = vld [vmem:[#allocation6_spill] sm:$0xff]  ;;  %v4148_v53 = vld [vmem:[#allocation7_spill] sm:$0xff] }
 0x245   : > { %v1670_v62 = vadd.f32 %v2818_v36, %v3648_v31  ;;  %v2820_v8 = vadd.f32 %v1513_v7, %v3606_v18  ;;  %v1515_v37 = vpop.f32.mrb[43].mxu0 }
 0x246   : > { %v3773_v48 = vpack.c.bf16 %v1769_v12, %v1768_v33  ;;  %v1671_v2 = vadd.f32 %v2819_v16, %v3651_v19  ;;  %v2821_v25 = vadd.f32 %v1515_v37, %v3608_v20 }
 0x247   : > { %v1730_v0 = vmax.f32 %v1670_v62, 0.0  ;;  %v1672_v24 = vadd.f32 %v2820_v8, %v3648_v31 }
 0x248   : > { %v1731_v17 = vmax.f32 %v1671_v2, 0.0  ;;  %v1673_v9 = vadd.f32 %v2821_v25, %v3651_v19  ;;  %2627 = vmatpush1.bf16.msra.mxu1 %v3773_v48 }
 0x249   : > { %v1732_v57 = vmax.f32 %v1672_v24, 0.0  ;;  %2628 = vmatprep.subr.bf16.mxu1 %v4142_v30  ;;  %v4149_v24 = vld [vmem:[#allocation8_spill] sm:$0xff] }
 0x24a   : > { %v1770_v55 = vmax.f32 %v1730_v0, %v1731_v17  ;;  %v1733_v18 = vmax.f32 %v1673_v9, 0.0  ;;  %v1519_v43 = vpop.f32.mrb[44].mxu0 }
 0x24b   : > { %v2822_v63 = vadd.f32 %v1519_v43, %v3610_v21  ;;  %v1521_v1 = vpop.f32.mrb[45].mxu0 }
 0x24c   : > { %v1771_v50 = vmax.f32 %v1732_v57, %v1733_v18  ;;  %v2823_v20 = vadd.f32 %v1521_v1, %v3612_v60  ;;  %v1523_v56 = vpop.f32.mrb[46].mxu0  ;;  %v4151_v1 = vld [vmem:[#allocation10_spill] sm:$0xff] }
 0x24d   : > { %v1674_v38 = vadd.f32 %v2822_v63, %v3648_v31  ;;  %v2824_v10 = vadd.f32 %v1523_v56, %v4143_v39  ;;  %v1525_v34 = vpop.f32.mrb[47].mxu0  ;;  %v4152_v39 = vld [vmem:[#allocation11_spill] sm:$0xff] }
 0x24e   : > { %v3785_v11 = vpack.c.bf16 %v1771_v50, %v1770_v55  ;;  %v1675_v47 = vadd.f32 %v2823_v20, %v3651_v19  ;;  %v2825_v58 = vadd.f32 %v1525_v34, %v4144_v13  ;;  %v4150_v55 = vld [vmem:[#allocation9_spill] sm:$0xff] }
 0x24f   : > { %v1734_v41 = vmax.f32 %v1674_v38, 0.0  ;;  %v1676_v44 = vadd.f32 %v2824_v10, %v3648_v31 }
 0x250   : > { %v1735_v21 = vmax.f32 %v1675_v47, 0.0  ;;  %v1677_v3 = vadd.f32 %v2825_v58, %v3651_v19  ;;  %2630 = vmatpush1.bf16.msra.mxu1 %v3785_v11 }
 0x251   : > { %v1736_v60 = vmax.f32 %v1676_v44, 0.0  ;;  %2631 = vmatprep.subr.bf16.mxu1 %v4142_v30 }
 0x252   : > { %v1772_v51 = vmax.f32 %v1734_v41, %v1735_v21  ;;  %v1737_v59 = vmax.f32 %v1677_v3, 0.0  ;;  %v1529_v4 = vpop.f32.mrb[48].mxu0 }
 0x253   : > { %v2826_v29 = vadd.f32 %v1529_v4, %v4145_v40  ;;  %v1531_v32 = vpop.f32.mrb[49].mxu0  ;;  %v4154_v40 = vld [vmem:[#allocation13_spill] sm:$0xff] }
 0x254   : > { %v1773_v6 = vmax.f32 %v1736_v60, %v1737_v59  ;;  %v2827_v42 = vadd.f32 %v1531_v32, %v4146_v61  ;;  %v1533_v14 = vpop.f32.mrb[50].mxu0  ;;  %v4153_v60 = vld [vmem:[#allocation12_spill] sm:$0xff]  ;;  %v4155_v61 = vld [vmem:[#allocation14_spill] sm:$0xff] }
 0x255   : > { %v1678_v35 = vadd.f32 %v2826_v29, %v3648_v31  ;;  %v2828_v33 = vadd.f32 %v1533_v14, %v4147_v15  ;;  %v1535_v54 = vpop.f32.mrb[51].mxu0 }
 0x256   : > { %v3797_v52 = vpack.c.bf16 %v1773_v6, %v1772_v51  ;;  %v1679_v36 = vadd.f32 %v2827_v42, %v3651_v19  ;;  %v2829_v12 = vadd.f32 %v1535_v54, %v4148_v53 }
 0x257   : > { %v1738_v16 = vmax.f32 %v1678_v35, 0.0  ;;  %v1680_v7 = vadd.f32 %v2828_v33, %v3648_v31  ;;  %v4156_v33 = vld [vmem:[#allocation15_spill] sm:$0xff] }
 0x258   : > { %v1739_v62 = vmax.f32 %v1679_v36, 0.0  ;;  %v1681_v8 = vadd.f32 %v2829_v12, %v3651_v19  ;;  %2633 = vmatpush1.bf16.msra.mxu1 %v3797_v52 }
 0x259   : > { %v1740_v37 = vmax.f32 %v1680_v7, 0.0  ;;  %2634 = vmatprep.subr.bf16.mxu1 %v4142_v30 }
 0x25a   : > { %v1774_v2 = vmax.f32 %v1738_v16, %v1739_v62  ;;  %v1741_v25 = vmax.f32 %v1681_v8, 0.0  ;;  %v1539_v0 = vpop.f32.mrb[52].mxu0 }
 0x25b   : > { %v2830_v17 = vadd.f32 %v1539_v0, %v4149_v24  ;;  %v1541_v9 = vpop.f32.mrb[53].mxu0  ;;  %v1785_v0 = vld [vmem:[%s4124_s3 + $0x28] sm:$0xff]  ;;  %v1784_v24 = vld [vmem:[%s4124_s3 + $0x20] sm:$0xff] }
 0x25c   : > { %v1775_v57 = vmax.f32 %v1740_v37, %v1741_v25  ;;  %v2831_v18 = vadd.f32 %v1541_v9, %v4150_v55  ;;  %v1543_v43 = vpop.f32.mrb[54].mxu0  ;;  %v1780_v25 = vld [vmem:[%s4124_s3] sm:$0xff]  ;;  %v1786_v9 = vld [vmem:[%s4124_s3 + $0x30] sm:$0xff] }
 0x25d   : > { %v1682_v63 = vadd.f32 %v2830_v17, %v3648_v31  ;;  %v2832_v50 = vadd.f32 %v1543_v43, %v4151_v1  ;;  %v1545_v20 = vpop.f32.mrb[55].mxu0  ;;  %v1787_v17 = vld [vmem:[%s4124_s3 + $0x38] sm:$0xff]  ;;  %v1788_v55 = vld [vmem:[%s4124_s3 + $0x40] sm:$0xff]  ;;  %v1790_v43 = vld [vmem:[%s4124_s3 + $0x50] sm:$0xff] }
 0x25e   : > { %v3809_v56 = vpack.c.bf16 %v1775_v57, %v1774_v2  ;;  %v1683_v38 = vadd.f32 %v2831_v18, %v3651_v19  ;;  %v2833_v10 = vadd.f32 %v1545_v20, %v4152_v39  ;;  %v1789_v57 = vld [vmem:[%s4124_s3 + $0x48] sm:$0xff]  ;;  %v1791_v18 = vld [vmem:[%s4124_s3 + $0x58] sm:$0xff]  ;;  %v1792_v1 = vld [vmem:[%s4124_s3 + $0x60] sm:$0xff] }
 0x25f   : > { %v1742_v34 = vmax.f32 %v1682_v63, 0.0  ;;  %v1684_v47 = vadd.f32 %v2832_v50, %v3648_v31  ;;  %v1793_v63 = vld [vmem:[%s4124_s3 + $0x68] sm:$0xff]  ;;  %v2534_v50 = vld [vmem:[%s4124_s3 + $0x78] sm:$0xff]  ;;  %v2533_v20 = vld [vmem:[%s4124_s3 + $0x70] sm:$0xff] }
 0x260   : > { %v1743_v13 = vmax.f32 %v1683_v38, 0.0  ;;  %v1685_v58 = vadd.f32 %v2833_v10, %v3651_v19  ;;  %2636 = vmatpush1.bf16.msra.mxu1 %v3809_v56  ;;  %v2536_v38 = vld [vmem:[%s4124_s3 + $0x88] sm:$0xff]  ;;  %v2535_v39 = vld [vmem:[%s4124_s3 + $0x80] sm:$0xff]  ;;  %v2538_v10 = vld [vmem:[%s4124_s3 + $0x98] sm:$0xff] }
 0x261   : > { %v1744_v41 = vmax.f32 %v1684_v47, 0.0  ;;  %2637 = vmatprep.subr.bf16.mxu1 %v4142_v30  ;;  %v2540_v47 = vld [vmem:[%s4124_s3 + $0xa8] sm:$0xff] }
 0x262   : > { %v1776_v44 = vmax.f32 %v1742_v34, %v1743_v13  ;;  %v1745_v21 = vmax.f32 %v1685_v58, 0.0  ;;  %v1549_v3 = vpop.f32.mrb[56].mxu0  ;;  %v2537_v34 = vld [vmem:[%s4124_s3 + $0x90] sm:$0xff]  ;;  %v2539_v13 = vld [vmem:[%s4124_s3 + $0xa0] sm:$0xff]  ;;  %v2542_v58 = vld [vmem:[%s4124_s3 + $0xb8] sm:$0xff] }
 0x263   : > { %v2834_v51 = vadd.f32 %v1549_v3, %v4153_v60  ;;  %v1551_v59 = vpop.f32.mrb[57].mxu0  ;;  %v2546_v3 = vld [vmem:[%s4124_s3 + $0xd8] sm:$0xff]  ;;  %v2545_v60 = vld [vmem:[%s4124_s3 + $0xd0] sm:$0xff] }
 0x264   : > { %v1777_v4 = vmax.f32 %v1744_v41, %v1745_v21  ;;  %v2835_v29 = vadd.f32 %v1551_v59, %v4154_v40  ;;  %v1553_v32 = vpop.f32.mrb[58].mxu0  ;;  %v2541_v41 = vld [vmem:[%s4124_s3 + $0xb0] sm:$0xff]  ;;  %v2543_v21 = vld [vmem:[%s4124_s3 + $0xc0] sm:$0xff] }
 0x265   : > { %v1686_v6 = vadd.f32 %v2834_v51, %v3648_v31  ;;  %v2836_v42 = vadd.f32 %v1553_v32, %v4155_v61  ;;  %v1555_v14 = vpop.f32.mrb[59].mxu0  ;;  %v2555_v51 = vld [vmem:[%s4124_s3 + $0xe8] sm:$0xff]  ;;  %v2554_v59 = vld [vmem:[%s4124_s3 + $0xe0] sm:$0xff]  ;;  %v2556_v40 = vld [vmem:[%s4124_s3 + $0xf0] sm:$0xff] }
 0x266   : > { %v3821_v35 = vpack.c.bf16 %v1777_v4, %v1776_v44  ;;  %v1687_v15 = vadd.f32 %v2835_v29, %v3651_v19  ;;  %v2837_v54 = vadd.f32 %v1555_v14, %v4156_v33  ;;  %v2544_v44 = vld [vmem:[%s4124_s3 + $0xc8] sm:$0xff]  ;;  %v2557_v4 = vld [vmem:[%s4124_s3 + $0xf8] sm:$0xff] }
 0x267   : > { %v1746_v36 = vmax.f32 %v1686_v6, 0.0  ;;  %v1688_v53 = vadd.f32 %v2836_v42, %v3648_v31  ;;  %v1783_v31 = vld [vmem:[%s4124_s3 + $0x18] sm:$0xff]  ;;  %v2559_v29 = vld [vmem:[%s4124_s3 + $0x108] sm:$0xff] }
 0x268   : > { %v1747_v12 = vmax.f32 %v1687_v15, 0.0  ;;  %v1689_v16 = vadd.f32 %v2837_v54, %v3651_v19  ;;  %2639 = vmatpush1.bf16.msra.mxu1 %v3821_v35  ;;  %v1782_v19 = vld [vmem:[%s4124_s3 + $0x10] sm:$0xff]  ;;  %v2561_v32 = vld [vmem:[%s4124_s3 + $0x118] sm:$0xff]  ;;  %v2563_v6 = vld [vmem:[%s4124_s3 + $0x128] sm:$0xff] }
 0x269   : > { %v1748_v7 = vmax.f32 %v1688_v53, 0.0  ;;  %2640 = vmatprep.subr.bf16.mxu1 %v4142_v30  ;;  %v2565_v61 = vld [vmem:[%s4124_s3 + $0x138] sm:$0xff]  ;;  %v2567_v42 = vld [vmem:[%s4124_s3 + $0x148] sm:$0xff]  ;;  %v2585_v15 = vld [vmem:[%s4124_s3 + $0x1a0] sm:$0xff] }
 0x26a   : > { %v1778_v62 = vmax.f32 %v1746_v36, %v1747_v12  ;;  %v1749_v8 = vmax.f32 %v1689_v16, 0.0  ;;  %v2576_v14 = vld [vmem:[%s4124_s3 + $0x158] sm:$0xff]  ;;  %v2587_v54 = vld [vmem:[%s4124_s3 + $0x1b0] sm:$0xff] }
 0x26b   : > { %v2588_v33 = vld [vmem:[%s4124_s3 + $0x1b8] sm:$0xff] }
 0x26c   : > { %v1779_v37 = vmax.f32 %v1748_v7, %v1749_v8 }
 0x26e   : > { %v3829_v2 = vpack.c.bf16 %v1779_v37, %v1778_v62 }
 0x270   : > { %2642 = vmatpush1.bf16.msra.mxu1 %v3829_v2 }
 0x271   : > { %2643 = vmatprep.subr.bf16.mxu1 %v4142_v30 }
 0x273   : > { %1881 = vmatmul.mubr.f32.vlgmr.msra.gmra.mrb[60].mxu1 %v1780_v25 }
 0x274   : > { %2645 = vmatpush1.bf16.msra.mxu1 %v3665_v5  ;;  %2527 = vmatprep.mubr.msk.f32.mxu1 %vm1794_vm0, %v1783_v31 }
 0x275   : > { %2646 = vmatprep.subr.bf16.mxu1 %v4142_v30 }
 0x277   : > { %1886 = vmatmul.mubr.f32.gmra.mrb[62].mxu1 %v1782_v19 }
 0x278   : > { %2648 = vmatpush1.bf16.msra.mxu1 %v3677_v27  ;;  %2528 = vmatprep.mubr.msk.f32.mxu1 %vm1794_vm0, %v1785_v0 }
 0x279   : > { %2649 = vmatprep.subr.bf16.mxu1 %v4142_v30 }
 0x27b   : > { %1891 = vmatmul.mubr.f32.gmra.mrb[64].mxu1 %v1784_v24 }
 0x27c   : > { %2651 = vmatpush1.bf16.msra.mxu1 %v3689_v26  ;;  %2529 = vmatprep.mubr.msk.f32.mxu1 %vm1794_vm0, %v1787_v17 }
 0x27d   : > { %2652 = vmatprep.subr.bf16.mxu1 %v4142_v30 }
 0x27f   : > { %1896 = vmatmul.mubr.f32.gmra.mrb[66].mxu1 %v1786_v9 }
 0x280   : > { %2654 = vmatpush1.bf16.msra.mxu1 %v3701_v46  ;;  %2530 = vmatprep.mubr.msk.f32.mxu1 %vm1794_vm0, %v1789_v57 }
 0x281   : > { %2655 = vmatprep.subr.bf16.mxu1 %v4142_v30 }
 0x283   : > { %1901 = vmatmul.mubr.f32.gmra.mrb[68].mxu1 %v1788_v55 }
 0x284   : > { %2657 = vmatpush1.bf16.msra.mxu1 %v3713_v49  ;;  %2531 = vmatprep.mubr.msk.f32.mxu1 %vm1794_vm0, %v1791_v18 }
 0x285   : > { %2658 = vmatprep.subr.bf16.mxu1 %v4142_v30 }
 0x287   : > { %1906 = vmatmul.mubr.f32.gmra.mrb[70].mxu1 %v1790_v43 }
 0x288   : > { %2660 = vmatpush1.bf16.msra.mxu1 %v3725_v23  ;;  %2532 = vmatprep.mubr.msk.f32.mxu1 %vm1794_vm0, %v1793_v63 }
 0x289   : > { %2661 = vmatprep.subr.bf16.mxu1 %v4142_v30 }
 0x28b   : > { %1911 = vmatmul.mubr.f32.gmra.mrb[72].mxu1 %v1792_v1 }
 0x28c   : > { %2663 = vmatpush1.bf16.msra.mxu1 %v3737_v28  ;;  %2547 = vmatprep.mubr.msk.f32.mxu1 %vm1794_vm0, %v2534_v50 }
 0x28d   : > { %2664 = vmatprep.subr.bf16.mxu1 %v4142_v30 }
 0x290   : > { %2666 = vmatpush1.bf16.msra.mxu1 %v3749_v45 }
 0x291   : > { %2667 = vmatprep.subr.bf16.mxu1 %v4142_v30 }
 0x294   : > { %2669 = vmatpush1.bf16.msra.mxu1 %v3761_v22 }
 0x295   : > { %2670 = vmatprep.subr.bf16.mxu1 %v4142_v30 }
 0x298   : > { %2672 = vmatpush1.bf16.msra.mxu1 %v3773_v48 }
 0x299   : > { %2673 = vmatprep.subr.bf16.mxu1 %v4142_v30 }
 0x29c   : > { %2675 = vmatpush1.bf16.msra.mxu1 %v3785_v11 }
 0x29d   : > { %2676 = vmatprep.subr.bf16.mxu1 %v4142_v30 }
 0x2a0   : > { %2678 = vmatpush1.bf16.msra.mxu1 %v3797_v52 }
 0x2a1   : > { %2679 = vmatprep.subr.bf16.mxu1 %v4142_v30 }
 0x2a4   : > { %2681 = vmatpush1.bf16.msra.mxu1 %v3809_v56 }
 0x2a5   : > { %2682 = vmatprep.subr.bf16.mxu1 %v4142_v30 }
 0x2a8   : > { %2684 = vmatpush1.bf16.msra.mxu1 %v3821_v35 }
 0x2a9   : > { %2685 = vmatprep.subr.bf16.mxu1 %v4142_v30 }
 0x2ac   : > { %2687 = vmatpush1.bf16.msra.mxu1 %v3829_v2 }
 0x2ad   : > { %2688 = vmatprep.subr.bf16.mxu1 %v4142_v30 }
 0x2af   : > { %2017 = vmatmul.mubr.f32.vlgmr.msra.gmra.mrb[74].mxu1 %v2533_v20 }
 0x2b0   : > { %2690 = vmatpush1.bf16.msra.mxu1 %v3665_v5  ;;  %2548 = vmatprep.mubr.msk.f32.mxu1 %vm1794_vm0, %v2536_v38 }
 0x2b1   : > { %2691 = vmatprep.subr.bf16.mxu1 %v4142_v30 }
 0x2b3   : > { %2022 = vmatmul.mubr.f32.gmra.mrb[76].mxu1 %v2535_v39 }
 0x2b4   : > { %2693 = vmatpush1.bf16.msra.mxu1 %v3677_v27  ;;  %2549 = vmatprep.mubr.msk.f32.mxu1 %vm1794_vm0, %v2538_v10 }
 0x2b5   : > { %2694 = vmatprep.subr.bf16.mxu1 %v4142_v30 }
 0x2b7   : > { %2027 = vmatmul.mubr.f32.gmra.mrb[78].mxu1 %v2537_v34 }
 0x2b8   : > { %2696 = vmatpush1.bf16.msra.mxu1 %v3689_v26  ;;  %2550 = vmatprep.mubr.msk.f32.mxu1 %vm1794_vm0, %v2540_v47 }
 0x2b9   : > { %2697 = vmatprep.subr.bf16.mxu1 %v4142_v30 }
 0x2bb   : > { %2032 = vmatmul.mubr.f32.gmra.mrb[80].mxu1 %v2539_v13 }
 0x2bc   : > { %2699 = vmatpush1.bf16.msra.mxu1 %v3701_v46  ;;  %2551 = vmatprep.mubr.msk.f32.mxu1 %vm1794_vm0, %v2542_v58 }
 0x2bd   : > { %2700 = vmatprep.subr.bf16.mxu1 %v4142_v30 }
 0x2bf   : > { %2037 = vmatmul.mubr.f32.gmra.mrb[82].mxu1 %v2541_v41 }
 0x2c0   : > { %2702 = vmatpush1.bf16.msra.mxu1 %v3713_v49  ;;  %2552 = vmatprep.mubr.msk.f32.mxu1 %vm1794_vm0, %v2544_v44 }
 0x2c1   : > { %2703 = vmatprep.subr.bf16.mxu1 %v4142_v30 }
 0x2c3   : > { %2042 = vmatmul.mubr.f32.gmra.mrb[84].mxu1 %v2543_v21 }
 0x2c4   : > { %2705 = vmatpush1.bf16.msra.mxu1 %v3725_v23  ;;  %2553 = vmatprep.mubr.msk.f32.mxu1 %vm1794_vm0, %v2546_v3 }
 0x2c5   : > { %2706 = vmatprep.subr.bf16.mxu1 %v4142_v30 }
 0x2c7   : > { %2047 = vmatmul.mubr.f32.gmra.mrb[86].mxu1 %v2545_v60 }
 0x2c8   : > { %2708 = vmatpush1.bf16.msra.mxu1 %v3737_v28  ;;  %2568 = vmatprep.mubr.msk.f32.mxu1 %vm1794_vm0, %v2555_v51 }
 0x2c9   : > { %2709 = vmatprep.subr.bf16.mxu1 %v4142_v30 }
 0x2cc   : > { %2711 = vmatpush1.bf16.msra.mxu1 %v3749_v45 }
 0x2cd   : > { %2712 = vmatprep.subr.bf16.mxu1 %v4142_v30 }
 0x2d0   : > { %2714 = vmatpush1.bf16.msra.mxu1 %v3761_v22 }
 0x2d1   : > { %2715 = vmatprep.subr.bf16.mxu1 %v4142_v30 }
 0x2d4   : > { %2717 = vmatpush1.bf16.msra.mxu1 %v3773_v48 }
 0x2d5   : > { %2718 = vmatprep.subr.bf16.mxu1 %v4142_v30 }
 0x2d8   : > { %2720 = vmatpush1.bf16.msra.mxu1 %v3785_v11 }
 0x2d9   : > { %2721 = vmatprep.subr.bf16.mxu1 %v4142_v30 }
 0x2dc   : > { %2723 = vmatpush1.bf16.msra.mxu1 %v3797_v52 }
 0x2dd   : > { %2724 = vmatprep.subr.bf16.mxu1 %v4142_v30 }
 0x2e0   : > { %2726 = vmatpush1.bf16.msra.mxu1 %v3809_v56 }
 0x2e1   : > { %2727 = vmatprep.subr.bf16.mxu1 %v4142_v30 }
 0x2e4   : > { %2729 = vmatpush1.bf16.msra.mxu1 %v3821_v35 }
 0x2e5   : > { %2730 = vmatprep.subr.bf16.mxu1 %v4142_v30 }
 0x2e8   : > { %2732 = vmatpush1.bf16.msra.mxu1 %v3829_v2 }
 0x2e9   : > { %2733 = vmatprep.subr.bf16.mxu1 %v4142_v30 }
 0x2eb   : > { %2160 = vmatmul.mubr.f32.vlgmr.msra.gmra.mrb[88].mxu1 %v2554_v59 }
 0x2ec   : > { %2735 = vmatpush1.bf16.msra.mxu1 %v3665_v5  ;;  %2569 = vmatprep.mubr.msk.f32.mxu1 %vm1794_vm0, %v2557_v4  ;;  %v2558_v5 = vld [vmem:[%s4124_s3 + $0x100] sm:$0xff] }
 0x2ed   : > { %2736 = vmatprep.subr.bf16.mxu1 %v4142_v30 }
 0x2ef   : > { %2165 = vmatmul.mubr.f32.gmra.mrb[90].mxu1 %v2556_v40 }
 0x2f0   : > { %2738 = vmatpush1.bf16.msra.mxu1 %v3677_v27  ;;  %2570 = vmatprep.mubr.msk.f32.mxu1 %vm1794_vm0, %v2559_v29  ;;  %v2560_v27 = vld [vmem:[%s4124_s3 + $0x110] sm:$0xff] }
 0x2f1   : > { %2739 = vmatprep.subr.bf16.mxu1 %v4142_v30 }
 0x2f3   : > { %2170 = vmatmul.mubr.f32.gmra.mrb[92].mxu1 %v2558_v5 }
 0x2f4   : > { %2741 = vmatpush1.bf16.msra.mxu1 %v3689_v26  ;;  %2571 = vmatprep.mubr.msk.f32.mxu1 %vm1794_vm0, %v2561_v32  ;;  %v2562_v26 = vld [vmem:[%s4124_s3 + $0x120] sm:$0xff] }
 0x2f5   : > { %2742 = vmatprep.subr.bf16.mxu1 %v4142_v30 }
 0x2f7   : > { %2175 = vmatmul.mubr.f32.gmra.mrb[94].mxu1 %v2560_v27 }
 0x2f8   : > { %2744 = vmatpush1.bf16.msra.mxu1 %v3701_v46  ;;  %2572 = vmatprep.mubr.msk.f32.mxu1 %vm1794_vm0, %v2563_v6  ;;  %v2564_v46 = vld [vmem:[%s4124_s3 + $0x130] sm:$0xff] }
 0x2f9   : > { %2745 = vmatprep.subr.bf16.mxu1 %v4142_v30 }
 0x2fb   : > { %2180 = vmatmul.mubr.f32.gmra.mrb[96].mxu1 %v2562_v26 }
 0x2fc   : > { %2747 = vmatpush1.bf16.msra.mxu1 %v3713_v49  ;;  %2573 = vmatprep.mubr.msk.f32.mxu1 %vm1794_vm0, %v2565_v61  ;;  %v2566_v49 = vld [vmem:[%s4124_s3 + $0x140] sm:$0xff] }
 0x2fd   : > { %2748 = vmatprep.subr.bf16.mxu1 %v4142_v30 }
 0x2ff   : > { %2185 = vmatmul.mubr.f32.gmra.mrb[98].mxu1 %v2564_v46 }
 0x300   : > { %2750 = vmatpush1.bf16.msra.mxu1 %v3725_v23  ;;  %2574 = vmatprep.mubr.msk.f32.mxu1 %vm1794_vm0, %v2567_v42  ;;  %v2575_v23 = vld [vmem:[%s4124_s3 + $0x150] sm:$0xff] }
 0x301   : > { %2751 = vmatprep.subr.bf16.mxu1 %v4142_v30 }
 0x303   : > { %2190 = vmatmul.mubr.f32.gmra.mrb[100].mxu1 %v2566_v49 }
 0x304   : > { %2753 = vmatpush1.bf16.msra.mxu1 %v3737_v28  ;;  %2589 = vmatprep.mubr.msk.f32.mxu1 %vm1794_vm0, %v2576_v14  ;;  %v2578_v28 = vld [vmem:[%s4124_s3 + $0x168] sm:$0xff] }
 0x305   : > { %2754 = vmatprep.subr.bf16.mxu1 %v4142_v30 }
 0x308   : > { %2756 = vmatpush1.bf16.msra.mxu1 %v3749_v45  ;;  %v2577_v45 = vld [vmem:[%s4124_s3 + $0x160] sm:$0xff] }
 0x309   : > { %2757 = vmatprep.subr.bf16.mxu1 %v4142_v30 }
 0x30c   : > { %2759 = vmatpush1.bf16.msra.mxu1 %v3761_v22  ;;  %v2579_v22 = vld [vmem:[%s4124_s3 + $0x170] sm:$0xff] }
 0x30d   : > { %2760 = vmatprep.subr.bf16.mxu1 %v4142_v30 }
 0x310   : > { %2762 = vmatpush1.bf16.msra.mxu1 %v3773_v48  ;;  %v2582_v48 = vld [vmem:[%s4124_s3 + $0x188] sm:$0xff] }
 0x311   : > { %2763 = vmatprep.subr.bf16.mxu1 %v4142_v30 }
 0x314   : > { %2765 = vmatpush1.bf16.msra.mxu1 %v3785_v11  ;;  %v2581_v11 = vld [vmem:[%s4124_s3 + $0x180] sm:$0xff] }
 0x315   : > { %2766 = vmatprep.subr.bf16.mxu1 %v4142_v30 }
 0x318   : > { %2768 = vmatpush1.bf16.msra.mxu1 %v3797_v52  ;;  %v2584_v52 = vld [vmem:[%s4124_s3 + $0x198] sm:$0xff] }
 0x319   : > { %2769 = vmatprep.subr.bf16.mxu1 %v4142_v30 }
 0x31c   : > { %2771 = vmatpush1.bf16.msra.mxu1 %v3809_v56  ;;  %v2583_v56 = vld [vmem:[%s4124_s3 + $0x190] sm:$0xff] }
 0x31d   : > { %2772 = vmatprep.subr.bf16.mxu1 %v4142_v30 }
 0x320   : > { %2774 = vmatpush1.bf16.msra.mxu1 %v3821_v35  ;;  %v2586_v35 = vld [vmem:[%s4124_s3 + $0x1a8] sm:$0xff] }
 0x321   : > { %2775 = vmatprep.subr.bf16.mxu1 %v4142_v30  ;;  %v2580_v30 = vld [vmem:[%s4124_s3 + $0x178] sm:$0xff] }
 0x324   : > { %2777 = vmatpush1.bf16.msra.mxu1 %v3829_v2 }
 0x327   : > { %2303 = vmatmul.mubr.f32.vlgmr.msra.gmra.mrb[102].mxu1 %v2575_v23 }
 0x328   : > { %2590 = vmatprep.mubr.msk.f32.mxu1 %vm1794_vm0, %v2578_v28 }
 0x32b   : > { %2308 = vmatmul.mubr.f32.gmra.mrb[104].mxu1 %v2577_v45 }
 0x32c   : > { %2591 = vmatprep.mubr.msk.f32.mxu1 %vm1794_vm0, %v2580_v30 }
 0x32f   : > { %2313 = vmatmul.mubr.f32.gmra.mrb[106].mxu1 %v2579_v22 }
 0x330   : > { %2592 = vmatprep.mubr.msk.f32.mxu1 %vm1794_vm0, %v2582_v48 }
 0x333   : > { %2318 = vmatmul.mubr.f32.gmra.mrb[108].mxu1 %v2581_v11 }
 0x334   : > { %2593 = vmatprep.mubr.msk.f32.mxu1 %vm1794_vm0, %v2584_v52 }
 0x337   : > { %2323 = vmatmul.mubr.f32.gmra.mrb[110].mxu1 %v2583_v56 }
 0x338   : > { %2594 = vmatprep.mubr.msk.f32.mxu1 %vm1794_vm0, %v2586_v35 }
 0x33b   : > { %2328 = vmatmul.mubr.f32.gmra.mrb[112].mxu1 %v2585_v15 }
 0x33c   : > { %2595 = vmatprep.mubr.msk.f32.mxu1 %vm1794_vm0, %v2588_v33 }
 0x33f   : > { %2333 = vmatmul.mubr.f32.gmra.mrb[114].mxu1 %v2587_v54 }
 0x346   : > { %v1882_v36 = vpop.f32.mrb[60].mxu1 }
 0x347   : > { %v1884_v53 = vpop.f32.mrb[61].mxu1 }
 0x34a   : > { %v1887_v12 = vpop.f32.mrb[62].mxu1 }
 0x34b   : > { %v1889_v16 = vpop.f32.mrb[63].mxu1 }
 0x34e   : > { %v1892_v7 = vpop.f32.mrb[64].mxu1 }
 0x34f   : > { %v1894_v62 = vpop.f32.mrb[65].mxu1 }
 0x352   : > { %v1897_v8 = vpop.f32.mrb[66].mxu1 }
 0x353   : > { %v1899_v37 = vpop.f32.mrb[67].mxu1 }
 0x356   : > { %v1902_v2 = vpop.f32.mrb[68].mxu1 }
 0x357   : > { %v1904_v25 = vpop.f32.mrb[69].mxu1 }
 0x35a   : > { %v1907_v31 = vpop.f32.mrb[70].mxu1 }
 0x35b   : > { %v1909_v19 = vpop.f32.mrb[71].mxu1 }
 0x35e   : > { %v1912_v0 = vpop.f32.mrb[72].mxu1 }
 0x35f   : > { %v1914_v24 = vpop.f32.mrb[73].mxu1 }
 0x382   : > { %v2018_v17 = vpop.f32.mrb[74].mxu1 }
 0x383   : > { %v2052_v9 = vmax.f32 %v1882_v36, %v2018_v17  ;;  %v2020_v57 = vpop.f32.mrb[75].mxu1 }
 0x386   : > { %v2023_v55 = vpop.f32.mrb[76].mxu1 }
 0x387   : > { %v2053_v18 = vmax.f32 %v1887_v12, %v2023_v55  ;;  %v2025_v43 = vpop.f32.mrb[77].mxu1 }
 0x38a   : > { %v2028_v63 = vpop.f32.mrb[78].mxu1 }
 0x38b   : > { %v2054_v1 = vmax.f32 %v1892_v7, %v2028_v63  ;;  %v2030_v50 = vpop.f32.mrb[79].mxu1 }
 0x38e   : > { %v2033_v20 = vpop.f32.mrb[80].mxu1 }
 0x38f   : > { %v2055_v38 = vmax.f32 %v1897_v8, %v2033_v20  ;;  %v2035_v39 = vpop.f32.mrb[81].mxu1 }
 0x392   : > { %v2038_v10 = vpop.f32.mrb[82].mxu1 }
 0x393   : > { %v2056_v34 = vmax.f32 %v1902_v2, %v2038_v10  ;;  %v2040_v47 = vpop.f32.mrb[83].mxu1 }
 0x396   : > { %v2043_v13 = vpop.f32.mrb[84].mxu1 }
 0x397   : > { %v2057_v58 = vmax.f32 %v1907_v31, %v2043_v13  ;;  %v2045_v41 = vpop.f32.mrb[85].mxu1 }
 0x39a   : > { %v2048_v44 = vpop.f32.mrb[86].mxu1 }
 0x39b   : > { %v2058_v21 = vmax.f32 %v1912_v0, %v2048_v44  ;;  %v2050_v3 = vpop.f32.mrb[87].mxu1 }
 0x3be   : > { %v2161_v60 = vpop.f32.mrb[88].mxu1 }
 0x3bf   : > { %v2195_v51 = vmax.f32 %v2052_v9, %v2161_v60  ;;  %v2163_v59 = vpop.f32.mrb[89].mxu1 }
 0x3c2   : > { %v2166_v4 = vpop.f32.mrb[90].mxu1 }
 0x3c3   : > { %v2196_v40 = vmax.f32 %v2053_v18, %v2166_v4  ;;  %v2168_v29 = vpop.f32.mrb[91].mxu1 }
 0x3c6   : > { %v2171_v5 = vpop.f32.mrb[92].mxu1 }
 0x3c7   : > { %v2197_v32 = vmax.f32 %v2054_v1, %v2171_v5  ;;  %v2173_v27 = vpop.f32.mrb[93].mxu1 }
 0x3ca   : > { %v2176_v6 = vpop.f32.mrb[94].mxu1 }
 0x3cb   : > { %v2198_v26 = vmax.f32 %v2055_v38, %v2176_v6  ;;  %v2178_v61 = vpop.f32.mrb[95].mxu1 }
 0x3ce   : > { %v2181_v46 = vpop.f32.mrb[96].mxu1 }
 0x3cf   : > { %v2199_v42 = vmax.f32 %v2056_v34, %v2181_v46  ;;  %v2183_v49 = vpop.f32.mrb[97].mxu1 }
 0x3d2   : > { %v2186_v14 = vpop.f32.mrb[98].mxu1 }
 0x3d3   : > { %v2200_v23 = vmax.f32 %v2057_v58, %v2186_v14  ;;  %v2188_v28 = vpop.f32.mrb[99].mxu1 }
 0x3d6   : > { %v2191_v45 = vpop.f32.mrb[100].mxu1 }
 0x3d7   : > { %v2201_v30 = vmax.f32 %v2058_v21, %v2191_v45  ;;  %v2193_v22 = vpop.f32.mrb[101].mxu1 }
 0x3fa   : > { %v2304_v48 = vpop.f32.mrb[102].mxu1 }
 0x3fb   : > { %v2338_v11 = vmax.f32 %v2195_v51, %v2304_v48  ;;  %v2306_v52 = vpop.f32.mrb[103].mxu1 }
 0x3fd   : > { %2345 = vst [vmem:[%s197_s30] sm:$0xff] %v2338_v11 }
 0x3fe   : > { %v2309_v56 = vpop.f32.mrb[104].mxu1 }
 0x3ff   : > { %v2339_v35 = vmax.f32 %v2196_v40, %v2309_v56  ;;  %v2311_v15 = vpop.f32.mrb[105].mxu1 }
 0x401   : > { %2346 = vst [vmem:[%s197_s30 + $0x8] sm:$0xff] %v2339_v35 }
 0x402   : > { %v2314_v33 = vpop.f32.mrb[106].mxu1 }
 0x403   : > { %v2340_v54 = vmax.f32 %v2197_v32, %v2314_v33  ;;  %v2316_v36 = vpop.f32.mrb[107].mxu1 }
 0x405   : > { %2347 = vst [vmem:[%s197_s30 + $0x10] sm:$0xff] %v2340_v54 }
 0x406   : > { %v2319_v53 = vpop.f32.mrb[108].mxu1 }
 0x407   : > { %v2341_v12 = vmax.f32 %v2198_v26, %v2319_v53  ;;  %v2321_v16 = vpop.f32.mrb[109].mxu1 }
 0x409   : > { %2348 = vst [vmem:[%s197_s30 + $0x18] sm:$0xff] %v2341_v12 }
 0x40a   : > { %v2324_v7 = vpop.f32.mrb[110].mxu1 }
 0x40b   : > { %v2342_v62 = vmax.f32 %v2199_v42, %v2324_v7  ;;  %v2326_v8 = vpop.f32.mrb[111].mxu1 }
 0x40d   : > { %2349 = vst [vmem:[%s197_s30 + $0x20] sm:$0xff] %v2342_v62 }
 0x40e   : > { %v2329_v37 = vpop.f32.mrb[112].mxu1 }
 0x40f   : > { %v2343_v2 = vmax.f32 %v2200_v23, %v2329_v37  ;;  %v2331_v25 = vpop.f32.mrb[113].mxu1 }
 0x411   : > { %2350 = vst [vmem:[%s197_s30 + $0x28] sm:$0xff] %v2343_v2 }
 0x412   : > { %v2334_v31 = vpop.f32.mrb[114].mxu1 }
 0x413   : > { %v2344_v19 = vmax.f32 %v2201_v30, %v2334_v31  ;;  %v2336_v0 = vpop.f32.mrb[115].mxu1 }
 0x415   : > { %2351 = vst [vmem:[%s197_s30 + $0x30] sm:$0xff] %v2344_v19 }
 0x416 PF: > { %s14_s15 = sadd.s32 1, %s3072_s15  }
 0x417   : > { %p11_p4 = scmp.ge.s32.totalorder %s14_s15, 4  }
 0x419   :  { %13 = sbr.rel (!%p11_p4) target bundleno = 1 (0x1), region = 72 }

// kernel: _lambda_.6
= control target key start
LH: loop header
LB: loop body
LE: loop exit
PB: predicated region body
PF: predicated region fallthrough
CT: control target
= control target key end

     0   :  { %s1443_s15 = smov 0   ;;  %s1689_s0 = inlined_call_operand.vmem [shape: f32[2,16,128], index: 0, kind: input, shape index: {}]   ;;  %s1690_s1 = inlined_call_operand.vmem [shape: bf16[4,128,256], index: 1, kind: input, shape index: {}]   ;;  %s1691_s2 = inlined_call_operand.vmem [shape: f32[1,256], index: 2, kind: input, shape index: {}]   ;;  %s1692_s3 = inlined_call_operand.vmem [shape: f32[4,8,6], index: 3, kind: input, shape index: {}]   ;;  %s1693_s4 = inlined_call_operand.vmem [shape: f32[2,8,128], index: 4, kind: output, shape index: {}]  }
   0x1 LB: > { %s1138_s16 = sadd.s32 4294967295, %s1413_s15   ;;  %p1142_p0 = scmp.ge.s32.totalorder %s1413_s15, 1  ;;  %s1413_s15 = sphi %s1443_s15, %s14_s15  }
   0x2   : > { %p162_p1 = scmp.lt.s32.totalorder %s1413_s15, 3 }
   0x4   : > { %p163_p2 = pnand %p1142_p0, %p162_p1 }
   0x5   : > { %v1311_v0 = vld [vmem:[%s1690_s1 + $0x84] ss:$8 sps:$4 sm:$0xff] (!%p163_p2)   ;;  %v1415_v2 = vmov (!%p163_p2), 0   ;;  %v1315_v3 = vld [vmem:[%s1690_s1 + $0x80] ss:$8 sps:$4 sm:$0xff] (!%p163_p2)   ;;  %p187_p3 = scmp.lt.s32.totalorder (!%p163_p2), %s1138_s16, 1 }
   0x6   : > { %166 = sbr.rel (%p163_p2) target bundleno = 517 (0x205), region = 36  ;;  %v1313_v1 = vld [vmem:[%s1690_s1 + $0x4] ss:$8 sps:$4 sm:$0xff] (!%p163_p2)   ;;  %346 = vmatprep.mubr.bf16.mxu0 (!%p163_p2), %v1415_v2  ;;  %467 = vmatprep.mubr.bf16.mxu1 (!%p163_p2), %v1415_v2  ;;  %v1316_v4 = vld [vmem:[%s1690_s1] ss:$8 sps:$4 sm:$0xff] (!%p163_p2)   ;;  %vm1417_vm0 = vmmov (!%p163_p2), 0  }
   0x7   : > { %314 = vmatprep.subr.bf16.mxu0 (!%p163_p2), %v1311_v0  ;;  %435 = vmatprep.subr.bf16.mxu1 (!%p163_p2), %v1313_v1  ;;  %v1317_v5 = vld [vmem:[%s1690_s1 + $0x94] ss:$8 sps:$4 sm:$0xff] (!%p163_p2)   ;;  %v1321_v7 = vld [vmem:[%s1690_s1 + $0x90] ss:$8 sps:$4 sm:$0xff] (!%p163_p2)   ;;  %v1323_v9 = vld [vmem:[%s1690_s1 + $0xa4] ss:$8 sps:$4 sm:$0xff] (!%p163_p2)  }
   0x8   : > { %315 = vmatpush1.bf16.msra.mxu0 (!%p163_p2), %v1315_v3  ;;  %436 = vmatpush1.bf16.msra.mxu1 (!%p163_p2), %v1316_v4  ;;  %v1319_v6 = vld [vmem:[%s1690_s1 + $0x14] ss:$8 sps:$4 sm:$0xff] (!%p163_p2)   ;;  %v1322_v8 = vld [vmem:[%s1690_s1 + $0x10] ss:$8 sps:$4 sm:$0xff] (!%p163_p2)   ;;  %v1325_v10 = vld [vmem:[%s1690_s1 + $0x24] ss:$8 sps:$4 sm:$0xff] (!%p163_p2)  }
   0x9   : > { %316 = vmatprep.subr.bf16.mxu0 (!%p163_p2), %v1317_v5  ;;  %437 = vmatprep.subr.bf16.mxu1 (!%p163_p2), %v1319_v6  ;;  %v1327_v11 = vld [vmem:[%s1690_s1 + $0xa0] ss:$8 sps:$4 sm:$0xff] (!%p163_p2)   ;;  %v1329_v13 = vld [vmem:[%s1690_s1 + $0xb4] ss:$8 sps:$4 sm:$0xff] (!%p163_p2)   ;;  %v1333_v15 = vld [vmem:[%s1690_s1 + $0xb0] ss:$8 sps:$4 sm:$0xff] (!%p163_p2)  }
   0xa   : > { %v1328_v12 = vld [vmem:[%s1690_s1 + $0x20] ss:$8 sps:$4 sm:$0xff] (!%p163_p2)   ;;  %v1331_v14 = vld [vmem:[%s1690_s1 + $0x34] ss:$8 sps:$4 sm:$0xff] (!%p163_p2)   ;;  %v1334_v16 = vld [vmem:[%s1690_s1 + $0x30] ss:$8 sps:$4 sm:$0xff] (!%p163_p2)  }
   0xb   : > { %v1335_v17 = vld [vmem:[%s1690_s1 + $0xc4] ss:$8 sps:$4 sm:$0xff] (!%p163_p2)   ;;  %v1339_v19 = vld [vmem:[%s1690_s1 + $0xc0] ss:$8 sps:$4 sm:$0xff] (!%p163_p2)   ;;  %v1341_v21 = vld [vmem:[%s1690_s1 + $0xd4] ss:$8 sps:$4 sm:$0xff] (!%p163_p2)  }
   0xc   : > { %317 = vmatpush1.bf16.msra.mxu0 (!%p163_p2), %v1321_v7  ;;  %438 = vmatpush1.bf16.msra.mxu1 (!%p163_p2), %v1322_v8  ;;  %v1337_v18 = vld [vmem:[%s1690_s1 + $0x44] ss:$8 sps:$4 sm:$0xff] (!%p163_p2)   ;;  %v1340_v20 = vld [vmem:[%s1690_s1 + $0x40] ss:$8 sps:$4 sm:$0xff] (!%p163_p2)   ;;  %v1343_v22 = vld [vmem:[%s1690_s1 + $0x54] ss:$8 sps:$4 sm:$0xff] (!%p163_p2)  }
   0xd   : > { %318 = vmatprep.subr.bf16.mxu0 %v1323_v9  ;;  %439 = vmatprep.subr.bf16.mxu1 %v1325_v10  ;;  %s1695_s16 = smov (!%p187_p3, %s1138_s16), 1  ;;  %v1345_v23 = vld [vmem:[%s1690_s1 + $0xd0] ss:$8 sps:$4 sm:$0xff]   ;;  %v1347_v25 = vld [vmem:[%s1690_s1 + $0xe4] ss:$8 sps:$4 sm:$0xff]   ;;  %v1416_v9 = vmov 0.0  }
   0xe   : > { %v1346_v24 = vld [vmem:[%s1690_s1 + $0x50] ss:$8 sps:$4 sm:$0xff]   ;;  %v1349_v26 = vld [vmem:[%s1690_s1 + $0x64] ss:$8 sps:$4 sm:$0xff]   ;;  %s1271_s21 = sshll.u32 %s1695_s16, 4  ;;  %vm782_vm1 = vcmask 1045504  }
   0xf   : > { %v1351_v27 = vld [vmem:[%s1690_s1 + $0xe0] ss:$8 sps:$4 sm:$0xff]   ;;  %v1353_v29 = vld [vmem:[%s1690_s1 + $0xf4] ss:$8 sps:$4 sm:$0xff]   ;;  %s1553_s6 = scalar_lea.vmem %s1689_s0, %s1271_s21  ;;  %v1357_v31 = vld [vmem:[%s1690_s1 + $0xf0] ss:$8 sps:$4 sm:$0xff]  }
  0x10   : > { %319 = vmatpush1.bf16.msra.mxu0 %v1327_v11  ;;  %440 = vmatpush1.bf16.msra.mxu1 %v1328_v12  ;;  %v1352_v28 = vld [vmem:[%s1690_s1 + $0x60] ss:$8 sps:$4 sm:$0xff]   ;;  %v1355_v30 = vld [vmem:[%s1690_s1 + $0x74] ss:$8 sps:$4 sm:$0xff]   ;;  %v1358_v32 = vld [vmem:[%s1690_s1 + $0x70] ss:$8 sps:$4 sm:$0xff]  }
  0x11   : > { %320 = vmatprep.subr.bf16.mxu0 %v1329_v13  ;;  %441 = vmatprep.subr.bf16.mxu1 %v1331_v14  ;;  %v215_v33 = vld [vmem:[%s1553_s6 + $0x1] sm:$0x3f]  ;;  %v1367_v41 = vld [vmem:[%s1690_s1 + $0x114] ss:$8 sps:$4 sm:$0xff]   ;;  %v1365_v43 = vld [vmem:[%s1690_s1 + $0x110] ss:$8 sps:$4 sm:$0xff]  }
  0x12   : > { %v197_v34 = vld [vmem:[%s1553_s6] sm:$0x3f]  ;;  %v216_v37 = vpack.c.bf16 %v215_v33, %v215_v33  ;;  %v1370_v42 = vld [vmem:[%s1690_s1 + $0x194] ss:$8 sps:$4 sm:$0xff]   ;;  %v1368_v44 = vld [vmem:[%s1690_s1 + $0x190] ss:$8 sps:$4 sm:$0xff]  }
  0x13   : > { %v1361_v35 = vld [vmem:[%s1690_s1 + $0x104] ss:$8 sps:$4 sm:$0xff]   ;;  %v198_v38 = vpack.c.bf16 %v197_v34, %v197_v34  ;;  %v1359_v39 = vld [vmem:[%s1690_s1 + $0x100] ss:$8 sps:$4 sm:$0xff]   ;;  %v1379_v49 = vld [vmem:[%s1690_s1 + $0x134] ss:$8 sps:$4 sm:$0xff]  }
  0x14   : > { %321 = vmatpush1.bf16.msra.mxu0 %v1333_v15  ;;  %442 = vmatpush1.bf16.msra.mxu1 %v1334_v16  ;;  %v1364_v36 = vld [vmem:[%s1690_s1 + $0x184] ss:$8 sps:$4 sm:$0xff]   ;;  %v1362_v40 = vld [vmem:[%s1690_s1 + $0x180] ss:$8 sps:$4 sm:$0xff]   ;;  %v1382_v50 = vld [vmem:[%s1690_s1 + $0x1b4] ss:$8 sps:$4 sm:$0xff]  }
  0x15   : > { %322 = vmatprep.subr.bf16.mxu0 %v1335_v17  ;;  %443 = vmatprep.subr.bf16.mxu1 %v1337_v18  ;;  %v1373_v45 = vld [vmem:[%s1690_s1 + $0x124] ss:$8 sps:$4 sm:$0xff]   ;;  %v1371_v47 = vld [vmem:[%s1690_s1 + $0x120] ss:$8 sps:$4 sm:$0xff]   ;;  %v1377_v51 = vld [vmem:[%s1690_s1 + $0x130] ss:$8 sps:$4 sm:$0xff]  }
  0x16   : > { %v1376_v46 = vld [vmem:[%s1690_s1 + $0x1a4] ss:$8 sps:$4 sm:$0xff]   ;;  %v1374_v48 = vld [vmem:[%s1690_s1 + $0x1a0] ss:$8 sps:$4 sm:$0xff]   ;;  %v1380_v52 = vld [vmem:[%s1690_s1 + $0x1b0] ss:$8 sps:$4 sm:$0xff]  }
  0x17   : > { %v1385_v53 = vld [vmem:[%s1690_s1 + $0x144] ss:$8 sps:$4 sm:$0xff]   ;;  %v1383_v55 = vld [vmem:[%s1690_s1 + $0x140] ss:$8 sps:$4 sm:$0xff]   ;;  %v1391_v57 = vld [vmem:[%s1690_s1 + $0x154] ss:$8 sps:$4 sm:$0xff]  }
  0x18   : > { %323 = vmatpush1.bf16.msra.mxu0 %v1339_v19  ;;  %444 = vmatpush1.bf16.msra.mxu1 %v1340_v20  ;;  %v1388_v54 = vld [vmem:[%s1690_s1 + $0x1c4] ss:$8 sps:$4 sm:$0xff]   ;;  %v1386_v56 = vld [vmem:[%s1690_s1 + $0x1c0] ss:$8 sps:$4 sm:$0xff]   ;;  %v1394_v58 = vld [vmem:[%s1690_s1 + $0x1d4] ss:$8 sps:$4 sm:$0xff]   ;;  %v762_v20 = vlaneseq }
  0x19   : > { %324 = vmatprep.subr.bf16.mxu0 %v1341_v21  ;;  %445 = vmatprep.subr.bf16.mxu1 %v1343_v22  ;;  %v1389_v59 = vld [vmem:[%s1690_s1 + $0x150] ss:$8 sps:$4 sm:$0xff]   ;;  %v1397_v61 = vld [vmem:[%s1690_s1 + $0x164] ss:$8 sps:$4 sm:$0xff]   ;;  %v1395_v63 = vld [vmem:[%s1690_s1 + $0x160] ss:$8 sps:$4 sm:$0xff]  }
  0x1a   : > { %v1392_v60 = vld [vmem:[%s1690_s1 + $0x1d0] ss:$8 sps:$4 sm:$0xff]   ;;  %v1400_v62 = vld [vmem:[%s1690_s1 + $0x1e4] ss:$8 sps:$4 sm:$0xff]   ;;  %v1398_v0 = vld [vmem:[%s1690_s1 + $0x1e0] ss:$8 sps:$4 sm:$0xff]  }
  0x1b   : > { %v1403_v1 = vld [vmem:[%s1690_s1 + $0x174] ss:$8 sps:$4 sm:$0xff]   ;;  %v1401_v3 = vld [vmem:[%s1690_s1 + $0x170] ss:$8 sps:$4 sm:$0xff]   ;;  %v476_v5 = vld [vmem:[%s1553_s6 + $0x3] sm:$0x3f] }
  0x1c   : > { %325 = vmatpush1.bf16.msra.mxu0 %v1345_v23  ;;  %446 = vmatpush1.bf16.msra.mxu1 %v1346_v24  ;;  %v1404_v4 = vld [vmem:[%s1690_s1 + $0x1f0] ss:$8 sps:$4 sm:$0xff]   ;;  %v618_v6 = vld [vmem:[%s1553_s6 + $0x4] sm:$0x3f]  ;;  %v477_v7 = vpack.c.bf16 %v476_v5, %v476_v5  ;;  %v763_v21 = vshrl.u32 %v762_v20, 7  ;;  %vm778_vm2 = vcmask 48128  }
  0x1d   : > { %326 = vmatprep.subr.bf16.mxu0 %v1347_v25  ;;  %447 = vmatprep.subr.bf16.mxu1 %v1349_v26  ;;  %v619_v8 = vpack.c.bf16 %v618_v6, %v618_v6  ;;  %v760_v23 = vld [vmem:[%s1691_s2] sm:$0x3]  ;;  %s1145_s17 = sshll.u32 %s1695_s16, 3 }
  0x1e   : > { %v764_v22 = vsub.s32 0, %v763_v21  ;;  %v768_v24 = vsub.s32 1, %v763_v21  ;;  %s195_s20 = scalar_lea.vmem %s1693_s4, %s1145_s17 }
  0x20   : > { %327 = vmatpush1.bf16.msra.mxu0 %v1351_v27  ;;  %448 = vmatpush1.bf16.msra.mxu1 %v1352_v28  ;;  %v765_v28 = vrot.slane %v760_v23, %v764_v22 }
  0x21   : > { %328 = vmatprep.subr.bf16.mxu0 %v1353_v29  ;;  %449 = vmatprep.subr.bf16.mxu1 %v1355_v30 }
  0x24   : > { %329 = vmatpush1.bf16.msra.mxu0 %v1357_v31  ;;  %450 = vmatpush1.bf16.msra.mxu1 %v1358_v32  ;;  %v769_v32 = vrot.slane %v760_v23, %v768_v24 }
  0x25   : > { %575 = vmatprep.subr.bf16.mxu0 %v1361_v35  ;;  %717 = vmatprep.subr.bf16.mxu1 %v1364_v36 }
  0x27   : > { %347 = vmatmul.mubr.bf16.vlgmr.msra.gmra.mrb[0].mxu0 %v216_v37  ;;  %468 = vmatmul.mubr.bf16.vlgmr.msra.gmra.mrb[0].mxu1 %v198_v38 }
  0x28   : > { %576 = vmatpush1.bf16.msra.mxu0 %v1359_v39  ;;  %718 = vmatpush1.bf16.msra.mxu1 %v1362_v40 }
  0x29   : > { %577 = vmatprep.subr.bf16.mxu0 %v1367_v41  ;;  %719 = vmatprep.subr.bf16.mxu1 %v1370_v42 }
  0x2a   : > { %607 = vmatprep.mubr.bf16.mxu0 %v1415_v2  ;;  %749 = vmatprep.mubr.bf16.mxu1 %v1415_v2  ;;  %v1406_v2 = vld [vmem:[%s1690_s1 + $0x1f4] ss:$8 sps:$4 sm:$0xff]  }
  0x2c   : > { %578 = vmatpush1.bf16.msra.mxu0 %v1365_v43  ;;  %720 = vmatpush1.bf16.msra.mxu1 %v1368_v44  ;;  %v777_v44 = vld [vmem:[%s1692_s3] sm:$0xff] }
  0x2d   : > { %579 = vmatprep.subr.bf16.mxu0 %v1373_v45  ;;  %721 = vmatprep.subr.bf16.mxu1 %v1376_v46  ;;  %v1260_v45 = vld [vmem:[%s1692_s3 + $0x8] sm:$0xff]  ;;  %v1263_v46 = vld [vmem:[%s1692_s3 + $0x10] sm:$0xff] }
  0x30   : > { %580 = vmatpush1.bf16.msra.mxu0 %v1371_v47  ;;  %722 = vmatpush1.bf16.msra.mxu1 %v1374_v48  ;;  %v1266_v47 = vld [vmem:[%s1692_s3 + $0x18] sm:$0xff] }
  0x31   : > { %581 = vmatprep.subr.bf16.mxu0 %v1379_v49  ;;  %723 = vmatprep.subr.bf16.mxu1 %v1382_v50 }
  0x34   : > { %582 = vmatpush1.bf16.msra.mxu0 %v1377_v51  ;;  %724 = vmatpush1.bf16.msra.mxu1 %v1380_v52 }
  0x35   : > { %583 = vmatprep.subr.bf16.mxu0 %v1385_v53  ;;  %725 = vmatprep.subr.bf16.mxu1 %v1388_v54 }
  0x38   : > { %584 = vmatpush1.bf16.msra.mxu0 %v1383_v55  ;;  %726 = vmatpush1.bf16.msra.mxu1 %v1386_v56 }
  0x39   : > { %585 = vmatprep.subr.bf16.mxu0 %v1391_v57  ;;  %727 = vmatprep.subr.bf16.mxu1 %v1394_v58 }
  0x3c   : > { %586 = vmatpush1.bf16.msra.mxu0 %v1389_v59  ;;  %728 = vmatpush1.bf16.msra.mxu1 %v1392_v60 }
  0x3d   : > { %587 = vmatprep.subr.bf16.mxu0 %v1397_v61  ;;  %729 = vmatprep.subr.bf16.mxu1 %v1400_v62 }
  0x40   : > { %588 = vmatpush1.bf16.msra.mxu0 %v1395_v63  ;;  %730 = vmatpush1.bf16.msra.mxu1 %v1398_v0 }
  0x41   : > { %589 = vmatprep.subr.bf16.mxu0 %v1403_v1  ;;  %731 = vmatprep.subr.bf16.mxu1 %v1406_v2 }
  0x44   : > { %590 = vmatpush1.bf16.msra.mxu0 %v1401_v3  ;;  %732 = vmatpush1.bf16.msra.mxu1 %v1404_v4 }
  0x45   : > { %1280 = vmatprep.subr.mxu0 %v1416_v9  ;;  %1285 = vmatprep.subr.mxu1 %v1416_v9 }
  0x47   : > { %608 = vmatmul.mubr.bf16.vlgmr.msra.gmra.mrb[4].mxu0 %v477_v7  ;;  %750 = vmatmul.mubr.bf16.vlgmr.msra.gmra.mrb[4].mxu1 %v619_v8 }
  0x48   : > { %1282 = vmatprep.mubr.msk.f32.mxu0 %vm1417_vm0, %v1416_v9  ;;  %1287 = vmatprep.mubr.msk.f32.mxu1 %vm1417_vm0, %v1416_v9 }
  0xfa   : > { %v348_v10 = vpop.f32.mrb[0].mxu0  ;;  %v469_v11 = vpop.f32.mrb[0].mxu1 }
  0xfb   : > { %v470_v12 = vadd.f32 %v469_v11, %v348_v10  ;;  %v350_v13 = vpop.f32.mrb[1].mxu0  ;;  %v471_v14 = vpop.f32.mrb[1].mxu1 }
  0xfc   : > { %v472_v15 = vadd.f32 %v471_v14, %v350_v13  ;;  %v352_v16 = vpop.f32.mrb[2].mxu0  ;;  %v473_v17 = vpop.f32.mrb[2].mxu1 }
  0xfd   : > { %v353_v18 = vpop.f32.mrb[3].mxu0  ;;  %v474_v19 = vpop.f32.mrb[3].mxu1 }
 0x11a   : > { %v609_v25 = vpop.f32.mrb[4].mxu0  ;;  %v751_v26 = vpop.f32.mrb[4].mxu1 }
 0x11b   : > { %v616_v27 = vadd.f32 %v609_v25, %v470_v12  ;;  %v611_v29 = vpop.f32.mrb[5].mxu0  ;;  %v753_v30 = vpop.f32.mrb[5].mxu1 }
 0x11c   : > { %v617_v31 = vadd.f32 %v611_v29, %v472_v15  ;;  %v613_v33 = vpop.f32.mrb[6].mxu0  ;;  %v755_v34 = vpop.f32.mrb[6].mxu1 }
 0x11d   : > { %v758_v35 = vadd.f32 %v751_v26, %v616_v27  ;;  %v614_v36 = vpop.f32.mrb[7].mxu0  ;;  %v756_v37 = vpop.f32.mrb[7].mxu1 }
 0x11e   : > { %v759_v38 = vadd.f32 %v753_v30, %v617_v31 }
 0x11f   : > { %v772_v39 = vadd.f32 %v765_v28, %v758_v35 }
 0x120   : > { %v773_v40 = vadd.f32 %v769_v32, %v759_v38 }
 0x121   : > { %v774_v41 = vmax.f32 %v772_v39, 0.0 }
 0x122   : > { %v775_v42 = vmax.f32 %v773_v40, 0.0 }
 0x124   : > { %v776_v43 = vmax.f32 %v774_v41, %v775_v42 }
 0x126   : > { %1281 = vmatpush3.msk.msra.mxu0 %vm782_vm1, %v776_v43  ;;  %1286 = vmatpush3.msk.msra.mxu1 %vm782_vm1, %v776_v43 }
 0x127   : > { %1290 = vmatprep.subr.mxu0 %v1416_v9  ;;  %1295 = vmatprep.subr.mxu1 %v1416_v9 }
 0x128   : > { %1283 = vmatmul.mubr.msk.f32.vlgmr.msra.gmra.mrb[8].mxu0 %vm778_vm2, %v777_v44  ;;  %1288 = vmatmul.mubr.msk.f32.vlgmr.msra.gmra.mrb[8].mxu1 %vm778_vm2, %v1260_v45 }
 0x129   : > { %1291 = vmatpush3.msk.msra.mxu0 %vm782_vm1, %v776_v43  ;;  %1296 = vmatpush3.msk.msra.mxu1 %vm782_vm1, %v776_v43 }
 0x12a   : > { %1292 = vmatprep.mubr.msk.f32.mxu0 %vm1417_vm0, %v1416_v9  ;;  %1297 = vmatprep.mubr.msk.f32.mxu1 %vm1417_vm0, %v1416_v9 }
 0x12c   : > { %1293 = vmatmul.mubr.msk.f32.vlgmr.msra.gmra.mrb[10].mxu0 %vm778_vm2, %v1263_v46  ;;  %1298 = vmatmul.mubr.msk.f32.vlgmr.msra.gmra.mrb[10].mxu1 %vm778_vm2, %v1266_v47 }
 0x1fb   : > { %v852_v48 = vpop.f32.mrb[8].mxu0  ;;  %v927_v49 = vpop.f32.mrb[8].mxu1 }
 0x1fc   : > { %v1284_v50 = vpop.f32.mrb[9].mxu0  ;;  %v931_v51 = vmax.f32 %v852_v48, %v927_v49  ;;  %v1289_v52 = vpop.f32.mrb[9].mxu1 }
 0x1ff   : > { %v1003_v53 = vpop.f32.mrb[10].mxu0  ;;  %v1079_v54 = vpop.f32.mrb[10].mxu1 }
 0x200   : > { %v1007_v55 = vmax.f32 %v931_v51, %v1003_v53  ;;  %v1294_v56 = vpop.f32.mrb[11].mxu0  ;;  %v1299_v57 = vpop.f32.mrb[11].mxu1 }
 0x202   : > { %v1083_v58 = vmax.f32 %v1007_v55, %v1079_v54 }
 0x204   : > { %1084 = vst [vmem:[%s195_s20] sm:$0xff] %v1083_v58 }
 0x205 PF: > { %s14_s15 = sadd.s32 1, %s1413_s15  }
 0x206   : > { %p11_p4 = scmp.ge.s32.totalorder %s14_s15, 4  }
 0x208   :  { %13 = sbr.rel (!%p11_p4) target bundleno = 1 (0x1), region = 72 }

// kernel: _lambda_.7
= control target key start
LH: loop header
LB: loop body
LE: loop exit
PB: predicated region body
PF: predicated region fallthrough
CT: control target
= control target key end

     0   :  { %v5716_v6 = vmov 0   ;;  %s8027_s0 = inlined_call_operand.vmem [shape: f32[2,128], index: 0, kind: input, shape index: {}]   ;;  %s8028_s1 = inlined_call_operand.vmem [shape: bf16[128,1000], index: 1, kind: input, shape index: {}]   ;;  %s8029_s2 = inlined_call_operand.vmem [shape: f32[1,1000], index: 2, kind: input, shape index: {}]   ;;  %s8030_s3 = inlined_call_operand.vmem [shape: bf16[1000,1000], index: 3, kind: input, shape index: {}]   ;;  %s8031_s4 = inlined_call_operand.vmem [shape: f32[1,1000], index: 4, kind: input, shape index: {}]   ;;  %s8032_s5 = inlined_call_operand.vmem [shape: f32[1000,2], index: 5, kind: input, shape index: {}]   ;;  %s8033_s6 = inlined_call_operand.vmem [shape: f32[1,2], index: 6, kind: input, shape index: {}]   ;;  %s8034_s7 = inlined_call_operand.hbm [shape: f32[2,2], index: 7, kind: output, shape index: {}]  }
   0x1   :  { %v30_v0 = vld [vmem:[%s8028_s1] sm:$0xff]  ;;  %488 = vmatprep.mubr.bf16.mxu0 %v5716_v6  ;;  %529 = vmatprep.mubr.bf16.mxu1 %v5716_v6  ;;  %v31_v14 = vld [vmem:[%s8028_s1 + $0x8] sm:$0xff]  ;;  %v32_v58 = vld [vmem:[%s8028_s1 + $0x10] sm:$0xff] }
   0x2   :  { %v34_v1 = vld [vmem:[%s8028_s1 + $0x20] sm:$0xff]  ;;  %v35_v15 = vld [vmem:[%s8028_s1 + $0x28] sm:$0xff]  ;;  %v36_v59 = vld [vmem:[%s8028_s1 + $0x30] sm:$0xff] }
   0x3   :  { %v38_v2 = vld [vmem:[%s8028_s1 + $0x40] sm:$0xff]  ;;  %v4803_v3 = vcombine.high %v30_v0, %v34_v1  ;;  %v4802_v4 = vcombine.low %v30_v0, %v34_v1  ;;  %v39_v16 = vld [vmem:[%s8028_s1 + $0x48] sm:$0xff]  ;;  %v4805_v18 = vcombine.high %v31_v14, %v35_v15  ;;  %v4804_v19 = vcombine.low %v31_v14, %v35_v15  ;;  %v52_v14 = vld [vmem:[%s8028_s1 + $0xb0] sm:$0xff] }
   0x4   :  { %v42_v5 = vld [vmem:[%s8028_s1 + $0x60] sm:$0xff]  ;;  %v43_v17 = vld [vmem:[%s8028_s1 + $0x68] sm:$0xff]  ;;  %v4807_v1 = vcombine.high %v32_v58, %v36_v59 }
   0x5   :  { %v4811_v7 = vcombine.high %v38_v2, %v42_v5  ;;  %v46_v8 = vld [vmem:[%s8028_s1 + $0x80] sm:$0xff]  ;;  %456 = vmatprep.subr.bf16.mxu0 %v4803_v3  ;;  %v4810_v10 = vcombine.low %v38_v2, %v42_v5  ;;  %v4813_v20 = vcombine.high %v39_v16, %v43_v17  ;;  %v47_v22 = vld [vmem:[%s8028_s1 + $0x88] sm:$0xff]  ;;  %497 = vmatprep.subr.bf16.mxu1 %v4805_v18  ;;  %v40_v3 = vld [vmem:[%s8028_s1 + $0x50] sm:$0xff] }
   0x6   :  { %v50_v9 = vld [vmem:[%s8028_s1 + $0xa0] sm:$0xff]  ;;  %457 = vmatpush1.bf16.msra.mxu0 %v4802_v4  ;;  %v51_v23 = vld [vmem:[%s8028_s1 + $0xa8] sm:$0xff]  ;;  %498 = vmatpush1.bf16.msra.mxu1 %v4804_v19  ;;  %v4812_v27 = vcombine.low %v39_v16, %v43_v17  ;;  %v44_v4 = vld [vmem:[%s8028_s1 + $0x70] sm:$0xff] }
   0x7   :  { %458 = vmatprep.subr.bf16.mxu0 %v4811_v7  ;;  %v4819_v11 = vcombine.high %v46_v8, %v50_v9  ;;  %v54_v12 = vld [vmem:[%s8028_s1 + $0xc0] sm:$0xff]  ;;  %v4818_v21 = vcombine.low %v46_v8, %v50_v9  ;;  %499 = vmatprep.subr.bf16.mxu1 %v4813_v20  ;;  %v4821_v28 = vcombine.high %v47_v22, %v51_v23  ;;  %v55_v30 = vld [vmem:[%s8028_s1 + $0xc8] sm:$0xff]  ;;  %v33_v9 = vld [vmem:[%s8028_s1 + $0x18] sm:$0xff] }
   0x8   :  { %v58_v13 = vld [vmem:[%s8028_s1 + $0xe0] sm:$0xff]  ;;  %v59_v31 = vld [vmem:[%s8028_s1 + $0xe8] sm:$0xff]  ;;  %v4820_v35 = vcombine.low %v47_v22, %v51_v23  ;;  %v4806_v8 = vcombine.low %v32_v58, %v36_v59  ;;  %v4814_v16 = vcombine.low %v40_v3, %v44_v4  ;;  %v41_v17 = vld [vmem:[%s8028_s1 + $0x58] sm:$0xff] }
   0x9   :  { %v4827_v24 = vcombine.high %v54_v12, %v58_v13  ;;  %v62_v25 = vld [vmem:[%s8028_s1 + $0x100] sm:$0xff]  ;;  %v4826_v29 = vcombine.low %v54_v12, %v58_v13  ;;  %v4829_v36 = vcombine.high %v55_v30, %v59_v31  ;;  %v63_v38 = vld [vmem:[%s8028_s1 + $0x108] sm:$0xff]  ;;  %v4828_v43 = vcombine.low %v55_v30, %v59_v31  ;;  %v48_v13 = vld [vmem:[%s8028_s1 + $0x90] sm:$0xff] }
   0xa   :  { %459 = vmatpush1.bf16.msra.mxu0 %v4810_v10  ;;  %v66_v26 = vld [vmem:[%s8028_s1 + $0x120] sm:$0xff]  ;;  %500 = vmatpush1.bf16.msra.mxu1 %v4812_v27  ;;  %v67_v39 = vld [vmem:[%s8028_s1 + $0x128] sm:$0xff]  ;;  %v37_v10 = vld [vmem:[%s8028_s1 + $0x38] sm:$0xff]  ;;  %v4823_v19 = vcombine.high %v48_v13, %v52_v14 }
   0xb   :  { %460 = vmatprep.subr.bf16.mxu0 %v4819_v11  ;;  %v4835_v32 = vcombine.high %v62_v25, %v66_v26  ;;  %v70_v33 = vld [vmem:[%s8028_s1 + $0x140] sm:$0xff]  ;;  %501 = vmatprep.subr.bf16.mxu1 %v4821_v28  ;;  %v4834_v37 = vcombine.low %v62_v25, %v66_v26  ;;  %v4837_v44 = vcombine.high %v63_v38, %v67_v39  ;;  %v71_v46 = vld [vmem:[%s8028_s1 + $0x148] sm:$0xff]  ;;  %v45_v18 = vld [vmem:[%s8028_s1 + $0x78] sm:$0xff] }
   0xc   :  { %v74_v34 = vld [vmem:[%s8028_s1 + $0x160] sm:$0xff]  ;;  %v75_v47 = vld [vmem:[%s8028_s1 + $0x168] sm:$0xff]  ;;  %v4836_v51 = vcombine.low %v63_v38, %v67_v39  ;;  %v4815_v11 = vcombine.high %v40_v3, %v44_v4  ;;  %v4809_v15 = vcombine.high %v33_v9, %v37_v10  ;;  %v56_v20 = vld [vmem:[%s8028_s1 + $0xd0] sm:$0xff]  ;;  %v4808_v22 = vcombine.low %v33_v9, %v37_v10 }
   0xd   :  { %v4843_v40 = vcombine.high %v70_v33, %v74_v34  ;;  %v78_v41 = vld [vmem:[%s8028_s1 + $0x180] sm:$0xff]  ;;  %v4842_v45 = vcombine.low %v70_v33, %v74_v34  ;;  %v4845_v52 = vcombine.high %v71_v46, %v75_v47  ;;  %v79_v54 = vld [vmem:[%s8028_s1 + $0x188] sm:$0xff]  ;;  %v4844_v57 = vcombine.low %v71_v46, %v75_v47  ;;  %v49_v25 = vld [vmem:[%s8028_s1 + $0x98] sm:$0xff] }
   0xe   :  { %461 = vmatpush1.bf16.msra.mxu0 %v4818_v21  ;;  %v82_v42 = vld [vmem:[%s8028_s1 + $0x1a0] sm:$0xff]  ;;  %502 = vmatpush1.bf16.msra.mxu1 %v4820_v35  ;;  %v83_v55 = vld [vmem:[%s8028_s1 + $0x1a8] sm:$0xff]  ;;  %v60_v21 = vld [vmem:[%s8028_s1 + $0xf0] sm:$0xff]  ;;  %v4817_v23 = vcombine.high %v41_v17, %v45_v18 }
   0xf   :  { %462 = vmatprep.subr.bf16.mxu0 %v4827_v24  ;;  %503 = vmatprep.subr.bf16.mxu1 %v4829_v36  ;;  %v4851_v48 = vcombine.high %v78_v41, %v82_v42  ;;  %v86_v49 = vld [vmem:[%s8028_s1 + $0x1c0] sm:$0xff]  ;;  %v4850_v53 = vcombine.low %v78_v41, %v82_v42  ;;  %v4853_v60 = vcombine.high %v79_v54, %v83_v55  ;;  %v87_v63 = vld [vmem:[%s8028_s1 + $0x1c8] sm:$0xff]  ;;  %v53_v26 = vld [vmem:[%s8028_s1 + $0xb8] sm:$0xff] }
  0x10   :  { %v90_v50 = vld [vmem:[%s8028_s1 + $0x1e0] sm:$0xff]  ;;  %v91_v0 = vld [vmem:[%s8028_s1 + $0x1e8] sm:$0xff]  ;;  %v4852_v2 = vcombine.low %v79_v54, %v83_v55  ;;  %v4822_v24 = vcombine.low %v48_v13, %v52_v14 }
  0x11   :  { %v4859_v56 = vcombine.high %v86_v49, %v90_v50  ;;  %v4858_v61 = vcombine.low %v86_v49, %v90_v50  ;;  %v28_v62 = vld [vmem:[%s8027_s0] sm:$0x3]  ;;  %v4861_v7 = vcombine.high %v87_v63, %v91_v0  ;;  %v4860_v12 = vcombine.low %v87_v63, %v91_v0 }
  0x12   :  { %463 = vmatpush1.bf16.msra.mxu0 %v4826_v29  ;;  %504 = vmatpush1.bf16.msra.mxu1 %v4828_v43  ;;  %v5873_v5 = vpack.c.bf16 %v28_v62, %v28_v62 }
  0x13   :  { %464 = vmatprep.subr.bf16.mxu0 %v4835_v32  ;;  %505 = vmatprep.subr.bf16.mxu1 %v4837_v44 }
  0x16   :  { %465 = vmatpush1.bf16.msra.mxu0 %v4834_v37  ;;  %506 = vmatpush1.bf16.msra.mxu1 %v4836_v51 }
  0x17   :  { %466 = vmatprep.subr.bf16.mxu0 %v4843_v40  ;;  %507 = vmatprep.subr.bf16.mxu1 %v4845_v52 }
  0x1a   :  { %467 = vmatpush1.bf16.msra.mxu0 %v4842_v45  ;;  %508 = vmatpush1.bf16.msra.mxu1 %v4844_v57 }
  0x1b   :  { %468 = vmatprep.subr.bf16.mxu0 %v4851_v48  ;;  %509 = vmatprep.subr.bf16.mxu1 %v4853_v60 }
  0x1e   :  { %469 = vmatpush1.bf16.msra.mxu0 %v4850_v53  ;;  %510 = vmatpush1.bf16.msra.mxu1 %v4852_v2 }
  0x1f   :  { %470 = vmatprep.subr.bf16.mxu0 %v4859_v56  ;;  %511 = vmatprep.subr.bf16.mxu1 %v4861_v7 }
  0x22   :  { %471 = vmatpush1.bf16.msra.mxu0 %v4858_v61  ;;  %512 = vmatpush1.bf16.msra.mxu1 %v4860_v12 }
  0x23   :  { %538 = vmatprep.subr.bf16.mxu0 %v4807_v1  ;;  %579 = vmatprep.subr.bf16.mxu1 %v4809_v15 }
  0x25   :  { %489 = vmatmul.mubr.bf16.vlgmr.msra.gmra.mrb[0].mxu0 %v5873_v5 }
  0x26   :  { %539 = vmatpush1.bf16.msra.mxu0 %v4806_v8  ;;  %570 = vmatprep.mubr.bf16.mxu0 %v5716_v6 }
  0x27   :  { %540 = vmatprep.subr.bf16.mxu0 %v4815_v11 }
  0x2a   :  { %541 = vmatpush1.bf16.msra.mxu0 %v4814_v16 }
  0x2b   :  { %12 = vsyncpa [#allocation3], 0  ;;  %530 = vmatmul.mubr.bf16.vlgmr.msra.gmra.mrb[0].mxu1 %v5873_v5  ;;  %542 = vmatprep.subr.bf16.mxu0 %v4823_v19  ;;  %v4831_v27 = vcombine.high %v56_v20, %v60_v21  ;;  %v64_v28 = vld [vmem:[%s8028_s1 + $0x110] sm:$0xff]  ;;  %v4816_v30 = vcombine.low %v41_v17, %v45_v18  ;;  %v4825_v31 = vcombine.high %v49_v25, %v53_v26  ;;  %v57_v33 = vld [vmem:[%s8028_s1 + $0xd8] sm:$0xff]  ;;  %vm3678_vm0 = vcmask 850944  }
  0x2c   :  { %v68_v29 = vld [vmem:[%s8028_s1 + $0x130] sm:$0xff]  ;;  %580 = vmatpush1.bf16.msra.mxu1 %v4808_v22  ;;  %611 = vmatprep.mubr.bf16.mxu1 %v5716_v6  ;;  %v4830_v32 = vcombine.low %v56_v20, %v60_v21  ;;  %v61_v34 = vld [vmem:[%s8028_s1 + $0xf8] sm:$0xff]  ;;  %v4824_v37 = vcombine.low %v49_v25, %v53_v26  ;;  %v636_v60 = vld [vmem:[%s8030_s3] sm:$0xff]  ;;  %vm3682_vm1 = vcmask 1043456   ;;  %vm4786_vm2 = vcmask 9216  }
  0x2d   :  { %581 = vmatprep.subr.bf16.mxu1 %v4817_v23  ;;  %v4839_v35 = vcombine.high %v64_v28, %v68_v29  ;;  %v72_v36 = vld [vmem:[%s8028_s1 + $0x150] sm:$0xff]  ;;  %v4833_v38 = vcombine.high %v57_v33, %v61_v34  ;;  %v4838_v39 = vcombine.low %v64_v28, %v68_v29  ;;  %v65_v40 = vld [vmem:[%s8028_s1 + $0x118] sm:$0xff]  ;;  %v4832_v45 = vcombine.low %v57_v33, %v61_v34  ;;  %v640_v61 = vld [vmem:[%s8030_s3 + $0x20] sm:$0xff] }
  0x2e   :  { %543 = vmatpush1.bf16.msra.mxu0 %v4822_v24  ;;  %v76_v6 = vld [vmem:[%s8028_s1 + $0x170] sm:$0xff]  ;;  %v69_v41 = vld [vmem:[%s8028_s1 + $0x138] sm:$0xff]  ;;  %v4867_v2 = vcombine.high %v636_v60, %v640_v61  ;;  %v644_v4 = vld [vmem:[%s8030_s3 + $0x40] sm:$0xff]  ;;  %v4866_v9 = vcombine.low %v636_v60, %v640_v61 }
  0x2f   :  { %544 = vmatprep.subr.bf16.mxu0 %v4831_v27  ;;  %v4847_v42 = vcombine.high %v72_v36, %v76_v6  ;;  %v80_v43 = vld [vmem:[%s8028_s1 + $0x190] sm:$0xff]  ;;  %v4841_v46 = vcombine.high %v65_v40, %v69_v41  ;;  %v4846_v47 = vcombine.low %v72_v36, %v76_v6  ;;  %v73_v48 = vld [vmem:[%s8028_s1 + $0x158] sm:$0xff]  ;;  %v4840_v53 = vcombine.low %v65_v40, %v69_v41  ;;  %v648_v7 = vld [vmem:[%s8030_s3 + $0x60] sm:$0xff] }
  0x30   :  { %582 = vmatpush1.bf16.msra.mxu1 %v4816_v30  ;;  %v84_v44 = vld [vmem:[%s8028_s1 + $0x1b0] sm:$0xff]  ;;  %v77_v49 = vld [vmem:[%s8028_s1 + $0x178] sm:$0xff]  ;;  %v637_v10 = vld [vmem:[%s8030_s3 + $0x8] sm:$0xff]  ;;  %v4875_v12 = vcombine.high %v644_v4, %v648_v7  ;;  %v4874_v17 = vcombine.low %v644_v4, %v648_v7 }
  0x31   :  { %583 = vmatprep.subr.bf16.mxu1 %v4825_v31  ;;  %v4855_v50 = vcombine.high %v80_v43, %v84_v44  ;;  %v88_v51 = vld [vmem:[%s8028_s1 + $0x1d0] sm:$0xff]  ;;  %v4849_v54 = vcombine.high %v73_v48, %v77_v49  ;;  %v4854_v55 = vcombine.low %v80_v43, %v84_v44  ;;  %v81_v56 = vld [vmem:[%s8028_s1 + $0x198] sm:$0xff]  ;;  %v4848_v59 = vcombine.low %v73_v48, %v77_v49  ;;  %v641_v11 = vld [vmem:[%s8030_s3 + $0x28] sm:$0xff] }
  0x32   :  { %545 = vmatpush1.bf16.msra.mxu0 %v4830_v32  ;;  %v92_v52 = vld [vmem:[%s8028_s1 + $0x1f0] sm:$0xff]  ;;  %v85_v57 = vld [vmem:[%s8028_s1 + $0x1b8] sm:$0xff]  ;;  %v652_v14 = vld [vmem:[%s8030_s3 + $0x80] sm:$0xff]  ;;  %v4869_v16 = vcombine.high %v637_v10, %v641_v11  ;;  %v4868_v21 = vcombine.low %v637_v10, %v641_v11 }
  0x33   :  { %546 = vmatprep.subr.bf16.mxu0 %v4839_v35  ;;  %v4863_v58 = vcombine.high %v88_v51, %v92_v52  ;;  %v4857_v62 = vcombine.high %v81_v56, %v85_v57  ;;  %v4862_v63 = vcombine.low %v88_v51, %v92_v52  ;;  %v89_v0 = vld [vmem:[%s8028_s1 + $0x1d8] sm:$0xff]  ;;  %v4856_v3 = vcombine.low %v81_v56, %v85_v57  ;;  %v656_v15 = vld [vmem:[%s8030_s3 + $0xa0] sm:$0xff]  ;;  %v645_v18 = vld [vmem:[%s8030_s3 + $0x48] sm:$0xff] }
  0x34   :  { %584 = vmatpush1.bf16.msra.mxu1 %v4824_v37  ;;  %v93_v1 = vld [vmem:[%s8028_s1 + $0x1f8] sm:$0xff]  ;;  %v649_v19 = vld [vmem:[%s8030_s3 + $0x68] sm:$0xff]  ;;  %v4883_v20 = vcombine.high %v652_v14, %v656_v15  ;;  %v660_v22 = vld [vmem:[%s8030_s3 + $0xc0] sm:$0xff]  ;;  %v4882_v25 = vcombine.low %v652_v14, %v656_v15  ;;  %s5719_s1 = smov [#allocation2]  }
  0x35   :  { %585 = vmatprep.subr.bf16.mxu1 %v4833_v38  ;;  %v4865_v8 = vcombine.high %v89_v0, %v93_v1  ;;  %v4864_v13 = vcombine.low %v89_v0, %v93_v1  ;;  %v664_v23 = vld [vmem:[%s8030_s3 + $0xe0] sm:$0xff]  ;;  %v4877_v24 = vcombine.high %v645_v18, %v649_v19  ;;  %v653_v26 = vld [vmem:[%s8030_s3 + $0x88] sm:$0xff]  ;;  %v4876_v29 = vcombine.low %v645_v18, %v649_v19  ;;  %s4794_s23 = sshll.u32 %s5719_s1, 4  ;;  %s4795_s23 = int_to_ptr.vmem [resolvable:$true] %s4794_s23 }
  0x36   :  { %547 = vmatpush1.bf16.msra.mxu0 %v4838_v39  ;;  %v657_v27 = vld [vmem:[%s8030_s3 + $0xa8] sm:$0xff]  ;;  %v4891_v28 = vcombine.high %v660_v22, %v664_v23  ;;  %v668_v30 = vld [vmem:[%s8030_s3 + $0x100] sm:$0xff]  ;;  %v4890_v33 = vcombine.low %v660_v22, %v664_v23  ;;  %s5692_s24 = scalar_lea.vmem %s4795_s23, 32  ;;  %p5697_p1 = scmp.lt.s32.totalorder %s4795_s23, %s4795_s23 }
  0x37   :  { %548 = vmatprep.subr.bf16.mxu0 %v4847_v42  ;;  %v672_v31 = vld [vmem:[%s8030_s3 + $0x120] sm:$0xff]  ;;  %v4885_v32 = vcombine.high %v653_v26, %v657_v27  ;;  %v665_v34 = vld [vmem:[%s8030_s3 + $0xe8] sm:$0xff]  ;;  %v4884_v36 = vcombine.low %v653_v26, %v657_v27  ;;  %p5693_p0 = scmp.ne.s32.totalorder %s4795_s23, %s5692_s24  ;;  %p5698_p2 = scmp.lt.s32.totalorder %s5692_s24, %s5692_s24 }
  0x38   :  { %586 = vmatpush1.bf16.msra.mxu1 %v4832_v45  ;;  %v4899_v35 = vcombine.high %v668_v30, %v672_v31  ;;  %v676_v6 = vld [vmem:[%s8030_s3 + $0x140] sm:$0xff]  ;;  %v4898_v39 = vcombine.low %v668_v30, %v672_v31  ;;  %v669_v40 = vld [vmem:[%s8030_s3 + $0x108] sm:$0xff] }
  0x39   :  { %587 = vmatprep.subr.bf16.mxu1 %v4841_v46  ;;  %v680_v37 = vld [vmem:[%s8030_s3 + $0x160] sm:$0xff]  ;;  %v673_v41 = vld [vmem:[%s8030_s3 + $0x128] sm:$0xff]  ;;  %p5699_p3 = por %p5698_p2, %p5697_p1 }
  0x3a   :  { %549 = vmatpush1.bf16.msra.mxu0 %v4846_v47  ;;  %v4907_v42 = vcombine.high %v676_v6, %v680_v37  ;;  %v684_v44 = vld [vmem:[%s8030_s3 + $0x180] sm:$0xff]  ;;  %v4901_v46 = vcombine.high %v669_v40, %v673_v41  ;;  %v4906_v47 = vcombine.low %v676_v6, %v680_v37  ;;  %v677_v48 = vld [vmem:[%s8030_s3 + $0x148] sm:$0xff]  ;;  %v4900_v51 = vcombine.low %v669_v40, %v673_v41 }
  0x3b   :  { %550 = vmatprep.subr.bf16.mxu0 %v4855_v50  ;;  %v688_v45 = vld [vmem:[%s8030_s3 + $0x1a0] sm:$0xff]  ;;  %v681_v49 = vld [vmem:[%s8030_s3 + $0x168] sm:$0xff]  ;;  %p5700_p4 = pnand %p5699_p3, %p5693_p0 }
  0x3c   :  { %588 = vmatpush1.bf16.msra.mxu1 %v4840_v53  ;;  %v4915_v50 = vcombine.high %v684_v44, %v688_v45  ;;  %v692_v52 = vld [vmem:[%s8030_s3 + $0x1c0] sm:$0xff]  ;;  %v685_v56 = vld [vmem:[%s8030_s3 + $0x188] sm:$0xff] }
  0x3d   :  { %589 = vmatprep.subr.bf16.mxu1 %v4849_v54  ;;  %v696_v53 = vld [vmem:[%s8030_s3 + $0x1e0] sm:$0xff]  ;;  %v4909_v54 = vcombine.high %v677_v48, %v681_v49  ;;  %v689_v57 = vld [vmem:[%s8030_s3 + $0x1a8] sm:$0xff] }
  0x3e   :  { %551 = vmatpush1.bf16.msra.mxu0 %v4854_v55  ;;  %v4914_v55 = vcombine.low %v684_v44, %v688_v45  ;;  %v700_v60 = vld [vmem:[%s8030_s3 + $0x200] sm:$0xff]  ;;  %v693_v0 = vld [vmem:[%s8030_s3 + $0x1c8] sm:$0xff] }
  0x3f   :  { %552 = vmatprep.subr.bf16.mxu0 %v4863_v58  ;;  %v4923_v58 = vcombine.high %v692_v52, %v696_v53  ;;  %v704_v61 = vld [vmem:[%s8030_s3 + $0x220] sm:$0xff]  ;;  %v697_v1 = vld [vmem:[%s8030_s3 + $0x1e8] sm:$0xff] }
  0x40   :  { %590 = vmatpush1.bf16.msra.mxu1 %v4848_v59  ;;  %v4908_v59 = vcombine.low %v677_v48, %v681_v49  ;;  %v708_v4 = vld [vmem:[%s8030_s3 + $0x240] sm:$0xff]  ;;  %v701_v10 = vld [vmem:[%s8030_s3 + $0x208] sm:$0xff] }
  0x41   :  { %591 = vmatprep.subr.bf16.mxu1 %v4857_v62  ;;  %v4917_v62 = vcombine.high %v685_v56, %v689_v57  ;;  %v712_v7 = vld [vmem:[%s8030_s3 + $0x260] sm:$0xff]  ;;  %v705_v11 = vld [vmem:[%s8030_s3 + $0x228] sm:$0xff] }
  0x42   :  { %553 = vmatpush1.bf16.msra.mxu0 %v4862_v63  ;;  %v4922_v63 = vcombine.low %v692_v52, %v696_v53  ;;  %v716_v14 = vld [vmem:[%s8030_s3 + $0x280] sm:$0xff]  ;;  %v709_v18 = vld [vmem:[%s8030_s3 + $0x248] sm:$0xff] }
  0x43   :  { %3707 = vmatprep.subr.bf16.mxu0 %v4867_v2  ;;  %v4931_v2 = vcombine.high %v700_v60, %v704_v61  ;;  %v720_v15 = vld [vmem:[%s8030_s3 + $0x2a0] sm:$0xff]  ;;  %v713_v19 = vld [vmem:[%s8030_s3 + $0x268] sm:$0xff] }
  0x44   :  { %592 = vmatpush1.bf16.msra.mxu1 %v4856_v3  ;;  %v4916_v3 = vcombine.low %v685_v56, %v689_v57  ;;  %v724_v22 = vld [vmem:[%s8030_s3 + $0x2c0] sm:$0xff]  ;;  %v717_v26 = vld [vmem:[%s8030_s3 + $0x288] sm:$0xff] }
  0x45   :  { %571 = vmatmul.mubr.bf16.vlgmr.msra.gmra.mrb[4].mxu0 %v5873_v5  ;;  %593 = vmatprep.subr.bf16.mxu1 %v4865_v8  ;;  %v4925_v8 = vcombine.high %v693_v0, %v697_v1  ;;  %v728_v23 = vld [vmem:[%s8030_s3 + $0x2e0] sm:$0xff]  ;;  %v721_v27 = vld [vmem:[%s8030_s3 + $0x2a8] sm:$0xff] }
  0x46   :  { %3708 = vmatpush1.bf16.msra.mxu0 %v4866_v9  ;;  %v4930_v9 = vcombine.low %v700_v60, %v704_v61  ;;  %v732_v30 = vld [vmem:[%s8030_s3 + $0x300] sm:$0xff]  ;;  %v733_v40 = vld [vmem:[%s8030_s3 + $0x308] sm:$0xff] }
  0x47   :  { %3709 = vmatprep.subr.bf16.mxu0 %v4875_v12  ;;  %v4939_v12 = vcombine.high %v708_v4, %v712_v7  ;;  %v736_v31 = vld [vmem:[%s8030_s3 + $0x320] sm:$0xff]  ;;  %v737_v41 = vld [vmem:[%s8030_s3 + $0x328] sm:$0xff] }
  0x48   :  { %594 = vmatpush1.bf16.msra.mxu1 %v4864_v13  ;;  %v4924_v13 = vcombine.low %v693_v0, %v697_v1  ;;  %v740_v6 = vld [vmem:[%s8030_s3 + $0x340] sm:$0xff]  ;;  %v4965_v44 = vcombine.high %v733_v40, %v737_v41  ;;  %v741_v48 = vld [vmem:[%s8030_s3 + $0x348] sm:$0xff] }
  0x49   :  { %3871 = vmatprep.subr.bf16.mxu1 %v4869_v16  ;;  %v4933_v16 = vcombine.high %v701_v10, %v705_v11  ;;  %v744_v37 = vld [vmem:[%s8030_s3 + $0x360] sm:$0xff]  ;;  %v745_v49 = vld [vmem:[%s8030_s3 + $0x368] sm:$0xff] }
  0x4a   :  { %3710 = vmatpush1.bf16.msra.mxu0 %v4874_v17  ;;  %v4938_v17 = vcombine.low %v708_v4, %v712_v7  ;;  %v748_v45 = vld [vmem:[%s8030_s3 + $0x380] sm:$0xff]  ;;  %v4973_v52 = vcombine.high %v741_v48, %v745_v49  ;;  %v749_v56 = vld [vmem:[%s8030_s3 + $0x388] sm:$0xff] }
  0x4b   :  { %612 = vmatmul.mubr.bf16.vlgmr.msra.gmra.mrb[4].mxu1 %v5873_v5  ;;  %3711 = vmatprep.subr.bf16.mxu0 %v4883_v20  ;;  %v661_v5 = vld [vmem:[%s8030_s3 + $0xc8] sm:$0xff]  ;;  %v4947_v20 = vcombine.high %v716_v14, %v720_v15  ;;  %v756_v53 = vld [vmem:[%s8030_s3 + $0x3c0] sm:$0xff] }
  0x4c   :  { %3872 = vmatpush1.bf16.msra.mxu1 %v4868_v21  ;;  %v4893_v38 = vcombine.high %v661_v5, %v665_v34  ;;  %v4892_v43 = vcombine.low %v661_v5, %v665_v34  ;;  %v4932_v21 = vcombine.low %v701_v10, %v705_v11  ;;  %v725_v5 = vld [vmem:[%s8030_s3 + $0x2c8] sm:$0xff]  ;;  %v764_v61 = vld [vmem:[%s8030_s3 + $0x400] sm:$0xff] }
  0x4d   :  { %3873 = vmatprep.subr.bf16.mxu1 %v4877_v24  ;;  %v4941_v24 = vcombine.high %v709_v18, %v713_v19  ;;  %v729_v34 = vld [vmem:[%s8030_s3 + $0x2e8] sm:$0xff] }
  0x4e   :  { %3712 = vmatpush1.bf16.msra.mxu0 %v4882_v25  ;;  %v4946_v25 = vcombine.low %v716_v14, %v720_v15  ;;  %v753_v57 = vld [vmem:[%s8030_s3 + $0x3a8] sm:$0xff] }
  0x4f   :  { %3713 = vmatprep.subr.bf16.mxu0 %v4891_v28  ;;  %v4955_v28 = vcombine.high %v724_v22, %v728_v23  ;;  %v4981_v60 = vcombine.high %v749_v56, %v753_v57  ;;  %v757_v1 = vld [vmem:[%s8030_s3 + $0x3c8] sm:$0xff] }
  0x50   :  { %3874 = vmatpush1.bf16.msra.mxu1 %v4876_v29  ;;  %v4940_v29 = vcombine.low %v709_v18, %v713_v19 }
  0x51   :  { %3875 = vmatprep.subr.bf16.mxu1 %v4885_v32  ;;  %v4949_v32 = vcombine.high %v717_v26, %v721_v27 }
  0x52   :  { %3714 = vmatpush1.bf16.msra.mxu0 %v4890_v33  ;;  %v4954_v33 = vcombine.low %v724_v22, %v728_v23 }
  0x53   :  { %3715 = vmatprep.subr.bf16.mxu0 %v4899_v35  ;;  %v4963_v35 = vcombine.high %v732_v30, %v736_v31 }
  0x54   :  { %3876 = vmatpush1.bf16.msra.mxu1 %v4884_v36  ;;  %v4948_v36 = vcombine.low %v717_v26, %v721_v27 }
  0x55   :  { %3877 = vmatprep.subr.bf16.mxu1 %v4893_v38  ;;  %v4957_v38 = vcombine.high %v725_v5, %v729_v34 }
  0x56   :  { %3716 = vmatpush1.bf16.msra.mxu0 %v4898_v39  ;;  %v4962_v39 = vcombine.low %v732_v30, %v736_v31  ;;  %v776_v30 = vld [vmem:[%s8030_s3 + $0x460] sm:$0xff]  ;;  %v773_v31 = vld [vmem:[%s8030_s3 + $0x448] sm:$0xff] }
  0x57   :  { %3717 = vmatprep.subr.bf16.mxu0 %v4907_v42  ;;  %v4971_v42 = vcombine.high %v740_v6, %v744_v37 }
  0x58   :  { %3878 = vmatpush1.bf16.msra.mxu1 %v4892_v43  ;;  %v4956_v43 = vcombine.low %v725_v5, %v729_v34 }
  0x59   :  { %3879 = vmatprep.subr.bf16.mxu1 %v4901_v46  ;;  %v752_v46 = vld [vmem:[%s8030_s3 + $0x3a0] sm:$0xff] }
  0x5a   :  { %3718 = vmatpush1.bf16.msra.mxu0 %v4906_v47  ;;  %v4970_v47 = vcombine.low %v740_v6, %v744_v37  ;;  %v780_v37 = vld [vmem:[%s8030_s3 + $0x480] sm:$0xff] }
  0x5b   :  { %3719 = vmatprep.subr.bf16.mxu0 %v4915_v50  ;;  %v4979_v50 = vcombine.high %v748_v45, %v752_v46 }
  0x5c   :  { %3880 = vmatpush1.bf16.msra.mxu1 %v4900_v51  ;;  %v4964_v51 = vcombine.low %v733_v40, %v737_v41  ;;  %v781_v40 = vld [vmem:[%s8030_s3 + $0x488] sm:$0xff] }
  0x5d   :  { %3881 = vmatprep.subr.bf16.mxu1 %v4909_v54  ;;  %v760_v54 = vld [vmem:[%s8030_s3 + $0x3e0] sm:$0xff]  ;;  %v785_v41 = vld [vmem:[%s8030_s3 + $0x4a8] sm:$0xff] }
  0x5e   :  { %3720 = vmatpush1.bf16.msra.mxu0 %v4914_v55  ;;  %v4978_v55 = vcombine.low %v748_v45, %v752_v46  ;;  %v4986_v0 = vcombine.low %v756_v53, %v760_v54 }
  0x5f   :  { %3721 = vmatprep.subr.bf16.mxu0 %v4923_v58  ;;  %v4987_v58 = vcombine.high %v756_v53, %v760_v54  ;;  %v793_v53 = vld [vmem:[%s8030_s3 + $0x4e8] sm:$0xff] }
  0x60   :  { %3882 = vmatpush1.bf16.msra.mxu1 %v4908_v59  ;;  %v4972_v59 = vcombine.low %v741_v48, %v745_v49  ;;  %v5013_v49 = vcombine.high %v781_v40, %v785_v41 }
  0x61   :  { %3883 = vmatprep.subr.bf16.mxu1 %v4917_v62  ;;  %v768_v62 = vld [vmem:[%s8030_s3 + $0x420] sm:$0xff] }
  0x62   :  { %3722 = vmatpush1.bf16.msra.mxu0 %v4922_v63  ;;  %v765_v63 = vld [vmem:[%s8030_s3 + $0x408] sm:$0xff]  ;;  %v4994_v4 = vcombine.low %v764_v61, %v768_v62  ;;  %v4995_v7 = vcombine.high %v764_v61, %v768_v62 }
  0x63   :  { %3723 = vmatprep.subr.bf16.mxu0 %v4931_v2  ;;  %v761_v2 = vld [vmem:[%s8030_s3 + $0x3e8] sm:$0xff] }
  0x64   :  { %3884 = vmatpush1.bf16.msra.mxu1 %v4916_v3  ;;  %v769_v3 = vld [vmem:[%s8030_s3 + $0x428] sm:$0xff]  ;;  %v4989_v10 = vcombine.high %v757_v1, %v761_v2  ;;  %v4988_v11 = vcombine.low %v757_v1, %v761_v2 }
  0x65   :  { %3885 = vmatprep.subr.bf16.mxu1 %v4925_v8  ;;  %v4996_v8 = vcombine.low %v765_v63, %v769_v3  ;;  %v797_v61 = vld [vmem:[%s8030_s3 + $0x508] sm:$0xff] }
  0x66   :  { %3724 = vmatpush1.bf16.msra.mxu0 %v4930_v9  ;;  %v4980_v9 = vcombine.low %v749_v56, %v753_v57  ;;  %v5012_v56 = vcombine.low %v781_v40, %v785_v41  ;;  %v801_v62 = vld [vmem:[%s8030_s3 + $0x528] sm:$0xff] }
  0x67   :  { %3725 = vmatprep.subr.bf16.mxu0 %v4939_v12  ;;  %v4997_v12 = vcombine.high %v765_v63, %v769_v3  ;;  %v5029_v2 = vcombine.high %v797_v61, %v801_v62  ;;  %v804_v3 = vld [vmem:[%s8030_s3 + $0x540] sm:$0xff] }
  0x68   :  { %3886 = vmatpush1.bf16.msra.mxu1 %v4924_v13  ;;  %v96_v13 = vlaneseq }
  0x69   :  { %3887 = vmatprep.subr.bf16.mxu1 %v4933_v16  ;;  %v6175_v16 = vld [vmem:[%s8029_s2] sm:$0xff] }
  0x6a   :  { %3726 = vmatpush1.bf16.msra.mxu0 %v4938_v17  ;;  %v6169_v14 = vshrl.u32 %v96_v13, 7  ;;  %v812_v13 = vld [vmem:[%s8030_s3 + $0x580] sm:$0xff] }
  0x6b   :  { %3727 = vmatprep.subr.bf16.mxu0 %v4947_v20 }
  0x6c   :  { %3888 = vmatpush1.bf16.msra.mxu1 %v4932_v21  ;;  %v98_v15 = vsub.s32 0, %v6169_v14  ;;  %v102_v17 = vsub.s32 1, %v6169_v14  ;;  %v110_v21 = vsub.s32 3, %v6169_v14 }
  0x6d   :  { %3889 = vmatprep.subr.bf16.mxu1 %v4941_v24 }
  0x6e   :  { %3728 = vmatpush1.bf16.msra.mxu0 %v4946_v25  ;;  %v99_v18 = vrot.slane %v6175_v16, %v98_v15  ;;  %v103_v19 = vrot.slane %v6175_v16, %v102_v17 }
  0x6f   :  { %3729 = vmatprep.subr.bf16.mxu0 %v4955_v28  ;;  %v772_v28 = vld [vmem:[%s8030_s3 + $0x440] sm:$0xff] }
  0x70   :  { %3890 = vmatpush1.bf16.msra.mxu1 %v4940_v29  ;;  %v5002_v45 = vcombine.low %v772_v28, %v776_v30 }
  0x71   :  { %3891 = vmatprep.subr.bf16.mxu1 %v4949_v32  ;;  %v777_v32 = vld [vmem:[%s8030_s3 + $0x468] sm:$0xff] }
  0x72   :  { %3730 = vmatpush1.bf16.msra.mxu0 %v4954_v33  ;;  %v111_v33 = vrot.slane %v6175_v16, %v110_v21  ;;  %v5005_v6 = vcombine.high %v773_v31, %v777_v32  ;;  %v5004_v46 = vcombine.low %v773_v31, %v777_v32 }
  0x73   :  { %3731 = vmatprep.subr.bf16.mxu0 %v4963_v35 }
  0x74   :  { %3892 = vmatpush1.bf16.msra.mxu1 %v4948_v36  ;;  %v5003_v36 = vcombine.high %v772_v28, %v776_v30  ;;  %v821_v28 = vld [vmem:[%s8030_s3 + $0x5c8] sm:$0xff] }
  0x75   :  { %3893 = vmatprep.subr.bf16.mxu1 %v4957_v38 }
  0x76   :  { %3732 = vmatpush1.bf16.msra.mxu0 %v4962_v39  ;;  %v784_v39 = vld [vmem:[%s8030_s3 + $0x4a0] sm:$0xff] }
  0x77   :  { %3733 = vmatprep.subr.bf16.mxu0 %v4971_v42  ;;  %v5011_v48 = vcombine.high %v780_v37, %v784_v39 }
  0x78   :  { %3894 = vmatpush1.bf16.msra.mxu1 %v4956_v43 }
  0x79   :  { %3895 = vmatprep.subr.bf16.mxu1 %v4965_v44 }
  0x7a   :  { %3734 = vmatpush1.bf16.msra.mxu0 %v4970_v47 }
  0x7b   :  { %3735 = vmatprep.subr.bf16.mxu0 %v4979_v50  ;;  %v788_v50 = vld [vmem:[%s8030_s3 + $0x4c0] sm:$0xff] }
  0x7c   :  { %3896 = vmatpush1.bf16.msra.mxu1 %v4964_v51  ;;  %v792_v51 = vld [vmem:[%s8030_s3 + $0x4e0] sm:$0xff] }
  0x7d   :  { %3897 = vmatprep.subr.bf16.mxu1 %v4973_v52  ;;  %v789_v52 = vld [vmem:[%s8030_s3 + $0x4c8] sm:$0xff]  ;;  %v5019_v57 = vcombine.high %v788_v50, %v792_v51  ;;  %v5018_v63 = vcombine.low %v788_v50, %v792_v51 }
  0x7e   :  { %3736 = vmatpush1.bf16.msra.mxu0 %v4978_v55  ;;  %v5010_v55 = vcombine.low %v780_v37, %v784_v39  ;;  %v829_v37 = vld [vmem:[%s8030_s3 + $0x608] sm:$0xff] }
  0x7f   :  { %3737 = vmatprep.subr.bf16.mxu0 %v4987_v58  ;;  %v5021_v58 = vcombine.high %v789_v52, %v793_v53  ;;  %v841_v50 = vld [vmem:[%s8030_s3 + $0x668] sm:$0xff] }
  0x80   :  { %3898 = vmatpush1.bf16.msra.mxu1 %v4972_v59  ;;  %v796_v59 = vld [vmem:[%s8030_s3 + $0x500] sm:$0xff] }
  0x81   :  { %3899 = vmatprep.subr.bf16.mxu1 %v4981_v60  ;;  %v800_v60 = vld [vmem:[%s8030_s3 + $0x520] sm:$0xff] }
  0x82   :  { %3738 = vmatpush1.bf16.msra.mxu0 %v4986_v0  ;;  %v5020_v0 = vcombine.low %v789_v52, %v793_v53  ;;  %v5027_v1 = vcombine.high %v796_v59, %v800_v60 }
  0x83   :  { %3748 = vmatprep.subr.bf16.mxu0 %v4995_v7  ;;  %v805_v7 = vld [vmem:[%s8030_s3 + $0x548] sm:$0xff] }
  0x84   :  { %3900 = vmatpush1.bf16.msra.mxu1 %v4980_v9  ;;  %v5026_v9 = vcombine.low %v796_v59, %v800_v60  ;;  %v848_v59 = vld [vmem:[%s8030_s3 + $0x6a0] sm:$0xff]  ;;  %v845_v60 = vld [vmem:[%s8030_s3 + $0x688] sm:$0xff] }
  0x85   :  { %3901 = vmatprep.subr.bf16.mxu1 %v4989_v10  ;;  %v5028_v10 = vcombine.low %v797_v61, %v801_v62  ;;  %v849_v61 = vld [vmem:[%s8030_s3 + $0x6a8] sm:$0xff] }
  0x88   :  { %3902 = vmatpush1.bf16.msra.mxu1 %v4988_v11 }
  0x89   :  { %3912 = vmatprep.subr.bf16.mxu1 %v4997_v12 }
  0xf8   :  { %v490_v20 = vpop.f32.mrb[0].mxu0 }
  0xf9   :  { %v491_v22 = vadd.f32 %v490_v20, %v99_v18  ;;  %v492_v23 = vpop.f32.mrb[1].mxu0  ;;  %v816_v18 = vld [vmem:[%s8030_s3 + $0x5a0] sm:$0xff]  ;;  %v817_v20 = vld [vmem:[%s8030_s3 + $0x5a8] sm:$0xff] }
  0xfa   :  { %v493_v24 = vadd.f32 %v492_v23, %v103_v19  ;;  %v494_v25 = vpop.f32.mrb[2].mxu0  ;;  %v813_v19 = vld [vmem:[%s8030_s3 + $0x588] sm:$0xff]  ;;  %v5042_v30 = vcombine.low %v812_v13, %v816_v18 }
  0xfb   :  { %v620_v26 = vmax.f32 %v491_v22, 0.0  ;;  %v495_v27 = vpop.f32.mrb[3].mxu0  ;;  %v5045_v25 = vcombine.high %v813_v19, %v817_v20  ;;  %v5044_v31 = vcombine.low %v813_v19, %v817_v20  ;;  %v864_v19 = vld [vmem:[%s8030_s3 + $0x720] sm:$0xff]  ;;  %v861_v20 = vld [vmem:[%s8030_s3 + $0x708] sm:$0xff] }
  0xfc   :  { %v621_v29 = vmax.f32 %v493_v24, 0.0  ;;  %v5043_v24 = vcombine.high %v812_v13, %v816_v18  ;;  %v824_v27 = vld [vmem:[%s8030_s3 + $0x5e0] sm:$0xff] }
  0xfd   :  { %v6204_v35 = vpack.c.bf16 %v620_v26, %v620_v26  ;;  %v820_v26 = vld [vmem:[%s8030_s3 + $0x5c0] sm:$0xff] }
  0xfe   :  { %v6200_v5 = vpack.c.bf16 %v621_v29, %v621_v29  ;;  %v6202_v34 = vpop.f32.mrb[0].mxu1  ;;  %v825_v29 = vld [vmem:[%s8030_s3 + $0x5e8] sm:$0xff]  ;;  %v5051_v32 = vcombine.high %v820_v26, %v824_v27  ;;  %v5050_v41 = vcombine.low %v820_v26, %v824_v27  ;;  %v860_v18 = vld [vmem:[%s8030_s3 + $0x700] sm:$0xff] }
  0xff   :  { %v533_v38 = vpop.f32.mrb[1].mxu1  ;;  %v868_v27 = vld [vmem:[%s8030_s3 + $0x740] sm:$0xff] }
 0x100   :  { %3739 = vmatprep.mubr.bf16.mxu0 %v6200_v5  ;;  %3903 = vmatprep.mubr.bf16.mxu1 %v6200_v5  ;;  %v534_v42 = vadd.f32 %v533_v38, %v111_v33  ;;  %v535_v43 = vpop.f32.mrb[2].mxu1  ;;  %v5053_v33 = vcombine.high %v821_v28, %v825_v29  ;;  %v833_v38 = vld [vmem:[%s8030_s3 + $0x628] sm:$0xff] }
 0x101   :  { %3740 = vmatmul.mubr.bf16.vlgmr.msra.gmra.mrb[8].mxu0 %v6204_v35  ;;  %3904 = vmatmul.mubr.bf16.vlgmr.msra.gmra.mrb[8].mxu1 %v6204_v35  ;;  %v536_v44 = vpop.f32.mrb[3].mxu1  ;;  %v5060_v52 = vcombine.low %v829_v37, %v833_v38 }
 0x102   :  { %3749 = vmatpush1.bf16.msra.mxu0 %v4994_v4  ;;  %3913 = vmatpush1.bf16.msra.mxu1 %v4996_v8  ;;  %v623_v47 = vmax.f32 %v534_v42, 0.0  ;;  %v808_v4 = vld [vmem:[%s8030_s3 + $0x560] sm:$0xff]  ;;  %v809_v8 = vld [vmem:[%s8030_s3 + $0x568] sm:$0xff]  ;;  %v5052_v42 = vcombine.low %v821_v28, %v825_v29 }
 0x103   :  { %3750 = vmatprep.subr.bf16.mxu0 %v5003_v36  ;;  %3914 = vmatprep.subr.bf16.mxu1 %v5005_v6  ;;  %v5035_v11 = vcombine.high %v804_v3, %v808_v4  ;;  %v5037_v12 = vcombine.high %v805_v7, %v809_v8  ;;  %v5034_v22 = vcombine.low %v804_v3, %v808_v4  ;;  %v828_v36 = vld [vmem:[%s8030_s3 + $0x600] sm:$0xff]  ;;  %v869_v29 = vld [vmem:[%s8030_s3 + $0x748] sm:$0xff] }
 0x104   :  { %v6234_v54 = vpack.c.bf16 %v623_v47, %v623_v47  ;;  %v5036_v23 = vcombine.low %v805_v7, %v809_v8  ;;  %v832_v6 = vld [vmem:[%s8030_s3 + $0x620] sm:$0xff]  ;;  %v5077_v3 = vcombine.high %v845_v60, %v849_v61  ;;  %v853_v8 = vld [vmem:[%s8030_s3 + $0x6c8] sm:$0xff] }
 0x105   :  { %v5059_v44 = vcombine.high %v828_v36, %v832_v6  ;;  %v5058_v51 = vcombine.low %v828_v36, %v832_v6  ;;  %v852_v4 = vld [vmem:[%s8030_s3 + $0x6c0] sm:$0xff] }
 0x106   :  { %3751 = vmatpush1.bf16.msra.mxu0 %v5002_v45  ;;  %3915 = vmatpush1.bf16.msra.mxu1 %v5004_v46  ;;  %v5061_v45 = vcombine.high %v829_v37, %v833_v38  ;;  %v836_v46 = vld [vmem:[%s8030_s3 + $0x640] sm:$0xff] }
 0x107   :  { %3752 = vmatprep.subr.bf16.mxu0 %v5011_v48  ;;  %3916 = vmatprep.subr.bf16.mxu1 %v5013_v49  ;;  %v840_v48 = vld [vmem:[%s8030_s3 + $0x660] sm:$0xff]  ;;  %v837_v49 = vld [vmem:[%s8030_s3 + $0x648] sm:$0xff] }
 0x108   :  { %3780 = vmatprep.mubr.bf16.mxu0 %v6234_v54  ;;  %3944 = vmatprep.mubr.bf16.mxu1 %v6234_v54  ;;  %v856_v7 = vld [vmem:[%s8030_s3 + $0x6e0] sm:$0xff] }
 0x109   :  { %v872_v28 = vld [vmem:[%s8030_s3 + $0x760] sm:$0xff] }
 0x10a   :  { %3753 = vmatpush1.bf16.msra.mxu0 %v5010_v55  ;;  %3917 = vmatpush1.bf16.msra.mxu1 %v5012_v56  ;;  %v5067_v55 = vcombine.high %v836_v46, %v840_v48  ;;  %v5069_v56 = vcombine.high %v837_v49, %v841_v50  ;;  %v5099_v36 = vcombine.high %v868_v27, %v872_v28  ;;  %v876_v37 = vld [vmem:[%s8030_s3 + $0x780] sm:$0xff] }
 0x10b   :  { %3754 = vmatprep.subr.bf16.mxu0 %v5019_v57  ;;  %3918 = vmatprep.subr.bf16.mxu1 %v5021_v58  ;;  %v844_v57 = vld [vmem:[%s8030_s3 + $0x680] sm:$0xff] }
 0x10c   :  { %v880_v38 = vld [vmem:[%s8030_s3 + $0x7a0] sm:$0xff] }
 0x10e   :  { %3755 = vmatpush1.bf16.msra.mxu0 %v5018_v63  ;;  %3919 = vmatpush1.bf16.msra.mxu1 %v5020_v0  ;;  %v5066_v0 = vcombine.low %v836_v46, %v840_v48 }
 0x10f   :  { %3756 = vmatprep.subr.bf16.mxu0 %v5027_v1  ;;  %3920 = vmatprep.subr.bf16.mxu1 %v5029_v2  ;;  %v5068_v1 = vcombine.low %v837_v49, %v841_v50  ;;  %v5075_v2 = vcombine.high %v844_v57, %v848_v59  ;;  %v884_v49 = vld [vmem:[%s8030_s3 + $0x7c0] sm:$0xff] }
 0x110   :  { %v888_v50 = vld [vmem:[%s8030_s3 + $0x7e0] sm:$0xff] }
 0x112   :  { %3757 = vmatpush1.bf16.msra.mxu0 %v5026_v9  ;;  %3921 = vmatpush1.bf16.msra.mxu1 %v5028_v10  ;;  %v857_v9 = vld [vmem:[%s8030_s3 + $0x6e8] sm:$0xff]  ;;  %v5074_v10 = vcombine.low %v844_v57, %v848_v59  ;;  %v5106_v57 = vcombine.low %v876_v37, %v880_v38 }
 0x113   :  { %3758 = vmatprep.subr.bf16.mxu0 %v5035_v11  ;;  %3922 = vmatprep.subr.bf16.mxu1 %v5037_v12  ;;  %v5076_v11 = vcombine.low %v845_v60, %v849_v61  ;;  %v5083_v12 = vcombine.high %v852_v4, %v856_v7  ;;  %v5085_v13 = vcombine.high %v853_v8, %v857_v9 }
 0x114   :  { %v5115_v60 = vcombine.high %v884_v49, %v888_v50 }
 0x116   :  { %3759 = vmatpush1.bf16.msra.mxu0 %v5034_v22  ;;  %3923 = vmatpush1.bf16.msra.mxu1 %v5036_v23  ;;  %v865_v22 = vld [vmem:[%s8030_s3 + $0x728] sm:$0xff]  ;;  %v5082_v23 = vcombine.low %v852_v4, %v856_v7 }
 0x117   :  { %3760 = vmatprep.subr.bf16.mxu0 %v5043_v24  ;;  %3924 = vmatprep.subr.bf16.mxu1 %v5045_v25  ;;  %v5084_v24 = vcombine.low %v853_v8, %v857_v9  ;;  %v5091_v25 = vcombine.high %v860_v18, %v864_v19  ;;  %v5093_v26 = vcombine.high %v861_v20, %v865_v22  ;;  %v900_v9 = vld [vmem:[%s8030_s3 + $0x840] sm:$0xff] }
 0x118   :  { %v6298_v39 = vpop.f32.mrb[4].mxu0 }
 0x119   :  { %v6300_v40 = vpop.f32.mrb[5].mxu0 }
 0x11a   :  { %3761 = vmatpush1.bf16.msra.mxu0 %v5042_v30  ;;  %3925 = vmatpush1.bf16.msra.mxu1 %v5044_v31  ;;  %v576_v43 = vpop.f32.mrb[6].mxu0  ;;  %v873_v30 = vld [vmem:[%s8030_s3 + $0x768] sm:$0xff]  ;;  %v106_v31 = vsub.s32 2, %v6169_v14 }
 0x11b   :  { %3762 = vmatprep.subr.bf16.mxu0 %v5051_v32  ;;  %3926 = vmatprep.subr.bf16.mxu1 %v5053_v33  ;;  %v577_v47 = vpop.f32.mrb[7].mxu0  ;;  %v5090_v32 = vcombine.low %v860_v18, %v864_v19  ;;  %v5092_v33 = vcombine.low %v861_v20, %v865_v22  ;;  %v5101_v6 = vcombine.high %v869_v29, %v873_v30  ;;  %v118_v43 = vsub.s32 5, %v6169_v14 }
 0x11c   :  { %v5100_v46 = vcombine.low %v869_v29, %v873_v30  ;;  %v5107_v47 = vcombine.high %v876_v37, %v880_v38  ;;  %v921_v37 = vld [vmem:[%s8030_s3 + $0x8e8] sm:$0xff] }
 0x11e   :  { %3763 = vmatpush1.bf16.msra.mxu0 %v5050_v41  ;;  %3927 = vmatpush1.bf16.msra.mxu1 %v5052_v42  ;;  %v6314_v53 = vpop.f32.mrb[4].mxu1  ;;  %v877_v41 = vld [vmem:[%s8030_s3 + $0x788] sm:$0xff] }
 0x11f   :  { %3764 = vmatprep.subr.bf16.mxu0 %v5059_v44  ;;  %3928 = vmatprep.subr.bf16.mxu1 %v5061_v45  ;;  %v6319_v58 = vpop.f32.mrb[5].mxu1  ;;  %v881_v42 = vld [vmem:[%s8030_s3 + $0x7a8] sm:$0xff]  ;;  %v107_v44 = vrot.slane %v6175_v16, %v106_v31  ;;  %v5098_v45 = vcombine.low %v868_v27, %v872_v28 }
 0x120   :  { %v617_v62 = vpop.f32.mrb[6].mxu1  ;;  %v5109_v48 = vcombine.high %v877_v41, %v881_v42  ;;  %v5108_v59 = vcombine.low %v877_v41, %v881_v42 }
 0x121   :  { %v618_v63 = vpop.f32.mrb[7].mxu1  ;;  %v892_v62 = vld [vmem:[%s8030_s3 + $0x800] sm:$0xff] }
 0x122   :  { %3765 = vmatpush1.bf16.msra.mxu0 %v5058_v51  ;;  %3929 = vmatpush1.bf16.msra.mxu1 %v5060_v52  ;;  %v885_v51 = vld [vmem:[%s8030_s3 + $0x7c8] sm:$0xff]  ;;  %v896_v63 = vld [vmem:[%s8030_s3 + $0x820] sm:$0xff] }
 0x123   :  { %3766 = vmatprep.subr.bf16.mxu0 %v5067_v55  ;;  %3930 = vmatprep.subr.bf16.mxu1 %v5069_v56  ;;  %v889_v52 = vld [vmem:[%s8030_s3 + $0x7e8] sm:$0xff]  ;;  %v119_v55 = vrot.slane %v6175_v16, %v118_v43  ;;  %v532_v56 = vadd.f32 %v6202_v34, %v107_v44  ;;  %v5123_v7 = vcombine.high %v892_v62, %v896_v63 }
 0x124   :  { %v5117_v61 = vcombine.high %v885_v51, %v889_v52  ;;  %v893_v34 = vld [vmem:[%s8030_s3 + $0x808] sm:$0xff]  ;;  %v5116_v4 = vcombine.low %v885_v51, %v889_v52  ;;  %v5122_v18 = vcombine.low %v892_v62, %v896_v63 }
 0x126   :  { %3767 = vmatpush1.bf16.msra.mxu0 %v5066_v0  ;;  %3931 = vmatpush1.bf16.msra.mxu1 %v5068_v1  ;;  %v897_v0 = vld [vmem:[%s8030_s3 + $0x828] sm:$0xff]  ;;  %v575_v1 = vadd.f32 %v6300_v40, %v119_v55  ;;  %v932_v55 = vld [vmem:[%s8030_s3 + $0x940] sm:$0xff] }
 0x127   :  { %3768 = vmatprep.subr.bf16.mxu0 %v5075_v2  ;;  %3932 = vmatprep.subr.bf16.mxu1 %v5077_v3  ;;  %v622_v2 = vmax.f32 %v532_v56, 0.0  ;;  %v5114_v3 = vcombine.low %v884_v49, %v888_v50  ;;  %v5125_v8 = vcombine.high %v893_v34, %v897_v0  ;;  %v901_v40 = vld [vmem:[%s8030_s3 + $0x848] sm:$0xff]  ;;  %v5124_v19 = vcombine.low %v893_v34, %v897_v0  ;;  %v936_v56 = vld [vmem:[%s8030_s3 + $0x960] sm:$0xff] }
 0x128   :  { %v5163_v62 = vcombine.high %v932_v55, %v936_v56  ;;  %v940_v34 = vld [vmem:[%s8030_s3 + $0x980] sm:$0xff] }
 0x129   :  { %v944_v0 = vld [vmem:[%s8030_s3 + $0x9a0] sm:$0xff] }
 0x12a   :  { %3769 = vmatpush1.bf16.msra.mxu0 %v5074_v10  ;;  %3933 = vmatpush1.bf16.msra.mxu1 %v5076_v11  ;;  %v904_v10 = vld [vmem:[%s8030_s3 + $0x860] sm:$0xff]  ;;  %v905_v11 = vld [vmem:[%s8030_s3 + $0x868] sm:$0xff] }
 0x12b   :  { %3770 = vmatprep.subr.bf16.mxu0 %v5083_v12  ;;  %3934 = vmatprep.subr.bf16.mxu1 %v5085_v13  ;;  %v625_v12 = vmax.f32 %v575_v1, 0.0  ;;  %v6424_v13 = vpack.c.bf16 %v622_v2, %v622_v2  ;;  %v5131_v20 = vcombine.high %v900_v9, %v904_v10  ;;  %v5133_v22 = vcombine.high %v901_v40, %v905_v11  ;;  %v941_v1 = vld [vmem:[%s8030_s3 + $0x988] sm:$0xff] }
 0x12c   :  { %v5130_v28 = vcombine.low %v900_v9, %v904_v10  ;;  %v5132_v29 = vcombine.low %v901_v40, %v905_v11  ;;  %v945_v2 = vld [vmem:[%s8030_s3 + $0x9a8] sm:$0xff]  ;;  %v948_v9 = vld [vmem:[%s8030_s3 + $0x9c0] sm:$0xff] }
 0x12d   :  { %v6438_v27 = vpack.c.bf16 %v625_v12, %v625_v12  ;;  %v952_v10 = vld [vmem:[%s8030_s3 + $0x9e0] sm:$0xff]  ;;  %v949_v40 = vld [vmem:[%s8030_s3 + $0x9c8] sm:$0xff]  ;;  %v5170_v12 = vcombine.low %v940_v34, %v944_v0 }
 0x12e   :  { %3771 = vmatpush1.bf16.msra.mxu0 %v5082_v23  ;;  %3935 = vmatpush1.bf16.msra.mxu1 %v5084_v24  ;;  %v908_v23 = vld [vmem:[%s8030_s3 + $0x880] sm:$0xff]  ;;  %v953_v11 = vld [vmem:[%s8030_s3 + $0x9e8] sm:$0xff] }
 0x12f   :  { %3772 = vmatprep.subr.bf16.mxu0 %v5091_v25  ;;  %3936 = vmatprep.subr.bf16.mxu1 %v5093_v26  ;;  %v912_v24 = vld [vmem:[%s8030_s3 + $0x8a0] sm:$0xff]  ;;  %v909_v25 = vld [vmem:[%s8030_s3 + $0x888] sm:$0xff] }
 0x130   :  { %v913_v26 = vld [vmem:[%s8030_s3 + $0x8a8] sm:$0xff]  ;;  %v5139_v30 = vcombine.high %v908_v23, %v912_v24  ;;  %v5138_v38 = vcombine.low %v908_v23, %v912_v24  ;;  %v960_v23 = vld [vmem:[%s8030_s3 + $0xa20] sm:$0xff] }
 0x131   :  { %v5140_v41 = vcombine.low %v909_v25, %v913_v26  ;;  %v957_v24 = vld [vmem:[%s8030_s3 + $0xa08] sm:$0xff] }
 0x132   :  { %3773 = vmatpush1.bf16.msra.mxu0 %v5090_v32  ;;  %3937 = vmatpush1.bf16.msra.mxu1 %v5092_v33  ;;  %v5141_v32 = vcombine.high %v909_v25, %v913_v26  ;;  %v916_v33 = vld [vmem:[%s8030_s3 + $0x8c0] sm:$0xff]  ;;  %v961_v25 = vld [vmem:[%s8030_s3 + $0xa28] sm:$0xff]  ;;  %v5178_v26 = vcombine.low %v948_v9, %v952_v10 }
 0x133   :  { %3774 = vmatprep.subr.bf16.mxu0 %v5099_v36  ;;  %3938 = vmatprep.subr.bf16.mxu1 %v5101_v6  ;;  %v920_v36 = vld [vmem:[%s8030_s3 + $0x8e0] sm:$0xff]  ;;  %v917_v6 = vld [vmem:[%s8030_s3 + $0x8c8] sm:$0xff] }
 0x134   :  { %v5147_v42 = vcombine.high %v916_v33, %v920_v36  ;;  %v5149_v44 = vcombine.high %v917_v6, %v921_v37  ;;  %v5146_v49 = vcombine.low %v916_v33, %v920_v36  ;;  %v5148_v50 = vcombine.low %v917_v6, %v921_v37  ;;  %v968_v33 = vld [vmem:[%s8030_s3 + $0xa60] sm:$0xff]  ;;  %v965_v36 = vld [vmem:[%s8030_s3 + $0xa48] sm:$0xff] }
 0x135   :  { %v969_v6 = vld [vmem:[%s8030_s3 + $0xa68] sm:$0xff] }
 0x136   :  { %3775 = vmatpush1.bf16.msra.mxu0 %v5098_v45  ;;  %3939 = vmatpush1.bf16.msra.mxu1 %v5100_v46  ;;  %v924_v45 = vld [vmem:[%s8030_s3 + $0x900] sm:$0xff] }
 0x137   :  { %3776 = vmatprep.subr.bf16.mxu0 %v5107_v47  ;;  %3940 = vmatprep.subr.bf16.mxu1 %v5109_v48  ;;  %v928_v46 = vld [vmem:[%s8030_s3 + $0x920] sm:$0xff]  ;;  %v925_v47 = vld [vmem:[%s8030_s3 + $0x908] sm:$0xff] }
 0x138   :  { %v929_v48 = vld [vmem:[%s8030_s3 + $0x928] sm:$0xff]  ;;  %v5155_v51 = vcombine.high %v924_v45, %v928_v46 }
 0x139   :  { %v5157_v52 = vcombine.high %v925_v47, %v929_v48 }
 0x13a   :  { %3777 = vmatpush1.bf16.msra.mxu0 %v5106_v57  ;;  %3941 = vmatpush1.bf16.msra.mxu1 %v5108_v59  ;;  %v933_v57 = vld [vmem:[%s8030_s3 + $0x948] sm:$0xff] }
 0x13b   :  { %3778 = vmatprep.subr.bf16.mxu0 %v5115_v60  ;;  %3942 = vmatprep.subr.bf16.mxu1 %v5117_v61  ;;  %v937_v59 = vld [vmem:[%s8030_s3 + $0x968] sm:$0xff]  ;;  %v5154_v60 = vcombine.low %v924_v45, %v928_v46  ;;  %v5156_v61 = vcombine.low %v925_v47, %v929_v48  ;;  %v976_v45 = vld [vmem:[%s8030_s3 + $0xaa0] sm:$0xff] }
 0x13c   :  { %v5165_v63 = vcombine.high %v933_v57, %v937_v59  ;;  %v973_v46 = vld [vmem:[%s8030_s3 + $0xa88] sm:$0xff] }
 0x13d   :  { %v977_v47 = vld [vmem:[%s8030_s3 + $0xaa8] sm:$0xff] }
 0x13e   :  { %3779 = vmatpush1.bf16.msra.mxu0 %v5114_v3  ;;  %3943 = vmatpush1.bf16.msra.mxu1 %v5116_v4  ;;  %v5162_v3 = vcombine.low %v932_v55, %v936_v56  ;;  %v5164_v4 = vcombine.low %v933_v57, %v937_v59  ;;  %v984_v55 = vld [vmem:[%s8030_s3 + $0xae0] sm:$0xff]  ;;  %v981_v56 = vld [vmem:[%s8030_s3 + $0xac8] sm:$0xff] }
 0x13f   :  { %3789 = vmatprep.subr.bf16.mxu0 %v5123_v7  ;;  %3953 = vmatprep.subr.bf16.mxu1 %v5125_v8  ;;  %v5171_v7 = vcombine.high %v940_v34, %v944_v0  ;;  %v5173_v8 = vcombine.high %v941_v1, %v945_v2  ;;  %v985_v57 = vld [vmem:[%s8030_s3 + $0xae8] sm:$0xff]  ;;  %v992_v34 = vld [vmem:[%s8030_s3 + $0xb20] sm:$0xff] }
 0x140   :  { %v989_v0 = vld [vmem:[%s8030_s3 + $0xb08] sm:$0xff] }
 0x141   :  { %3781 = vmatmul.mubr.bf16.vlgmr.msra.gmra.mrb[8].mxu0 %v6424_v13  ;;  %3945 = vmatmul.mubr.bf16.vlgmr.msra.gmra.mrb[8].mxu1 %v6424_v13 }
 0x142   :  { %3790 = vmatpush1.bf16.msra.mxu0 %v5122_v18  ;;  %3954 = vmatpush1.bf16.msra.mxu1 %v5124_v19  ;;  %v5172_v18 = vcombine.low %v941_v1, %v945_v2  ;;  %v5179_v19 = vcombine.high %v948_v9, %v952_v10  ;;  %v993_v1 = vld [vmem:[%s8030_s3 + $0xb28] sm:$0xff]  ;;  %v1000_v9 = vld [vmem:[%s8030_s3 + $0xb60] sm:$0xff] }
 0x143   :  { %3791 = vmatprep.subr.bf16.mxu0 %v5131_v20  ;;  %3955 = vmatprep.subr.bf16.mxu1 %v5133_v22  ;;  %v5181_v20 = vcombine.high %v949_v40, %v953_v11  ;;  %v956_v22 = vld [vmem:[%s8030_s3 + $0xa00] sm:$0xff]  ;;  %v997_v10 = vld [vmem:[%s8030_s3 + $0xb48] sm:$0xff] }
 0x144   :  { %3821 = vmatprep.mubr.bf16.mxu0 %v6438_v27  ;;  %3985 = vmatprep.mubr.bf16.mxu1 %v6438_v27  ;;  %v5186_v37 = vcombine.low %v956_v22, %v960_v23 }
 0x146   :  { %3792 = vmatpush1.bf16.msra.mxu0 %v5130_v28  ;;  %3956 = vmatpush1.bf16.msra.mxu1 %v5132_v29  ;;  %v5180_v28 = vcombine.low %v949_v40, %v953_v11  ;;  %v5187_v29 = vcombine.high %v956_v22, %v960_v23  ;;  %v1001_v40 = vld [vmem:[%s8030_s3 + $0xb68] sm:$0xff]  ;;  %v114_v11 = vsub.s32 4, %v6169_v14  ;;  %v1004_v22 = vld [vmem:[%s8030_s3 + $0xb80] sm:$0xff] }
 0x147   :  { %3793 = vmatprep.subr.bf16.mxu0 %v5139_v30  ;;  %3957 = vmatprep.subr.bf16.mxu1 %v5141_v32  ;;  %v5189_v30 = vcombine.high %v957_v24, %v961_v25  ;;  %v964_v32 = vld [vmem:[%s8030_s3 + $0xa40] sm:$0xff] }
 0x148   :  { %v5194_v48 = vcombine.low %v964_v32, %v968_v33  ;;  %v1008_v23 = vld [vmem:[%s8030_s3 + $0xba0] sm:$0xff] }
 0x14a   :  { %3794 = vmatpush1.bf16.msra.mxu0 %v5138_v38  ;;  %3958 = vmatpush1.bf16.msra.mxu1 %v5140_v41  ;;  %v5188_v38 = vcombine.low %v957_v24, %v961_v25  ;;  %v5195_v41 = vcombine.high %v964_v32, %v968_v33  ;;  %v1005_v24 = vld [vmem:[%s8030_s3 + $0xb88] sm:$0xff]  ;;  %v5235_v32 = vcombine.high %v1004_v22, %v1008_v23 }
 0x14b   :  { %3795 = vmatprep.subr.bf16.mxu0 %v5147_v42  ;;  %3959 = vmatprep.subr.bf16.mxu1 %v5149_v44  ;;  %v5197_v42 = vcombine.high %v965_v36, %v969_v6  ;;  %v972_v44 = vld [vmem:[%s8030_s3 + $0xa80] sm:$0xff]  ;;  %v1009_v25 = vld [vmem:[%s8030_s3 + $0xba8] sm:$0xff] }
 0x14c   :  { %v5202_v59 = vcombine.low %v972_v44, %v976_v45  ;;  %v5237_v33 = vcombine.high %v1005_v24, %v1009_v25 }
 0x14e   :  { %3796 = vmatpush1.bf16.msra.mxu0 %v5146_v49  ;;  %3960 = vmatpush1.bf16.msra.mxu1 %v5148_v50  ;;  %v5196_v49 = vcombine.low %v965_v36, %v969_v6  ;;  %v5203_v50 = vcombine.high %v972_v44, %v976_v45  ;;  %v1012_v36 = vld [vmem:[%s8030_s3 + $0xbc0] sm:$0xff]  ;;  %v5234_v44 = vcombine.low %v1004_v22, %v1008_v23  ;;  %v1045_v22 = vld [vmem:[%s8030_s3 + $0xcc8] sm:$0xff] }
 0x14f   :  { %3797 = vmatprep.subr.bf16.mxu0 %v5155_v51  ;;  %3961 = vmatprep.subr.bf16.mxu1 %v5157_v52  ;;  %v5205_v51 = vcombine.high %v973_v46, %v977_v47  ;;  %v980_v52 = vld [vmem:[%s8030_s3 + $0xac0] sm:$0xff]  ;;  %v5236_v45 = vcombine.low %v1005_v24, %v1009_v25  ;;  %v1049_v23 = vld [vmem:[%s8030_s3 + $0xce8] sm:$0xff] }
 0x150   :  { %v5210_v2 = vcombine.low %v980_v52, %v984_v55  ;;  %v1016_v6 = vld [vmem:[%s8030_s3 + $0xbe0] sm:$0xff] }
 0x152   :  { %3798 = vmatpush1.bf16.msra.mxu0 %v5154_v60  ;;  %3962 = vmatpush1.bf16.msra.mxu1 %v5156_v61  ;;  %v5204_v60 = vcombine.low %v973_v46, %v977_v47  ;;  %v5211_v61 = vcombine.high %v980_v52, %v984_v55  ;;  %v5243_v46 = vcombine.high %v1012_v36, %v1016_v6 }
 0x153   :  { %3799 = vmatprep.subr.bf16.mxu0 %v5163_v62  ;;  %3963 = vmatprep.subr.bf16.mxu1 %v5165_v63  ;;  %v5213_v62 = vcombine.high %v981_v56, %v985_v57  ;;  %v988_v63 = vld [vmem:[%s8030_s3 + $0xb00] sm:$0xff]  ;;  %v5242_v52 = vcombine.low %v1012_v36, %v1016_v6  ;;  %v1057_v36 = vld [vmem:[%s8030_s3 + $0xd28] sm:$0xff] }
 0x156   :  { %3800 = vmatpush1.bf16.msra.mxu0 %v5162_v3  ;;  %3964 = vmatpush1.bf16.msra.mxu1 %v5164_v4  ;;  %v5212_v3 = vcombine.low %v981_v56, %v985_v57  ;;  %v5219_v4 = vcombine.high %v988_v63, %v992_v34 }
 0x157   :  { %3801 = vmatprep.subr.bf16.mxu0 %v5171_v7  ;;  %3965 = vmatprep.subr.bf16.mxu1 %v5173_v8  ;;  %v5221_v7 = vcombine.high %v989_v0, %v993_v1  ;;  %v996_v8 = vld [vmem:[%s8030_s3 + $0xb40] sm:$0xff] }
 0x15a   :  { %3802 = vmatpush1.bf16.msra.mxu0 %v5170_v12  ;;  %3966 = vmatpush1.bf16.msra.mxu1 %v5172_v18  ;;  %v5218_v12 = vcombine.low %v988_v63, %v992_v34  ;;  %v5220_v18 = vcombine.low %v989_v0, %v993_v1 }
 0x15b   :  { %3803 = vmatprep.subr.bf16.mxu0 %v5179_v19  ;;  %3967 = vmatprep.subr.bf16.mxu1 %v5181_v20  ;;  %v5227_v19 = vcombine.high %v996_v8, %v1000_v9  ;;  %v5229_v20 = vcombine.high %v997_v10, %v1001_v40 }
 0x15e   :  { %3804 = vmatpush1.bf16.msra.mxu0 %v5178_v26  ;;  %3968 = vmatpush1.bf16.msra.mxu1 %v5180_v28  ;;  %v126_v26 = vsub.s32 7, %v6169_v14  ;;  %v115_v28 = vrot.slane %v6175_v16, %v114_v11 }
 0x15f   :  { %3805 = vmatprep.subr.bf16.mxu0 %v5187_v29  ;;  %3969 = vmatprep.subr.bf16.mxu1 %v5189_v30  ;;  %v5226_v29 = vcombine.low %v996_v8, %v1000_v9  ;;  %v5228_v30 = vcombine.low %v997_v10, %v1001_v40  ;;  %v1041_v8 = vld [vmem:[%s8030_s3 + $0xca8] sm:$0xff] }
 0x162   :  { %3806 = vmatpush1.bf16.msra.mxu0 %v5186_v37  ;;  %3970 = vmatpush1.bf16.msra.mxu1 %v5188_v38  ;;  %v1013_v37 = vld [vmem:[%s8030_s3 + $0xbc8] sm:$0xff] }
 0x163   :  { %3807 = vmatprep.subr.bf16.mxu0 %v5195_v41  ;;  %3971 = vmatprep.subr.bf16.mxu1 %v5197_v42  ;;  %v1017_v38 = vld [vmem:[%s8030_s3 + $0xbe8] sm:$0xff]  ;;  %v127_v41 = vrot.slane %v6175_v16, %v126_v26  ;;  %v573_v42 = vadd.f32 %v6298_v39, %v115_v28 }
 0x164   :  { %v5245_v47 = vcombine.high %v1013_v37, %v1017_v38  ;;  %v1021_v16 = vld [vmem:[%s8030_s3 + $0xc08] sm:$0xff]  ;;  %v5244_v55 = vcombine.low %v1013_v37, %v1017_v38  ;;  %v5276_v37 = vcombine.low %v1045_v22, %v1049_v23 }
 0x165   :  { %v1025_v39 = vld [vmem:[%s8030_s3 + $0xc28] sm:$0xff] }
 0x166   :  { %3808 = vmatpush1.bf16.msra.mxu0 %v5194_v48  ;;  %3972 = vmatpush1.bf16.msra.mxu1 %v5196_v49  ;;  %v1020_v48 = vld [vmem:[%s8030_s3 + $0xc00] sm:$0xff]  ;;  %v5253_v57 = vcombine.high %v1021_v16, %v1025_v39  ;;  %v5252_v0 = vcombine.low %v1021_v16, %v1025_v39 }
 0x167   :  { %3809 = vmatprep.subr.bf16.mxu0 %v5203_v50  ;;  %3973 = vmatprep.subr.bf16.mxu1 %v5205_v51  ;;  %v1024_v49 = vld [vmem:[%s8030_s3 + $0xc20] sm:$0xff]  ;;  %v616_v50 = vadd.f32 %v6319_v58, %v127_v41  ;;  %v624_v51 = vmax.f32 %v573_v42, 0.0  ;;  %v1029_v58 = vld [vmem:[%s8030_s3 + $0xc48] sm:$0xff] }
 0x168   :  { %v5251_v56 = vcombine.high %v1020_v48, %v1024_v49  ;;  %v5250_v34 = vcombine.low %v1020_v48, %v1024_v49  ;;  %v1060_v42 = vld [vmem:[%s8030_s3 + $0xd40] sm:$0xff] }
 0x169   :  { %v6634_v63 = vpack.c.bf16 %v624_v51, %v624_v51  ;;  %v1068_v39 = vld [vmem:[%s8030_s3 + $0xd80] sm:$0xff]  ;;  %v1069_v51 = vld [vmem:[%s8030_s3 + $0xd88] sm:$0xff] }
 0x16a   :  { %3810 = vmatpush1.bf16.msra.mxu0 %v5202_v59  ;;  %3974 = vmatpush1.bf16.msra.mxu1 %v5204_v60  ;;  %v1028_v59 = vld [vmem:[%s8030_s3 + $0xc40] sm:$0xff] }
 0x16b   :  { %3811 = vmatprep.subr.bf16.mxu0 %v5211_v61  ;;  %3975 = vmatprep.subr.bf16.mxu1 %v5213_v62  ;;  %v1032_v60 = vld [vmem:[%s8030_s3 + $0xc60] sm:$0xff]  ;;  %v1033_v61 = vld [vmem:[%s8030_s3 + $0xc68] sm:$0xff]  ;;  %v627_v62 = vmax.f32 %v616_v50, 0.0 }
 0x16c   :  { %v5259_v1 = vcombine.high %v1028_v59, %v1032_v60  ;;  %v5258_v10 = vcombine.low %v1028_v59, %v1032_v60  ;;  %v5260_v40 = vcombine.low %v1029_v58, %v1033_v61  ;;  %v1072_v50 = vld [vmem:[%s8030_s3 + $0xda0] sm:$0xff] }
 0x16d   :  { %v6648_v9 = vpack.c.bf16 %v627_v62, %v627_v62  ;;  %v1076_v60 = vld [vmem:[%s8030_s3 + $0xdc0] sm:$0xff]  ;;  %v1081_v62 = vld [vmem:[%s8030_s3 + $0xde8] sm:$0xff] }
 0x16e   :  { %3812 = vmatpush1.bf16.msra.mxu0 %v5210_v2  ;;  %3976 = vmatpush1.bf16.msra.mxu1 %v5212_v3  ;;  %v5261_v2 = vcombine.high %v1029_v58, %v1033_v61  ;;  %v1036_v3 = vld [vmem:[%s8030_s3 + $0xc80] sm:$0xff]  ;;  %v1077_v61 = vld [vmem:[%s8030_s3 + $0xdc8] sm:$0xff] }
 0x16f   :  { %3813 = vmatprep.subr.bf16.mxu0 %v5219_v4  ;;  %3977 = vmatprep.subr.bf16.mxu1 %v5221_v7  ;;  %v1040_v4 = vld [vmem:[%s8030_s3 + $0xca0] sm:$0xff]  ;;  %v1037_v7 = vld [vmem:[%s8030_s3 + $0xc88] sm:$0xff] }
 0x170   :  { %v5266_v24 = vcombine.low %v1036_v3, %v1040_v4  ;;  %v5268_v25 = vcombine.low %v1037_v7, %v1041_v8  ;;  %v1080_v58 = vld [vmem:[%s8030_s3 + $0xde0] sm:$0xff] }
 0x172   :  { %3814 = vmatpush1.bf16.msra.mxu0 %v5218_v12  ;;  %3978 = vmatpush1.bf16.msra.mxu1 %v5220_v18  ;;  %v5267_v12 = vcombine.high %v1036_v3, %v1040_v4  ;;  %v5269_v18 = vcombine.high %v1037_v7, %v1041_v8  ;;  %v1084_v3 = vld [vmem:[%s8030_s3 + $0xe00] sm:$0xff]  ;;  %v1085_v7 = vld [vmem:[%s8030_s3 + $0xe08] sm:$0xff] }
 0x173   :  { %3815 = vmatprep.subr.bf16.mxu0 %v5227_v19  ;;  %3979 = vmatprep.subr.bf16.mxu1 %v5229_v20  ;;  %v1044_v19 = vld [vmem:[%s8030_s3 + $0xcc0] sm:$0xff]  ;;  %v1089_v8 = vld [vmem:[%s8030_s3 + $0xe28] sm:$0xff] }
 0x174   :  { %v1048_v20 = vld [vmem:[%s8030_s3 + $0xce0] sm:$0xff] }
 0x175   :  { %v5275_v28 = vcombine.high %v1044_v19, %v1048_v20  ;;  %v5274_v6 = vcombine.low %v1044_v19, %v1048_v20  ;;  %v1088_v4 = vld [vmem:[%s8030_s3 + $0xe20] sm:$0xff] }
 0x176   :  { %3816 = vmatpush1.bf16.msra.mxu0 %v5226_v29  ;;  %3980 = vmatpush1.bf16.msra.mxu1 %v5228_v30  ;;  %v5277_v29 = vcombine.high %v1045_v22, %v1049_v23  ;;  %v1052_v30 = vld [vmem:[%s8030_s3 + $0xd00] sm:$0xff]  ;;  %v1093_v22 = vld [vmem:[%s8030_s3 + $0xe48] sm:$0xff] }
 0x177   :  { %3817 = vmatprep.subr.bf16.mxu0 %v5235_v32  ;;  %3981 = vmatprep.subr.bf16.mxu1 %v5237_v33  ;;  %v1056_v32 = vld [vmem:[%s8030_s3 + $0xd20] sm:$0xff]  ;;  %v1053_v33 = vld [vmem:[%s8030_s3 + $0xd08] sm:$0xff] }
 0x178   :  { %v5283_v38 = vcombine.high %v1052_v30, %v1056_v32  ;;  %v5285_v41 = vcombine.high %v1053_v33, %v1057_v36  ;;  %v5284_v48 = vcombine.low %v1053_v33, %v1057_v36  ;;  %v1092_v19 = vld [vmem:[%s8030_s3 + $0xe40] sm:$0xff]  ;;  %v1097_v23 = vld [vmem:[%s8030_s3 + $0xe68] sm:$0xff] }
 0x179   :  { %v1096_v20 = vld [vmem:[%s8030_s3 + $0xe60] sm:$0xff]  ;;  %v1101_v33 = vld [vmem:[%s8030_s3 + $0xe88] sm:$0xff] }
 0x17a   :  { %3818 = vmatpush1.bf16.msra.mxu0 %v5234_v44  ;;  %3982 = vmatpush1.bf16.msra.mxu1 %v5236_v45  ;;  %v1064_v44 = vld [vmem:[%s8030_s3 + $0xd60] sm:$0xff]  ;;  %v1061_v45 = vld [vmem:[%s8030_s3 + $0xd48] sm:$0xff] }
 0x17b   :  { %3819 = vmatprep.subr.bf16.mxu0 %v5243_v46  ;;  %3983 = vmatprep.subr.bf16.mxu1 %v5245_v47  ;;  %v1065_v46 = vld [vmem:[%s8030_s3 + $0xd68] sm:$0xff]  ;;  %v5282_v47 = vcombine.low %v1052_v30, %v1056_v32  ;;  %v5291_v49 = vcombine.high %v1060_v42, %v1064_v44  ;;  %v1100_v30 = vld [vmem:[%s8030_s3 + $0xe80] sm:$0xff] }
 0x17c   :  { %v5293_v16 = vcombine.high %v1061_v45, %v1065_v46  ;;  %v1104_v32 = vld [vmem:[%s8030_s3 + $0xea0] sm:$0xff]  ;;  %v1105_v36 = vld [vmem:[%s8030_s3 + $0xea8] sm:$0xff] }
 0x17e   :  { %3820 = vmatpush1.bf16.msra.mxu0 %v5242_v52  ;;  %3984 = vmatpush1.bf16.msra.mxu1 %v5244_v55  ;;  %v1073_v52 = vld [vmem:[%s8030_s3 + $0xda8] sm:$0xff]  ;;  %v5290_v55 = vcombine.low %v1060_v42, %v1064_v44  ;;  %v1108_v42 = vld [vmem:[%s8030_s3 + $0xec0] sm:$0xff] }
 0x17f   :  { %3830 = vmatprep.subr.bf16.mxu0 %v5251_v56  ;;  %3994 = vmatprep.subr.bf16.mxu1 %v5253_v57  ;;  %v5292_v56 = vcombine.low %v1061_v45, %v1065_v46  ;;  %v5299_v57 = vcombine.high %v1068_v39, %v1072_v50  ;;  %v5301_v59 = vcombine.high %v1069_v51, %v1073_v52  ;;  %v1112_v44 = vld [vmem:[%s8030_s3 + $0xee0] sm:$0xff]  ;;  %v1109_v45 = vld [vmem:[%s8030_s3 + $0xec8] sm:$0xff] }
 0x180   :  { %v1113_v46 = vld [vmem:[%s8030_s3 + $0xee8] sm:$0xff] }
 0x181   :  { %3822 = vmatmul.mubr.bf16.vlgmr.msra.gmra.mrb[8].mxu0 %v6634_v63  ;;  %3986 = vmatmul.mubr.bf16.vlgmr.msra.gmra.mrb[8].mxu1 %v6634_v63 }
 0x182   :  { %3831 = vmatpush1.bf16.msra.mxu0 %v5250_v34  ;;  %3995 = vmatpush1.bf16.msra.mxu1 %v5252_v0  ;;  %v5298_v34 = vcombine.low %v1068_v39, %v1072_v50  ;;  %v5300_v0 = vcombine.low %v1069_v51, %v1073_v52  ;;  %v1116_v39 = vld [vmem:[%s8030_s3 + $0xf00] sm:$0xff]  ;;  %v1117_v51 = vld [vmem:[%s8030_s3 + $0xf08] sm:$0xff] }
 0x183   :  { %3832 = vmatprep.subr.bf16.mxu0 %v5259_v1  ;;  %3996 = vmatprep.subr.bf16.mxu1 %v5261_v2  ;;  %v5307_v1 = vcombine.high %v1076_v60, %v1080_v58  ;;  %v5309_v2 = vcombine.high %v1077_v61, %v1081_v62  ;;  %v1120_v50 = vld [vmem:[%s8030_s3 + $0xf20] sm:$0xff]  ;;  %v1121_v52 = vld [vmem:[%s8030_s3 + $0xf28] sm:$0xff] }
 0x184   :  { %5371 = vmatprep.mubr.msk.bf16.mxu0 %vm3678_vm0, %v6648_v9  ;;  %5373 = vmatprep.mubr.msk.bf16.mxu1 %vm3678_vm0, %v6648_v9 }
 0x186   :  { %3833 = vmatpush1.bf16.msra.mxu0 %v5258_v10  ;;  %3997 = vmatpush1.bf16.msra.mxu1 %v5260_v40  ;;  %v5306_v10 = vcombine.low %v1076_v60, %v1080_v58  ;;  %v5308_v40 = vcombine.low %v1077_v61, %v1081_v62  ;;  %v5349_v60 = vcombine.high %v1117_v51, %v1121_v52  ;;  %v1124_v58 = vld [vmem:[%s8030_s3 + $0xf40] sm:$0xff]  ;;  %v1125_v62 = vld [vmem:[%s8030_s3 + $0xf48] sm:$0xff] }
 0x187   :  { %3834 = vmatprep.subr.bf16.mxu0 %v5267_v12  ;;  %3998 = vmatprep.subr.bf16.mxu1 %v5269_v18  ;;  %v5315_v12 = vcombine.high %v1084_v3, %v1088_v4  ;;  %v5317_v18 = vcombine.high %v1085_v7, %v1089_v8  ;;  %v1128_v61 = vld [vmem:[%s8030_s3 + $0xf60] sm:$0xff] }
 0x18a   :  { %3835 = vmatpush1.bf16.msra.mxu0 %v5266_v24  ;;  %3999 = vmatpush1.bf16.msra.mxu1 %v5268_v25  ;;  %v5314_v24 = vcombine.low %v1084_v3, %v1088_v4  ;;  %v5316_v25 = vcombine.low %v1085_v7, %v1089_v8  ;;  %v5348_v3 = vcombine.low %v1117_v51, %v1121_v52  ;;  %v1132_v8 = vld [vmem:[%s8030_s3 + $0xf80] sm:$0xff] }
 0x18b   :  { %3836 = vmatprep.subr.bf16.mxu0 %v5275_v28  ;;  %4000 = vmatprep.subr.bf16.mxu1 %v5277_v29  ;;  %v5323_v28 = vcombine.high %v1092_v19, %v1096_v20  ;;  %v5325_v29 = vcombine.high %v1093_v22, %v1097_v23  ;;  %v5355_v4 = vcombine.high %v1124_v58, %v1128_v61 }
 0x18e   :  { %3837 = vmatpush1.bf16.msra.mxu0 %v5274_v6  ;;  %4001 = vmatpush1.bf16.msra.mxu1 %v5276_v37  ;;  %v5322_v6 = vcombine.low %v1092_v19, %v1096_v20  ;;  %v5324_v37 = vcombine.low %v1093_v22, %v1097_v23  ;;  %v5363_v19 = vcombine.high %v1132_v8, %v1132_v8 }
 0x18f   :  { %3838 = vmatprep.subr.bf16.mxu0 %v5283_v38  ;;  %4002 = vmatprep.subr.bf16.mxu1 %v5285_v41  ;;  %v5331_v38 = vcombine.high %v1100_v30, %v1104_v32  ;;  %v5333_v41 = vcombine.high %v1101_v33, %v1105_v36  ;;  %v5362_v22 = vcombine.low %v1132_v8, %v1132_v8 }
 0x192   :  { %3839 = vmatpush1.bf16.msra.mxu0 %v5282_v47  ;;  %4003 = vmatpush1.bf16.msra.mxu1 %v5284_v48  ;;  %v5330_v47 = vcombine.low %v1100_v30, %v1104_v32  ;;  %v5332_v48 = vcombine.low %v1101_v33, %v1105_v36  ;;  %v3684_v30 = vsel %vm3682_vm1, %v5362_v22, 0 }
 0x193   :  { %3840 = vmatprep.subr.bf16.mxu0 %v5291_v49  ;;  %4004 = vmatprep.subr.bf16.mxu1 %v5293_v16  ;;  %v5339_v49 = vcombine.high %v1108_v42, %v1112_v44  ;;  %v5341_v16 = vcombine.high %v1109_v45, %v1113_v46 }
 0x196   :  { %3841 = vmatpush1.bf16.msra.mxu0 %v5290_v55  ;;  %4005 = vmatpush1.bf16.msra.mxu1 %v5292_v56  ;;  %v122_v55 = vsub.s32 6, %v6169_v14  ;;  %v5338_v56 = vcombine.low %v1108_v42, %v1112_v44 }
 0x197   :  { %3842 = vmatprep.subr.bf16.mxu0 %v5299_v57  ;;  %4006 = vmatprep.subr.bf16.mxu1 %v5301_v59  ;;  %v5340_v57 = vcombine.low %v1109_v45, %v1113_v46  ;;  %v5347_v59 = vcombine.high %v1116_v39, %v1120_v50 }
 0x19a   :  { %3843 = vmatpush1.bf16.msra.mxu0 %v5298_v34  ;;  %4007 = vmatpush1.bf16.msra.mxu1 %v5300_v0  ;;  %v1129_v34 = vld [vmem:[%s8030_s3 + $0xf68] sm:$0xff]  ;;  %v5691_v0 = vld [vmem:[%s8029_s2] sm:$0xff] }
 0x19b   :  { %3844 = vmatprep.subr.bf16.mxu0 %v5307_v1  ;;  %4008 = vmatprep.subr.bf16.mxu1 %v5309_v2  ;;  %v123_v1 = vrot.slane %v5691_v0, %v122_v55  ;;  %v5346_v2 = vcombine.low %v1116_v39, %v1120_v50  ;;  %v5357_v7 = vcombine.high %v1125_v62, %v1129_v34  ;;  %v659_v39 = vld [vmem:[%s8030_s3 + $0xb8] sm:$0xff]  ;;  %v670_v0 = vld [vmem:[%s8030_s3 + $0x110] sm:$0xff] }
 0x19e   :  { %3845 = vmatpush1.bf16.msra.mxu0 %v5306_v10  ;;  %4009 = vmatpush1.bf16.msra.mxu1 %v5308_v40  ;;  %v1133_v10 = vld [vmem:[%s8030_s3 + $0xf88] sm:$0xff]  ;;  %v614_v40 = vadd.f32 %v6314_v53, %v123_v1  ;;  %v639_v53 = vld [vmem:[%s8030_s3 + $0x18] sm:$0xff]  ;;  %v674_v1 = vld [vmem:[%s8030_s3 + $0x130] sm:$0xff] }
 0x19f   :  { %3846 = vmatprep.subr.bf16.mxu0 %v5315_v12  ;;  %4010 = vmatprep.subr.bf16.mxu1 %v5317_v18  ;;  %v5354_v12 = vcombine.low %v1124_v58, %v1128_v61  ;;  %v5356_v18 = vcombine.low %v1125_v62, %v1129_v34  ;;  %v5365_v20 = vcombine.high %v1133_v10, %v1133_v10 }
 0x1a0   :  { %v5364_v23 = vcombine.low %v1133_v10, %v1133_v10  ;;  %v4903_v8 = vcombine.high %v670_v0, %v674_v1 }
 0x1a2   :  { %3847 = vmatpush1.bf16.msra.mxu0 %v5314_v24  ;;  %4011 = vmatpush1.bf16.msra.mxu1 %v5316_v25  ;;  %v638_v24 = vld [vmem:[%s8030_s3 + $0x10] sm:$0xff]  ;;  %v3690_v32 = vsel %vm3682_vm1, %v5364_v23, 0 }
 0x1a3   :  { %3848 = vmatprep.subr.bf16.mxu0 %v5323_v28  ;;  %4012 = vmatprep.subr.bf16.mxu1 %v5325_v29  ;;  %v642_v25 = vld [vmem:[%s8030_s3 + $0x30] sm:$0xff]  ;;  %v643_v28 = vld [vmem:[%s8030_s3 + $0x38] sm:$0xff]  ;;  %v626_v29 = vmax.f32 %v614_v40, 0.0 }
 0x1a4   :  { %v4871_v33 = vcombine.high %v638_v24, %v642_v25  ;;  %v4873_v36 = vcombine.high %v639_v53, %v643_v28  ;;  %v4870_v42 = vcombine.low %v638_v24, %v642_v25  ;;  %v4872_v45 = vcombine.low %v639_v53, %v643_v28  ;;  %v678_v40 = vld [vmem:[%s8030_s3 + $0x150] sm:$0xff]  ;;  %v687_v28 = vld [vmem:[%s8030_s3 + $0x198] sm:$0xff] }
 0x1a5   :  { %v6829_v44 = vpack.c.bf16 %v626_v29, %v626_v29  ;;  %v686_v25 = vld [vmem:[%s8030_s3 + $0x190] sm:$0xff]  ;;  %v691_v29 = vld [vmem:[%s8030_s3 + $0x1b8] sm:$0xff] }
 0x1a6   :  { %3849 = vmatpush1.bf16.msra.mxu0 %v5322_v6  ;;  %4013 = vmatpush1.bf16.msra.mxu1 %v5324_v37  ;;  %v646_v6 = vld [vmem:[%s8030_s3 + $0x50] sm:$0xff] }
 0x1a7   :  { %3850 = vmatprep.subr.bf16.mxu0 %v5331_v38  ;;  %4014 = vmatprep.subr.bf16.mxu1 %v5333_v41  ;;  %v650_v37 = vld [vmem:[%s8030_s3 + $0x70] sm:$0xff]  ;;  %v647_v38 = vld [vmem:[%s8030_s3 + $0x58] sm:$0xff] }
 0x1a8   :  { %v651_v41 = vld [vmem:[%s8030_s3 + $0x78] sm:$0xff]  ;;  %v4879_v46 = vcombine.high %v646_v6, %v650_v37  ;;  %v4878_v50 = vcombine.low %v646_v6, %v650_v37  ;;  %v690_v53 = vld [vmem:[%s8030_s3 + $0x1b0] sm:$0xff] }
 0x1a9   :  { %v4880_v51 = vcombine.low %v647_v38, %v651_v41  ;;  %v694_v6 = vld [vmem:[%s8030_s3 + $0x1d0] sm:$0xff] }
 0x1aa   :  { %3851 = vmatpush1.bf16.msra.mxu0 %v5330_v47  ;;  %4015 = vmatpush1.bf16.msra.mxu1 %v5332_v48  ;;  %v4881_v47 = vcombine.high %v647_v38, %v651_v41  ;;  %v654_v48 = vld [vmem:[%s8030_s3 + $0x90] sm:$0xff]  ;;  %v695_v38 = vld [vmem:[%s8030_s3 + $0x1d8] sm:$0xff] }
 0x1ab   :  { %3852 = vmatprep.subr.bf16.mxu0 %v5339_v49  ;;  %4016 = vmatprep.subr.bf16.mxu1 %v5341_v16  ;;  %v658_v49 = vld [vmem:[%s8030_s3 + $0xb0] sm:$0xff]  ;;  %v655_v16 = vld [vmem:[%s8030_s3 + $0x98] sm:$0xff] }
 0x1ac   :  { %v4887_v52 = vcombine.high %v654_v48, %v658_v49  ;;  %v4886_v58 = vcombine.low %v654_v48, %v658_v49  ;;  %v4888_v61 = vcombine.low %v655_v16, %v659_v39  ;;  %v698_v37 = vld [vmem:[%s8030_s3 + $0x1f0] sm:$0xff]  ;;  %v699_v41 = vld [vmem:[%s8030_s3 + $0x1f8] sm:$0xff] }
 0x1ad   :  { %v702_v48 = vld [vmem:[%s8030_s3 + $0x210] sm:$0xff] }
 0x1ae   :  { %3853 = vmatpush1.bf16.msra.mxu0 %v5338_v56  ;;  %4017 = vmatpush1.bf16.msra.mxu1 %v5340_v57  ;;  %v4889_v56 = vcombine.high %v655_v16, %v659_v39  ;;  %v662_v57 = vld [vmem:[%s8030_s3 + $0xd0] sm:$0xff]  ;;  %v703_v16 = vld [vmem:[%s8030_s3 + $0x218] sm:$0xff] }
 0x1af   :  { %3854 = vmatprep.subr.bf16.mxu0 %v5347_v59  ;;  %4018 = vmatprep.subr.bf16.mxu1 %v5349_v60  ;;  %v666_v59 = vld [vmem:[%s8030_s3 + $0xf0] sm:$0xff]  ;;  %v663_v60 = vld [vmem:[%s8030_s3 + $0xd8] sm:$0xff] }
 0x1b0   :  { %v4895_v62 = vcombine.high %v662_v57, %v666_v59  ;;  %v706_v49 = vld [vmem:[%s8030_s3 + $0x230] sm:$0xff]  ;;  %v707_v39 = vld [vmem:[%s8030_s3 + $0x238] sm:$0xff] }
 0x1b2   :  { %3855 = vmatpush1.bf16.msra.mxu0 %v5346_v2  ;;  %4019 = vmatpush1.bf16.msra.mxu1 %v5348_v3  ;;  %v671_v2 = vld [vmem:[%s8030_s3 + $0x118] sm:$0xff] }
 0x1b3   :  { %3856 = vmatprep.subr.bf16.mxu0 %v5355_v4  ;;  %4020 = vmatprep.subr.bf16.mxu1 %v5357_v7  ;;  %v675_v3 = vld [vmem:[%s8030_s3 + $0x138] sm:$0xff]  ;;  %v4894_v4 = vcombine.low %v662_v57, %v666_v59  ;;  %v710_v57 = vld [vmem:[%s8030_s3 + $0x250] sm:$0xff] }
 0x1b4   :  { %v4905_v10 = vcombine.high %v671_v2, %v675_v3  ;;  %v4904_v22 = vcombine.low %v671_v2, %v675_v3  ;;  %v714_v59 = vld [vmem:[%s8030_s3 + $0x270] sm:$0xff]  ;;  %v719_v2 = vld [vmem:[%s8030_s3 + $0x298] sm:$0xff] }
 0x1b5   :  { %v723_v3 = vld [vmem:[%s8030_s3 + $0x2b8] sm:$0xff] }
 0x1b6   :  { %3857 = vmatpush1.bf16.msra.mxu0 %v5354_v12  ;;  %4021 = vmatpush1.bf16.msra.mxu1 %v5356_v18  ;;  %v682_v12 = vld [vmem:[%s8030_s3 + $0x170] sm:$0xff]  ;;  %v679_v18 = vld [vmem:[%s8030_s3 + $0x158] sm:$0xff] }
 0x1b7   :  { %5370 = vmatprep.subr.msk.bf16.mxu0 %vm3682_vm1, %v5363_v19  ;;  %5372 = vmatprep.subr.msk.bf16.mxu1 %vm3682_vm1, %v5365_v20  ;;  %v683_v19 = vld [vmem:[%s8030_s3 + $0x178] sm:$0xff]  ;;  %v4902_v20 = vcombine.low %v670_v0, %v674_v1  ;;  %v4911_v23 = vcombine.high %v678_v40, %v682_v12  ;;  %v718_v0 = vld [vmem:[%s8030_s3 + $0x290] sm:$0xff] }
 0x1b8   :  { %v4913_v24 = vcombine.high %v679_v18, %v683_v19  ;;  %v722_v1 = vld [vmem:[%s8030_s3 + $0x2b0] sm:$0xff] }
 0x1ba   :  { %3859 = vmatpush1.bf16.msra.mxu0 %v3684_v30  ;;  %4023 = vmatpush1.bf16.msra.mxu1 %v3690_v32  ;;  %v4910_v30 = vcombine.low %v678_v40, %v682_v12  ;;  %v4912_v32 = vcombine.low %v679_v18, %v683_v19  ;;  %v726_v40 = vld [vmem:[%s8030_s3 + $0x2d0] sm:$0xff]  ;;  %v727_v18 = vld [vmem:[%s8030_s3 + $0x2d8] sm:$0xff] }
 0x1bb   :  { %4035 = vmatprep.subr.bf16.mxu0 %v4871_v33  ;;  %4199 = vmatprep.subr.bf16.mxu1 %v4873_v36  ;;  %v4919_v33 = vcombine.high %v686_v25, %v690_v53  ;;  %v4921_v36 = vcombine.high %v687_v28, %v691_v29  ;;  %v730_v12 = vld [vmem:[%s8030_s3 + $0x2f0] sm:$0xff]  ;;  %v731_v19 = vld [vmem:[%s8030_s3 + $0x2f8] sm:$0xff] }
 0x1bd   :  { %3863 = vmatmul.mubr.bf16.vlgmr.msra.gmra.mrb[8].mxu0 %v6829_v44  ;;  %4027 = vmatmul.mubr.bf16.vlgmr.msra.gmra.mrb[8].mxu1 %v6829_v44 }
 0x1be   :  { %4036 = vmatpush1.bf16.msra.mxu0 %v4870_v42  ;;  %4067 = vmatprep.mubr.bf16.mxu0 %v6200_v5  ;;  %v4918_v42 = vcombine.low %v686_v25, %v690_v53  ;;  %v734_v25 = vld [vmem:[%s8030_s3 + $0x310] sm:$0xff] }
 0x1bf   :  { %4200 = vmatpush1.bf16.msra.mxu1 %v4872_v45  ;;  %4231 = vmatprep.mubr.bf16.mxu1 %v6200_v5  ;;  %v667_v5 = vld [vmem:[%s8030_s3 + $0xf8] sm:$0xff]  ;;  %v4920_v45 = vcombine.low %v687_v28, %v691_v29  ;;  %v738_v53 = vld [vmem:[%s8030_s3 + $0x330] sm:$0xff] }
 0x1c0   :  { %4037 = vmatprep.subr.bf16.mxu0 %v4879_v46  ;;  %4201 = vmatprep.subr.bf16.mxu1 %v4881_v47  ;;  %v4897_v34 = vcombine.high %v663_v60, %v667_v5  ;;  %v4896_v7 = vcombine.low %v663_v60, %v667_v5  ;;  %v4927_v46 = vcombine.high %v694_v6, %v698_v37  ;;  %v711_v60 = vld [vmem:[%s8030_s3 + $0x258] sm:$0xff] }
 0x1c1   :  { %v4929_v47 = vcombine.high %v695_v38, %v699_v41  ;;  %v715_v5 = vld [vmem:[%s8030_s3 + $0x278] sm:$0xff] }
 0x1c2   :  { %4038 = vmatpush1.bf16.msra.mxu0 %v4878_v50  ;;  %v4926_v50 = vcombine.low %v694_v6, %v698_v37  ;;  %v735_v28 = vld [vmem:[%s8030_s3 + $0x318] sm:$0xff]  ;;  %v742_v6 = vld [vmem:[%s8030_s3 + $0x350] sm:$0xff] }
 0x1c3   :  { %4202 = vmatpush1.bf16.msra.mxu1 %v4880_v51  ;;  %4039 = vmatprep.subr.bf16.mxu0 %v4887_v52  ;;  %v4928_v51 = vcombine.low %v695_v38, %v699_v41  ;;  %v4935_v52 = vcombine.high %v702_v48, %v706_v49  ;;  %v739_v29 = vld [vmem:[%s8030_s3 + $0x338] sm:$0xff]  ;;  %v746_v37 = vld [vmem:[%s8030_s3 + $0x370] sm:$0xff] }
 0x1c4   :  { %4203 = vmatprep.subr.bf16.mxu1 %v4889_v56  ;;  %v4937_v56 = vcombine.high %v703_v16, %v707_v39  ;;  %v743_v38 = vld [vmem:[%s8030_s3 + $0x358] sm:$0xff] }
 0x1c5   :  { %v747_v41 = vld [vmem:[%s8030_s3 + $0x378] sm:$0xff] }
 0x1c6   :  { %4040 = vmatpush1.bf16.msra.mxu0 %v4886_v58  ;;  %v4934_v58 = vcombine.low %v702_v48, %v706_v49  ;;  %v750_v48 = vld [vmem:[%s8030_s3 + $0x390] sm:$0xff] }
 0x1c7   :  { %4204 = vmatpush1.bf16.msra.mxu1 %v4888_v61  ;;  %4041 = vmatprep.subr.bf16.mxu0 %v4895_v62  ;;  %v4936_v61 = vcombine.low %v703_v16, %v707_v39  ;;  %v4943_v62 = vcombine.high %v710_v57, %v714_v59  ;;  %v754_v49 = vld [vmem:[%s8030_s3 + $0x3b0] sm:$0xff]  ;;  %v751_v16 = vld [vmem:[%s8030_s3 + $0x398] sm:$0xff] }
 0x1c8   :  { %4205 = vmatprep.subr.bf16.mxu1 %v4897_v34  ;;  %v4945_v34 = vcombine.high %v711_v60, %v715_v5  ;;  %v755_v39 = vld [vmem:[%s8030_s3 + $0x3b8] sm:$0xff] }
 0x1ca   :  { %4042 = vmatpush1.bf16.msra.mxu0 %v4894_v4  ;;  %v4942_v4 = vcombine.low %v710_v57, %v714_v59  ;;  %v758_v57 = vld [vmem:[%s8030_s3 + $0x3d0] sm:$0xff] }
 0x1cb   :  { %4206 = vmatpush1.bf16.msra.mxu1 %v4896_v7  ;;  %4043 = vmatprep.subr.bf16.mxu0 %v4903_v8  ;;  %v4944_v7 = vcombine.low %v711_v60, %v715_v5  ;;  %v4951_v8 = vcombine.high %v718_v0, %v722_v1  ;;  %v762_v59 = vld [vmem:[%s8030_s3 + $0x3f0] sm:$0xff]  ;;  %v759_v60 = vld [vmem:[%s8030_s3 + $0x3d8] sm:$0xff] }
 0x1cc   :  { %4207 = vmatprep.subr.bf16.mxu1 %v4905_v10  ;;  %v4953_v10 = vcombine.high %v719_v2, %v723_v3  ;;  %v763_v5 = vld [vmem:[%s8030_s3 + $0x3f8] sm:$0xff] }
 0x1ce   :  { %4044 = vmatpush1.bf16.msra.mxu0 %v4902_v20  ;;  %v4950_v20 = vcombine.low %v718_v0, %v722_v1  ;;  %v766_v0 = vld [vmem:[%s8030_s3 + $0x410] sm:$0xff] }
 0x1cf   :  { %4208 = vmatpush1.bf16.msra.mxu1 %v4904_v22  ;;  %4045 = vmatprep.subr.bf16.mxu0 %v4911_v23  ;;  %v4952_v22 = vcombine.low %v719_v2, %v723_v3  ;;  %v4959_v23 = vcombine.high %v726_v40, %v730_v12  ;;  %v770_v1 = vld [vmem:[%s8030_s3 + $0x430] sm:$0xff]  ;;  %v767_v2 = vld [vmem:[%s8030_s3 + $0x418] sm:$0xff] }
 0x1d0   :  { %4209 = vmatprep.subr.bf16.mxu1 %v4913_v24  ;;  %v4961_v24 = vcombine.high %v727_v18, %v731_v19  ;;  %v771_v3 = vld [vmem:[%s8030_s3 + $0x438] sm:$0xff] }
 0x1d2   :  { %4046 = vmatpush1.bf16.msra.mxu0 %v4910_v30  ;;  %v4958_v30 = vcombine.low %v726_v40, %v730_v12  ;;  %v774_v40 = vld [vmem:[%s8030_s3 + $0x450] sm:$0xff] }
 0x1d3   :  { %4210 = vmatpush1.bf16.msra.mxu1 %v4912_v32  ;;  %4047 = vmatprep.subr.bf16.mxu0 %v4919_v33  ;;  %v4960_v32 = vcombine.low %v727_v18, %v731_v19  ;;  %v4967_v33 = vcombine.high %v734_v25, %v738_v53  ;;  %v778_v12 = vld [vmem:[%s8030_s3 + $0x470] sm:$0xff]  ;;  %v4998_v18 = vcombine.low %v766_v0, %v770_v1  ;;  %v775_v19 = vld [vmem:[%s8030_s3 + $0x458] sm:$0xff] }
 0x1d4   :  { %4211 = vmatprep.subr.bf16.mxu1 %v4921_v36  ;;  %v4969_v36 = vcombine.high %v735_v28, %v739_v29 }
 0x1d6   :  { %4048 = vmatpush1.bf16.msra.mxu0 %v4918_v42  ;;  %v4966_v42 = vcombine.low %v734_v25, %v738_v53  ;;  %v786_v25 = vld [vmem:[%s8030_s3 + $0x4b0] sm:$0xff] }
 0x1d7   :  { %4212 = vmatpush1.bf16.msra.mxu1 %v4920_v45  ;;  %4049 = vmatprep.subr.bf16.mxu0 %v4927_v46  ;;  %v4968_v45 = vcombine.low %v735_v28, %v739_v29  ;;  %v4975_v46 = vcombine.high %v742_v6, %v746_v37  ;;  %v783_v28 = vld [vmem:[%s8030_s3 + $0x498] sm:$0xff] }
 0x1d8   :  { %4213 = vmatprep.subr.bf16.mxu1 %v4929_v47  ;;  %v4977_v47 = vcombine.high %v743_v38, %v747_v41  ;;  %v787_v29 = vld [vmem:[%s8030_s3 + $0x4b8] sm:$0xff] }
 0x1da   :  { %4050 = vmatpush1.bf16.msra.mxu0 %v4926_v50  ;;  %v4974_v50 = vcombine.low %v742_v6, %v746_v37  ;;  %v790_v6 = vld [vmem:[%s8030_s3 + $0x4d0] sm:$0xff] }
 0x1db   :  { %4214 = vmatpush1.bf16.msra.mxu1 %v4928_v51  ;;  %4051 = vmatprep.subr.bf16.mxu0 %v4935_v52  ;;  %v4976_v51 = vcombine.low %v743_v38, %v747_v41  ;;  %v4983_v52 = vcombine.high %v750_v48, %v754_v49  ;;  %v794_v37 = vld [vmem:[%s8030_s3 + $0x4f0] sm:$0xff]  ;;  %v795_v38 = vld [vmem:[%s8030_s3 + $0x4f8] sm:$0xff]  ;;  %v5016_v41 = vcombine.low %v783_v28, %v787_v29 }
 0x1dc   :  { %4215 = vmatprep.subr.bf16.mxu1 %v4937_v56  ;;  %v4985_v56 = vcombine.high %v751_v16, %v755_v39 }
 0x1de   :  { %4052 = vmatpush1.bf16.msra.mxu0 %v4934_v58  ;;  %v4982_v58 = vcombine.low %v750_v48, %v754_v49  ;;  %v799_v48 = vld [vmem:[%s8030_s3 + $0x518] sm:$0xff] }
 0x1df   :  { %4216 = vmatpush1.bf16.msra.mxu1 %v4936_v61  ;;  %4053 = vmatprep.subr.bf16.mxu0 %v4943_v62  ;;  %v4984_v61 = vcombine.low %v751_v16, %v755_v39  ;;  %v4991_v62 = vcombine.high %v758_v57, %v762_v59  ;;  %v803_v49 = vld [vmem:[%s8030_s3 + $0x538] sm:$0xff]  ;;  %v5022_v16 = vcombine.low %v790_v6, %v794_v37 }
 0x1e0   :  { %4217 = vmatprep.subr.bf16.mxu1 %v4945_v34  ;;  %v4993_v34 = vcombine.high %v759_v60, %v763_v5 }
 0x1e2   :  { %4054 = vmatpush1.bf16.msra.mxu0 %v4942_v4  ;;  %v4990_v4 = vcombine.low %v758_v57, %v762_v59  ;;  %v807_v57 = vld [vmem:[%s8030_s3 + $0x558] sm:$0xff] }
 0x1e3   :  { %4218 = vmatpush1.bf16.msra.mxu1 %v4944_v7  ;;  %4055 = vmatprep.subr.bf16.mxu0 %v4951_v8  ;;  %v4992_v7 = vcombine.low %v759_v60, %v763_v5  ;;  %v4999_v8 = vcombine.high %v766_v0, %v770_v1  ;;  %v811_v59 = vld [vmem:[%s8030_s3 + $0x578] sm:$0xff]  ;;  %v5032_v5 = vcombine.low %v799_v48, %v803_v49 }
 0x1e4   :  { %4219 = vmatprep.subr.bf16.mxu1 %v4953_v10  ;;  %v5001_v10 = vcombine.high %v767_v2, %v771_v3  ;;  %v815_v0 = vld [vmem:[%s8030_s3 + $0x598] sm:$0xff] }
 0x1e5   :  { %v819_v1 = vld [vmem:[%s8030_s3 + $0x5b8] sm:$0xff] }
 0x1e6   :  { %4056 = vmatpush1.bf16.msra.mxu0 %v4950_v20  ;;  %v779_v20 = vld [vmem:[%s8030_s3 + $0x478] sm:$0xff] }
 0x1e7   :  { %4220 = vmatpush1.bf16.msra.mxu1 %v4952_v22  ;;  %4057 = vmatprep.subr.bf16.mxu0 %v4959_v23  ;;  %v5000_v22 = vcombine.low %v767_v2, %v771_v3  ;;  %v5007_v23 = vcombine.high %v774_v40, %v778_v12  ;;  %v5009_v53 = vcombine.high %v775_v19, %v779_v20 }
 0x1e8   :  { %4221 = vmatprep.subr.bf16.mxu1 %v4961_v24  ;;  %v782_v24 = vld [vmem:[%s8030_s3 + $0x490] sm:$0xff]  ;;  %v5040_v3 = vcombine.low %v807_v57, %v811_v59 }
 0x1ea   :  { %4058 = vmatpush1.bf16.msra.mxu0 %v4958_v30  ;;  %v5006_v30 = vcombine.low %v774_v40, %v778_v12  ;;  %v823_v40 = vld [vmem:[%s8030_s3 + $0x5d8] sm:$0xff] }
 0x1eb   :  { %4222 = vmatpush1.bf16.msra.mxu1 %v4960_v32  ;;  %4059 = vmatprep.subr.bf16.mxu0 %v4967_v33  ;;  %v5008_v32 = vcombine.low %v775_v19, %v779_v20  ;;  %v5015_v33 = vcombine.high %v782_v24, %v786_v25  ;;  %v827_v12 = vld [vmem:[%s8030_s3 + $0x5f8] sm:$0xff]  ;;  %v5048_v19 = vcombine.low %v815_v0, %v819_v1 }
 0x1ec   :  { %4223 = vmatprep.subr.bf16.mxu1 %v4969_v36  ;;  %v5017_v36 = vcombine.high %v783_v28, %v787_v29  ;;  %v5056_v29 = vcombine.low %v823_v40, %v827_v12 }
 0x1ee   :  { %4060 = vmatpush1.bf16.msra.mxu0 %v4966_v42  ;;  %v5023_v42 = vcombine.high %v790_v6, %v794_v37  ;;  %v839_v6 = vld [vmem:[%s8030_s3 + $0x658] sm:$0xff] }
 0x1ef   :  { %4224 = vmatpush1.bf16.msra.mxu1 %v4968_v45  ;;  %4061 = vmatprep.subr.bf16.mxu0 %v4975_v46  ;;  %v798_v46 = vld [vmem:[%s8030_s3 + $0x510] sm:$0xff]  ;;  %v843_v37 = vld [vmem:[%s8030_s3 + $0x678] sm:$0xff] }
 0x1f0   :  { %4225 = vmatprep.subr.bf16.mxu1 %v4977_v47  ;;  %v802_v47 = vld [vmem:[%s8030_s3 + $0x530] sm:$0xff] }
 0x1f1   :  { %v5030_v60 = vcombine.low %v798_v46, %v802_v47 }
 0x1f2   :  { %4062 = vmatpush1.bf16.msra.mxu0 %v4974_v50  ;;  %v5031_v50 = vcombine.high %v798_v46, %v802_v47  ;;  %v847_v46 = vld [vmem:[%s8030_s3 + $0x698] sm:$0xff] }
 0x1f3   :  { %4226 = vmatpush1.bf16.msra.mxu1 %v4976_v51  ;;  %4063 = vmatprep.subr.bf16.mxu0 %v4983_v52  ;;  %v5033_v51 = vcombine.high %v799_v48, %v803_v49  ;;  %v806_v52 = vld [vmem:[%s8030_s3 + $0x550] sm:$0xff]  ;;  %v851_v47 = vld [vmem:[%s8030_s3 + $0x6b8] sm:$0xff]  ;;  %v5072_v49 = vcombine.low %v839_v6, %v843_v37 }
 0x1f4   :  { %4227 = vmatprep.subr.bf16.mxu1 %v4985_v56  ;;  %v810_v56 = vld [vmem:[%s8030_s3 + $0x570] sm:$0xff] }
 0x1f5   :  { %v5038_v2 = vcombine.low %v806_v52, %v810_v56 }
 0x1f6   :  { %4064 = vmatpush1.bf16.msra.mxu0 %v4982_v58  ;;  %v5039_v58 = vcombine.high %v806_v52, %v810_v56  ;;  %v855_v52 = vld [vmem:[%s8030_s3 + $0x6d8] sm:$0xff] }
 0x1f7   :  { %4228 = vmatpush1.bf16.msra.mxu1 %v4984_v61  ;;  %4065 = vmatprep.subr.bf16.mxu0 %v4991_v62  ;;  %v5041_v61 = vcombine.high %v807_v57, %v811_v59  ;;  %v814_v62 = vld [vmem:[%s8030_s3 + $0x590] sm:$0xff]  ;;  %v859_v56 = vld [vmem:[%s8030_s3 + $0x6f8] sm:$0xff]  ;;  %v5080_v59 = vcombine.low %v847_v46, %v851_v47 }
 0x1f8   :  { %4229 = vmatprep.subr.bf16.mxu1 %v4993_v34  ;;  %v818_v34 = vld [vmem:[%s8030_s3 + $0x5b0] sm:$0xff] }
 0x1fa   :  { %4066 = vmatpush1.bf16.msra.mxu0 %v4990_v4  ;;  %v5047_v4 = vcombine.high %v814_v62, %v818_v34 }
 0x1fb   :  { %4230 = vmatpush1.bf16.msra.mxu1 %v4992_v7  ;;  %4076 = vmatprep.subr.bf16.mxu0 %v4999_v8  ;;  %v5049_v7 = vcombine.high %v815_v0, %v819_v1  ;;  %v822_v8 = vld [vmem:[%s8030_s3 + $0x5d0] sm:$0xff]  ;;  %v5088_v1 = vcombine.low %v855_v52, %v859_v56 }
 0x1fc   :  { %4240 = vmatprep.subr.bf16.mxu1 %v5001_v10  ;;  %v826_v10 = vld [vmem:[%s8030_s3 + $0x5f0] sm:$0xff] }
 0x1fd   :  { %4068 = vmatmul.mubr.bf16.vlgmr.msra.gmra.mrb[12].mxu0 %v6204_v35  ;;  %v5055_v20 = vcombine.high %v822_v8, %v826_v10  ;;  %v5054_v28 = vcombine.low %v822_v8, %v826_v10  ;;  %v871_v8 = vld [vmem:[%s8030_s3 + $0x758] sm:$0xff] }
 0x1fe   :  { %4232 = vmatmul.mubr.bf16.vlgmr.msra.gmra.mrb[12].mxu1 %v6204_v35  ;;  %4077 = vmatpush1.bf16.msra.mxu0 %v4998_v18  ;;  %v791_v35 = vld [vmem:[%s8030_s3 + $0x4d8] sm:$0xff]  ;;  %v5046_v18 = vcombine.low %v814_v62, %v818_v34 }
 0x1ff   :  { %4108 = vmatprep.mubr.bf16.mxu0 %v6234_v54  ;;  %4241 = vmatpush1.bf16.msra.mxu1 %v5000_v22  ;;  %v5025_v45 = vcombine.high %v791_v35, %v795_v38  ;;  %v5024_v39 = vcombine.low %v791_v35, %v795_v38  ;;  %v5057_v22 = vcombine.high %v823_v40, %v827_v12  ;;  %v863_v62 = vld [vmem:[%s8030_s3 + $0x718] sm:$0xff] }
 0x200   :  { %4272 = vmatprep.mubr.bf16.mxu1 %v6234_v54  ;;  %4078 = vmatprep.subr.bf16.mxu0 %v5007_v23  ;;  %v5014_v54 = vcombine.low %v782_v24, %v786_v25  ;;  %v830_v23 = vld [vmem:[%s8030_s3 + $0x610] sm:$0xff]  ;;  %v831_v25 = vld [vmem:[%s8030_s3 + $0x618] sm:$0xff] }
 0x201   :  { %4242 = vmatprep.subr.bf16.mxu1 %v5009_v53  ;;  %v834_v24 = vld [vmem:[%s8030_s3 + $0x630] sm:$0xff]  ;;  %v835_v53 = vld [vmem:[%s8030_s3 + $0x638] sm:$0xff] }
 0x202   :  { %4079 = vmatpush1.bf16.msra.mxu0 %v5006_v30  ;;  %v5063_v30 = vcombine.high %v830_v23, %v834_v24  ;;  %v5062_v35 = vcombine.low %v830_v23, %v834_v24  ;;  %v5064_v38 = vcombine.low %v831_v25, %v835_v53  ;;  %v867_v34 = vld [vmem:[%s8030_s3 + $0x738] sm:$0xff] }
 0x203   :  { %4243 = vmatpush1.bf16.msra.mxu1 %v5008_v32  ;;  %4080 = vmatprep.subr.bf16.mxu0 %v5015_v33  ;;  %v5065_v32 = vcombine.high %v831_v25, %v835_v53  ;;  %v838_v33 = vld [vmem:[%s8030_s3 + $0x650] sm:$0xff]  ;;  %v875_v10 = vld [vmem:[%s8030_s3 + $0x778] sm:$0xff]  ;;  %v5096_v12 = vcombine.low %v863_v62, %v867_v34 }
 0x204   :  { %4244 = vmatprep.subr.bf16.mxu1 %v5017_v36  ;;  %v842_v36 = vld [vmem:[%s8030_s3 + $0x670] sm:$0xff]  ;;  %v879_v23 = vld [vmem:[%s8030_s3 + $0x798] sm:$0xff]  ;;  %v5104_v53 = vcombine.low %v871_v8, %v875_v10 }
 0x205   :  { %v5070_v48 = vcombine.low %v838_v33, %v842_v36  ;;  %v883_v24 = vld [vmem:[%s8030_s3 + $0x7b8] sm:$0xff] }
 0x206   :  { %4081 = vmatpush1.bf16.msra.mxu0 %v5014_v54  ;;  %v5071_v54 = vcombine.high %v838_v33, %v842_v36  ;;  %v887_v33 = vld [vmem:[%s8030_s3 + $0x7d8] sm:$0xff] }
 0x207   :  { %4245 = vmatpush1.bf16.msra.mxu1 %v5016_v41  ;;  %4082 = vmatprep.subr.bf16.mxu0 %v5023_v42  ;;  %v5073_v41 = vcombine.high %v839_v6, %v843_v37  ;;  %v846_v42 = vld [vmem:[%s8030_s3 + $0x690] sm:$0xff]  ;;  %v891_v36 = vld [vmem:[%s8030_s3 + $0x7f8] sm:$0xff]  ;;  %v5112_v37 = vcombine.low %v879_v23, %v883_v24 }
 0x208   :  { %4246 = vmatprep.subr.bf16.mxu1 %v5025_v45  ;;  %v850_v45 = vld [vmem:[%s8030_s3 + $0x6b0] sm:$0xff] }
 0x209   :  { %v5078_v57 = vcombine.low %v846_v42, %v850_v45 }
 0x20a   :  { %4083 = vmatpush1.bf16.msra.mxu0 %v5022_v16  ;;  %v5079_v16 = vcombine.high %v846_v42, %v850_v45  ;;  %v895_v42 = vld [vmem:[%s8030_s3 + $0x818] sm:$0xff] }
 0x20b   :  { %4247 = vmatpush1.bf16.msra.mxu1 %v5024_v39  ;;  %4084 = vmatprep.subr.bf16.mxu0 %v5031_v50  ;;  %v5081_v39 = vcombine.high %v847_v46, %v851_v47  ;;  %v854_v50 = vld [vmem:[%s8030_s3 + $0x6d0] sm:$0xff]  ;;  %v899_v45 = vld [vmem:[%s8030_s3 + $0x838] sm:$0xff]  ;;  %v5120_v47 = vcombine.low %v887_v33, %v891_v36 }
 0x20c   :  { %4248 = vmatprep.subr.bf16.mxu1 %v5033_v51  ;;  %v858_v51 = vld [vmem:[%s8030_s3 + $0x6f0] sm:$0xff] }
 0x20d   :  { %v5086_v0 = vcombine.low %v854_v50, %v858_v51 }
 0x20e   :  { %4085 = vmatpush1.bf16.msra.mxu0 %v5030_v60  ;;  %v5087_v60 = vcombine.high %v854_v50, %v858_v51  ;;  %v903_v51 = vld [vmem:[%s8030_s3 + $0x858] sm:$0xff] }
 0x20f   :  { %4249 = vmatpush1.bf16.msra.mxu1 %v5032_v5  ;;  %4086 = vmatprep.subr.bf16.mxu0 %v5039_v58  ;;  %v5089_v5 = vcombine.high %v855_v52, %v859_v56  ;;  %v862_v58 = vld [vmem:[%s8030_s3 + $0x710] sm:$0xff]  ;;  %v907_v52 = vld [vmem:[%s8030_s3 + $0x878] sm:$0xff]  ;;  %v5128_v56 = vcombine.low %v895_v42, %v899_v45 }
 0x210   :  { %4250 = vmatprep.subr.bf16.mxu1 %v5041_v61  ;;  %v866_v61 = vld [vmem:[%s8030_s3 + $0x730] sm:$0xff] }
 0x211   :  { %v5094_v40 = vcombine.low %v862_v58, %v866_v61 }
 0x212   :  { %4087 = vmatpush1.bf16.msra.mxu0 %v5038_v2  ;;  %v5095_v2 = vcombine.high %v862_v58, %v866_v61  ;;  %v911_v58 = vld [vmem:[%s8030_s3 + $0x898] sm:$0xff] }
 0x213   :  { %4251 = vmatpush1.bf16.msra.mxu1 %v5040_v3  ;;  %4088 = vmatprep.subr.bf16.mxu0 %v5047_v4  ;;  %v5097_v3 = vcombine.high %v863_v62, %v867_v34  ;;  %v870_v4 = vld [vmem:[%s8030_s3 + $0x750] sm:$0xff]  ;;  %v915_v61 = vld [vmem:[%s8030_s3 + $0x8b8] sm:$0xff]  ;;  %v5136_v34 = vcombine.low %v903_v51, %v907_v52 }
 0x214   :  { %4252 = vmatprep.subr.bf16.mxu1 %v5049_v7  ;;  %v874_v7 = vld [vmem:[%s8030_s3 + $0x770] sm:$0xff] }
 0x215   :  { %v5102_v25 = vcombine.low %v870_v4, %v874_v7 }
 0x216   :  { %4089 = vmatpush1.bf16.msra.mxu0 %v5046_v18  ;;  %v5103_v18 = vcombine.high %v870_v4, %v874_v7  ;;  %v923_v4 = vld [vmem:[%s8030_s3 + $0x8f8] sm:$0xff]  ;;  %v5144_v7 = vcombine.low %v911_v58, %v915_v61 }
 0x217   :  { %4253 = vmatpush1.bf16.msra.mxu1 %v5048_v19  ;;  %4090 = vmatprep.subr.bf16.mxu0 %v5055_v20  ;;  %v5105_v19 = vcombine.high %v871_v8, %v875_v10  ;;  %v878_v20 = vld [vmem:[%s8030_s3 + $0x790] sm:$0xff] }
 0x218   :  { %4254 = vmatprep.subr.bf16.mxu1 %v5057_v22  ;;  %v882_v22 = vld [vmem:[%s8030_s3 + $0x7b0] sm:$0xff] }
 0x219   :  { %v5110_v6 = vcombine.low %v878_v20, %v882_v22 }
 0x21a   :  { %4091 = vmatpush1.bf16.msra.mxu0 %v5054_v28  ;;  %v5111_v28 = vcombine.high %v878_v20, %v882_v22 }
 0x21b   :  { %4255 = vmatpush1.bf16.msra.mxu1 %v5056_v29  ;;  %4092 = vmatprep.subr.bf16.mxu0 %v5063_v30  ;;  %v5113_v29 = vcombine.high %v879_v23, %v883_v24  ;;  %v886_v30 = vld [vmem:[%s8030_s3 + $0x7d0] sm:$0xff] }
 0x21c   :  { %4256 = vmatprep.subr.bf16.mxu1 %v5065_v32  ;;  %v890_v32 = vld [vmem:[%s8030_s3 + $0x7f0] sm:$0xff] }
 0x21d   :  { %v5118_v46 = vcombine.low %v886_v30, %v890_v32 }
 0x21e   :  { %4093 = vmatpush1.bf16.msra.mxu0 %v5062_v35  ;;  %v5119_v35 = vcombine.high %v886_v30, %v890_v32 }
 0x21f   :  { %4257 = vmatpush1.bf16.msra.mxu1 %v5064_v38  ;;  %4094 = vmatprep.subr.bf16.mxu0 %v5071_v54  ;;  %v5121_v38 = vcombine.high %v887_v33, %v891_v36  ;;  %v894_v54 = vld [vmem:[%s8030_s3 + $0x810] sm:$0xff] }
 0x220   :  { %4258 = vmatprep.subr.bf16.mxu1 %v5073_v41  ;;  %v898_v41 = vld [vmem:[%s8030_s3 + $0x830] sm:$0xff] }
 0x221   :  { %v5126_v50 = vcombine.low %v894_v54, %v898_v41 }
 0x222   :  { %4095 = vmatpush1.bf16.msra.mxu0 %v5070_v48  ;;  %v5127_v48 = vcombine.high %v894_v54, %v898_v41 }
 0x223   :  { %4259 = vmatpush1.bf16.msra.mxu1 %v5072_v49  ;;  %4096 = vmatprep.subr.bf16.mxu0 %v5079_v16  ;;  %v5129_v49 = vcombine.high %v895_v42, %v899_v45  ;;  %v902_v16 = vld [vmem:[%s8030_s3 + $0x850] sm:$0xff] }
 0x224   :  { %4260 = vmatprep.subr.bf16.mxu1 %v5081_v39  ;;  %v906_v39 = vld [vmem:[%s8030_s3 + $0x870] sm:$0xff] }
 0x225   :  { %v5134_v62 = vcombine.low %v902_v16, %v906_v39 }
 0x226   :  { %4097 = vmatpush1.bf16.msra.mxu0 %v5078_v57  ;;  %v5135_v57 = vcombine.high %v902_v16, %v906_v39 }
 0x227   :  { %4261 = vmatpush1.bf16.msra.mxu1 %v5080_v59  ;;  %4098 = vmatprep.subr.bf16.mxu0 %v5087_v60  ;;  %v910_v59 = vld [vmem:[%s8030_s3 + $0x890] sm:$0xff] }
 0x228   :  { %4262 = vmatprep.subr.bf16.mxu1 %v5089_v5  ;;  %v914_v60 = vld [vmem:[%s8030_s3 + $0x8b0] sm:$0xff]  ;;  %v5137_v5 = vcombine.high %v903_v51, %v907_v52 }
 0x229   :  { %v958_v52 = vld [vmem:[%s8030_s3 + $0xa10] sm:$0xff] }
 0x22a   :  { %4099 = vmatpush1.bf16.msra.mxu0 %v5086_v0  ;;  %v5143_v0 = vcombine.high %v910_v59, %v914_v60 }
 0x22b   :  { %4263 = vmatpush1.bf16.msra.mxu1 %v5088_v1  ;;  %4100 = vmatprep.subr.bf16.mxu0 %v5095_v2  ;;  %v5145_v1 = vcombine.high %v911_v58, %v915_v61  ;;  %v918_v2 = vld [vmem:[%s8030_s3 + $0x8d0] sm:$0xff] }
 0x22c   :  { %4264 = vmatprep.subr.bf16.mxu1 %v5097_v3  ;;  %v922_v3 = vld [vmem:[%s8030_s3 + $0x8f0] sm:$0xff] }
 0x22d   :  { %v5151_v8 = vcombine.high %v918_v2, %v922_v3  ;;  %v5150_v20 = vcombine.low %v918_v2, %v922_v3 }
 0x22e   :  { %4101 = vmatpush1.bf16.msra.mxu0 %v5094_v40  ;;  %v926_v40 = vld [vmem:[%s8030_s3 + $0x910] sm:$0xff] }
 0x22f   :  { %4265 = vmatpush1.bf16.msra.mxu1 %v5096_v12  ;;  %4102 = vmatprep.subr.bf16.mxu0 %v5103_v18  ;;  %v930_v12 = vld [vmem:[%s8030_s3 + $0x930] sm:$0xff]  ;;  %v927_v18 = vld [vmem:[%s8030_s3 + $0x918] sm:$0xff] }
 0x230   :  { %4266 = vmatprep.subr.bf16.mxu1 %v5105_v19  ;;  %v931_v19 = vld [vmem:[%s8030_s3 + $0x938] sm:$0xff]  ;;  %v5159_v23 = vcombine.high %v926_v40, %v930_v12  ;;  %v5158_v30 = vcombine.low %v926_v40, %v930_v12 }
 0x231   :  { %v5161_v24 = vcombine.high %v927_v18, %v931_v19  ;;  %v5160_v32 = vcombine.low %v927_v18, %v931_v19 }
 0x232   :  { %4103 = vmatpush1.bf16.msra.mxu0 %v5102_v25  ;;  %v934_v25 = vld [vmem:[%s8030_s3 + $0x950] sm:$0xff] }
 0x233   :  { %4267 = vmatpush1.bf16.msra.mxu1 %v5104_v53  ;;  %4104 = vmatprep.subr.bf16.mxu0 %v5111_v28  ;;  %v938_v53 = vld [vmem:[%s8030_s3 + $0x970] sm:$0xff]  ;;  %v935_v28 = vld [vmem:[%s8030_s3 + $0x958] sm:$0xff] }
 0x234   :  { %4268 = vmatprep.subr.bf16.mxu1 %v5113_v29  ;;  %v939_v29 = vld [vmem:[%s8030_s3 + $0x978] sm:$0xff]  ;;  %v5167_v33 = vcombine.high %v934_v25, %v938_v53  ;;  %v5166_v54 = vcombine.low %v934_v25, %v938_v53 }
 0x235   :  { %v5169_v36 = vcombine.high %v935_v28, %v939_v29  ;;  %v5168_v41 = vcombine.low %v935_v28, %v939_v29 }
 0x236   :  { %4105 = vmatpush1.bf16.msra.mxu0 %v5110_v6  ;;  %v942_v6 = vld [vmem:[%s8030_s3 + $0x990] sm:$0xff] }
 0x237   :  { %4269 = vmatpush1.bf16.msra.mxu1 %v5112_v37  ;;  %4106 = vmatprep.subr.bf16.mxu0 %v5119_v35  ;;  %v946_v37 = vld [vmem:[%s8030_s3 + $0x9b0] sm:$0xff]  ;;  %v943_v35 = vld [vmem:[%s8030_s3 + $0x998] sm:$0xff] }
 0x238   :  { %4270 = vmatprep.subr.bf16.mxu1 %v5121_v38  ;;  %v947_v38 = vld [vmem:[%s8030_s3 + $0x9b8] sm:$0xff]  ;;  %v5175_v42 = vcombine.high %v942_v6, %v946_v37  ;;  %v5174_v16 = vcombine.low %v942_v6, %v946_v37 }
 0x239   :  { %v5177_v45 = vcombine.high %v943_v35, %v947_v38  ;;  %v5176_v39 = vcombine.low %v943_v35, %v947_v38 }
 0x23a   :  { %4107 = vmatpush1.bf16.msra.mxu0 %v5118_v46  ;;  %v950_v46 = vld [vmem:[%s8030_s3 + $0x9d0] sm:$0xff] }
 0x23b   :  { %4271 = vmatpush1.bf16.msra.mxu1 %v5120_v47  ;;  %4117 = vmatprep.subr.bf16.mxu0 %v5127_v48  ;;  %v954_v47 = vld [vmem:[%s8030_s3 + $0x9f0] sm:$0xff]  ;;  %v951_v48 = vld [vmem:[%s8030_s3 + $0x9d8] sm:$0xff] }
 0x23c   :  { %4281 = vmatprep.subr.bf16.mxu1 %v5129_v49  ;;  %v955_v49 = vld [vmem:[%s8030_s3 + $0x9f8] sm:$0xff] }
 0x23d   :  { %4109 = vmatmul.mubr.bf16.vlgmr.msra.gmra.mrb[12].mxu0 %v6424_v13  ;;  %v5185_v51 = vcombine.high %v951_v48, %v955_v49 }
 0x23e   :  { %4273 = vmatmul.mubr.bf16.vlgmr.msra.gmra.mrb[12].mxu1 %v6424_v13  ;;  %4118 = vmatpush1.bf16.msra.mxu0 %v5126_v50  ;;  %v919_v13 = vld [vmem:[%s8030_s3 + $0x8d8] sm:$0xff]  ;;  %v5183_v50 = vcombine.high %v950_v46, %v954_v47 }
 0x23f   :  { %4149 = vmatprep.mubr.bf16.mxu0 %v6438_v27  ;;  %4282 = vmatpush1.bf16.msra.mxu1 %v5128_v56  ;;  %v5153_v10 = vcombine.high %v919_v13, %v923_v4  ;;  %v5152_v22 = vcombine.low %v919_v13, %v923_v4  ;;  %v962_v56 = vld [vmem:[%s8030_s3 + $0xa30] sm:$0xff] }
 0x240   :  { %4313 = vmatprep.mubr.bf16.mxu1 %v6438_v27  ;;  %4119 = vmatprep.subr.bf16.mxu0 %v5135_v57  ;;  %v5142_v27 = vcombine.low %v910_v59, %v914_v60  ;;  %v959_v57 = vld [vmem:[%s8030_s3 + $0xa18] sm:$0xff]  ;;  %v5182_v60 = vcombine.low %v950_v46, %v954_v47  ;;  %v5191_v58 = vcombine.high %v958_v52, %v962_v56 }
 0x241   :  { %4283 = vmatprep.subr.bf16.mxu1 %v5137_v5  ;;  %v963_v59 = vld [vmem:[%s8030_s3 + $0xa38] sm:$0xff]  ;;  %v5184_v5 = vcombine.low %v951_v48, %v955_v49  ;;  %v5190_v2 = vcombine.low %v958_v52, %v962_v56 }
 0x242   :  { %4120 = vmatpush1.bf16.msra.mxu0 %v5134_v62  ;;  %v5193_v61 = vcombine.high %v959_v57, %v963_v59  ;;  %v966_v62 = vld [vmem:[%s8030_s3 + $0xa50] sm:$0xff]  ;;  %v5192_v3 = vcombine.low %v959_v57, %v963_v59 }
 0x243   :  { %4284 = vmatpush1.bf16.msra.mxu1 %v5136_v34  ;;  %4121 = vmatprep.subr.bf16.mxu0 %v5143_v0  ;;  %v970_v34 = vld [vmem:[%s8030_s3 + $0xa70] sm:$0xff]  ;;  %v967_v0 = vld [vmem:[%s8030_s3 + $0xa58] sm:$0xff] }
 0x244   :  { %4285 = vmatprep.subr.bf16.mxu1 %v5145_v1  ;;  %v971_v1 = vld [vmem:[%s8030_s3 + $0xa78] sm:$0xff]  ;;  %v5199_v13 = vcombine.high %v966_v62, %v970_v34  ;;  %v5198_v40 = vcombine.low %v966_v62, %v970_v34 }
 0x245   :  { %v5201_v4 = vcombine.high %v967_v0, %v971_v1  ;;  %v5200_v12 = vcombine.low %v967_v0, %v971_v1 }
 0x246   :  { %4122 = vmatpush1.bf16.msra.mxu0 %v5142_v27  ;;  %v974_v27 = vld [vmem:[%s8030_s3 + $0xa90] sm:$0xff] }
 0x247   :  { %4286 = vmatpush1.bf16.msra.mxu1 %v5144_v7  ;;  %4123 = vmatprep.subr.bf16.mxu0 %v5151_v8  ;;  %v978_v7 = vld [vmem:[%s8030_s3 + $0xab0] sm:$0xff]  ;;  %v975_v8 = vld [vmem:[%s8030_s3 + $0xa98] sm:$0xff] }
 0x248   :  { %4287 = vmatprep.subr.bf16.mxu1 %v5153_v10  ;;  %v979_v10 = vld [vmem:[%s8030_s3 + $0xab8] sm:$0xff]  ;;  %v5207_v18 = vcombine.high %v974_v27, %v978_v7  ;;  %v5206_v25 = vcombine.low %v974_v27, %v978_v7 }
 0x249   :  { %v5209_v19 = vcombine.high %v975_v8, %v979_v10  ;;  %v5208_v53 = vcombine.low %v975_v8, %v979_v10 }
 0x24a   :  { %4124 = vmatpush1.bf16.msra.mxu0 %v5150_v20  ;;  %v982_v20 = vld [vmem:[%s8030_s3 + $0xad0] sm:$0xff] }
 0x24b   :  { %4288 = vmatpush1.bf16.msra.mxu1 %v5152_v22  ;;  %4125 = vmatprep.subr.bf16.mxu0 %v5159_v23  ;;  %v986_v22 = vld [vmem:[%s8030_s3 + $0xaf0] sm:$0xff]  ;;  %v983_v23 = vld [vmem:[%s8030_s3 + $0xad8] sm:$0xff] }
 0x24c   :  { %4289 = vmatprep.subr.bf16.mxu1 %v5161_v24  ;;  %v987_v24 = vld [vmem:[%s8030_s3 + $0xaf8] sm:$0xff]  ;;  %v5215_v28 = vcombine.high %v982_v20, %v986_v22  ;;  %v5214_v6 = vcombine.low %v982_v20, %v986_v22 }
 0x24d   :  { %v5217_v29 = vcombine.high %v983_v23, %v987_v24  ;;  %v5216_v37 = vcombine.low %v983_v23, %v987_v24  ;;  %v1035_v20 = vld [vmem:[%s8030_s3 + $0xc78] sm:$0xff]  ;;  %v1038_v24 = vld [vmem:[%s8030_s3 + $0xc90] sm:$0xff] }
 0x24e   :  { %4126 = vmatpush1.bf16.msra.mxu0 %v5158_v30  ;;  %v990_v30 = vld [vmem:[%s8030_s3 + $0xb10] sm:$0xff] }
 0x24f   :  { %4290 = vmatpush1.bf16.msra.mxu1 %v5160_v32  ;;  %4127 = vmatprep.subr.bf16.mxu0 %v5167_v33  ;;  %v994_v32 = vld [vmem:[%s8030_s3 + $0xb30] sm:$0xff]  ;;  %v991_v33 = vld [vmem:[%s8030_s3 + $0xb18] sm:$0xff] }
 0x250   :  { %4291 = vmatprep.subr.bf16.mxu1 %v5169_v36  ;;  %v995_v36 = vld [vmem:[%s8030_s3 + $0xb38] sm:$0xff]  ;;  %v5223_v35 = vcombine.high %v990_v30, %v994_v32  ;;  %v5222_v46 = vcombine.low %v990_v30, %v994_v32 }
 0x251   :  { %v5225_v38 = vcombine.high %v991_v33, %v995_v36  ;;  %v5224_v47 = vcombine.low %v991_v33, %v995_v36 }
 0x252   :  { %4128 = vmatpush1.bf16.msra.mxu0 %v5166_v54  ;;  %v998_v54 = vld [vmem:[%s8030_s3 + $0xb50] sm:$0xff] }
 0x253   :  { %4292 = vmatpush1.bf16.msra.mxu1 %v5168_v41  ;;  %4129 = vmatprep.subr.bf16.mxu0 %v5175_v42  ;;  %v1002_v41 = vld [vmem:[%s8030_s3 + $0xb70] sm:$0xff]  ;;  %v999_v42 = vld [vmem:[%s8030_s3 + $0xb58] sm:$0xff] }
 0x254   :  { %4293 = vmatprep.subr.bf16.mxu1 %v5177_v45  ;;  %v1003_v45 = vld [vmem:[%s8030_s3 + $0xb78] sm:$0xff]  ;;  %v5231_v48 = vcombine.high %v998_v54, %v1002_v41  ;;  %v5230_v52 = vcombine.low %v998_v54, %v1002_v41 }
 0x255   :  { %v5233_v49 = vcombine.high %v999_v42, %v1003_v45  ;;  %v5232_v56 = vcombine.low %v999_v42, %v1003_v45  ;;  %v1054_v42 = vld [vmem:[%s8030_s3 + $0xd10] sm:$0xff] }
 0x256   :  { %4130 = vmatpush1.bf16.msra.mxu0 %v5174_v16  ;;  %v1006_v16 = vld [vmem:[%s8030_s3 + $0xb90] sm:$0xff] }
 0x257   :  { %4294 = vmatpush1.bf16.msra.mxu1 %v5176_v39  ;;  %4131 = vmatprep.subr.bf16.mxu0 %v5183_v50  ;;  %v1010_v39 = vld [vmem:[%s8030_s3 + $0xbb0] sm:$0xff]  ;;  %v1007_v50 = vld [vmem:[%s8030_s3 + $0xb98] sm:$0xff] }
 0x258   :  { %4295 = vmatprep.subr.bf16.mxu1 %v5185_v51  ;;  %v1011_v51 = vld [vmem:[%s8030_s3 + $0xbb8] sm:$0xff]  ;;  %v5239_v57 = vcombine.high %v1006_v16, %v1010_v39  ;;  %v5238_v62 = vcombine.low %v1006_v16, %v1010_v39  ;;  %v1058_v45 = vld [vmem:[%s8030_s3 + $0xd30] sm:$0xff] }
 0x259   :  { %v5241_v59 = vcombine.high %v1007_v50, %v1011_v51  ;;  %v5240_v34 = vcombine.low %v1007_v50, %v1011_v51  ;;  %v5287_v16 = vcombine.high %v1054_v42, %v1058_v45  ;;  %v1062_v50 = vld [vmem:[%s8030_s3 + $0xd50] sm:$0xff] }
 0x25a   :  { %4132 = vmatpush1.bf16.msra.mxu0 %v5182_v60  ;;  %v1014_v60 = vld [vmem:[%s8030_s3 + $0xbd0] sm:$0xff] }
 0x25b   :  { %4296 = vmatpush1.bf16.msra.mxu1 %v5184_v5  ;;  %4133 = vmatprep.subr.bf16.mxu0 %v5191_v58  ;;  %v1018_v5 = vld [vmem:[%s8030_s3 + $0xbf0] sm:$0xff]  ;;  %v1015_v58 = vld [vmem:[%s8030_s3 + $0xbd8] sm:$0xff] }
 0x25c   :  { %4297 = vmatprep.subr.bf16.mxu1 %v5193_v61  ;;  %v1019_v61 = vld [vmem:[%s8030_s3 + $0xbf8] sm:$0xff]  ;;  %v5247_v0 = vcombine.high %v1014_v60, %v1018_v5  ;;  %v5246_v27 = vcombine.low %v1014_v60, %v1018_v5  ;;  %v1066_v51 = vld [vmem:[%s8030_s3 + $0xd70] sm:$0xff] }
 0x25d   :  { %v5249_v1 = vcombine.high %v1015_v58, %v1019_v61  ;;  %v5248_v7 = vcombine.low %v1015_v58, %v1019_v61  ;;  %v5295_v60 = vcombine.high %v1062_v50, %v1066_v51  ;;  %v1070_v58 = vld [vmem:[%s8030_s3 + $0xd90] sm:$0xff] }
 0x25e   :  { %4134 = vmatpush1.bf16.msra.mxu0 %v5190_v2  ;;  %v1022_v2 = vld [vmem:[%s8030_s3 + $0xc10] sm:$0xff] }
 0x25f   :  { %4298 = vmatpush1.bf16.msra.mxu1 %v5192_v3  ;;  %4135 = vmatprep.subr.bf16.mxu0 %v5199_v13  ;;  %v1026_v3 = vld [vmem:[%s8030_s3 + $0xc30] sm:$0xff]  ;;  %v1023_v13 = vld [vmem:[%s8030_s3 + $0xc18] sm:$0xff] }
 0x260   :  { %4299 = vmatprep.subr.bf16.mxu1 %v5201_v4  ;;  %v1027_v4 = vld [vmem:[%s8030_s3 + $0xc38] sm:$0xff]  ;;  %v5255_v8 = vcombine.high %v1022_v2, %v1026_v3  ;;  %v1074_v61 = vld [vmem:[%s8030_s3 + $0xdb0] sm:$0xff] }
 0x261   :  { %v5257_v10 = vcombine.high %v1023_v13, %v1027_v4  ;;  %v5256_v22 = vcombine.low %v1023_v13, %v1027_v4 }
 0x262   :  { %4136 = vmatpush1.bf16.msra.mxu0 %v5198_v40  ;;  %v1030_v40 = vld [vmem:[%s8030_s3 + $0xc50] sm:$0xff] }
 0x263   :  { %4300 = vmatpush1.bf16.msra.mxu1 %v5200_v12  ;;  %4137 = vmatprep.subr.bf16.mxu0 %v5207_v18  ;;  %v1034_v12 = vld [vmem:[%s8030_s3 + $0xc70] sm:$0xff]  ;;  %v5254_v18 = vcombine.low %v1022_v2, %v1026_v3  ;;  %v5303_v2 = vcombine.high %v1070_v58, %v1074_v61 }
 0x264   :  { %4301 = vmatprep.subr.bf16.mxu1 %v5209_v19  ;;  %v1031_v19 = vld [vmem:[%s8030_s3 + $0xc58] sm:$0xff]  ;;  %v5263_v23 = vcombine.high %v1030_v40, %v1034_v12  ;;  %v5262_v30 = vcombine.low %v1030_v40, %v1034_v12 }
 0x265   :  { %v5264_v32 = vcombine.low %v1031_v19, %v1035_v20  ;;  %v1079_v40 = vld [vmem:[%s8030_s3 + $0xdd8] sm:$0xff] }
 0x266   :  { %4138 = vmatpush1.bf16.msra.mxu0 %v5206_v25  ;;  %v1042_v25 = vld [vmem:[%s8030_s3 + $0xcb0] sm:$0xff]  ;;  %v1083_v12 = vld [vmem:[%s8030_s3 + $0xdf8] sm:$0xff] }
 0x267   :  { %4302 = vmatpush1.bf16.msra.mxu1 %v5208_v53  ;;  %4139 = vmatprep.subr.bf16.mxu0 %v5215_v28  ;;  %v5265_v53 = vcombine.high %v1031_v19, %v1035_v20  ;;  %v1039_v28 = vld [vmem:[%s8030_s3 + $0xc98] sm:$0xff]  ;;  %v5271_v33 = vcombine.high %v1038_v24, %v1042_v25  ;;  %v5302_v20 = vcombine.low %v1070_v58, %v1074_v61 }
 0x268   :  { %4303 = vmatprep.subr.bf16.mxu1 %v5217_v29  ;;  %v1043_v29 = vld [vmem:[%s8030_s3 + $0xcb8] sm:$0xff] }
 0x269   :  { %v5273_v36 = vcombine.high %v1039_v28, %v1043_v29 }
 0x26a   :  { %4140 = vmatpush1.bf16.msra.mxu0 %v5214_v6  ;;  %v1046_v6 = vld [vmem:[%s8030_s3 + $0xcd0] sm:$0xff] }
 0x26b   :  { %4304 = vmatpush1.bf16.msra.mxu1 %v5216_v37  ;;  %4141 = vmatprep.subr.bf16.mxu0 %v5223_v35  ;;  %v1047_v37 = vld [vmem:[%s8030_s3 + $0xcd8] sm:$0xff] }
 0x26c   :  { %4305 = vmatprep.subr.bf16.mxu1 %v5225_v38  ;;  %v1051_v35 = vld [vmem:[%s8030_s3 + $0xcf8] sm:$0xff]  ;;  %v5272_v38 = vcombine.low %v1039_v28, %v1043_v29  ;;  %v1086_v28 = vld [vmem:[%s8030_s3 + $0xe10] sm:$0xff] }
 0x26d   :  { %v5281_v41 = vcombine.high %v1047_v37, %v1051_v35  ;;  %v1090_v29 = vld [vmem:[%s8030_s3 + $0xe30] sm:$0xff] }
 0x26e   :  { %4142 = vmatpush1.bf16.msra.mxu0 %v5222_v46  ;;  %v1055_v46 = vld [vmem:[%s8030_s3 + $0xd18] sm:$0xff] }
 0x26f   :  { %4306 = vmatpush1.bf16.msra.mxu1 %v5224_v47  ;;  %4143 = vmatprep.subr.bf16.mxu0 %v5231_v48  ;;  %v1059_v47 = vld [vmem:[%s8030_s3 + $0xd38] sm:$0xff] }
 0x270   :  { %4307 = vmatprep.subr.bf16.mxu1 %v5233_v49  ;;  %v5280_v49 = vcombine.low %v1047_v37, %v1051_v35  ;;  %v5289_v39 = vcombine.high %v1055_v46, %v1059_v47  ;;  %v1094_v37 = vld [vmem:[%s8030_s3 + $0xe50] sm:$0xff] }
 0x271   :  { %v1098_v35 = vld [vmem:[%s8030_s3 + $0xe70] sm:$0xff] }
 0x272   :  { %4144 = vmatpush1.bf16.msra.mxu0 %v5230_v52  ;;  %v1063_v52 = vld [vmem:[%s8030_s3 + $0xd58] sm:$0xff] }
 0x273   :  { %4308 = vmatpush1.bf16.msra.mxu1 %v5232_v56  ;;  %4145 = vmatprep.subr.bf16.mxu0 %v5239_v57  ;;  %v1067_v56 = vld [vmem:[%s8030_s3 + $0xd78] sm:$0xff]  ;;  %v5286_v57 = vcombine.low %v1054_v42, %v1058_v45  ;;  %v5327_v42 = vcombine.high %v1094_v37, %v1098_v35 }
 0x274   :  { %4309 = vmatprep.subr.bf16.mxu1 %v5241_v59  ;;  %v5288_v59 = vcombine.low %v1055_v46, %v1059_v47  ;;  %v5297_v5 = vcombine.high %v1063_v52, %v1067_v56  ;;  %v1102_v46 = vld [vmem:[%s8030_s3 + $0xe90] sm:$0xff] }
 0x275   :  { %v1106_v47 = vld [vmem:[%s8030_s3 + $0xeb0] sm:$0xff] }
 0x276   :  { %4146 = vmatpush1.bf16.msra.mxu0 %v5238_v62  ;;  %v1071_v62 = vld [vmem:[%s8030_s3 + $0xd98] sm:$0xff] }
 0x277   :  { %4310 = vmatpush1.bf16.msra.mxu1 %v5240_v34  ;;  %4147 = vmatprep.subr.bf16.mxu0 %v5247_v0  ;;  %v1075_v34 = vld [vmem:[%s8030_s3 + $0xdb8] sm:$0xff]  ;;  %v5294_v0 = vcombine.low %v1062_v50, %v1066_v51  ;;  %v5335_v50 = vcombine.high %v1102_v46, %v1106_v47 }
 0x278   :  { %4311 = vmatprep.subr.bf16.mxu1 %v5249_v1  ;;  %v5296_v1 = vcombine.low %v1063_v52, %v1067_v56  ;;  %v5305_v4 = vcombine.high %v1071_v62, %v1075_v34  ;;  %v1110_v52 = vld [vmem:[%s8030_s3 + $0xed0] sm:$0xff] }
 0x279   :  { %v1114_v56 = vld [vmem:[%s8030_s3 + $0xef0] sm:$0xff] }
 0x27a   :  { %4148 = vmatpush1.bf16.msra.mxu0 %v5246_v27  ;;  %v1078_v27 = vld [vmem:[%s8030_s3 + $0xdd0] sm:$0xff]  ;;  %v5343_v58 = vcombine.high %v1110_v52, %v1114_v56 }
 0x27b   :  { %4312 = vmatpush1.bf16.msra.mxu1 %v5248_v7  ;;  %4158 = vmatprep.subr.bf16.mxu0 %v5255_v8  ;;  %v1082_v7 = vld [vmem:[%s8030_s3 + $0xdf0] sm:$0xff] }
 0x27c   :  { %4322 = vmatprep.subr.bf16.mxu1 %v5257_v10 }
 0x27d   :  { %4150 = vmatmul.mubr.bf16.vlgmr.msra.gmra.mrb[12].mxu0 %v6634_v63 }
 0x27e   :  { %4314 = vmatmul.mubr.bf16.vlgmr.msra.gmra.mrb[12].mxu1 %v6634_v63  ;;  %4159 = vmatpush1.bf16.msra.mxu0 %v5254_v18  ;;  %v1050_v63 = vld [vmem:[%s8030_s3 + $0xcf0] sm:$0xff] }
 0x27f   :  { %5375 = vmatprep.mubr.msk.bf16.mxu0 %vm3678_vm0, %v6648_v9  ;;  %4323 = vmatpush1.bf16.msra.mxu1 %v5256_v22  ;;  %v5279_v54 = vcombine.high %v1046_v6, %v1050_v63  ;;  %v5278_v48 = vcombine.low %v1046_v6, %v1050_v63  ;;  %v5319_v6 = vcombine.high %v1086_v28, %v1090_v29 }
 0x280   :  { %5377 = vmatprep.mubr.msk.bf16.mxu1 %vm3678_vm0, %v6648_v9  ;;  %4160 = vmatprep.subr.bf16.mxu0 %v5263_v23  ;;  %v5270_v9 = vcombine.low %v1038_v24, %v1042_v25  ;;  %v5304_v24 = vcombine.low %v1071_v62, %v1075_v34  ;;  %v5311_v25 = vcombine.high %v1078_v27, %v1082_v7  ;;  %v1118_v62 = vld [vmem:[%s8030_s3 + $0xf10] sm:$0xff] }
 0x281   :  { %4324 = vmatprep.subr.bf16.mxu1 %v5265_v53  ;;  %v5313_v53 = vcombine.high %v1079_v40, %v1083_v12  ;;  %v1122_v34 = vld [vmem:[%s8030_s3 + $0xf30] sm:$0xff] }
 0x282   :  { %4161 = vmatpush1.bf16.msra.mxu0 %v5262_v30  ;;  %v1087_v30 = vld [vmem:[%s8030_s3 + $0xe18] sm:$0xff] }
 0x283   :  { %4325 = vmatpush1.bf16.msra.mxu1 %v5264_v32  ;;  %4162 = vmatprep.subr.bf16.mxu0 %v5271_v33  ;;  %v1091_v32 = vld [vmem:[%s8030_s3 + $0xe38] sm:$0xff]  ;;  %v5310_v33 = vcombine.low %v1078_v27, %v1082_v7  ;;  %v5351_v27 = vcombine.high %v1118_v62, %v1122_v34 }
 0x284   :  { %4326 = vmatprep.subr.bf16.mxu1 %v5273_v36  ;;  %v5312_v36 = vcombine.low %v1079_v40, %v1083_v12  ;;  %v5321_v63 = vcombine.high %v1087_v30, %v1091_v32  ;;  %v1126_v40 = vld [vmem:[%s8030_s3 + $0xf50] sm:$0xff] }
 0x285   :  { %v1130_v12 = vld [vmem:[%s8030_s3 + $0xf70] sm:$0xff] }
 0x286   :  { %4163 = vmatpush1.bf16.msra.mxu0 %v5270_v9  ;;  %v1095_v9 = vld [vmem:[%s8030_s3 + $0xe58] sm:$0xff] }
 0x287   :  { %4327 = vmatpush1.bf16.msra.mxu1 %v5272_v38  ;;  %4164 = vmatprep.subr.bf16.mxu0 %v5279_v54  ;;  %v1099_v38 = vld [vmem:[%s8030_s3 + $0xe78] sm:$0xff]  ;;  %v5318_v54 = vcombine.low %v1086_v28, %v1090_v29  ;;  %v7586_v28 = vld [vmem:[%s8031_s4] sm:$0xff]  ;;  %v5358_v29 = vcombine.low %v1126_v40, %v1130_v12 }
 0x288   :  { %4328 = vmatprep.subr.bf16.mxu1 %v5281_v41  ;;  %v5320_v41 = vcombine.low %v1087_v30, %v1091_v32  ;;  %v5329_v45 = vcombine.high %v1095_v9, %v1099_v38 }
 0x28a   :  { %4165 = vmatpush1.bf16.msra.mxu0 %v5278_v48  ;;  %v1103_v48 = vld [vmem:[%s8030_s3 + $0xe98] sm:$0xff] }
 0x28b   :  { %4329 = vmatpush1.bf16.msra.mxu1 %v5280_v49  ;;  %4166 = vmatprep.subr.bf16.mxu0 %v5287_v16  ;;  %v1107_v49 = vld [vmem:[%s8030_s3 + $0xeb8] sm:$0xff]  ;;  %v5326_v16 = vcombine.low %v1094_v37, %v1098_v35  ;;  %v4388_v37 = vld [vmem:[%s8032_s5 + $0x88] sm:$0xff]  ;;  %v1145_v35 = vrot.slane %v7586_v28, %v102_v17  ;;  %v4371_v17 = vld [vmem:[%s8032_s5] sm:$0xff] }
 0x28c   :  { %4330 = vmatprep.subr.bf16.mxu1 %v5289_v39  ;;  %v5328_v39 = vcombine.low %v1095_v9, %v1099_v38  ;;  %v5337_v51 = vcombine.high %v1103_v48, %v1107_v49  ;;  %v4419_v9 = vld [vmem:[%s8032_s5 + $0x180] sm:$0xff]  ;;  %v4420_v38 = vld [vmem:[%s8032_s5 + $0x188] sm:$0xff] }
 0x28e   :  { %4167 = vmatpush1.bf16.msra.mxu0 %v5286_v57  ;;  %v1111_v57 = vld [vmem:[%s8030_s3 + $0xed8] sm:$0xff] }
 0x28f   :  { %4331 = vmatpush1.bf16.msra.mxu1 %v5288_v59  ;;  %4168 = vmatprep.subr.bf16.mxu0 %v5295_v60  ;;  %v1115_v59 = vld [vmem:[%s8030_s3 + $0xef8] sm:$0xff]  ;;  %v5334_v60 = vcombine.low %v1102_v46, %v1106_v47  ;;  %v4403_v47 = vld [vmem:[%s8032_s5 + $0x100] sm:$0xff] }
 0x290   :  { %v7485_v3 = vpop.f32.mrb[8].mxu0  ;;  %v7487_v13 = vpop.f32.mrb[8].mxu1  ;;  %4332 = vmatprep.subr.bf16.mxu1 %v5297_v5  ;;  %v5336_v5 = vcombine.low %v1103_v48, %v1107_v49  ;;  %v5345_v61 = vcombine.high %v1111_v57, %v1115_v59  ;;  %v4404_v48 = vld [vmem:[%s8032_s5 + $0x108] sm:$0xff] }
 0x291   :  { %v7495_v8 = vpop.f32.mrb[9].mxu0  ;;  %v7497_v10 = vpop.f32.mrb[9].mxu1 }
 0x292   :  { %v3868_v18 = vpop.f32.mrb[10].mxu0  ;;  %v4032_v19 = vpop.f32.mrb[10].mxu1  ;;  %4169 = vmatpush1.bf16.msra.mxu0 %v5294_v0  ;;  %v1119_v0 = vld [vmem:[%s8030_s3 + $0xf18] sm:$0xff]  ;;  %v5624_v49 = vadd.f32 %v7495_v8, %v1145_v35  ;;  %v4427_v35 = vld [vmem:[%s8032_s5 + $0x1c0] sm:$0xff] }
 0x293   :  { %4333 = vmatpush1.bf16.msra.mxu1 %v5296_v1  ;;  %v3869_v22 = vpop.f32.mrb[11].mxu0  ;;  %v4033_v23 = vpop.f32.mrb[11].mxu1  ;;  %4170 = vmatprep.subr.bf16.mxu0 %v5303_v2  ;;  %v1123_v1 = vld [vmem:[%s8030_s3 + $0xf38] sm:$0xff]  ;;  %v5342_v2 = vcombine.low %v1110_v52, %v1114_v56  ;;  %v4421_v52 = vld [vmem:[%s8032_s5 + $0x190] sm:$0xff]  ;;  %v5519_v56 = vpack.c.bf16 %v4404_v48, %v4403_v47 }
 0x294   :  { %4334 = vmatprep.subr.bf16.mxu1 %v5305_v4  ;;  %v5344_v4 = vcombine.low %v1111_v57, %v1115_v59  ;;  %v5353_v7 = vcombine.high %v1119_v0, %v1123_v1  ;;  %v1127_v18 = vld [vmem:[%s8030_s3 + $0xf58] sm:$0xff]  ;;  %v5352_v22 = vcombine.low %v1119_v0, %v1123_v1  ;;  %v5359_v23 = vcombine.high %v1126_v40, %v1130_v12  ;;  %v4373_v57 = vld [vmem:[%s8032_s5 + $0x10] sm:$0xff]  ;;  %v4423_v0 = vld [vmem:[%s8032_s5 + $0x1a0] sm:$0xff] }
 0x295   :  { %v1131_v19 = vld [vmem:[%s8030_s3 + $0xf78] sm:$0xff]  ;;  %v4405_v59 = vld [vmem:[%s8032_s5 + $0x110] sm:$0xff]  ;;  %v4424_v1 = vld [vmem:[%s8032_s5 + $0x1a8] sm:$0xff] }
 0x296   :  { %4171 = vmatpush1.bf16.msra.mxu0 %v5302_v20  ;;  %v5350_v20 = vcombine.low %v1118_v62, %v1122_v34  ;;  %v5360_v30 = vcombine.low %v1127_v18, %v1131_v19  ;;  %v4422_v8 = vld [vmem:[%s8032_s5 + $0x198] sm:$0xff]  ;;  %v4364_v62 = vmax.f32 %v5624_v49, 0.0  ;;  %v4375_v40 = vld [vmem:[%s8032_s5 + $0x20] sm:$0xff]  ;;  %v4376_v12 = vld [vmem:[%s8032_s5 + $0x28] sm:$0xff] }
 0x297   :  { %4335 = vmatpush1.bf16.msra.mxu1 %v5304_v24  ;;  %4172 = vmatprep.subr.bf16.mxu0 %v5311_v25  ;;  %v5361_v24 = vcombine.high %v1127_v18, %v1131_v19  ;;  %v1134_v25 = vld [vmem:[%s8030_s3 + $0xf90] sm:$0xff]  ;;  %v5521_v34 = vpack.c.bf16 %v4422_v8, %v4421_v52  ;;  %v4407_v18 = vld [vmem:[%s8032_s5 + $0x120] sm:$0xff]  ;;  %v4408_v19 = vld [vmem:[%s8032_s5 + $0x128] sm:$0xff] }
 0x298   :  { %4336 = vmatprep.subr.bf16.mxu1 %v5313_v53  ;;  %v1135_v53 = vld [vmem:[%s8030_s3 + $0xf98] sm:$0xff]  ;;  %v5367_v32 = vcombine.high %v1134_v25, %v1134_v25  ;;  %v4397_v47 = vld [vmem:[%s8032_s5 + $0xd0] sm:$0xff] }
 0x299   :  { %v4398_v48 = vld [vmem:[%s8032_s5 + $0xd8] sm:$0xff]  ;;  %v4429_v49 = vld [vmem:[%s8032_s5 + $0x1d0] sm:$0xff] }
 0x29a   :  { %4173 = vmatpush1.bf16.msra.mxu0 %v5310_v33  ;;  %v5366_v33 = vcombine.low %v1134_v25, %v1134_v25  ;;  %v5495_v25 = vpack.c.bf16 %v4376_v12, %v4375_v40  ;;  %v4381_v52 = vld [vmem:[%s8032_s5 + $0x50] sm:$0xff]  ;;  %v4382_v8 = vld [vmem:[%s8032_s5 + $0x58] sm:$0xff] }
 0x29b   :  { %4337 = vmatpush1.bf16.msra.mxu1 %v5312_v36  ;;  %4174 = vmatprep.subr.bf16.mxu0 %v5319_v6  ;;  %v5369_v36 = vcombine.high %v1135_v53, %v1135_v53  ;;  %v5368_v6 = vcombine.low %v1135_v53, %v1135_v53  ;;  %v5527_v53 = vpack.c.bf16 %v4408_v19, %v4407_v18  ;;  %v4402_v40 = vld [vmem:[%s8032_s5 + $0xf8] sm:$0xff]  ;;  %v4433_v12 = vld [vmem:[%s8032_s5 + $0x1f0] sm:$0xff] }
 0x29c   :  { %4338 = vmatprep.subr.bf16.mxu1 %v5321_v63  ;;  %v4387_v63 = vld [vmem:[%s8032_s5 + $0x80] sm:$0xff]  ;;  %v4434_v18 = vld [vmem:[%s8032_s5 + $0x1f8] sm:$0xff]  ;;  %v1141_v19 = vrot.slane %v7586_v28, %v98_v15  ;;  %v1149_v15 = vrot.slane %v7586_v28, %v106_v31 }
 0x29d   :  { %v3702_v46 = vsel %vm3682_vm1, %v5368_v6, 0  ;;  %v4410_v6 = vld [vmem:[%s8032_s5 + $0x138] sm:$0xff] }
 0x29e   :  { %4175 = vmatpush1.bf16.msra.mxu0 %v5318_v54  ;;  %v1153_v54 = vrot.slane %v7586_v28, %v110_v21  ;;  %v5517_v21 = vpack.c.bf16 %v4420_v38, %v4419_v9  ;;  %v4428_v9 = vld [vmem:[%s8032_s5 + $0x1c8] sm:$0xff] }
 0x29f   :  { %4339 = vmatpush1.bf16.msra.mxu1 %v5320_v41  ;;  %4176 = vmatprep.subr.bf16.mxu0 %v5327_v42  ;;  %v3696_v41 = vsel %vm3682_vm1, %v5366_v33, 0  ;;  %v5485_v42 = vpack.c.bf16 %v4388_v37, %v4387_v63  ;;  %v4409_v33 = vld [vmem:[%s8032_s5 + $0x130] sm:$0xff]  ;;  %v4395_v63 = vld [vmem:[%s8032_s5 + $0xc0] sm:$0xff]  ;;  %v4396_v37 = vld [vmem:[%s8032_s5 + $0xc8] sm:$0xff] }
 0x2a0   :  { %4340 = vmatprep.subr.bf16.mxu1 %v5329_v45  ;;  %v4372_v45 = vld [vmem:[%s8032_s5 + $0x8] sm:$0xff] }
 0x2a2   :  { %4177 = vmatpush1.bf16.msra.mxu0 %v5326_v16  ;;  %v4389_v16 = vld [vmem:[%s8032_s5 + $0x90] sm:$0xff] }
 0x2a3   :  { %4341 = vmatpush1.bf16.msra.mxu1 %v5328_v39  ;;  %4178 = vmatprep.subr.bf16.mxu0 %v5335_v50  ;;  %v4390_v39 = vld [vmem:[%s8032_s5 + $0x98] sm:$0xff]  ;;  %v5626_v50 = vadd.f32 %v7497_v10, %v1153_v54  ;;  %v5531_v54 = vpack.c.bf16 %v4410_v6, %v4409_v33  ;;  %v4467_v6 = vld [vmem:[%s8032_s5 + $0x300] sm:$0xff] }
 0x2a4   :  { %4342 = vmatprep.subr.bf16.mxu1 %v5337_v51  ;;  %v5487_v51 = vpack.c.bf16 %v4372_v45, %v4371_v17  ;;  %v4374_v10 = vld [vmem:[%s8032_s5 + $0x18] sm:$0xff]  ;;  %v4380_v17 = vld [vmem:[%s8032_s5 + $0x48] sm:$0xff]  ;;  %v4411_v45 = vld [vmem:[%s8032_s5 + $0x140] sm:$0xff] }
 0x2a6   :  { %4179 = vmatpush1.bf16.msra.mxu0 %v5334_v60  ;;  %v5489_v60 = vpack.c.bf16 %v4390_v39, %v4389_v16  ;;  %v4430_v16 = vld [vmem:[%s8032_s5 + $0x1d8] sm:$0xff] }
 0x2a7   :  { %4343 = vmatpush1.bf16.msra.mxu1 %v5336_v5  ;;  %4180 = vmatprep.subr.bf16.mxu0 %v5343_v58  ;;  %v4406_v5 = vld [vmem:[%s8032_s5 + $0x118] sm:$0xff]  ;;  %v4391_v58 = vld [vmem:[%s8032_s5 + $0xa0] sm:$0xff] }
 0x2a8   :  { %4344 = vmatprep.subr.bf16.mxu1 %v5345_v61  ;;  %v4392_v61 = vld [vmem:[%s8032_s5 + $0xa8] sm:$0xff] }
 0x2aa   :  { %4181 = vmatpush1.bf16.msra.mxu0 %v5342_v2  ;;  %v4366_v2 = vmax.f32 %v5626_v50, 0.0 }
 0x2ab   :  { %4345 = vmatpush1.bf16.msra.mxu1 %v5344_v4  ;;  %4182 = vmatprep.subr.bf16.mxu0 %v5351_v27  ;;  %v5491_v4 = vpack.c.bf16 %v4374_v10, %v4373_v57  ;;  %v5523_v27 = vpack.c.bf16 %v4406_v5, %v4405_v59  ;;  %v5537_v57 = vpack.c.bf16 %v4430_v16, %v4429_v49  ;;  %v4414_v10 = vld [vmem:[%s8032_s5 + $0x158] sm:$0xff]  ;;  %v4399_v59 = vld [vmem:[%s8032_s5 + $0xe0] sm:$0xff] }
 0x2ac   :  { %4346 = vmatprep.subr.bf16.mxu1 %v5353_v7  ;;  %v5493_v7 = vpack.c.bf16 %v4392_v61, %v4391_v58  ;;  %v4431_v5 = vld [vmem:[%s8032_s5 + $0x1e0] sm:$0xff]  ;;  %v4432_v58 = vld [vmem:[%s8032_s5 + $0x1e8] sm:$0xff]  ;;  %v5507_v61 = vpack.c.bf16 %v4382_v8, %v4381_v52  ;;  %v4470_v49 = vld [vmem:[%s8032_s5 + $0x318] sm:$0xff] }
 0x2ad   :  { %v4455_v16 = vld [vmem:[%s8032_s5 + $0x2a0] sm:$0xff] }
 0x2ae   :  { %4183 = vmatpush1.bf16.msra.mxu0 %v5350_v20  ;;  %v4393_v20 = vld [vmem:[%s8032_s5 + $0xb0] sm:$0xff]  ;;  %v4471_v52 = vld [vmem:[%s8032_s5 + $0x320] sm:$0xff] }
 0x2af   :  { %4347 = vmatpush1.bf16.msra.mxu1 %v5352_v22  ;;  %4184 = vmatprep.subr.bf16.mxu0 %v5359_v23  ;;  %v4394_v22 = vld [vmem:[%s8032_s5 + $0xb8] sm:$0xff]  ;;  %v4425_v23 = vld [vmem:[%s8032_s5 + $0x1b0] sm:$0xff] }
 0x2b0   :  { %4348 = vmatprep.subr.bf16.mxu1 %v5361_v24  ;;  %v4426_v24 = vld [vmem:[%s8032_s5 + $0x1b8] sm:$0xff] }
 0x2b2   :  { %4185 = vmatpush1.bf16.msra.mxu0 %v5358_v29  ;;  %v5497_v29 = vpack.c.bf16 %v4394_v22, %v4393_v20 }
 0x2b3   :  { %4349 = vmatpush1.bf16.msra.mxu1 %v5360_v30  ;;  %5374 = vmatprep.subr.msk.bf16.mxu0 %vm3682_vm1, %v5367_v32  ;;  %v4377_v30 = vld [vmem:[%s8032_s5 + $0x30] sm:$0xff]  ;;  %v4378_v32 = vld [vmem:[%s8032_s5 + $0x38] sm:$0xff] }
 0x2b4   :  { %5376 = vmatprep.subr.msk.bf16.mxu1 %vm3682_vm1, %v5369_v36  ;;  %v5529_v36 = vpack.c.bf16 %v4426_v24, %v4425_v23  ;;  %v5499_v38 = vpack.c.bf16 %v4378_v32, %v4377_v30  ;;  %v4385_v23 = vld [vmem:[%s8032_s5 + $0x70] sm:$0xff]  ;;  %v4386_v24 = vld [vmem:[%s8032_s5 + $0x78] sm:$0xff]  ;;  %v4451_v30 = vld [vmem:[%s8032_s5 + $0x280] sm:$0xff] }
 0x2b5   :  { %v4452_v32 = vld [vmem:[%s8032_s5 + $0x288] sm:$0xff]  ;;  %v5515_v33 = vpack.c.bf16 %v4386_v24, %v4385_v23 }
 0x2b6   :  { %4187 = vmatpush1.bf16.msra.mxu0 %v3696_v41  ;;  %v5501_v41 = vpack.c.bf16 %v4396_v37, %v4395_v63  ;;  %v5549_v63 = vpack.c.bf16 %v4452_v32, %v4451_v30  ;;  %v4435_v37 = vld [vmem:[%s8032_s5 + $0x200] sm:$0xff]  ;;  %v4478_v30 = vld [vmem:[%s8032_s5 + $0x358] sm:$0xff] }
 0x2b7   :  { %4351 = vmatpush1.bf16.msra.mxu1 %v3702_v46  ;;  %5486 = vmatprep.subr.bf16.mxu0 %v5485_v42  ;;  %v4379_v42 = vld [vmem:[%s8032_s5 + $0x40] sm:$0xff]  ;;  %v5533_v46 = vpack.c.bf16 %v4428_v9, %v4427_v35  ;;  %v4436_v35 = vld [vmem:[%s8032_s5 + $0x208] sm:$0xff]  ;;  %v5625_v9 = vadd.f32 %v7487_v13, %v1149_v15  ;;  %v4469_v13 = vld [vmem:[%s8032_s5 + $0x310] sm:$0xff] }
 0x2b8   :  { %5518 = vmatprep.subr.bf16.mxu1 %v5517_v21  ;;  %v4412_v21 = vld [vmem:[%s8032_s5 + $0x148] sm:$0xff]  ;;  %v5503_v39 = vpack.c.bf16 %v4380_v17, %v4379_v42  ;;  %v4463_v32 = vld [vmem:[%s8032_s5 + $0x2e0] sm:$0xff] }
 0x2b9   :  { %4191 = vmatmul.mubr.bf16.vlgmr.msra.gmra.mrb[12].mxu0 %v6829_v44  ;;  %v5535_v50 = vpack.c.bf16 %v4412_v21, %v4411_v45  ;;  %v4438_v21 = vld [vmem:[%s8032_s5 + $0x218] sm:$0xff] }
 0x2ba   :  { %4355 = vmatmul.mubr.bf16.vlgmr.msra.gmra.mrb[12].mxu1 %v6829_v44  ;;  %5488 = vmatpush3.bf16.msra.mxu0 %v5487_v51  ;;  %v5525_v44 = vpack.c.bf16 %v4424_v1, %v4423_v0  ;;  %v5505_v51 = vpack.c.bf16 %v4398_v48, %v4397_v47  ;;  %v4383_v0 = vld [vmem:[%s8032_s5 + $0x60] sm:$0xff]  ;;  %v4384_v1 = vld [vmem:[%s8032_s5 + $0x68] sm:$0xff]  ;;  %v4365_v47 = vmax.f32 %v5625_v9, 0.0  ;;  %v5717_v48 = vmov 0.0|0.0   ;;  %v4481_v9 = vld [vmem:[%s8032_s5 + $0x370] sm:$0xff] }
 0x2bb   :  { %4570 = vmatprep.mubr.f32.mxu0 %v4364_v62  ;;  %5520 = vmatpush3.bf16.msra.mxu1 %v5519_v56  ;;  %v4413_v56 = vld [vmem:[%s8032_s5 + $0x150] sm:$0xff] }
 0x2bc   :  { %4640 = vmatprep.mubr.f32.mxu1 %v4366_v2  ;;  %5490 = vmatprep.subr.bf16.mxu0 %v5489_v60  ;;  %v4400_v60 = vld [vmem:[%s8032_s5 + $0xe8] sm:$0xff]  ;;  %v5539_v62 = vpack.c.bf16 %v4414_v10, %v4413_v56  ;;  %v4415_v2 = vld [vmem:[%s8032_s5 + $0x160] sm:$0xff] }
 0x2bd   :  { %5522 = vmatprep.subr.bf16.mxu1 %v5521_v34  ;;  %v5509_v34 = vpack.c.bf16 %v4400_v60, %v4399_v59  ;;  %v4439_v56 = vld [vmem:[%s8032_s5 + $0x220] sm:$0xff]  ;;  %v4472_v10 = vld [vmem:[%s8032_s5 + $0x328] sm:$0xff]  ;;  %v4457_v59 = vld [vmem:[%s8032_s5 + $0x2b0] sm:$0xff] }
 0x2be   :  { %5492 = vmatpush3.bf16.msra.mxu0 %v5491_v4  ;;  %v5541_v4 = vpack.c.bf16 %v4432_v58, %v4431_v5  ;;  %v4458_v60 = vld [vmem:[%s8032_s5 + $0x2b8] sm:$0xff]  ;;  %v5588_v58 = vpack.c.bf16 %v4472_v10, %v4471_v52  ;;  %v4493_v10 = vld [vmem:[%s8032_s5 + $0x3d0] sm:$0xff] }
 0x2bf   :  { %5524 = vmatpush3.bf16.msra.mxu1 %v5523_v27  ;;  %5494 = vmatprep.subr.bf16.mxu0 %v5493_v7  ;;  %v4416_v27 = vld [vmem:[%s8032_s5 + $0x168] sm:$0xff]  ;;  %v4401_v7 = vld [vmem:[%s8032_s5 + $0xf0] sm:$0xff] }
 0x2c0   :  { %5526 = vmatprep.subr.bf16.mxu1 %v5525_v44  ;;  %v5511_v44 = vpack.c.bf16 %v4384_v1, %v4383_v0  ;;  %v5543_v20 = vpack.c.bf16 %v4416_v27, %v4415_v2  ;;  %v5513_v22 = vpack.c.bf16 %v4402_v40, %v4401_v7  ;;  %v4442_v0 = vld [vmem:[%s8032_s5 + $0x238] sm:$0xff]  ;;  %v4459_v2 = vld [vmem:[%s8032_s5 + $0x2c0] sm:$0xff] }
 0x2c1   :  { %v4474_v1 = vld [vmem:[%s8032_s5 + $0x338] sm:$0xff]  ;;  %v4475_v40 = vld [vmem:[%s8032_s5 + $0x340] sm:$0xff] }
 0x2c2   :  { %5496 = vmatpush3.bf16.msra.mxu0 %v5495_v25  ;;  %v4417_v25 = vld [vmem:[%s8032_s5 + $0x170] sm:$0xff] }
 0x2c3   :  { %5528 = vmatpush3.bf16.msra.mxu1 %v5527_v53  ;;  %5498 = vmatprep.subr.bf16.mxu0 %v5497_v29  ;;  %v5545_v53 = vpack.c.bf16 %v4434_v18, %v4433_v12  ;;  %v4418_v29 = vld [vmem:[%s8032_s5 + $0x178] sm:$0xff]  ;;  %v4443_v18 = vld [vmem:[%s8032_s5 + $0x240] sm:$0xff] }
 0x2c4   :  { %5530 = vmatprep.subr.bf16.mxu1 %v5529_v36  ;;  %v5623_v36 = vadd.f32 %v7485_v3, %v1141_v19  ;;  %v5547_v31 = vpack.c.bf16 %v4418_v29, %v4417_v25  ;;  %v4468_v3 = vld [vmem:[%s8032_s5 + $0x308] sm:$0xff]  ;;  %v4477_v25 = vld [vmem:[%s8032_s5 + $0x350] sm:$0xff]  ;;  %v4446_v29 = vld [vmem:[%s8032_s5 + $0x258] sm:$0xff] }
 0x2c5   :  { %v5582_v17 = vpack.c.bf16 %v4468_v3, %v4467_v6  ;;  %v4476_v19 = vld [vmem:[%s8032_s5 + $0x348] sm:$0xff]  ;;  %v4482_v3 = vld [vmem:[%s8032_s5 + $0x378] sm:$0xff] }
 0x2c6   :  { %5500 = vmatpush3.bf16.msra.mxu0 %v5499_v38  ;;  %v4453_v38 = vld [vmem:[%s8032_s5 + $0x290] sm:$0xff]  ;;  %v4363_v42 = vmax.f32 %v5623_v36, 0.0  ;;  %v5594_v24 = vpack.c.bf16 %v4476_v19, %v4475_v40 }
 0x2c7   :  { %5532 = vmatpush3.bf16.msra.mxu1 %v5531_v54  ;;  %5502 = vmatprep.subr.bf16.mxu0 %v5501_v41  ;;  %v4454_v54 = vld [vmem:[%s8032_s5 + $0x298] sm:$0xff]  ;;  %v5551_v41 = vpack.c.bf16 %v4436_v35, %v4435_v37  ;;  %v4480_v37 = vld [vmem:[%s8032_s5 + $0x368] sm:$0xff] }
 0x2c8   :  { %5534 = vmatprep.subr.bf16.mxu1 %v5533_v46  ;;  %v5553_v45 = vpack.c.bf16 %v4454_v54, %v4453_v38  ;;  %v4437_v46 = vld [vmem:[%s8032_s5 + $0x210] sm:$0xff]  ;;  %v5603_v38 = vpack.c.bf16 %v4482_v3, %v4481_v9  ;;  %v4483_v54 = vld [vmem:[%s8032_s5 + $0x380] sm:$0xff] }
 0x2ca   :  { %5504 = vmatpush3.bf16.msra.mxu0 %v5503_v39  ;;  %v4456_v39 = vld [vmem:[%s8032_s5 + $0x2a8] sm:$0xff] }
 0x2cb   :  { %5536 = vmatpush3.bf16.msra.mxu1 %v5535_v50  ;;  %5506 = vmatprep.subr.bf16.mxu0 %v5505_v51  ;;  %v5555_v50 = vpack.c.bf16 %v4438_v21, %v4437_v46  ;;  %v5585_v51 = vpack.c.bf16 %v4470_v49, %v4469_v13  ;;  %v5557_v8 = vpack.c.bf16 %v4456_v39, %v4455_v16  ;;  %v4486_v13 = vld [vmem:[%s8032_s5 + $0x398] sm:$0xff]  ;;  %v4487_v46 = vld [vmem:[%s8032_s5 + $0x3a0] sm:$0xff]  ;;  %v4488_v21 = vld [vmem:[%s8032_s5 + $0x3a8] sm:$0xff] }
 0x2cc   :  { %5538 = vmatprep.subr.bf16.mxu1 %v5537_v57  ;;  %v4440_v57 = vld [vmem:[%s8032_s5 + $0x228] sm:$0xff]  ;;  %v4489_v49 = vld [vmem:[%s8032_s5 + $0x3b0] sm:$0xff]  ;;  %v4490_v16 = vld [vmem:[%s8032_s5 + $0x3b8] sm:$0xff] }
 0x2cd   :  { %v5559_v5 = vpack.c.bf16 %v4440_v57, %v4439_v56  ;;  %v5615_v39 = vpack.c.bf16 %v4490_v16, %v4489_v49  ;;  %v4448_v56 = vld [vmem:[%s8032_s5 + $0x268] sm:$0xff] }
 0x2ce   :  { %5508 = vmatpush3.bf16.msra.mxu0 %v5507_v61  ;;  %v4473_v61 = vld [vmem:[%s8032_s5 + $0x330] sm:$0xff] }
 0x2cf   :  { %5540 = vmatpush3.bf16.msra.mxu1 %v5539_v62  ;;  %5510 = vmatprep.subr.bf16.mxu0 %v5509_v34  ;;  %v5561_v62 = vpack.c.bf16 %v4458_v60, %v4457_v59  ;;  %v4441_v34 = vld [vmem:[%s8032_s5 + $0x230] sm:$0xff]  ;;  %v5591_v7 = vpack.c.bf16 %v4474_v1, %v4473_v61  ;;  %v4494_v59 = vld [vmem:[%s8032_s5 + $0x3d8] sm:$0xff]  ;;  %v4495_v1 = vld [vmem:[%s8032_s5 + $0x3e0] sm:$0xff] }
 0x2d0   :  { %5542 = vmatprep.subr.bf16.mxu1 %v5541_v4  ;;  %v4460_v4 = vld [vmem:[%s8032_s5 + $0x2c8] sm:$0xff]  ;;  %v5563_v27 = vpack.c.bf16 %v4442_v0, %v4441_v34  ;;  %v5621_v60 = vpack.c.bf16 %v4494_v59, %v4493_v10  ;;  %v5718_v0 = vmov 0.0  }
 0x2d1   :  { %v5565_v12 = vpack.c.bf16 %v4460_v4, %v4459_v2  ;;  %v1157_v2 = vrot.slane %v7586_v28, %v114_v11  ;;  %v1165_v4 = vrot.slane %v7586_v28, %v122_v55 }
 0x2d2   :  { %5512 = vmatpush3.bf16.msra.mxu0 %v5511_v44  ;;  %v4444_v44 = vld [vmem:[%s8032_s5 + $0x248] sm:$0xff] }
 0x2d3   :  { %5544 = vmatpush3.bf16.msra.mxu1 %v5543_v20  ;;  %5514 = vmatprep.subr.bf16.mxu0 %v5513_v22  ;;  %v4461_v20 = vld [vmem:[%s8032_s5 + $0x2d0] sm:$0xff]  ;;  %v4462_v22 = vld [vmem:[%s8032_s5 + $0x2d8] sm:$0xff]  ;;  %v5567_v23 = vpack.c.bf16 %v4444_v44, %v4443_v18 }
 0x2d4   :  { %5546 = vmatprep.subr.bf16.mxu1 %v5545_v53  ;;  %v5569_v15 = vpack.c.bf16 %v4462_v22, %v4461_v20  ;;  %v4445_v53 = vld [vmem:[%s8032_s5 + $0x250] sm:$0xff] }
 0x2d5   :  { %v5571_v36 = vpack.c.bf16 %v4446_v29, %v4445_v53 }
 0x2d6   :  { %5516 = vmatpush3.bf16.msra.mxu0 %v5515_v33  ;;  %v4464_v33 = vld [vmem:[%s8032_s5 + $0x2e8] sm:$0xff] }
 0x2d7   :  { %5548 = vmatpush3.bf16.msra.mxu1 %v5547_v31  ;;  %5550 = vmatprep.subr.bf16.mxu0 %v5549_v63  ;;  %v5597_v31 = vpack.c.bf16 %v4478_v30, %v4477_v25  ;;  %v5573_v6 = vpack.c.bf16 %v4464_v33, %v4463_v32  ;;  %v4479_v63 = vld [vmem:[%s8032_s5 + $0x360] sm:$0xff] }
 0x2d8   :  { %5581 = vmatprep.subr.bf16.mxu1 %v5717_v48  ;;  %v5600_v35 = vpack.c.bf16 %v4480_v37, %v4479_v63 }
 0x2d9   :  { %4571 = vmatmul.mubr.f32.vlgmr.msra.gmra.mrb[16].mxu0 %v4363_v42 }
 0x2da   :  { %4641 = vmatmul.mubr.f32.vlgmr.msra.gmra.mrb[16].mxu1 %v4365_v47  ;;  %5552 = vmatpush3.bf16.msra.mxu0 %v5551_v41  ;;  %v4484_v41 = vld [vmem:[%s8032_s5 + $0x388] sm:$0xff]  ;;  %v5612_v47 = vpack.c.bf16 %v4488_v21, %v4487_v46 }
 0x2db   :  { %5583 = vmatpush1.bf16.msra.mxu1 %v5582_v17  ;;  %5554 = vmatprep.subr.bf16.mxu0 %v5553_v45  ;;  %v5606_v42 = vpack.c.bf16 %v4484_v41, %v4483_v54  ;;  %v4485_v17 = vld [vmem:[%s8032_s5 + $0x390] sm:$0xff] }
 0x2dc   :  { %5584 = vmatprep.subr.bf16.mxu1 %v5717_v48  ;;  %v5609_v45 = vpack.c.bf16 %v4486_v13, %v4485_v17 }
 0x2de   :  { %5556 = vmatpush3.bf16.msra.mxu0 %v5555_v50  ;;  %v4491_v50 = vld [vmem:[%s8032_s5 + $0x3c0] sm:$0xff] }
 0x2df   :  { %5586 = vmatpush1.bf16.msra.mxu1 %v5585_v51  ;;  %5558 = vmatprep.subr.bf16.mxu0 %v5557_v8  ;;  %v4492_v51 = vld [vmem:[%s8032_s5 + $0x3c8] sm:$0xff]  ;;  %v4447_v8 = vld [vmem:[%s8032_s5 + $0x260] sm:$0xff] }
 0x2e0   :  { %5587 = vmatprep.subr.bf16.mxu1 %v5717_v48  ;;  %v5618_v52 = vpack.c.bf16 %v4492_v51, %v4491_v50  ;;  %v5575_v57 = vpack.c.bf16 %v4448_v56, %v4447_v8 }
 0x2e2   :  { %5560 = vmatpush3.bf16.msra.mxu0 %v5559_v5  ;;  %v4465_v5 = vld [vmem:[%s8032_s5 + $0x2f0] sm:$0xff] }
 0x2e3   :  { %5589 = vmatpush1.bf16.msra.mxu1 %v5588_v58  ;;  %5562 = vmatprep.subr.bf16.mxu0 %v5561_v62  ;;  %v4466_v58 = vld [vmem:[%s8032_s5 + $0x2f8] sm:$0xff] }
 0x2e4   :  { %5590 = vmatprep.subr.bf16.mxu1 %v5717_v48  ;;  %v5577_v61 = vpack.c.bf16 %v4466_v58, %v4465_v5  ;;  %v4450_v62 = vld [vmem:[%s8032_s5 + $0x278] sm:$0xff] }
 0x2e6   :  { %5564 = vmatpush3.bf16.msra.mxu0 %v5563_v27  ;;  %v1161_v27 = vrot.slane %v7586_v28, %v118_v43 }
 0x2e7   :  { %5592 = vmatpush1.bf16.msra.mxu1 %v5591_v7  ;;  %5566 = vmatprep.subr.bf16.mxu0 %v5565_v12  ;;  %v1169_v7 = vrot.slane %v7586_v28, %v126_v26  ;;  %v5378_v28 = vld [vmem:[%s8033_s6] ss:$0 sm:$0xff] }
 0x2e8   :  { %5593 = vmatprep.subr.bf16.mxu1 %v5717_v48 }
 0x2ea   :  { %5568 = vmatpush3.bf16.msra.mxu0 %v5567_v23 }
 0x2eb   :  { %5595 = vmatpush1.bf16.msra.mxu1 %v5594_v24  ;;  %5570 = vmatprep.subr.bf16.mxu0 %v5569_v15 }
 0x2ec   :  { %5596 = vmatprep.subr.bf16.mxu1 %v5717_v48 }
 0x2ee   :  { %5572 = vmatpush3.bf16.msra.mxu0 %v5571_v36 }
 0x2ef   :  { %5598 = vmatpush1.bf16.msra.mxu1 %v5597_v31  ;;  %5574 = vmatprep.subr.bf16.mxu0 %v5573_v6 }
 0x2f0   :  { %5599 = vmatprep.subr.bf16.mxu1 %v5717_v48 }
 0x2f2   :  { %5576 = vmatpush3.bf16.msra.mxu0 %v5575_v57 }
 0x2f3   :  { %5601 = vmatpush1.bf16.msra.mxu1 %v5600_v35  ;;  %5578 = vmatprep.subr.bf16.mxu0 %v5577_v61 }
 0x2f4   :  { %5602 = vmatprep.subr.bf16.mxu1 %v5717_v48 }
 0x2f7   :  { %5604 = vmatpush1.bf16.msra.mxu1 %v5603_v38 }
 0x2f8   :  { %5605 = vmatprep.subr.bf16.mxu1 %v5717_v48 }
 0x2fb   :  { %5607 = vmatpush1.bf16.msra.mxu1 %v5606_v42 }
 0x2fc   :  { %5608 = vmatprep.subr.bf16.mxu1 %v5717_v48 }
 0x2ff   :  { %5610 = vmatpush1.bf16.msra.mxu1 %v5609_v45 }
 0x300   :  { %5611 = vmatprep.subr.bf16.mxu1 %v5717_v48 }
 0x303   :  { %5613 = vmatpush1.bf16.msra.mxu1 %v5612_v47 }
 0x304   :  { %5614 = vmatprep.subr.bf16.mxu1 %v5717_v48 }
 0x307   :  { %5616 = vmatpush1.bf16.msra.mxu1 %v5615_v39 }
 0x308   :  { %5617 = vmatprep.subr.bf16.mxu1 %v5717_v48 }
 0x30b   :  { %5619 = vmatpush1.bf16.msra.mxu1 %v5618_v52 }
 0x30c   :  { %5620 = vmatprep.subr.bf16.mxu1 %v5717_v48  ;;  %v4449_v48 = vld [vmem:[%s8032_s5 + $0x270] sm:$0xff] }
 0x30d   :  { %v5579_v34 = vpack.c.bf16 %v4450_v62, %v4449_v48 }
 0x30f   :  { %5622 = vmatpush1.bf16.msra.mxu1 %v5621_v60  ;;  %5580 = vmatpush3.bf16.msra.mxu0 %v5579_v34 }
 0x310   :  { %4772 = vmatprep.subr.mxu1 %v5718_v0 }
 0x313   :  { %4773 = vmatpush1.msra.mxu1 %v4495_v1 }
 0x38c   :  { %v4192_v40 = vpop.f32.mrb[12].mxu0 }
 0x38d   :  { %v5627_v12 = vadd.f32 %v4192_v40, %v1157_v2  ;;  %v4356_v18 = vpop.f32.mrb[12].mxu1  ;;  %v4194_v44 = vpop.f32.mrb[13].mxu0 }
 0x38e   :  { %v5629_v19 = vadd.f32 %v4356_v18, %v1165_v4  ;;  %v5628_v20 = vadd.f32 %v4194_v44, %v1161_v27  ;;  %v4358_v22 = vpop.f32.mrb[13].mxu1  ;;  %v4196_v11 = vpop.f32.mrb[14].mxu0 }
 0x38f   :  { %v5630_v23 = vadd.f32 %v4358_v22, %v1169_v7  ;;  %v4360_v24 = vpop.f32.mrb[14].mxu1  ;;  %v4197_v25 = vpop.f32.mrb[15].mxu0  ;;  %v4367_v53 = vmax.f32 %v5627_v12, 0.0 }
 0x390   :  { %v4368_v55 = vmax.f32 %v5628_v20, 0.0  ;;  %v4361_v15 = vpop.f32.mrb[15].mxu1  ;;  %v4369_v43 = vmax.f32 %v5629_v19, 0.0 }
 0x391   :  { %v4370_v29 = vmax.f32 %v5630_v23, 0.0 }
 0x392   :  { %4710 = vmatprep.mubr.f32.mxu0 %v4368_v55 }
 0x393   :  { %5379 = vmatprep.mubr.msk.f32.mxu1 %vm3678_vm0, %v4370_v29  ;;  %4711 = vmatmul.mubr.f32.vlgmr.msra.gmra.mrb[18].mxu0 %v4367_v53 }
 0x394   :  { %4781 = vmatmul.mubr.f32.vlgmr.msra.gmra.mrb[18].mxu1 %v4369_v43 }
 0x3ac   :  { %v5412_v14 = vpop.f32.mrb[16].mxu0 }
 0x3ad   :  { %v5447_v26 = vpop.f32.mrb[16].mxu1  ;;  %v5413_v30 = vpop.f32.mrb[17].mxu0 }
 0x3ae   :  { %v5414_v32 = vadd.f32 %v5413_v30, %v5412_v14  ;;  %v5448_v33 = vpop.f32.mrb[17].mxu1 }
 0x3af   :  { %v5449_v36 = vadd.f32 %v5448_v33, %v5447_v26 }
 0x3b0   :  { %v4573_v31 = vadd.f32 %v5414_v32, %v5378_v28 }
 0x3b2   :  { %v4643_v6 = vadd.f32 %v5449_v36, %v4573_v31 }
 0x466   :  { %v5482_v63 = vpop.f32.mrb[18].mxu0 }
 0x467   :  { %v4782_v37 = vpop.f32.mrb[18].mxu1  ;;  %v5483_v35 = vpop.f32.mrb[19].mxu0 }
 0x468   :  { %v5484_v9 = vadd.f32 %v5483_v35, %v5482_v63  ;;  %v4784_v3 = vpop.f32.mrb[19].mxu1 }
 0x46a   :  { %v4713_v38 = vadd.f32 %v5484_v9, %v4643_v6 }
 0x46c   :  { %v4783_v54 = vadd.f32 %v4782_v37, %v4713_v38 }
 0x46e   :  { %4787 = vst.msk [vmem:[#allocation2] sm:$0x3] %vm4786_vm2, %v4783_v54 }
 0x46f   :  { %5703 = shalt.err (!%p5700_p4)
}
 0x470   :  { %s5704_s25 = scalar_lea.hbm %s8034_s7, 32 }
 0x471   :  { %p5705_p5 = scmp.ne.s32.totalorder %s8034_s7, %s5704_s25  ;;  %p5708_p6 = scmp.lt.u32.totalorder %s5704_s25, %s8034_s7 }
 0x473   :  { %p5710_p7 = pnand %p5708_p6, %p5705_p5 }
 0x475   :  { %5713 = shalt.err (!%p5710_p7)
}
 0x476   :  { %4797 = dma.vmem_to_hbm [thread:$0]  %s4795_s23, 32, %s8034_s7, [#allocation3]  }
 0x477   :  { %5714 = dma.done.wait [#allocation3], 32  }
 0x478   :  { %5715 = vsyncadd [#allocation3], 4294967264 }
 0x479   :  { %4801 = vsyncpa [#allocation3], 1 }

</bundles_post_ra>
